<compile_context>
chip_gen: v5e
topology: v5e:2x2
jax: 0.10.0
libtpu: 0.0.40
codegen_flags: <defaults>
</compile_context>

<pallas_src>
import functools

import jax
import jax.numpy as jnp
from jax.experimental import pallas as pl
from jax.experimental.pallas import tpu as pltpu

# ----------------------------- configuration --------------------------------
SOURCES = 2          # number of separated sources
AUDIO_CH = 2         # stereo
CHANNELS = 8         # first encoder width
DEPTH = 2
KERNEL = 8
STRIDE = 4
GROWTH = 2
CONTEXT = 3
LSTM_LAYERS = 2
BATCH = 2
TIME = 128           # input length (valid for this depth/kernel/stride)

# The chunked im2col / col2im used below relies on kernel == 2 * stride
# (Demucs' default geometry).
assert KERNEL == 2 * STRIDE


# ----------------------- in-kernel building blocks ---------------------------
# These helpers operate on traced VALUES inside the Pallas kernel, so all of
# the data they touch lives in VMEM / vregs.

def _glu(y):
    """GLU over the channel (lane) axis: first half * sigmoid(second half)."""
    c = y.shape[-1] // 2
    return y[:, :c] * jax.nn.sigmoid(y[:, c:])


def _conv_strided_relu(act, wmat, bias):
    """Strided Conv1d (kernel=2*stride) + ReLU.  act: (B, T, Cin) channels-last.

    In-kernel im2col: split time into (chunks, stride), take the two chunks
    each output step needs, lane-concatenate the K taps, one MXU dot.
    """
    B, T, Cin = act.shape
    S, K = STRIDE, KERNEL
    Tout = (T - K) // S + 1
    xr = act[:, :(Tout + 1) * S, :].reshape(B, Tout + 1, S, Cin)
    pieces = []
    for k in range(K):
        off, s = divmod(k, S)            # input index t*S + k == (t+off)*S + s
        pieces.append(xr[:, off:off + Tout, s:s + 1, :].reshape(B * Tout, Cin))
    cols = jnp.concatenate(pieces, axis=-1)                  # (B*Tout, K*Cin)
    y = jnp.dot(cols, wmat, preferred_element_type=jnp.float32) + bias
    y = jnp.maximum(y, 0.0)
    return y.reshape(B, Tout, wmat.shape[1])


def _conv1x1_glu(act, wmat, bias):
    """1x1 rewrite conv + GLU: one (B*T, C) @ (C, 2C) dot, split in-kernel."""
    B, T, C = act.shape
    y = jnp.dot(act.reshape(B * T, C), wmat,
                preferred_element_type=jnp.float32) + bias
    return _glu(y).reshape(B, T, wmat.shape[1] // 2)


def _conv_ctx_glu(act, wmat, bias):
    """Stride-1 'context' conv (kernel=CONTEXT) + GLU, taps lane-concatenated."""
    B, T, C = act.shape
    Tout = T - CONTEXT + 1
    pieces = [act[:, k:k + Tout, :].reshape(B * Tout, C) for k in range(CONTEXT)]
    cols = jnp.concatenate(pieces, axis=-1)                  # (B*Tout, CONTEXT*C)
    y = jnp.dot(cols, wmat, preferred_element_type=jnp.float32) + bias
    return _glu(y).reshape(B, Tout, wmat.shape[1] // 2)


def _conv_transpose(act, wmat, bias, relu):
    """ConvTranspose1d (kernel=2*stride) with in-VMEM overlap-add (col2im).

    Output position p = c*S + s receives tap k=s from input step c and tap
    k=S+s from input step c-1; both contributions are assembled with a
    zero-padded chunk add (no strided scatter into HBM).
    """
    B, Tin, Cin = act.shape
    S, K = STRIDE, KERNEL
    Cout = wmat.shape[1] // K
    y = jnp.dot(act.reshape(B * Tin, Cin), wmat,
                preferred_element_type=jnp.float32)          # (B*Tin, K*Cout)
    lo, hi = [], []
    for s in range(S):
        lo.append(y[:, s * Cout:(s + 1) * Cout].reshape(B, Tin, 1, Cout))
        hi.append(y[:, (S + s) * Cout:(S + s + 1) * Cout].reshape(B, Tin, 1, Cout))
    lo = jnp.concatenate(lo, axis=2)                         # taps k <  S
    hi = jnp.concatenate(hi, axis=2)                         # taps k >= S
    zc = jnp.zeros((B, 1, S, Cout), jnp.float32)
    full = (jnp.concatenate([lo, zc], axis=1)
            + jnp.concatenate([zc, hi], axis=1))             # (B, Tin+1, S, Cout)
    out = full.reshape(B, (Tin + 1) * S, Cout) + bias        # Tout = (Tin-1)*S + K
    if relu:
        out = jnp.maximum(out, 0.0)
    return out


def _lstm_direction(xs, p, reverse):
    """One LSTM direction.  Input projection is one dot over all time steps;
    the (inherently sequential) recurrence is fully unrolled at trace time
    with h/c kept in registers (T is tiny and static)."""
    B, T, In = xs.shape
    H = p["w_hh_t"].shape[0]
    gx = jnp.dot(xs.reshape(B * T, In), p["w_ih_t"],
                 preferred_element_type=jnp.float32) + p["b_ih"]
    gx = gx.reshape(B, T, 4 * H)
    h = jnp.zeros((B, H), jnp.float32)
    c = jnp.zeros((B, H), jnp.float32)
    hs = [None] * T
    order = range(T - 1, -1, -1) if reverse else range(T)
    for t in order:
        g = gx[:, t:t + 1, :].reshape(B, 4 * H)
        g = g + jnp.dot(h, p["w_hh_t"],
                        preferred_element_type=jnp.float32) + p["b_hh"]
        i = jax.nn.sigmoid(g[:, 0 * H:1 * H])
        f = jax.nn.sigmoid(g[:, 1 * H:2 * H])
        gg = jnp.tanh(g[:, 2 * H:3 * H])
        o = jax.nn.sigmoid(g[:, 3 * H:4 * H])
        c = f * c + i * gg
        h = o * jnp.tanh(c)
        hs[t] = h
    return hs                                                # time-ordered list


def _blstm(x, lp):
    """Demucs BLSTM bottleneck (2 bidirectional layers + linear), in-kernel."""
    B, T, _ = x.shape
    inp = x
    for layer in lp["layers"]:
        hf = _lstm_direction(inp, layer["fwd"], reverse=False)
        hb = _lstm_direction(inp, layer["bwd"], reverse=True)
        steps = [jnp.concatenate([hf[t], hb[t]], axis=-1).reshape(B, 1, -1)
                 for t in range(T)]
        inp = jnp.concatenate(steps, axis=1)                 # (B, T, 2H)
    H2 = inp.shape[-1]
    y = jnp.dot(inp.reshape(B * T, H2), lp["lin_w_t"],
                preferred_element_type=jnp.float32) + lp["lin_b"]
    return y.reshape(B, T, -1)


def _center_trim(t, length):
    delta = t.shape[1] - length
    if delta == 0:
        return t
    return t[:, delta // 2: delta // 2 + length, :]


# ------------------------------- fused kernel --------------------------------
def _demucs_kernel(*refs, treedef):
    src_ref, out_ref = refs[0], refs[-1]
    params = jax.tree_util.tree_unflatten(treedef, [r[...] for r in refs[1:-1]])

    src = src_ref[...]                                       # (B, S, T, Cin)
    B, nsrc, T, Cin = src.shape

    # mix = sources.sum(dim=1), fused here (no dedicated kernel / HBM pass).
    mix = src[:, 0:1].reshape(B, T, Cin)
    for s in range(1, nsrc):
        mix = mix + src[:, s:s + 1].reshape(B, T, Cin)

    # -------- encoder --------
    x = mix
    saved = [x]
    for enc in params["encoder"]:
        x = _conv_strided_relu(x, enc["w"], enc["b"])
        x = _conv1x1_glu(x, enc["rw_w"], enc["rw_b"])
        saved.append(x)

    # -------- BLSTM bottleneck --------
    x = _blstm(x, params["lstm"])

    # -------- decoder --------
    n_dec = len(params["decoder"])
    for di, dec in enumerate(params["decoder"]):
        skip = _center_trim(saved.pop(-1), x.shape[1])
        x = x + skip
        x = _conv_ctx_glu(x, dec["rw_w"], dec["rw_b"])
        x = _conv_transpose(x, dec["tr_w"], dec["tr_b"], relu=(di != n_dec - 1))

    out_ref[...] = x                                         # (B, T_out, S*AC)


# --------------------------------- wrapper -----------------------------------
def _output_length(t):
    for _ in range(DEPTH):
        t = (t - KERNEL) // STRIDE + 1
    for _ in range(DEPTH):                                   # BLSTM keeps length
        t = t - CONTEXT + 1
        t = (t - 1) * STRIDE + KERNEL
    return t


def _full_spec(shape):
    return pl.BlockSpec(shape, lambda i, _n=len(shape): (0,) * _n)


def demucs_wrapper_forward(params, streams):
    sources = streams[:, 1:]
    # augment: Demucs augmentation modules (Shift/FlipChannels/FlipSign/Remix/
    # Scale) are random train-time-only ops and are identity in eval mode.
    src_cl = sources.transpose(0, 1, 3, 2)                   # (B, S, T, Cin)
    B, _, T, _ = src_cl.shape
    t_out = _output_length(T)

    leaves, treedef = jax.tree_util.tree_flatten(params)
    out_cl = pl.pallas_call(
        functools.partial(_demucs_kernel, treedef=treedef),
        grid=(1,),
        in_specs=[_full_spec(src_cl.shape)]
                 + [_full_spec(leaf.shape) for leaf in leaves],
        out_specs=_full_spec((B, t_out, SOURCES * AUDIO_CH)),
        out_shape=jax.ShapeDtypeStruct((B, t_out, SOURCES * AUDIO_CH),
                                       jnp.float32),
        compiler_params=pltpu.CompilerParams(
            dimension_semantics=("arbitrary",)),
    )(src_cl, *leaves)

    model_out = out_cl.transpose(0, 2, 1).reshape(B, SOURCES, AUDIO_CH, t_out)
    return sources, model_out


# ------------------------------ parameter init --------------------------------
def init_params(key):
    keys = iter(jax.random.split(key, 128))

    def nrm(shape, scale=0.1):
        return scale * jax.random.normal(next(keys), shape, dtype=jnp.float32)

    # Weights are drawn in PyTorch layout and converted ONCE here into the
    # matmul-ready layouts the fused kernel consumes (pre-transposed weights,
    # broadcast-ready biases) -- no per-forward transpose/reshape glue.
    encoder, enc_channels = [], []
    ch_in, ch = AUDIO_CH, CHANNELS
    for _ in range(DEPTH):
        conv_w = nrm((ch, ch_in, KERNEL))        # torch Conv1d: (Cout, Cin, K)
        conv_b = nrm((ch,))
        rw_w = nrm((2 * ch, ch, 1))              # 1x1 GLU rewrite conv
        rw_b = nrm((2 * ch,))
        encoder.append(dict(
            w=conv_w.transpose(2, 1, 0).reshape(KERNEL * ch_in, ch),
            b=conv_b.reshape(1, ch),
            rw_w=rw_w.transpose(2, 1, 0).reshape(ch, 2 * ch),
            rw_b=rw_b.reshape(1, 2 * ch),
        ))
        enc_channels.append((ch_in, ch))
        ch_in, ch = ch, int(GROWTH * ch)

    decoder = []                                 # forward-execution order
    for i in reversed(range(DEPTH)):
        c_in_enc, c = enc_channels[i]
        out_ch = c_in_enc if i > 0 else SOURCES * AUDIO_CH
        rw_w = nrm((2 * c, c, CONTEXT))
        rw_b = nrm((2 * c,))
        tr_w = nrm((c, out_ch, KERNEL))          # torch ConvTranspose1d: (Cin, Cout, K)
        tr_b = nrm((out_ch,))
        decoder.append(dict(
            rw_w=rw_w.transpose(2, 1, 0).reshape(CONTEXT * c, 2 * c),
            rw_b=rw_b.reshape(1, 2 * c),
            tr_w=tr_w.transpose(0, 2, 1).reshape(c, KERNEL * out_ch),
            tr_b=tr_b.reshape(1, 1, out_ch),
        ))

    dim = enc_channels[-1][1]
    layers, in_size = [], dim
    for _ in range(LSTM_LAYERS):
        layer = {}
        for d in ("fwd", "bwd"):
            layer[d] = dict(
                w_ih_t=nrm((4 * dim, in_size)).T,            # (In, 4H)
                w_hh_t=nrm((4 * dim, dim)).T,                # (H, 4H)
                b_ih=nrm((4 * dim,)).reshape(1, 4 * dim),
                b_hh=nrm((4 * dim,)).reshape(1, 4 * dim),
            )
        layers.append(layer)
        in_size = 2 * dim
    lstm = dict(layers=layers,
                lin_w_t=nrm((dim, 2 * dim)).T,               # (2H, H)
                lin_b=nrm((dim,)).reshape(1, dim))
    return dict(encoder=encoder, decoder=decoder, lstm=lstm)


# ----------------------------------- main -------------------------------------
if __name__ == "__main__":
    key = jax.random.PRNGKey(0)
    pkey, xkey = jax.random.split(key)
    params = init_params(pkey)
    # streams: (batch, 1 + sources, audio_channels, time)
    streams = jax.random.normal(
        xkey, (BATCH, SOURCES + 1, AUDIO_CH, TIME), dtype=jnp.float32)

    fwd = jax.jit(demucs_wrapper_forward)
    sources_out, model_out = fwd(params, streams)
    jax.block_until_ready((sources_out, model_out))

    assert sources_out.shape == (BATCH, SOURCES, AUDIO_CH, TIME)
    assert model_out.shape == (BATCH, SOURCES, AUDIO_CH, _output_length(TIME))
    assert bool(jnp.all(jnp.isfinite(model_out)))
    print("KERNEL_OK")
</pallas_src>

<mosaic_0001>
module attributes {stable_mosaic.version = 11 : i64} {
  func.func @_demucs_kernel(%arg0: i32, %arg1: memref<2x2x128x2xf32, #tpu.memory_space<vmem>>, %arg2: memref<1x32xf32, #tpu.memory_space<vmem>>, %arg3: memref<48x32xf32, #tpu.memory_space<vmem>>, %arg4: memref<1x1x8xf32, #tpu.memory_space<vmem>>, %arg5: memref<16x64xf32, #tpu.memory_space<vmem>>, %arg6: memref<1x16xf32, #tpu.memory_space<vmem>>, %arg7: memref<24x16xf32, #tpu.memory_space<vmem>>, %arg8: memref<1x1x4xf32, #tpu.memory_space<vmem>>, %arg9: memref<8x32xf32, #tpu.memory_space<vmem>>, %arg10: memref<1x8xf32, #tpu.memory_space<vmem>>, %arg11: memref<1x16xf32, #tpu.memory_space<vmem>>, %arg12: memref<8x16xf32, #tpu.memory_space<vmem>>, %arg13: memref<16x8xf32, #tpu.memory_space<vmem>>, %arg14: memref<1x16xf32, #tpu.memory_space<vmem>>, %arg15: memref<1x32xf32, #tpu.memory_space<vmem>>, %arg16: memref<16x32xf32, #tpu.memory_space<vmem>>, %arg17: memref<64x16xf32, #tpu.memory_space<vmem>>, %arg18: memref<1x64xf32, #tpu.memory_space<vmem>>, %arg19: memref<1x64xf32, #tpu.memory_space<vmem>>, %arg20: memref<16x64xf32, #tpu.memory_space<vmem>>, %arg21: memref<16x64xf32, #tpu.memory_space<vmem>>, %arg22: memref<1x64xf32, #tpu.memory_space<vmem>>, %arg23: memref<1x64xf32, #tpu.memory_space<vmem>>, %arg24: memref<16x64xf32, #tpu.memory_space<vmem>>, %arg25: memref<16x64xf32, #tpu.memory_space<vmem>>, %arg26: memref<1x64xf32, #tpu.memory_space<vmem>>, %arg27: memref<1x64xf32, #tpu.memory_space<vmem>>, %arg28: memref<16x64xf32, #tpu.memory_space<vmem>>, %arg29: memref<32x64xf32, #tpu.memory_space<vmem>>, %arg30: memref<1x64xf32, #tpu.memory_space<vmem>>, %arg31: memref<1x64xf32, #tpu.memory_space<vmem>>, %arg32: memref<16x64xf32, #tpu.memory_space<vmem>>, %arg33: memref<32x64xf32, #tpu.memory_space<vmem>>, %arg34: memref<1x16xf32, #tpu.memory_space<vmem>>, %arg35: memref<32x16xf32, #tpu.memory_space<vmem>>, %arg36: memref<2x76x4xf32, #tpu.memory_space<vmem>>) attributes {dimension_semantics = [#tpu.dimension_semantics<arbitrary>], iteration_bounds = array<i64: 1>, scalar_prefetch = 0 : i64, scratch_operands = 0 : i64, tpu.core_type = #tpu.core_type<tc>, window_params = [{pipeline_mode = #tpu.pipeline_mode<synchronous>, transform_indices = @transform_0, window_bounds = array<i64: 2, 2, 128, 2>}, {pipeline_mode = #tpu.pipeline_mode<synchronous>, transform_indices = @transform_1, window_bounds = array<i64: 1, 32>}, {pipeline_mode = #tpu.pipeline_mode<synchronous>, transform_indices = @transform_2, window_bounds = array<i64: 48, 32>}, {pipeline_mode = #tpu.pipeline_mode<synchronous>, transform_indices = @transform_3, window_bounds = array<i64: 1, 1, 8>}, {pipeline_mode = #tpu.pipeline_mode<synchronous>, transform_indices = @transform_4, window_bounds = array<i64: 16, 64>}, {pipeline_mode = #tpu.pipeline_mode<synchronous>, transform_indices = @transform_5, window_bounds = array<i64: 1, 16>}, {pipeline_mode = #tpu.pipeline_mode<synchronous>, transform_indices = @transform_6, window_bounds = array<i64: 24, 16>}, {pipeline_mode = #tpu.pipeline_mode<synchronous>, transform_indices = @transform_7, window_bounds = array<i64: 1, 1, 4>}, {pipeline_mode = #tpu.pipeline_mode<synchronous>, transform_indices = @transform_8, window_bounds = array<i64: 8, 32>}, {pipeline_mode = #tpu.pipeline_mode<synchronous>, transform_indices = @transform_9, window_bounds = array<i64: 1, 8>}, {pipeline_mode = #tpu.pipeline_mode<synchronous>, transform_indices = @transform_10, window_bounds = array<i64: 1, 16>}, {pipeline_mode = #tpu.pipeline_mode<synchronous>, transform_indices = @transform_11, window_bounds = array<i64: 8, 16>}, {pipeline_mode = #tpu.pipeline_mode<synchronous>, transform_indices = @transform_12, window_bounds = array<i64: 16, 8>}, {pipeline_mode = #tpu.pipeline_mode<synchronous>, transform_indices = @transform_13, window_bounds = array<i64: 1, 16>}, {pipeline_mode = #tpu.pipeline_mode<synchronous>, transform_indices = @transform_14, window_bounds = array<i64: 1, 32>}, {pipeline_mode = #tpu.pipeline_mode<synchronous>, transform_indices = @transform_15, window_bounds = array<i64: 16, 32>}, {pipeline_mode = #tpu.pipeline_mode<synchronous>, transform_indices = @transform_16, window_bounds = array<i64: 64, 16>}, {pipeline_mode = #tpu.pipeline_mode<synchronous>, transform_indices = @transform_17, window_bounds = array<i64: 1, 64>}, {pipeline_mode = #tpu.pipeline_mode<synchronous>, transform_indices = @transform_18, window_bounds = array<i64: 1, 64>}, {pipeline_mode = #tpu.pipeline_mode<synchronous>, transform_indices = @transform_19, window_bounds = array<i64: 16, 64>}, {pipeline_mode = #tpu.pipeline_mode<synchronous>, transform_indices = @transform_20, window_bounds = array<i64: 16, 64>}, {pipeline_mode = #tpu.pipeline_mode<synchronous>, transform_indices = @transform_21, window_bounds = array<i64: 1, 64>}, {pipeline_mode = #tpu.pipeline_mode<synchronous>, transform_indices = @transform_22, window_bounds = array<i64: 1, 64>}, {pipeline_mode = #tpu.pipeline_mode<synchronous>, transform_indices = @transform_23, window_bounds = array<i64: 16, 64>}, {pipeline_mode = #tpu.pipeline_mode<synchronous>, transform_indices = @transform_24, window_bounds = array<i64: 16, 64>}, {pipeline_mode = #tpu.pipeline_mode<synchronous>, transform_indices = @transform_25, window_bounds = array<i64: 1, 64>}, {pipeline_mode = #tpu.pipeline_mode<synchronous>, transform_indices = @transform_26, window_bounds = array<i64: 1, 64>}, {pipeline_mode = #tpu.pipeline_mode<synchronous>, transform_indices = @transform_27, window_bounds = array<i64: 16, 64>}, {pipeline_mode = #tpu.pipeline_mode<synchronous>, transform_indices = @transform_28, window_bounds = array<i64: 32, 64>}, {pipeline_mode = #tpu.pipeline_mode<synchronous>, transform_indices = @transform_29, window_bounds = array<i64: 1, 64>}, {pipeline_mode = #tpu.pipeline_mode<synchronous>, transform_indices = @transform_30, window_bounds = array<i64: 1, 64>}, {pipeline_mode = #tpu.pipeline_mode<synchronous>, transform_indices = @transform_31, window_bounds = array<i64: 16, 64>}, {pipeline_mode = #tpu.pipeline_mode<synchronous>, transform_indices = @transform_32, window_bounds = array<i64: 32, 64>}, {pipeline_mode = #tpu.pipeline_mode<synchronous>, transform_indices = @transform_33, window_bounds = array<i64: 1, 16>}, {pipeline_mode = #tpu.pipeline_mode<synchronous>, transform_indices = @transform_34, window_bounds = array<i64: 32, 16>}, {pipeline_mode = #tpu.pipeline_mode<synchronous>, transform_indices = @transform_35, window_bounds = array<i64: 2, 76, 4>}]} {
    %c0 = arith.constant 0 : index
    %c0_0 = arith.constant 0 : index
    %0 = vector.load %arg2[%c0, %c0_0] : memref<1x32xf32, #tpu.memory_space<vmem>>, vector<1x32xf32>
    %c0_1 = arith.constant 0 : index
    %c0_2 = arith.constant 0 : index
    %1 = vector.load %arg3[%c0_1, %c0_2] : memref<48x32xf32, #tpu.memory_space<vmem>>, vector<48x32xf32>
    %c0_3 = arith.constant 0 : index
    %c0_4 = arith.constant 0 : index
    %c0_5 = arith.constant 0 : index
    %2 = vector.load %arg4[%c0_3, %c0_4, %c0_5] : memref<1x1x8xf32, #tpu.memory_space<vmem>>, vector<1x1x8xf32>
    %c0_6 = arith.constant 0 : index
    %c0_7 = arith.constant 0 : index
    %3 = vector.load %arg5[%c0_6, %c0_7] : memref<16x64xf32, #tpu.memory_space<vmem>>, vector<16x64xf32>
    %c0_8 = arith.constant 0 : index
    %c0_9 = arith.constant 0 : index
    %4 = vector.load %arg6[%c0_8, %c0_9] : memref<1x16xf32, #tpu.memory_space<vmem>>, vector<1x16xf32>
    %c0_10 = arith.constant 0 : index
    %c0_11 = arith.constant 0 : index
    %5 = vector.load %arg7[%c0_10, %c0_11] : memref<24x16xf32, #tpu.memory_space<vmem>>, vector<24x16xf32>
    %c0_12 = arith.constant 0 : index
    %c0_13 = arith.constant 0 : index
    %c0_14 = arith.constant 0 : index
    %6 = vector.load %arg8[%c0_12, %c0_13, %c0_14] : memref<1x1x4xf32, #tpu.memory_space<vmem>>, vector<1x1x4xf32>
    %c0_15 = arith.constant 0 : index
    %c0_16 = arith.constant 0 : index
    %7 = vector.load %arg9[%c0_15, %c0_16] : memref<8x32xf32, #tpu.memory_space<vmem>>, vector<8x32xf32>
    %c0_17 = arith.constant 0 : index
    %c0_18 = arith.constant 0 : index
    %8 = vector.load %arg10[%c0_17, %c0_18] : memref<1x8xf32, #tpu.memory_space<vmem>>, vector<1x8xf32>
    %c0_19 = arith.constant 0 : index
    %c0_20 = arith.constant 0 : index
    %9 = vector.load %arg11[%c0_19, %c0_20] : memref<1x16xf32, #tpu.memory_space<vmem>>, vector<1x16xf32>
    %c0_21 = arith.constant 0 : index
    %c0_22 = arith.constant 0 : index
    %10 = vector.load %arg12[%c0_21, %c0_22] : memref<8x16xf32, #tpu.memory_space<vmem>>, vector<8x16xf32>
    %c0_23 = arith.constant 0 : index
    %c0_24 = arith.constant 0 : index
    %11 = vector.load %arg13[%c0_23, %c0_24] : memref<16x8xf32, #tpu.memory_space<vmem>>, vector<16x8xf32>
    %c0_25 = arith.constant 0 : index
    %c0_26 = arith.constant 0 : index
    %12 = vector.load %arg14[%c0_25, %c0_26] : memref<1x16xf32, #tpu.memory_space<vmem>>, vector<1x16xf32>
    %c0_27 = arith.constant 0 : index
    %c0_28 = arith.constant 0 : index
    %13 = vector.load %arg15[%c0_27, %c0_28] : memref<1x32xf32, #tpu.memory_space<vmem>>, vector<1x32xf32>
    %c0_29 = arith.constant 0 : index
    %c0_30 = arith.constant 0 : index
    %14 = vector.load %arg16[%c0_29, %c0_30] : memref<16x32xf32, #tpu.memory_space<vmem>>, vector<16x32xf32>
    %c0_31 = arith.constant 0 : index
    %c0_32 = arith.constant 0 : index
    %15 = vector.load %arg17[%c0_31, %c0_32] : memref<64x16xf32, #tpu.memory_space<vmem>>, vector<64x16xf32>
    %c0_33 = arith.constant 0 : index
    %c0_34 = arith.constant 0 : index
    %16 = vector.load %arg18[%c0_33, %c0_34] : memref<1x64xf32, #tpu.memory_space<vmem>>, vector<1x64xf32>
    %c0_35 = arith.constant 0 : index
    %c0_36 = arith.constant 0 : index
    %17 = vector.load %arg19[%c0_35, %c0_36] : memref<1x64xf32, #tpu.memory_space<vmem>>, vector<1x64xf32>
    %c0_37 = arith.constant 0 : index
    %c0_38 = arith.constant 0 : index
    %18 = vector.load %arg20[%c0_37, %c0_38] : memref<16x64xf32, #tpu.memory_space<vmem>>, vector<16x64xf32>
    %c0_39 = arith.constant 0 : index
    %c0_40 = arith.constant 0 : index
    %19 = vector.load %arg21[%c0_39, %c0_40] : memref<16x64xf32, #tpu.memory_space<vmem>>, vector<16x64xf32>
    %c0_41 = arith.constant 0 : index
    %c0_42 = arith.constant 0 : index
    %20 = vector.load %arg22[%c0_41, %c0_42] : memref<1x64xf32, #tpu.memory_space<vmem>>, vector<1x64xf32>
    %c0_43 = arith.constant 0 : index
    %c0_44 = arith.constant 0 : index
    %21 = vector.load %arg23[%c0_43, %c0_44] : memref<1x64xf32, #tpu.memory_space<vmem>>, vector<1x64xf32>
    %c0_45 = arith.constant 0 : index
    %c0_46 = arith.constant 0 : index
    %22 = vector.load %arg24[%c0_45, %c0_46] : memref<16x64xf32, #tpu.memory_space<vmem>>, vector<16x64xf32>
    %c0_47 = arith.constant 0 : index
    %c0_48 = arith.constant 0 : index
    %23 = vector.load %arg25[%c0_47, %c0_48] : memref<16x64xf32, #tpu.memory_space<vmem>>, vector<16x64xf32>
    %c0_49 = arith.constant 0 : index
    %c0_50 = arith.constant 0 : index
    %24 = vector.load %arg26[%c0_49, %c0_50] : memref<1x64xf32, #tpu.memory_space<vmem>>, vector<1x64xf32>
    %c0_51 = arith.constant 0 : index
    %c0_52 = arith.constant 0 : index
    %25 = vector.load %arg27[%c0_51, %c0_52] : memref<1x64xf32, #tpu.memory_space<vmem>>, vector<1x64xf32>
    %c0_53 = arith.constant 0 : index
    %c0_54 = arith.constant 0 : index
    %26 = vector.load %arg28[%c0_53, %c0_54] : memref<16x64xf32, #tpu.memory_space<vmem>>, vector<16x64xf32>
    %c0_55 = arith.constant 0 : index
    %c0_56 = arith.constant 0 : index
    %27 = vector.load %arg29[%c0_55, %c0_56] : memref<32x64xf32, #tpu.memory_space<vmem>>, vector<32x64xf32>
    %c0_57 = arith.constant 0 : index
    %c0_58 = arith.constant 0 : index
    %28 = vector.load %arg30[%c0_57, %c0_58] : memref<1x64xf32, #tpu.memory_space<vmem>>, vector<1x64xf32>
    %c0_59 = arith.constant 0 : index
    %c0_60 = arith.constant 0 : index
    %29 = vector.load %arg31[%c0_59, %c0_60] : memref<1x64xf32, #tpu.memory_space<vmem>>, vector<1x64xf32>
    %c0_61 = arith.constant 0 : index
    %c0_62 = arith.constant 0 : index
    %30 = vector.load %arg32[%c0_61, %c0_62] : memref<16x64xf32, #tpu.memory_space<vmem>>, vector<16x64xf32>
    %c0_63 = arith.constant 0 : index
    %c0_64 = arith.constant 0 : index
    %31 = vector.load %arg33[%c0_63, %c0_64] : memref<32x64xf32, #tpu.memory_space<vmem>>, vector<32x64xf32>
    %c0_65 = arith.constant 0 : index
    %c0_66 = arith.constant 0 : index
    %32 = vector.load %arg34[%c0_65, %c0_66] : memref<1x16xf32, #tpu.memory_space<vmem>>, vector<1x16xf32>
    %c0_67 = arith.constant 0 : index
    %c0_68 = arith.constant 0 : index
    %33 = vector.load %arg35[%c0_67, %c0_68] : memref<32x16xf32, #tpu.memory_space<vmem>>, vector<32x16xf32>
    %c0_69 = arith.constant 0 : index
    %c0_70 = arith.constant 0 : index
    %c0_71 = arith.constant 0 : index
    %c0_72 = arith.constant 0 : index
    %34 = vector.load %arg1[%c0_69, %c0_70, %c0_71, %c0_72] : memref<2x2x128x2xf32, #tpu.memory_space<vmem>>, vector<2x2x128x2xf32>
    %35 = vector.extract_strided_slice %34 {offsets = [0, 0, 0, 0], sizes = [2, 1, 128, 2], strides = [1, 1, 1, 1]} : vector<2x2x128x2xf32> to vector<2x1x128x2xf32>
    %36 = vector.shape_cast %35 : vector<2x1x128x2xf32> to vector<2x128x2xf32>
    %37 = vector.extract_strided_slice %34 {offsets = [0, 1, 0, 0], sizes = [2, 1, 128, 2], strides = [1, 1, 1, 1]} : vector<2x2x128x2xf32> to vector<2x1x128x2xf32>
    %38 = vector.shape_cast %37 : vector<2x1x128x2xf32> to vector<2x128x2xf32>
    %39 = arith.addf %36, %38 : vector<2x128x2xf32>
    %40 = vector.shape_cast %39 : vector<2x128x2xf32> to vector<2x32x4x2xf32>
    %41 = vector.extract_strided_slice %40 {offsets = [0, 0, 0, 0], sizes = [2, 31, 1, 2], strides = [1, 1, 1, 1]} : vector<2x32x4x2xf32> to vector<2x31x1x2xf32>
    %42 = vector.shape_cast %41 : vector<2x31x1x2xf32> to vector<62x2xf32>
    %43 = vector.extract_strided_slice %40 {offsets = [0, 0, 1, 0], sizes = [2, 31, 1, 2], strides = [1, 1, 1, 1]} : vector<2x32x4x2xf32> to vector<2x31x1x2xf32>
    %44 = vector.shape_cast %43 : vector<2x31x1x2xf32> to vector<62x2xf32>
    %45 = vector.extract_strided_slice %40 {offsets = [0, 0, 2, 0], sizes = [2, 31, 1, 2], strides = [1, 1, 1, 1]} : vector<2x32x4x2xf32> to vector<2x31x1x2xf32>
    %46 = vector.shape_cast %45 : vector<2x31x1x2xf32> to vector<62x2xf32>
    %47 = vector.extract_strided_slice %40 {offsets = [0, 0, 3, 0], sizes = [2, 31, 1, 2], strides = [1, 1, 1, 1]} : vector<2x32x4x2xf32> to vector<2x31x1x2xf32>
    %48 = vector.shape_cast %47 : vector<2x31x1x2xf32> to vector<62x2xf32>
    %49 = vector.extract_strided_slice %40 {offsets = [0, 1, 0, 0], sizes = [2, 31, 1, 2], strides = [1, 1, 1, 1]} : vector<2x32x4x2xf32> to vector<2x31x1x2xf32>
    %50 = vector.shape_cast %49 : vector<2x31x1x2xf32> to vector<62x2xf32>
    %51 = vector.extract_strided_slice %40 {offsets = [0, 1, 1, 0], sizes = [2, 31, 1, 2], strides = [1, 1, 1, 1]} : vector<2x32x4x2xf32> to vector<2x31x1x2xf32>
    %52 = vector.shape_cast %51 : vector<2x31x1x2xf32> to vector<62x2xf32>
    %53 = vector.extract_strided_slice %40 {offsets = [0, 1, 2, 0], sizes = [2, 31, 1, 2], strides = [1, 1, 1, 1]} : vector<2x32x4x2xf32> to vector<2x31x1x2xf32>
    %54 = vector.shape_cast %53 : vector<2x31x1x2xf32> to vector<62x2xf32>
    %55 = vector.extract_strided_slice %40 {offsets = [0, 1, 3, 0], sizes = [2, 31, 1, 2], strides = [1, 1, 1, 1]} : vector<2x32x4x2xf32> to vector<2x31x1x2xf32>
    %56 = vector.shape_cast %55 : vector<2x31x1x2xf32> to vector<62x2xf32>
    %57 = tpu.concatenate %42, %44, %46, %48, %50, %52, %54, %56 in 1 : vector<62x2xf32>, vector<62x2xf32>, vector<62x2xf32>, vector<62x2xf32>, vector<62x2xf32>, vector<62x2xf32>, vector<62x2xf32>, vector<62x2xf32> -> vector<62x16xf32>
    %cst = arith.constant dense<0.000000e+00> : vector<62x8xf32>
    %58 = tpu.matmul %57, %11, %cst {dimension_numbers = #tpu.dot_dimension_numbers<[1], [0], [0], [1], [0, 0, 1, 1], [], []>} : vector<62x16xf32>, vector<16x8xf32>, vector<62x8xf32> -> vector<62x8xf32>
    %59 = vector.broadcast %8 : vector<1x8xf32> to vector<62x8xf32>
    %60 = arith.addf %58, %59 : vector<62x8xf32>
    %cst_73 = arith.constant 0.000000e+00 : f32
    %61 = vector.broadcast %cst_73 : f32 to vector<62x8xf32>
    %62 = arith.maximumf %60, %61 : vector<62x8xf32>
    %63 = vector.shape_cast %62 : vector<62x8xf32> to vector<2x31x8xf32>
    %64 = vector.shape_cast %63 : vector<2x31x8xf32> to vector<62x8xf32>
    %cst_74 = arith.constant dense<0.000000e+00> : vector<62x16xf32>
    %65 = tpu.matmul %64, %10, %cst_74 {dimension_numbers = #tpu.dot_dimension_numbers<[1], [0], [0], [1], [0, 0, 1, 1], [], []>} : vector<62x8xf32>, vector<8x16xf32>, vector<62x16xf32> -> vector<62x16xf32>
    %66 = vector.broadcast %9 : vector<1x16xf32> to vector<62x16xf32>
    %67 = arith.addf %65, %66 : vector<62x16xf32>
    %68 = vector.extract_strided_slice %67 {offsets = [0, 0], sizes = [62, 8], strides = [1, 1]} : vector<62x16xf32> to vector<62x8xf32>
    %69 = vector.extract_strided_slice %67 {offsets = [0, 8], sizes = [62, 8], strides = [1, 1]} : vector<62x16xf32> to vector<62x8xf32>
    %70 = arith.negf %69 : vector<62x8xf32>
    %71 = math.exp %70 : vector<62x8xf32>
    %cst_75 = arith.constant 1.000000e+00 : f32
    %72 = vector.broadcast %cst_75 : f32 to vector<62x8xf32>
    %73 = arith.addf %72, %71 : vector<62x8xf32>
    %74 = arith.divf %72, %73 : vector<62x8xf32>
    %75 = arith.mulf %68, %74 : vector<62x8xf32>
    %76 = vector.shape_cast %75 : vector<62x8xf32> to vector<2x31x8xf32>
    %77 = vector.extract_strided_slice %76 {offsets = [0, 0, 0], sizes = [2, 28, 8], strides = [1, 1, 1]} : vector<2x31x8xf32> to vector<2x28x8xf32>
    %78 = vector.shape_cast %77 : vector<2x28x8xf32> to vector<2x7x4x8xf32>
    %79 = vector.extract_strided_slice %78 {offsets = [0, 0, 0, 0], sizes = [2, 6, 1, 8], strides = [1, 1, 1, 1]} : vector<2x7x4x8xf32> to vector<2x6x1x8xf32>
    %80 = vector.shape_cast %79 : vector<2x6x1x8xf32> to vector<12x8xf32>
    %81 = vector.extract_strided_slice %78 {offsets = [0, 0, 1, 0], sizes = [2, 6, 1, 8], strides = [1, 1, 1, 1]} : vector<2x7x4x8xf32> to vector<2x6x1x8xf32>
    %82 = vector.shape_cast %81 : vector<2x6x1x8xf32> to vector<12x8xf32>
    %83 = vector.extract_strided_slice %78 {offsets = [0, 0, 2, 0], sizes = [2, 6, 1, 8], strides = [1, 1, 1, 1]} : vector<2x7x4x8xf32> to vector<2x6x1x8xf32>
    %84 = vector.shape_cast %83 : vector<2x6x1x8xf32> to vector<12x8xf32>
    %85 = vector.extract_strided_slice %78 {offsets = [0, 0, 3, 0], sizes = [2, 6, 1, 8], strides = [1, 1, 1, 1]} : vector<2x7x4x8xf32> to vector<2x6x1x8xf32>
    %86 = vector.shape_cast %85 : vector<2x6x1x8xf32> to vector<12x8xf32>
    %87 = vector.extract_strided_slice %78 {offsets = [0, 1, 0, 0], sizes = [2, 6, 1, 8], strides = [1, 1, 1, 1]} : vector<2x7x4x8xf32> to vector<2x6x1x8xf32>
    %88 = vector.shape_cast %87 : vector<2x6x1x8xf32> to vector<12x8xf32>
    %89 = vector.extract_strided_slice %78 {offsets = [0, 1, 1, 0], sizes = [2, 6, 1, 8], strides = [1, 1, 1, 1]} : vector<2x7x4x8xf32> to vector<2x6x1x8xf32>
    %90 = vector.shape_cast %89 : vector<2x6x1x8xf32> to vector<12x8xf32>
    %91 = vector.extract_strided_slice %78 {offsets = [0, 1, 2, 0], sizes = [2, 6, 1, 8], strides = [1, 1, 1, 1]} : vector<2x7x4x8xf32> to vector<2x6x1x8xf32>
    %92 = vector.shape_cast %91 : vector<2x6x1x8xf32> to vector<12x8xf32>
    %93 = vector.extract_strided_slice %78 {offsets = [0, 1, 3, 0], sizes = [2, 6, 1, 8], strides = [1, 1, 1, 1]} : vector<2x7x4x8xf32> to vector<2x6x1x8xf32>
    %94 = vector.shape_cast %93 : vector<2x6x1x8xf32> to vector<12x8xf32>
    %95 = tpu.concatenate %80, %82, %84, %86, %88, %90, %92, %94 in 1 : vector<12x8xf32>, vector<12x8xf32>, vector<12x8xf32>, vector<12x8xf32>, vector<12x8xf32>, vector<12x8xf32>, vector<12x8xf32>, vector<12x8xf32> -> vector<12x64xf32>
    %cst_76 = arith.constant dense<0.000000e+00> : vector<12x16xf32>
    %96 = tpu.matmul %95, %15, %cst_76 {dimension_numbers = #tpu.dot_dimension_numbers<[1], [0], [0], [1], [0, 0, 1, 1], [], []>} : vector<12x64xf32>, vector<64x16xf32>, vector<12x16xf32> -> vector<12x16xf32>
    %97 = vector.broadcast %12 : vector<1x16xf32> to vector<12x16xf32>
    %98 = arith.addf %96, %97 : vector<12x16xf32>
    %cst_77 = arith.constant 0.000000e+00 : f32
    %99 = vector.broadcast %cst_77 : f32 to vector<12x16xf32>
    %100 = arith.maximumf %98, %99 : vector<12x16xf32>
    %101 = vector.shape_cast %100 : vector<12x16xf32> to vector<2x6x16xf32>
    %102 = vector.shape_cast %101 : vector<2x6x16xf32> to vector<12x16xf32>
    %cst_78 = arith.constant dense<0.000000e+00> : vector<12x32xf32>
    %103 = tpu.matmul %102, %14, %cst_78 {dimension_numbers = #tpu.dot_dimension_numbers<[1], [0], [0], [1], [0, 0, 1, 1], [], []>} : vector<12x16xf32>, vector<16x32xf32>, vector<12x32xf32> -> vector<12x32xf32>
    %104 = vector.broadcast %13 : vector<1x32xf32> to vector<12x32xf32>
    %105 = arith.addf %103, %104 : vector<12x32xf32>
    %106 = vector.extract_strided_slice %105 {offsets = [0, 0], sizes = [12, 16], strides = [1, 1]} : vector<12x32xf32> to vector<12x16xf32>
    %107 = vector.extract_strided_slice %105 {offsets = [0, 16], sizes = [12, 16], strides = [1, 1]} : vector<12x32xf32> to vector<12x16xf32>
    %108 = arith.negf %107 : vector<12x16xf32>
    %109 = math.exp %108 : vector<12x16xf32>
    %cst_79 = arith.constant 1.000000e+00 : f32
    %110 = vector.broadcast %cst_79 : f32 to vector<12x16xf32>
    %111 = arith.addf %110, %109 : vector<12x16xf32>
    %112 = arith.divf %110, %111 : vector<12x16xf32>
    %113 = arith.mulf %106, %112 : vector<12x16xf32>
    %114 = vector.shape_cast %113 : vector<12x16xf32> to vector<2x6x16xf32>
    %115 = vector.shape_cast %114 : vector<2x6x16xf32> to vector<12x16xf32>
    %cst_80 = arith.constant dense<0.000000e+00> : vector<12x64xf32>
    %116 = tpu.matmul %115, %23, %cst_80 {dimension_numbers = #tpu.dot_dimension_numbers<[1], [0], [0], [1], [0, 0, 1, 1], [], []>} : vector<12x16xf32>, vector<16x64xf32>, vector<12x64xf32> -> vector<12x64xf32>
    %117 = vector.broadcast %21 : vector<1x64xf32> to vector<12x64xf32>
    %118 = arith.addf %116, %117 : vector<12x64xf32>
    %119 = vector.shape_cast %118 : vector<12x64xf32> to vector<2x6x64xf32>
    %cst_81 = arith.constant 0.000000e+00 : f32
    %120 = vector.broadcast %cst_81 : f32 to vector<2x16xf32>
    %cst_82 = arith.constant 0.000000e+00 : f32
    %121 = vector.broadcast %cst_82 : f32 to vector<2x16xf32>
    %122 = vector.extract_strided_slice %119 {offsets = [0, 0, 0], sizes = [2, 1, 64], strides = [1, 1, 1]} : vector<2x6x64xf32> to vector<2x1x64xf32>
    %123 = vector.shape_cast %122 : vector<2x1x64xf32> to vector<2x64xf32>
    %cst_83 = arith.constant dense<0.000000e+00> : vector<2x64xf32>
    %124 = tpu.matmul %120, %22, %cst_83 {dimension_numbers = #tpu.dot_dimension_numbers<[1], [0], [0], [1], [0, 0, 1, 1], [], []>} : vector<2x16xf32>, vector<16x64xf32>, vector<2x64xf32> -> vector<2x64xf32>
    %125 = arith.addf %123, %124 : vector<2x64xf32>
    %126 = vector.broadcast %20 : vector<1x64xf32> to vector<2x64xf32>
    %127 = arith.addf %125, %126 : vector<2x64xf32>
    %128 = vector.extract_strided_slice %127 {offsets = [0, 0], sizes = [2, 16], strides = [1, 1]} : vector<2x64xf32> to vector<2x16xf32>
    %129 = arith.negf %128 : vector<2x16xf32>
    %130 = math.exp %129 : vector<2x16xf32>
    %cst_84 = arith.constant 1.000000e+00 : f32
    %131 = vector.broadcast %cst_84 : f32 to vector<2x16xf32>
    %132 = arith.addf %131, %130 : vector<2x16xf32>
    %133 = arith.divf %131, %132 : vector<2x16xf32>
    %134 = vector.extract_strided_slice %127 {offsets = [0, 16], sizes = [2, 16], strides = [1, 1]} : vector<2x64xf32> to vector<2x16xf32>
    %135 = arith.negf %134 : vector<2x16xf32>
    %136 = math.exp %135 : vector<2x16xf32>
    %cst_85 = arith.constant 1.000000e+00 : f32
    %137 = vector.broadcast %cst_85 : f32 to vector<2x16xf32>
    %138 = arith.addf %137, %136 : vector<2x16xf32>
    %139 = arith.divf %137, %138 : vector<2x16xf32>
    %140 = vector.extract_strided_slice %127 {offsets = [0, 32], sizes = [2, 16], strides = [1, 1]} : vector<2x64xf32> to vector<2x16xf32>
    %141 = math.tanh %140 : vector<2x16xf32>
    %142 = vector.extract_strided_slice %127 {offsets = [0, 48], sizes = [2, 16], strides = [1, 1]} : vector<2x64xf32> to vector<2x16xf32>
    %143 = arith.negf %142 : vector<2x16xf32>
    %144 = math.exp %143 : vector<2x16xf32>
    %cst_86 = arith.constant 1.000000e+00 : f32
    %145 = vector.broadcast %cst_86 : f32 to vector<2x16xf32>
    %146 = arith.addf %145, %144 : vector<2x16xf32>
    %147 = arith.divf %145, %146 : vector<2x16xf32>
    %148 = arith.mulf %139, %121 : vector<2x16xf32>
    %149 = arith.mulf %133, %141 : vector<2x16xf32>
    %150 = arith.addf %148, %149 : vector<2x16xf32>
    %151 = math.tanh %150 : vector<2x16xf32>
    %152 = arith.mulf %147, %151 : vector<2x16xf32>
    %153 = vector.extract_strided_slice %119 {offsets = [0, 1, 0], sizes = [2, 1, 64], strides = [1, 1, 1]} : vector<2x6x64xf32> to vector<2x1x64xf32>
    %154 = vector.shape_cast %153 : vector<2x1x64xf32> to vector<2x64xf32>
    %cst_87 = arith.constant dense<0.000000e+00> : vector<2x64xf32>
    %155 = tpu.matmul %152, %22, %cst_87 {dimension_numbers = #tpu.dot_dimension_numbers<[1], [0], [0], [1], [0, 0, 1, 1], [], []>} : vector<2x16xf32>, vector<16x64xf32>, vector<2x64xf32> -> vector<2x64xf32>
    %156 = arith.addf %154, %155 : vector<2x64xf32>
    %157 = vector.broadcast %20 : vector<1x64xf32> to vector<2x64xf32>
    %158 = arith.addf %156, %157 : vector<2x64xf32>
    %159 = vector.extract_strided_slice %158 {offsets = [0, 0], sizes = [2, 16], strides = [1, 1]} : vector<2x64xf32> to vector<2x16xf32>
    %160 = arith.negf %159 : vector<2x16xf32>
    %161 = math.exp %160 : vector<2x16xf32>
    %cst_88 = arith.constant 1.000000e+00 : f32
    %162 = vector.broadcast %cst_88 : f32 to vector<2x16xf32>
    %163 = arith.addf %162, %161 : vector<2x16xf32>
    %164 = arith.divf %162, %163 : vector<2x16xf32>
    %165 = vector.extract_strided_slice %158 {offsets = [0, 16], sizes = [2, 16], strides = [1, 1]} : vector<2x64xf32> to vector<2x16xf32>
    %166 = arith.negf %165 : vector<2x16xf32>
    %167 = math.exp %166 : vector<2x16xf32>
    %cst_89 = arith.constant 1.000000e+00 : f32
    %168 = vector.broadcast %cst_89 : f32 to vector<2x16xf32>
    %169 = arith.addf %168, %167 : vector<2x16xf32>
    %170 = arith.divf %168, %169 : vector<2x16xf32>
    %171 = vector.extract_strided_slice %158 {offsets = [0, 32], sizes = [2, 16], strides = [1, 1]} : vector<2x64xf32> to vector<2x16xf32>
    %172 = math.tanh %171 : vector<2x16xf32>
    %173 = vector.extract_strided_slice %158 {offsets = [0, 48], sizes = [2, 16], strides = [1, 1]} : vector<2x64xf32> to vector<2x16xf32>
    %174 = arith.negf %173 : vector<2x16xf32>
    %175 = math.exp %174 : vector<2x16xf32>
    %cst_90 = arith.constant 1.000000e+00 : f32
    %176 = vector.broadcast %cst_90 : f32 to vector<2x16xf32>
    %177 = arith.addf %176, %175 : vector<2x16xf32>
    %178 = arith.divf %176, %177 : vector<2x16xf32>
    %179 = arith.mulf %170, %150 : vector<2x16xf32>
    %180 = arith.mulf %164, %172 : vector<2x16xf32>
    %181 = arith.addf %179, %180 : vector<2x16xf32>
    %182 = math.tanh %181 : vector<2x16xf32>
    %183 = arith.mulf %178, %182 : vector<2x16xf32>
    %184 = vector.extract_strided_slice %119 {offsets = [0, 2, 0], sizes = [2, 1, 64], strides = [1, 1, 1]} : vector<2x6x64xf32> to vector<2x1x64xf32>
    %185 = vector.shape_cast %184 : vector<2x1x64xf32> to vector<2x64xf32>
    %cst_91 = arith.constant dense<0.000000e+00> : vector<2x64xf32>
    %186 = tpu.matmul %183, %22, %cst_91 {dimension_numbers = #tpu.dot_dimension_numbers<[1], [0], [0], [1], [0, 0, 1, 1], [], []>} : vector<2x16xf32>, vector<16x64xf32>, vector<2x64xf32> -> vector<2x64xf32>
    %187 = arith.addf %185, %186 : vector<2x64xf32>
    %188 = vector.broadcast %20 : vector<1x64xf32> to vector<2x64xf32>
    %189 = arith.addf %187, %188 : vector<2x64xf32>
    %190 = vector.extract_strided_slice %189 {offsets = [0, 0], sizes = [2, 16], strides = [1, 1]} : vector<2x64xf32> to vector<2x16xf32>
    %191 = arith.negf %190 : vector<2x16xf32>
    %192 = math.exp %191 : vector<2x16xf32>
    %cst_92 = arith.constant 1.000000e+00 : f32
    %193 = vector.broadcast %cst_92 : f32 to vector<2x16xf32>
    %194 = arith.addf %193, %192 : vector<2x16xf32>
    %195 = arith.divf %193, %194 : vector<2x16xf32>
    %196 = vector.extract_strided_slice %189 {offsets = [0, 16], sizes = [2, 16], strides = [1, 1]} : vector<2x64xf32> to vector<2x16xf32>
    %197 = arith.negf %196 : vector<2x16xf32>
    %198 = math.exp %197 : vector<2x16xf32>
    %cst_93 = arith.constant 1.000000e+00 : f32
    %199 = vector.broadcast %cst_93 : f32 to vector<2x16xf32>
    %200 = arith.addf %199, %198 : vector<2x16xf32>
    %201 = arith.divf %199, %200 : vector<2x16xf32>
    %202 = vector.extract_strided_slice %189 {offsets = [0, 32], sizes = [2, 16], strides = [1, 1]} : vector<2x64xf32> to vector<2x16xf32>
    %203 = math.tanh %202 : vector<2x16xf32>
    %204 = vector.extract_strided_slice %189 {offsets = [0, 48], sizes = [2, 16], strides = [1, 1]} : vector<2x64xf32> to vector<2x16xf32>
    %205 = arith.negf %204 : vector<2x16xf32>
    %206 = math.exp %205 : vector<2x16xf32>
    %cst_94 = arith.constant 1.000000e+00 : f32
    %207 = vector.broadcast %cst_94 : f32 to vector<2x16xf32>
    %208 = arith.addf %207, %206 : vector<2x16xf32>
    %209 = arith.divf %207, %208 : vector<2x16xf32>
    %210 = arith.mulf %201, %181 : vector<2x16xf32>
    %211 = arith.mulf %195, %203 : vector<2x16xf32>
    %212 = arith.addf %210, %211 : vector<2x16xf32>
    %213 = math.tanh %212 : vector<2x16xf32>
    %214 = arith.mulf %209, %213 : vector<2x16xf32>
    %215 = vector.extract_strided_slice %119 {offsets = [0, 3, 0], sizes = [2, 1, 64], strides = [1, 1, 1]} : vector<2x6x64xf32> to vector<2x1x64xf32>
    %216 = vector.shape_cast %215 : vector<2x1x64xf32> to vector<2x64xf32>
    %cst_95 = arith.constant dense<0.000000e+00> : vector<2x64xf32>
    %217 = tpu.matmul %214, %22, %cst_95 {dimension_numbers = #tpu.dot_dimension_numbers<[1], [0], [0], [1], [0, 0, 1, 1], [], []>} : vector<2x16xf32>, vector<16x64xf32>, vector<2x64xf32> -> vector<2x64xf32>
    %218 = arith.addf %216, %217 : vector<2x64xf32>
    %219 = vector.broadcast %20 : vector<1x64xf32> to vector<2x64xf32>
    %220 = arith.addf %218, %219 : vector<2x64xf32>
    %221 = vector.extract_strided_slice %220 {offsets = [0, 0], sizes = [2, 16], strides = [1, 1]} : vector<2x64xf32> to vector<2x16xf32>
    %222 = arith.negf %221 : vector<2x16xf32>
    %223 = math.exp %222 : vector<2x16xf32>
    %cst_96 = arith.constant 1.000000e+00 : f32
    %224 = vector.broadcast %cst_96 : f32 to vector<2x16xf32>
    %225 = arith.addf %224, %223 : vector<2x16xf32>
    %226 = arith.divf %224, %225 : vector<2x16xf32>
    %227 = vector.extract_strided_slice %220 {offsets = [0, 16], sizes = [2, 16], strides = [1, 1]} : vector<2x64xf32> to vector<2x16xf32>
    %228 = arith.negf %227 : vector<2x16xf32>
    %229 = math.exp %228 : vector<2x16xf32>
    %cst_97 = arith.constant 1.000000e+00 : f32
    %230 = vector.broadcast %cst_97 : f32 to vector<2x16xf32>
    %231 = arith.addf %230, %229 : vector<2x16xf32>
    %232 = arith.divf %230, %231 : vector<2x16xf32>
    %233 = vector.extract_strided_slice %220 {offsets = [0, 32], sizes = [2, 16], strides = [1, 1]} : vector<2x64xf32> to vector<2x16xf32>
    %234 = math.tanh %233 : vector<2x16xf32>
    %235 = vector.extract_strided_slice %220 {offsets = [0, 48], sizes = [2, 16], strides = [1, 1]} : vector<2x64xf32> to vector<2x16xf32>
    %236 = arith.negf %235 : vector<2x16xf32>
    %237 = math.exp %236 : vector<2x16xf32>
    %cst_98 = arith.constant 1.000000e+00 : f32
    %238 = vector.broadcast %cst_98 : f32 to vector<2x16xf32>
    %239 = arith.addf %238, %237 : vector<2x16xf32>
    %240 = arith.divf %238, %239 : vector<2x16xf32>
    %241 = arith.mulf %232, %212 : vector<2x16xf32>
    %242 = arith.mulf %226, %234 : vector<2x16xf32>
    %243 = arith.addf %241, %242 : vector<2x16xf32>
    %244 = math.tanh %243 : vector<2x16xf32>
    %245 = arith.mulf %240, %244 : vector<2x16xf32>
    %246 = vector.extract_strided_slice %119 {offsets = [0, 4, 0], sizes = [2, 1, 64], strides = [1, 1, 1]} : vector<2x6x64xf32> to vector<2x1x64xf32>
    %247 = vector.shape_cast %246 : vector<2x1x64xf32> to vector<2x64xf32>
    %cst_99 = arith.constant dense<0.000000e+00> : vector<2x64xf32>
    %248 = tpu.matmul %245, %22, %cst_99 {dimension_numbers = #tpu.dot_dimension_numbers<[1], [0], [0], [1], [0, 0, 1, 1], [], []>} : vector<2x16xf32>, vector<16x64xf32>, vector<2x64xf32> -> vector<2x64xf32>
    %249 = arith.addf %247, %248 : vector<2x64xf32>
    %250 = vector.broadcast %20 : vector<1x64xf32> to vector<2x64xf32>
    %251 = arith.addf %249, %250 : vector<2x64xf32>
    %252 = vector.extract_strided_slice %251 {offsets = [0, 0], sizes = [2, 16], strides = [1, 1]} : vector<2x64xf32> to vector<2x16xf32>
    %253 = arith.negf %252 : vector<2x16xf32>
    %254 = math.exp %253 : vector<2x16xf32>
    %cst_100 = arith.constant 1.000000e+00 : f32
    %255 = vector.broadcast %cst_100 : f32 to vector<2x16xf32>
    %256 = arith.addf %255, %254 : vector<2x16xf32>
    %257 = arith.divf %255, %256 : vector<2x16xf32>
    %258 = vector.extract_strided_slice %251 {offsets = [0, 16], sizes = [2, 16], strides = [1, 1]} : vector<2x64xf32> to vector<2x16xf32>
    %259 = arith.negf %258 : vector<2x16xf32>
    %260 = math.exp %259 : vector<2x16xf32>
    %cst_101 = arith.constant 1.000000e+00 : f32
    %261 = vector.broadcast %cst_101 : f32 to vector<2x16xf32>
    %262 = arith.addf %261, %260 : vector<2x16xf32>
    %263 = arith.divf %261, %262 : vector<2x16xf32>
    %264 = vector.extract_strided_slice %251 {offsets = [0, 32], sizes = [2, 16], strides = [1, 1]} : vector<2x64xf32> to vector<2x16xf32>
    %265 = math.tanh %264 : vector<2x16xf32>
    %266 = vector.extract_strided_slice %251 {offsets = [0, 48], sizes = [2, 16], strides = [1, 1]} : vector<2x64xf32> to vector<2x16xf32>
    %267 = arith.negf %266 : vector<2x16xf32>
    %268 = math.exp %267 : vector<2x16xf32>
    %cst_102 = arith.constant 1.000000e+00 : f32
    %269 = vector.broadcast %cst_102 : f32 to vector<2x16xf32>
    %270 = arith.addf %269, %268 : vector<2x16xf32>
    %271 = arith.divf %269, %270 : vector<2x16xf32>
    %272 = arith.mulf %263, %243 : vector<2x16xf32>
    %273 = arith.mulf %257, %265 : vector<2x16xf32>
    %274 = arith.addf %272, %273 : vector<2x16xf32>
    %275 = math.tanh %274 : vector<2x16xf32>
    %276 = arith.mulf %271, %275 : vector<2x16xf32>
    %277 = vector.extract_strided_slice %119 {offsets = [0, 5, 0], sizes = [2, 1, 64], strides = [1, 1, 1]} : vector<2x6x64xf32> to vector<2x1x64xf32>
    %278 = vector.shape_cast %277 : vector<2x1x64xf32> to vector<2x64xf32>
    %cst_103 = arith.constant dense<0.000000e+00> : vector<2x64xf32>
    %279 = tpu.matmul %276, %22, %cst_103 {dimension_numbers = #tpu.dot_dimension_numbers<[1], [0], [0], [1], [0, 0, 1, 1], [], []>} : vector<2x16xf32>, vector<16x64xf32>, vector<2x64xf32> -> vector<2x64xf32>
    %280 = arith.addf %278, %279 : vector<2x64xf32>
    %281 = vector.broadcast %20 : vector<1x64xf32> to vector<2x64xf32>
    %282 = arith.addf %280, %281 : vector<2x64xf32>
    %283 = vector.extract_strided_slice %282 {offsets = [0, 0], sizes = [2, 16], strides = [1, 1]} : vector<2x64xf32> to vector<2x16xf32>
    %284 = arith.negf %283 : vector<2x16xf32>
    %285 = math.exp %284 : vector<2x16xf32>
    %cst_104 = arith.constant 1.000000e+00 : f32
    %286 = vector.broadcast %cst_104 : f32 to vector<2x16xf32>
    %287 = arith.addf %286, %285 : vector<2x16xf32>
    %288 = arith.divf %286, %287 : vector<2x16xf32>
    %289 = vector.extract_strided_slice %282 {offsets = [0, 16], sizes = [2, 16], strides = [1, 1]} : vector<2x64xf32> to vector<2x16xf32>
    %290 = arith.negf %289 : vector<2x16xf32>
    %291 = math.exp %290 : vector<2x16xf32>
    %cst_105 = arith.constant 1.000000e+00 : f32
    %292 = vector.broadcast %cst_105 : f32 to vector<2x16xf32>
    %293 = arith.addf %292, %291 : vector<2x16xf32>
    %294 = arith.divf %292, %293 : vector<2x16xf32>
    %295 = vector.extract_strided_slice %282 {offsets = [0, 32], sizes = [2, 16], strides = [1, 1]} : vector<2x64xf32> to vector<2x16xf32>
    %296 = math.tanh %295 : vector<2x16xf32>
    %297 = vector.extract_strided_slice %282 {offsets = [0, 48], sizes = [2, 16], strides = [1, 1]} : vector<2x64xf32> to vector<2x16xf32>
    %298 = arith.negf %297 : vector<2x16xf32>
    %299 = math.exp %298 : vector<2x16xf32>
    %cst_106 = arith.constant 1.000000e+00 : f32
    %300 = vector.broadcast %cst_106 : f32 to vector<2x16xf32>
    %301 = arith.addf %300, %299 : vector<2x16xf32>
    %302 = arith.divf %300, %301 : vector<2x16xf32>
    %303 = arith.mulf %294, %274 : vector<2x16xf32>
    %304 = arith.mulf %288, %296 : vector<2x16xf32>
    %305 = arith.addf %303, %304 : vector<2x16xf32>
    %306 = math.tanh %305 : vector<2x16xf32>
    %307 = arith.mulf %302, %306 : vector<2x16xf32>
    %308 = vector.shape_cast %114 : vector<2x6x16xf32> to vector<12x16xf32>
    %cst_107 = arith.constant dense<0.000000e+00> : vector<12x64xf32>
    %309 = tpu.matmul %308, %19, %cst_107 {dimension_numbers = #tpu.dot_dimension_numbers<[1], [0], [0], [1], [0, 0, 1, 1], [], []>} : vector<12x16xf32>, vector<16x64xf32>, vector<12x64xf32> -> vector<12x64xf32>
    %310 = vector.broadcast %17 : vector<1x64xf32> to vector<12x64xf32>
    %311 = arith.addf %309, %310 : vector<12x64xf32>
    %312 = vector.shape_cast %311 : vector<12x64xf32> to vector<2x6x64xf32>
    %cst_108 = arith.constant 0.000000e+00 : f32
    %313 = vector.broadcast %cst_108 : f32 to vector<2x16xf32>
    %cst_109 = arith.constant 0.000000e+00 : f32
    %314 = vector.broadcast %cst_109 : f32 to vector<2x16xf32>
    %315 = vector.extract_strided_slice %312 {offsets = [0, 5, 0], sizes = [2, 1, 64], strides = [1, 1, 1]} : vector<2x6x64xf32> to vector<2x1x64xf32>
    %316 = vector.shape_cast %315 : vector<2x1x64xf32> to vector<2x64xf32>
    %cst_110 = arith.constant dense<0.000000e+00> : vector<2x64xf32>
    %317 = tpu.matmul %313, %18, %cst_110 {dimension_numbers = #tpu.dot_dimension_numbers<[1], [0], [0], [1], [0, 0, 1, 1], [], []>} : vector<2x16xf32>, vector<16x64xf32>, vector<2x64xf32> -> vector<2x64xf32>
    %318 = arith.addf %316, %317 : vector<2x64xf32>
    %319 = vector.broadcast %16 : vector<1x64xf32> to vector<2x64xf32>
    %320 = arith.addf %318, %319 : vector<2x64xf32>
    %321 = vector.extract_strided_slice %320 {offsets = [0, 0], sizes = [2, 16], strides = [1, 1]} : vector<2x64xf32> to vector<2x16xf32>
    %322 = arith.negf %321 : vector<2x16xf32>
    %323 = math.exp %322 : vector<2x16xf32>
    %cst_111 = arith.constant 1.000000e+00 : f32
    %324 = vector.broadcast %cst_111 : f32 to vector<2x16xf32>
    %325 = arith.addf %324, %323 : vector<2x16xf32>
    %326 = arith.divf %324, %325 : vector<2x16xf32>
    %327 = vector.extract_strided_slice %320 {offsets = [0, 16], sizes = [2, 16], strides = [1, 1]} : vector<2x64xf32> to vector<2x16xf32>
    %328 = arith.negf %327 : vector<2x16xf32>
    %329 = math.exp %328 : vector<2x16xf32>
    %cst_112 = arith.constant 1.000000e+00 : f32
    %330 = vector.broadcast %cst_112 : f32 to vector<2x16xf32>
    %331 = arith.addf %330, %329 : vector<2x16xf32>
    %332 = arith.divf %330, %331 : vector<2x16xf32>
    %333 = vector.extract_strided_slice %320 {offsets = [0, 32], sizes = [2, 16], strides = [1, 1]} : vector<2x64xf32> to vector<2x16xf32>
    %334 = math.tanh %333 : vector<2x16xf32>
    %335 = vector.extract_strided_slice %320 {offsets = [0, 48], sizes = [2, 16], strides = [1, 1]} : vector<2x64xf32> to vector<2x16xf32>
    %336 = arith.negf %335 : vector<2x16xf32>
    %337 = math.exp %336 : vector<2x16xf32>
    %cst_113 = arith.constant 1.000000e+00 : f32
    %338 = vector.broadcast %cst_113 : f32 to vector<2x16xf32>
    %339 = arith.addf %338, %337 : vector<2x16xf32>
    %340 = arith.divf %338, %339 : vector<2x16xf32>
    %341 = arith.mulf %332, %314 : vector<2x16xf32>
    %342 = arith.mulf %326, %334 : vector<2x16xf32>
    %343 = arith.addf %341, %342 : vector<2x16xf32>
    %344 = math.tanh %343 : vector<2x16xf32>
    %345 = arith.mulf %340, %344 : vector<2x16xf32>
    %346 = vector.extract_strided_slice %312 {offsets = [0, 4, 0], sizes = [2, 1, 64], strides = [1, 1, 1]} : vector<2x6x64xf32> to vector<2x1x64xf32>
    %347 = vector.shape_cast %346 : vector<2x1x64xf32> to vector<2x64xf32>
    %cst_114 = arith.constant dense<0.000000e+00> : vector<2x64xf32>
    %348 = tpu.matmul %345, %18, %cst_114 {dimension_numbers = #tpu.dot_dimension_numbers<[1], [0], [0], [1], [0, 0, 1, 1], [], []>} : vector<2x16xf32>, vector<16x64xf32>, vector<2x64xf32> -> vector<2x64xf32>
    %349 = arith.addf %347, %348 : vector<2x64xf32>
    %350 = vector.broadcast %16 : vector<1x64xf32> to vector<2x64xf32>
    %351 = arith.addf %349, %350 : vector<2x64xf32>
    %352 = vector.extract_strided_slice %351 {offsets = [0, 0], sizes = [2, 16], strides = [1, 1]} : vector<2x64xf32> to vector<2x16xf32>
    %353 = arith.negf %352 : vector<2x16xf32>
    %354 = math.exp %353 : vector<2x16xf32>
    %cst_115 = arith.constant 1.000000e+00 : f32
    %355 = vector.broadcast %cst_115 : f32 to vector<2x16xf32>
    %356 = arith.addf %355, %354 : vector<2x16xf32>
    %357 = arith.divf %355, %356 : vector<2x16xf32>
    %358 = vector.extract_strided_slice %351 {offsets = [0, 16], sizes = [2, 16], strides = [1, 1]} : vector<2x64xf32> to vector<2x16xf32>
    %359 = arith.negf %358 : vector<2x16xf32>
    %360 = math.exp %359 : vector<2x16xf32>
    %cst_116 = arith.constant 1.000000e+00 : f32
    %361 = vector.broadcast %cst_116 : f32 to vector<2x16xf32>
    %362 = arith.addf %361, %360 : vector<2x16xf32>
    %363 = arith.divf %361, %362 : vector<2x16xf32>
    %364 = vector.extract_strided_slice %351 {offsets = [0, 32], sizes = [2, 16], strides = [1, 1]} : vector<2x64xf32> to vector<2x16xf32>
    %365 = math.tanh %364 : vector<2x16xf32>
    %366 = vector.extract_strided_slice %351 {offsets = [0, 48], sizes = [2, 16], strides = [1, 1]} : vector<2x64xf32> to vector<2x16xf32>
    %367 = arith.negf %366 : vector<2x16xf32>
    %368 = math.exp %367 : vector<2x16xf32>
    %cst_117 = arith.constant 1.000000e+00 : f32
    %369 = vector.broadcast %cst_117 : f32 to vector<2x16xf32>
    %370 = arith.addf %369, %368 : vector<2x16xf32>
    %371 = arith.divf %369, %370 : vector<2x16xf32>
    %372 = arith.mulf %363, %343 : vector<2x16xf32>
    %373 = arith.mulf %357, %365 : vector<2x16xf32>
    %374 = arith.addf %372, %373 : vector<2x16xf32>
    %375 = math.tanh %374 : vector<2x16xf32>
    %376 = arith.mulf %371, %375 : vector<2x16xf32>
    %377 = vector.extract_strided_slice %312 {offsets = [0, 3, 0], sizes = [2, 1, 64], strides = [1, 1, 1]} : vector<2x6x64xf32> to vector<2x1x64xf32>
    %378 = vector.shape_cast %377 : vector<2x1x64xf32> to vector<2x64xf32>
    %cst_118 = arith.constant dense<0.000000e+00> : vector<2x64xf32>
    %379 = tpu.matmul %376, %18, %cst_118 {dimension_numbers = #tpu.dot_dimension_numbers<[1], [0], [0], [1], [0, 0, 1, 1], [], []>} : vector<2x16xf32>, vector<16x64xf32>, vector<2x64xf32> -> vector<2x64xf32>
    %380 = arith.addf %378, %379 : vector<2x64xf32>
    %381 = vector.broadcast %16 : vector<1x64xf32> to vector<2x64xf32>
    %382 = arith.addf %380, %381 : vector<2x64xf32>
    %383 = vector.extract_strided_slice %382 {offsets = [0, 0], sizes = [2, 16], strides = [1, 1]} : vector<2x64xf32> to vector<2x16xf32>
    %384 = arith.negf %383 : vector<2x16xf32>
    %385 = math.exp %384 : vector<2x16xf32>
    %cst_119 = arith.constant 1.000000e+00 : f32
    %386 = vector.broadcast %cst_119 : f32 to vector<2x16xf32>
    %387 = arith.addf %386, %385 : vector<2x16xf32>
    %388 = arith.divf %386, %387 : vector<2x16xf32>
    %389 = vector.extract_strided_slice %382 {offsets = [0, 16], sizes = [2, 16], strides = [1, 1]} : vector<2x64xf32> to vector<2x16xf32>
    %390 = arith.negf %389 : vector<2x16xf32>
    %391 = math.exp %390 : vector<2x16xf32>
    %cst_120 = arith.constant 1.000000e+00 : f32
    %392 = vector.broadcast %cst_120 : f32 to vector<2x16xf32>
    %393 = arith.addf %392, %391 : vector<2x16xf32>
    %394 = arith.divf %392, %393 : vector<2x16xf32>
    %395 = vector.extract_strided_slice %382 {offsets = [0, 32], sizes = [2, 16], strides = [1, 1]} : vector<2x64xf32> to vector<2x16xf32>
    %396 = math.tanh %395 : vector<2x16xf32>
    %397 = vector.extract_strided_slice %382 {offsets = [0, 48], sizes = [2, 16], strides = [1, 1]} : vector<2x64xf32> to vector<2x16xf32>
    %398 = arith.negf %397 : vector<2x16xf32>
    %399 = math.exp %398 : vector<2x16xf32>
    %cst_121 = arith.constant 1.000000e+00 : f32
    %400 = vector.broadcast %cst_121 : f32 to vector<2x16xf32>
    %401 = arith.addf %400, %399 : vector<2x16xf32>
    %402 = arith.divf %400, %401 : vector<2x16xf32>
    %403 = arith.mulf %394, %374 : vector<2x16xf32>
    %404 = arith.mulf %388, %396 : vector<2x16xf32>
    %405 = arith.addf %403, %404 : vector<2x16xf32>
    %406 = math.tanh %405 : vector<2x16xf32>
    %407 = arith.mulf %402, %406 : vector<2x16xf32>
    %408 = vector.extract_strided_slice %312 {offsets = [0, 2, 0], sizes = [2, 1, 64], strides = [1, 1, 1]} : vector<2x6x64xf32> to vector<2x1x64xf32>
    %409 = vector.shape_cast %408 : vector<2x1x64xf32> to vector<2x64xf32>
    %cst_122 = arith.constant dense<0.000000e+00> : vector<2x64xf32>
    %410 = tpu.matmul %407, %18, %cst_122 {dimension_numbers = #tpu.dot_dimension_numbers<[1], [0], [0], [1], [0, 0, 1, 1], [], []>} : vector<2x16xf32>, vector<16x64xf32>, vector<2x64xf32> -> vector<2x64xf32>
    %411 = arith.addf %409, %410 : vector<2x64xf32>
    %412 = vector.broadcast %16 : vector<1x64xf32> to vector<2x64xf32>
    %413 = arith.addf %411, %412 : vector<2x64xf32>
    %414 = vector.extract_strided_slice %413 {offsets = [0, 0], sizes = [2, 16], strides = [1, 1]} : vector<2x64xf32> to vector<2x16xf32>
    %415 = arith.negf %414 : vector<2x16xf32>
    %416 = math.exp %415 : vector<2x16xf32>
    %cst_123 = arith.constant 1.000000e+00 : f32
    %417 = vector.broadcast %cst_123 : f32 to vector<2x16xf32>
    %418 = arith.addf %417, %416 : vector<2x16xf32>
    %419 = arith.divf %417, %418 : vector<2x16xf32>
    %420 = vector.extract_strided_slice %413 {offsets = [0, 16], sizes = [2, 16], strides = [1, 1]} : vector<2x64xf32> to vector<2x16xf32>
    %421 = arith.negf %420 : vector<2x16xf32>
    %422 = math.exp %421 : vector<2x16xf32>
    %cst_124 = arith.constant 1.000000e+00 : f32
    %423 = vector.broadcast %cst_124 : f32 to vector<2x16xf32>
    %424 = arith.addf %423, %422 : vector<2x16xf32>
    %425 = arith.divf %423, %424 : vector<2x16xf32>
    %426 = vector.extract_strided_slice %413 {offsets = [0, 32], sizes = [2, 16], strides = [1, 1]} : vector<2x64xf32> to vector<2x16xf32>
    %427 = math.tanh %426 : vector<2x16xf32>
    %428 = vector.extract_strided_slice %413 {offsets = [0, 48], sizes = [2, 16], strides = [1, 1]} : vector<2x64xf32> to vector<2x16xf32>
    %429 = arith.negf %428 : vector<2x16xf32>
    %430 = math.exp %429 : vector<2x16xf32>
    %cst_125 = arith.constant 1.000000e+00 : f32
    %431 = vector.broadcast %cst_125 : f32 to vector<2x16xf32>
    %432 = arith.addf %431, %430 : vector<2x16xf32>
    %433 = arith.divf %431, %432 : vector<2x16xf32>
    %434 = arith.mulf %425, %405 : vector<2x16xf32>
    %435 = arith.mulf %419, %427 : vector<2x16xf32>
    %436 = arith.addf %434, %435 : vector<2x16xf32>
    %437 = math.tanh %436 : vector<2x16xf32>
    %438 = arith.mulf %433, %437 : vector<2x16xf32>
    %439 = vector.extract_strided_slice %312 {offsets = [0, 1, 0], sizes = [2, 1, 64], strides = [1, 1, 1]} : vector<2x6x64xf32> to vector<2x1x64xf32>
    %440 = vector.shape_cast %439 : vector<2x1x64xf32> to vector<2x64xf32>
    %cst_126 = arith.constant dense<0.000000e+00> : vector<2x64xf32>
    %441 = tpu.matmul %438, %18, %cst_126 {dimension_numbers = #tpu.dot_dimension_numbers<[1], [0], [0], [1], [0, 0, 1, 1], [], []>} : vector<2x16xf32>, vector<16x64xf32>, vector<2x64xf32> -> vector<2x64xf32>
    %442 = arith.addf %440, %441 : vector<2x64xf32>
    %443 = vector.broadcast %16 : vector<1x64xf32> to vector<2x64xf32>
    %444 = arith.addf %442, %443 : vector<2x64xf32>
    %445 = vector.extract_strided_slice %444 {offsets = [0, 0], sizes = [2, 16], strides = [1, 1]} : vector<2x64xf32> to vector<2x16xf32>
    %446 = arith.negf %445 : vector<2x16xf32>
    %447 = math.exp %446 : vector<2x16xf32>
    %cst_127 = arith.constant 1.000000e+00 : f32
    %448 = vector.broadcast %cst_127 : f32 to vector<2x16xf32>
    %449 = arith.addf %448, %447 : vector<2x16xf32>
    %450 = arith.divf %448, %449 : vector<2x16xf32>
    %451 = vector.extract_strided_slice %444 {offsets = [0, 16], sizes = [2, 16], strides = [1, 1]} : vector<2x64xf32> to vector<2x16xf32>
    %452 = arith.negf %451 : vector<2x16xf32>
    %453 = math.exp %452 : vector<2x16xf32>
    %cst_128 = arith.constant 1.000000e+00 : f32
    %454 = vector.broadcast %cst_128 : f32 to vector<2x16xf32>
    %455 = arith.addf %454, %453 : vector<2x16xf32>
    %456 = arith.divf %454, %455 : vector<2x16xf32>
    %457 = vector.extract_strided_slice %444 {offsets = [0, 32], sizes = [2, 16], strides = [1, 1]} : vector<2x64xf32> to vector<2x16xf32>
    %458 = math.tanh %457 : vector<2x16xf32>
    %459 = vector.extract_strided_slice %444 {offsets = [0, 48], sizes = [2, 16], strides = [1, 1]} : vector<2x64xf32> to vector<2x16xf32>
    %460 = arith.negf %459 : vector<2x16xf32>
    %461 = math.exp %460 : vector<2x16xf32>
    %cst_129 = arith.constant 1.000000e+00 : f32
    %462 = vector.broadcast %cst_129 : f32 to vector<2x16xf32>
    %463 = arith.addf %462, %461 : vector<2x16xf32>
    %464 = arith.divf %462, %463 : vector<2x16xf32>
    %465 = arith.mulf %456, %436 : vector<2x16xf32>
    %466 = arith.mulf %450, %458 : vector<2x16xf32>
    %467 = arith.addf %465, %466 : vector<2x16xf32>
    %468 = math.tanh %467 : vector<2x16xf32>
    %469 = arith.mulf %464, %468 : vector<2x16xf32>
    %470 = vector.extract_strided_slice %312 {offsets = [0, 0, 0], sizes = [2, 1, 64], strides = [1, 1, 1]} : vector<2x6x64xf32> to vector<2x1x64xf32>
    %471 = vector.shape_cast %470 : vector<2x1x64xf32> to vector<2x64xf32>
    %cst_130 = arith.constant dense<0.000000e+00> : vector<2x64xf32>
    %472 = tpu.matmul %469, %18, %cst_130 {dimension_numbers = #tpu.dot_dimension_numbers<[1], [0], [0], [1], [0, 0, 1, 1], [], []>} : vector<2x16xf32>, vector<16x64xf32>, vector<2x64xf32> -> vector<2x64xf32>
    %473 = arith.addf %471, %472 : vector<2x64xf32>
    %474 = vector.broadcast %16 : vector<1x64xf32> to vector<2x64xf32>
    %475 = arith.addf %473, %474 : vector<2x64xf32>
    %476 = vector.extract_strided_slice %475 {offsets = [0, 0], sizes = [2, 16], strides = [1, 1]} : vector<2x64xf32> to vector<2x16xf32>
    %477 = arith.negf %476 : vector<2x16xf32>
    %478 = math.exp %477 : vector<2x16xf32>
    %cst_131 = arith.constant 1.000000e+00 : f32
    %479 = vector.broadcast %cst_131 : f32 to vector<2x16xf32>
    %480 = arith.addf %479, %478 : vector<2x16xf32>
    %481 = arith.divf %479, %480 : vector<2x16xf32>
    %482 = vector.extract_strided_slice %475 {offsets = [0, 16], sizes = [2, 16], strides = [1, 1]} : vector<2x64xf32> to vector<2x16xf32>
    %483 = arith.negf %482 : vector<2x16xf32>
    %484 = math.exp %483 : vector<2x16xf32>
    %cst_132 = arith.constant 1.000000e+00 : f32
    %485 = vector.broadcast %cst_132 : f32 to vector<2x16xf32>
    %486 = arith.addf %485, %484 : vector<2x16xf32>
    %487 = arith.divf %485, %486 : vector<2x16xf32>
    %488 = vector.extract_strided_slice %475 {offsets = [0, 32], sizes = [2, 16], strides = [1, 1]} : vector<2x64xf32> to vector<2x16xf32>
    %489 = math.tanh %488 : vector<2x16xf32>
    %490 = vector.extract_strided_slice %475 {offsets = [0, 48], sizes = [2, 16], strides = [1, 1]} : vector<2x64xf32> to vector<2x16xf32>
    %491 = arith.negf %490 : vector<2x16xf32>
    %492 = math.exp %491 : vector<2x16xf32>
    %cst_133 = arith.constant 1.000000e+00 : f32
    %493 = vector.broadcast %cst_133 : f32 to vector<2x16xf32>
    %494 = arith.addf %493, %492 : vector<2x16xf32>
    %495 = arith.divf %493, %494 : vector<2x16xf32>
    %496 = arith.mulf %487, %467 : vector<2x16xf32>
    %497 = arith.mulf %481, %489 : vector<2x16xf32>
    %498 = arith.addf %496, %497 : vector<2x16xf32>
    %499 = math.tanh %498 : vector<2x16xf32>
    %500 = arith.mulf %495, %499 : vector<2x16xf32>
    %501 = tpu.concatenate %152, %500 in 1 : vector<2x16xf32>, vector<2x16xf32> -> vector<2x32xf32>
    %502 = vector.shape_cast %501 : vector<2x32xf32> to vector<2x1x32xf32>
    %503 = tpu.concatenate %183, %469 in 1 : vector<2x16xf32>, vector<2x16xf32> -> vector<2x32xf32>
    %504 = vector.shape_cast %503 : vector<2x32xf32> to vector<2x1x32xf32>
    %505 = tpu.concatenate %214, %438 in 1 : vector<2x16xf32>, vector<2x16xf32> -> vector<2x32xf32>
    %506 = vector.shape_cast %505 : vector<2x32xf32> to vector<2x1x32xf32>
    %507 = tpu.concatenate %245, %407 in 1 : vector<2x16xf32>, vector<2x16xf32> -> vector<2x32xf32>
    %508 = vector.shape_cast %507 : vector<2x32xf32> to vector<2x1x32xf32>
    %509 = tpu.concatenate %276, %376 in 1 : vector<2x16xf32>, vector<2x16xf32> -> vector<2x32xf32>
    %510 = vector.shape_cast %509 : vector<2x32xf32> to vector<2x1x32xf32>
    %511 = tpu.concatenate %307, %345 in 1 : vector<2x16xf32>, vector<2x16xf32> -> vector<2x32xf32>
    %512 = vector.shape_cast %511 : vector<2x32xf32> to vector<2x1x32xf32>
    %513 = tpu.concatenate %502, %504, %506, %508, %510, %512 in 1 : vector<2x1x32xf32>, vector<2x1x32xf32>, vector<2x1x32xf32>, vector<2x1x32xf32>, vector<2x1x32xf32>, vector<2x1x32xf32> -> vector<2x6x32xf32>
    %514 = vector.shape_cast %513 : vector<2x6x32xf32> to vector<12x32xf32>
    %cst_134 = arith.constant dense<0.000000e+00> : vector<12x64xf32>
    %515 = tpu.matmul %514, %31, %cst_134 {dimension_numbers = #tpu.dot_dimension_numbers<[1], [0], [0], [1], [0, 0, 1, 1], [], []>} : vector<12x32xf32>, vector<32x64xf32>, vector<12x64xf32> -> vector<12x64xf32>
    %516 = vector.broadcast %29 : vector<1x64xf32> to vector<12x64xf32>
    %517 = arith.addf %515, %516 : vector<12x64xf32>
    %518 = vector.shape_cast %517 : vector<12x64xf32> to vector<2x6x64xf32>
    %cst_135 = arith.constant 0.000000e+00 : f32
    %519 = vector.broadcast %cst_135 : f32 to vector<2x16xf32>
    %cst_136 = arith.constant 0.000000e+00 : f32
    %520 = vector.broadcast %cst_136 : f32 to vector<2x16xf32>
    %521 = vector.extract_strided_slice %518 {offsets = [0, 0, 0], sizes = [2, 1, 64], strides = [1, 1, 1]} : vector<2x6x64xf32> to vector<2x1x64xf32>
    %522 = vector.shape_cast %521 : vector<2x1x64xf32> to vector<2x64xf32>
    %cst_137 = arith.constant dense<0.000000e+00> : vector<2x64xf32>
    %523 = tpu.matmul %519, %30, %cst_137 {dimension_numbers = #tpu.dot_dimension_numbers<[1], [0], [0], [1], [0, 0, 1, 1], [], []>} : vector<2x16xf32>, vector<16x64xf32>, vector<2x64xf32> -> vector<2x64xf32>
    %524 = arith.addf %522, %523 : vector<2x64xf32>
    %525 = vector.broadcast %28 : vector<1x64xf32> to vector<2x64xf32>
    %526 = arith.addf %524, %525 : vector<2x64xf32>
    %527 = vector.extract_strided_slice %526 {offsets = [0, 0], sizes = [2, 16], strides = [1, 1]} : vector<2x64xf32> to vector<2x16xf32>
    %528 = arith.negf %527 : vector<2x16xf32>
    %529 = math.exp %528 : vector<2x16xf32>
    %cst_138 = arith.constant 1.000000e+00 : f32
    %530 = vector.broadcast %cst_138 : f32 to vector<2x16xf32>
    %531 = arith.addf %530, %529 : vector<2x16xf32>
    %532 = arith.divf %530, %531 : vector<2x16xf32>
    %533 = vector.extract_strided_slice %526 {offsets = [0, 16], sizes = [2, 16], strides = [1, 1]} : vector<2x64xf32> to vector<2x16xf32>
    %534 = arith.negf %533 : vector<2x16xf32>
    %535 = math.exp %534 : vector<2x16xf32>
    %cst_139 = arith.constant 1.000000e+00 : f32
    %536 = vector.broadcast %cst_139 : f32 to vector<2x16xf32>
    %537 = arith.addf %536, %535 : vector<2x16xf32>
    %538 = arith.divf %536, %537 : vector<2x16xf32>
    %539 = vector.extract_strided_slice %526 {offsets = [0, 32], sizes = [2, 16], strides = [1, 1]} : vector<2x64xf32> to vector<2x16xf32>
    %540 = math.tanh %539 : vector<2x16xf32>
    %541 = vector.extract_strided_slice %526 {offsets = [0, 48], sizes = [2, 16], strides = [1, 1]} : vector<2x64xf32> to vector<2x16xf32>
    %542 = arith.negf %541 : vector<2x16xf32>
    %543 = math.exp %542 : vector<2x16xf32>
    %cst_140 = arith.constant 1.000000e+00 : f32
    %544 = vector.broadcast %cst_140 : f32 to vector<2x16xf32>
    %545 = arith.addf %544, %543 : vector<2x16xf32>
    %546 = arith.divf %544, %545 : vector<2x16xf32>
    %547 = arith.mulf %538, %520 : vector<2x16xf32>
    %548 = arith.mulf %532, %540 : vector<2x16xf32>
    %549 = arith.addf %547, %548 : vector<2x16xf32>
    %550 = math.tanh %549 : vector<2x16xf32>
    %551 = arith.mulf %546, %550 : vector<2x16xf32>
    %552 = vector.extract_strided_slice %518 {offsets = [0, 1, 0], sizes = [2, 1, 64], strides = [1, 1, 1]} : vector<2x6x64xf32> to vector<2x1x64xf32>
    %553 = vector.shape_cast %552 : vector<2x1x64xf32> to vector<2x64xf32>
    %cst_141 = arith.constant dense<0.000000e+00> : vector<2x64xf32>
    %554 = tpu.matmul %551, %30, %cst_141 {dimension_numbers = #tpu.dot_dimension_numbers<[1], [0], [0], [1], [0, 0, 1, 1], [], []>} : vector<2x16xf32>, vector<16x64xf32>, vector<2x64xf32> -> vector<2x64xf32>
    %555 = arith.addf %553, %554 : vector<2x64xf32>
    %556 = vector.broadcast %28 : vector<1x64xf32> to vector<2x64xf32>
    %557 = arith.addf %555, %556 : vector<2x64xf32>
    %558 = vector.extract_strided_slice %557 {offsets = [0, 0], sizes = [2, 16], strides = [1, 1]} : vector<2x64xf32> to vector<2x16xf32>
    %559 = arith.negf %558 : vector<2x16xf32>
    %560 = math.exp %559 : vector<2x16xf32>
    %cst_142 = arith.constant 1.000000e+00 : f32
    %561 = vector.broadcast %cst_142 : f32 to vector<2x16xf32>
    %562 = arith.addf %561, %560 : vector<2x16xf32>
    %563 = arith.divf %561, %562 : vector<2x16xf32>
    %564 = vector.extract_strided_slice %557 {offsets = [0, 16], sizes = [2, 16], strides = [1, 1]} : vector<2x64xf32> to vector<2x16xf32>
    %565 = arith.negf %564 : vector<2x16xf32>
    %566 = math.exp %565 : vector<2x16xf32>
    %cst_143 = arith.constant 1.000000e+00 : f32
    %567 = vector.broadcast %cst_143 : f32 to vector<2x16xf32>
    %568 = arith.addf %567, %566 : vector<2x16xf32>
    %569 = arith.divf %567, %568 : vector<2x16xf32>
    %570 = vector.extract_strided_slice %557 {offsets = [0, 32], sizes = [2, 16], strides = [1, 1]} : vector<2x64xf32> to vector<2x16xf32>
    %571 = math.tanh %570 : vector<2x16xf32>
    %572 = vector.extract_strided_slice %557 {offsets = [0, 48], sizes = [2, 16], strides = [1, 1]} : vector<2x64xf32> to vector<2x16xf32>
    %573 = arith.negf %572 : vector<2x16xf32>
    %574 = math.exp %573 : vector<2x16xf32>
    %cst_144 = arith.constant 1.000000e+00 : f32
    %575 = vector.broadcast %cst_144 : f32 to vector<2x16xf32>
    %576 = arith.addf %575, %574 : vector<2x16xf32>
    %577 = arith.divf %575, %576 : vector<2x16xf32>
    %578 = arith.mulf %569, %549 : vector<2x16xf32>
    %579 = arith.mulf %563, %571 : vector<2x16xf32>
    %580 = arith.addf %578, %579 : vector<2x16xf32>
    %581 = math.tanh %580 : vector<2x16xf32>
    %582 = arith.mulf %577, %581 : vector<2x16xf32>
    %583 = vector.extract_strided_slice %518 {offsets = [0, 2, 0], sizes = [2, 1, 64], strides = [1, 1, 1]} : vector<2x6x64xf32> to vector<2x1x64xf32>
    %584 = vector.shape_cast %583 : vector<2x1x64xf32> to vector<2x64xf32>
    %cst_145 = arith.constant dense<0.000000e+00> : vector<2x64xf32>
    %585 = tpu.matmul %582, %30, %cst_145 {dimension_numbers = #tpu.dot_dimension_numbers<[1], [0], [0], [1], [0, 0, 1, 1], [], []>} : vector<2x16xf32>, vector<16x64xf32>, vector<2x64xf32> -> vector<2x64xf32>
    %586 = arith.addf %584, %585 : vector<2x64xf32>
    %587 = vector.broadcast %28 : vector<1x64xf32> to vector<2x64xf32>
    %588 = arith.addf %586, %587 : vector<2x64xf32>
    %589 = vector.extract_strided_slice %588 {offsets = [0, 0], sizes = [2, 16], strides = [1, 1]} : vector<2x64xf32> to vector<2x16xf32>
    %590 = arith.negf %589 : vector<2x16xf32>
    %591 = math.exp %590 : vector<2x16xf32>
    %cst_146 = arith.constant 1.000000e+00 : f32
    %592 = vector.broadcast %cst_146 : f32 to vector<2x16xf32>
    %593 = arith.addf %592, %591 : vector<2x16xf32>
    %594 = arith.divf %592, %593 : vector<2x16xf32>
    %595 = vector.extract_strided_slice %588 {offsets = [0, 16], sizes = [2, 16], strides = [1, 1]} : vector<2x64xf32> to vector<2x16xf32>
    %596 = arith.negf %595 : vector<2x16xf32>
    %597 = math.exp %596 : vector<2x16xf32>
    %cst_147 = arith.constant 1.000000e+00 : f32
    %598 = vector.broadcast %cst_147 : f32 to vector<2x16xf32>
    %599 = arith.addf %598, %597 : vector<2x16xf32>
    %600 = arith.divf %598, %599 : vector<2x16xf32>
    %601 = vector.extract_strided_slice %588 {offsets = [0, 32], sizes = [2, 16], strides = [1, 1]} : vector<2x64xf32> to vector<2x16xf32>
    %602 = math.tanh %601 : vector<2x16xf32>
    %603 = vector.extract_strided_slice %588 {offsets = [0, 48], sizes = [2, 16], strides = [1, 1]} : vector<2x64xf32> to vector<2x16xf32>
    %604 = arith.negf %603 : vector<2x16xf32>
    %605 = math.exp %604 : vector<2x16xf32>
    %cst_148 = arith.constant 1.000000e+00 : f32
    %606 = vector.broadcast %cst_148 : f32 to vector<2x16xf32>
    %607 = arith.addf %606, %605 : vector<2x16xf32>
    %608 = arith.divf %606, %607 : vector<2x16xf32>
    %609 = arith.mulf %600, %580 : vector<2x16xf32>
    %610 = arith.mulf %594, %602 : vector<2x16xf32>
    %611 = arith.addf %609, %610 : vector<2x16xf32>
    %612 = math.tanh %611 : vector<2x16xf32>
    %613 = arith.mulf %608, %612 : vector<2x16xf32>
    %614 = vector.extract_strided_slice %518 {offsets = [0, 3, 0], sizes = [2, 1, 64], strides = [1, 1, 1]} : vector<2x6x64xf32> to vector<2x1x64xf32>
    %615 = vector.shape_cast %614 : vector<2x1x64xf32> to vector<2x64xf32>
    %cst_149 = arith.constant dense<0.000000e+00> : vector<2x64xf32>
    %616 = tpu.matmul %613, %30, %cst_149 {dimension_numbers = #tpu.dot_dimension_numbers<[1], [0], [0], [1], [0, 0, 1, 1], [], []>} : vector<2x16xf32>, vector<16x64xf32>, vector<2x64xf32> -> vector<2x64xf32>
    %617 = arith.addf %615, %616 : vector<2x64xf32>
    %618 = vector.broadcast %28 : vector<1x64xf32> to vector<2x64xf32>
    %619 = arith.addf %617, %618 : vector<2x64xf32>
    %620 = vector.extract_strided_slice %619 {offsets = [0, 0], sizes = [2, 16], strides = [1, 1]} : vector<2x64xf32> to vector<2x16xf32>
    %621 = arith.negf %620 : vector<2x16xf32>
    %622 = math.exp %621 : vector<2x16xf32>
    %cst_150 = arith.constant 1.000000e+00 : f32
    %623 = vector.broadcast %cst_150 : f32 to vector<2x16xf32>
    %624 = arith.addf %623, %622 : vector<2x16xf32>
    %625 = arith.divf %623, %624 : vector<2x16xf32>
    %626 = vector.extract_strided_slice %619 {offsets = [0, 16], sizes = [2, 16], strides = [1, 1]} : vector<2x64xf32> to vector<2x16xf32>
    %627 = arith.negf %626 : vector<2x16xf32>
    %628 = math.exp %627 : vector<2x16xf32>
    %cst_151 = arith.constant 1.000000e+00 : f32
    %629 = vector.broadcast %cst_151 : f32 to vector<2x16xf32>
    %630 = arith.addf %629, %628 : vector<2x16xf32>
    %631 = arith.divf %629, %630 : vector<2x16xf32>
    %632 = vector.extract_strided_slice %619 {offsets = [0, 32], sizes = [2, 16], strides = [1, 1]} : vector<2x64xf32> to vector<2x16xf32>
    %633 = math.tanh %632 : vector<2x16xf32>
    %634 = vector.extract_strided_slice %619 {offsets = [0, 48], sizes = [2, 16], strides = [1, 1]} : vector<2x64xf32> to vector<2x16xf32>
    %635 = arith.negf %634 : vector<2x16xf32>
    %636 = math.exp %635 : vector<2x16xf32>
    %cst_152 = arith.constant 1.000000e+00 : f32
    %637 = vector.broadcast %cst_152 : f32 to vector<2x16xf32>
    %638 = arith.addf %637, %636 : vector<2x16xf32>
    %639 = arith.divf %637, %638 : vector<2x16xf32>
    %640 = arith.mulf %631, %611 : vector<2x16xf32>
    %641 = arith.mulf %625, %633 : vector<2x16xf32>
    %642 = arith.addf %640, %641 : vector<2x16xf32>
    %643 = math.tanh %642 : vector<2x16xf32>
    %644 = arith.mulf %639, %643 : vector<2x16xf32>
    %645 = vector.extract_strided_slice %518 {offsets = [0, 4, 0], sizes = [2, 1, 64], strides = [1, 1, 1]} : vector<2x6x64xf32> to vector<2x1x64xf32>
    %646 = vector.shape_cast %645 : vector<2x1x64xf32> to vector<2x64xf32>
    %cst_153 = arith.constant dense<0.000000e+00> : vector<2x64xf32>
    %647 = tpu.matmul %644, %30, %cst_153 {dimension_numbers = #tpu.dot_dimension_numbers<[1], [0], [0], [1], [0, 0, 1, 1], [], []>} : vector<2x16xf32>, vector<16x64xf32>, vector<2x64xf32> -> vector<2x64xf32>
    %648 = arith.addf %646, %647 : vector<2x64xf32>
    %649 = vector.broadcast %28 : vector<1x64xf32> to vector<2x64xf32>
    %650 = arith.addf %648, %649 : vector<2x64xf32>
    %651 = vector.extract_strided_slice %650 {offsets = [0, 0], sizes = [2, 16], strides = [1, 1]} : vector<2x64xf32> to vector<2x16xf32>
    %652 = arith.negf %651 : vector<2x16xf32>
    %653 = math.exp %652 : vector<2x16xf32>
    %cst_154 = arith.constant 1.000000e+00 : f32
    %654 = vector.broadcast %cst_154 : f32 to vector<2x16xf32>
    %655 = arith.addf %654, %653 : vector<2x16xf32>
    %656 = arith.divf %654, %655 : vector<2x16xf32>
    %657 = vector.extract_strided_slice %650 {offsets = [0, 16], sizes = [2, 16], strides = [1, 1]} : vector<2x64xf32> to vector<2x16xf32>
    %658 = arith.negf %657 : vector<2x16xf32>
    %659 = math.exp %658 : vector<2x16xf32>
    %cst_155 = arith.constant 1.000000e+00 : f32
    %660 = vector.broadcast %cst_155 : f32 to vector<2x16xf32>
    %661 = arith.addf %660, %659 : vector<2x16xf32>
    %662 = arith.divf %660, %661 : vector<2x16xf32>
    %663 = vector.extract_strided_slice %650 {offsets = [0, 32], sizes = [2, 16], strides = [1, 1]} : vector<2x64xf32> to vector<2x16xf32>
    %664 = math.tanh %663 : vector<2x16xf32>
    %665 = vector.extract_strided_slice %650 {offsets = [0, 48], sizes = [2, 16], strides = [1, 1]} : vector<2x64xf32> to vector<2x16xf32>
    %666 = arith.negf %665 : vector<2x16xf32>
    %667 = math.exp %666 : vector<2x16xf32>
    %cst_156 = arith.constant 1.000000e+00 : f32
    %668 = vector.broadcast %cst_156 : f32 to vector<2x16xf32>
    %669 = arith.addf %668, %667 : vector<2x16xf32>
    %670 = arith.divf %668, %669 : vector<2x16xf32>
    %671 = arith.mulf %662, %642 : vector<2x16xf32>
    %672 = arith.mulf %656, %664 : vector<2x16xf32>
    %673 = arith.addf %671, %672 : vector<2x16xf32>
    %674 = math.tanh %673 : vector<2x16xf32>
    %675 = arith.mulf %670, %674 : vector<2x16xf32>
    %676 = vector.extract_strided_slice %518 {offsets = [0, 5, 0], sizes = [2, 1, 64], strides = [1, 1, 1]} : vector<2x6x64xf32> to vector<2x1x64xf32>
    %677 = vector.shape_cast %676 : vector<2x1x64xf32> to vector<2x64xf32>
    %cst_157 = arith.constant dense<0.000000e+00> : vector<2x64xf32>
    %678 = tpu.matmul %675, %30, %cst_157 {dimension_numbers = #tpu.dot_dimension_numbers<[1], [0], [0], [1], [0, 0, 1, 1], [], []>} : vector<2x16xf32>, vector<16x64xf32>, vector<2x64xf32> -> vector<2x64xf32>
    %679 = arith.addf %677, %678 : vector<2x64xf32>
    %680 = vector.broadcast %28 : vector<1x64xf32> to vector<2x64xf32>
    %681 = arith.addf %679, %680 : vector<2x64xf32>
    %682 = vector.extract_strided_slice %681 {offsets = [0, 0], sizes = [2, 16], strides = [1, 1]} : vector<2x64xf32> to vector<2x16xf32>
    %683 = arith.negf %682 : vector<2x16xf32>
    %684 = math.exp %683 : vector<2x16xf32>
    %cst_158 = arith.constant 1.000000e+00 : f32
    %685 = vector.broadcast %cst_158 : f32 to vector<2x16xf32>
    %686 = arith.addf %685, %684 : vector<2x16xf32>
    %687 = arith.divf %685, %686 : vector<2x16xf32>
    %688 = vector.extract_strided_slice %681 {offsets = [0, 16], sizes = [2, 16], strides = [1, 1]} : vector<2x64xf32> to vector<2x16xf32>
    %689 = arith.negf %688 : vector<2x16xf32>
    %690 = math.exp %689 : vector<2x16xf32>
    %cst_159 = arith.constant 1.000000e+00 : f32
    %691 = vector.broadcast %cst_159 : f32 to vector<2x16xf32>
    %692 = arith.addf %691, %690 : vector<2x16xf32>
    %693 = arith.divf %691, %692 : vector<2x16xf32>
    %694 = vector.extract_strided_slice %681 {offsets = [0, 32], sizes = [2, 16], strides = [1, 1]} : vector<2x64xf32> to vector<2x16xf32>
    %695 = math.tanh %694 : vector<2x16xf32>
    %696 = vector.extract_strided_slice %681 {offsets = [0, 48], sizes = [2, 16], strides = [1, 1]} : vector<2x64xf32> to vector<2x16xf32>
    %697 = arith.negf %696 : vector<2x16xf32>
    %698 = math.exp %697 : vector<2x16xf32>
    %cst_160 = arith.constant 1.000000e+00 : f32
    %699 = vector.broadcast %cst_160 : f32 to vector<2x16xf32>
    %700 = arith.addf %699, %698 : vector<2x16xf32>
    %701 = arith.divf %699, %700 : vector<2x16xf32>
    %702 = arith.mulf %693, %673 : vector<2x16xf32>
    %703 = arith.mulf %687, %695 : vector<2x16xf32>
    %704 = arith.addf %702, %703 : vector<2x16xf32>
    %705 = math.tanh %704 : vector<2x16xf32>
    %706 = arith.mulf %701, %705 : vector<2x16xf32>
    %707 = vector.shape_cast %513 : vector<2x6x32xf32> to vector<12x32xf32>
    %cst_161 = arith.constant dense<0.000000e+00> : vector<12x64xf32>
    %708 = tpu.matmul %707, %27, %cst_161 {dimension_numbers = #tpu.dot_dimension_numbers<[1], [0], [0], [1], [0, 0, 1, 1], [], []>} : vector<12x32xf32>, vector<32x64xf32>, vector<12x64xf32> -> vector<12x64xf32>
    %709 = vector.broadcast %25 : vector<1x64xf32> to vector<12x64xf32>
    %710 = arith.addf %708, %709 : vector<12x64xf32>
    %711 = vector.shape_cast %710 : vector<12x64xf32> to vector<2x6x64xf32>
    %cst_162 = arith.constant 0.000000e+00 : f32
    %712 = vector.broadcast %cst_162 : f32 to vector<2x16xf32>
    %cst_163 = arith.constant 0.000000e+00 : f32
    %713 = vector.broadcast %cst_163 : f32 to vector<2x16xf32>
    %714 = vector.extract_strided_slice %711 {offsets = [0, 5, 0], sizes = [2, 1, 64], strides = [1, 1, 1]} : vector<2x6x64xf32> to vector<2x1x64xf32>
    %715 = vector.shape_cast %714 : vector<2x1x64xf32> to vector<2x64xf32>
    %cst_164 = arith.constant dense<0.000000e+00> : vector<2x64xf32>
    %716 = tpu.matmul %712, %26, %cst_164 {dimension_numbers = #tpu.dot_dimension_numbers<[1], [0], [0], [1], [0, 0, 1, 1], [], []>} : vector<2x16xf32>, vector<16x64xf32>, vector<2x64xf32> -> vector<2x64xf32>
    %717 = arith.addf %715, %716 : vector<2x64xf32>
    %718 = vector.broadcast %24 : vector<1x64xf32> to vector<2x64xf32>
    %719 = arith.addf %717, %718 : vector<2x64xf32>
    %720 = vector.extract_strided_slice %719 {offsets = [0, 0], sizes = [2, 16], strides = [1, 1]} : vector<2x64xf32> to vector<2x16xf32>
    %721 = arith.negf %720 : vector<2x16xf32>
    %722 = math.exp %721 : vector<2x16xf32>
    %cst_165 = arith.constant 1.000000e+00 : f32
    %723 = vector.broadcast %cst_165 : f32 to vector<2x16xf32>
    %724 = arith.addf %723, %722 : vector<2x16xf32>
    %725 = arith.divf %723, %724 : vector<2x16xf32>
    %726 = vector.extract_strided_slice %719 {offsets = [0, 16], sizes = [2, 16], strides = [1, 1]} : vector<2x64xf32> to vector<2x16xf32>
    %727 = arith.negf %726 : vector<2x16xf32>
    %728 = math.exp %727 : vector<2x16xf32>
    %cst_166 = arith.constant 1.000000e+00 : f32
    %729 = vector.broadcast %cst_166 : f32 to vector<2x16xf32>
    %730 = arith.addf %729, %728 : vector<2x16xf32>
    %731 = arith.divf %729, %730 : vector<2x16xf32>
    %732 = vector.extract_strided_slice %719 {offsets = [0, 32], sizes = [2, 16], strides = [1, 1]} : vector<2x64xf32> to vector<2x16xf32>
    %733 = math.tanh %732 : vector<2x16xf32>
    %734 = vector.extract_strided_slice %719 {offsets = [0, 48], sizes = [2, 16], strides = [1, 1]} : vector<2x64xf32> to vector<2x16xf32>
    %735 = arith.negf %734 : vector<2x16xf32>
    %736 = math.exp %735 : vector<2x16xf32>
    %cst_167 = arith.constant 1.000000e+00 : f32
    %737 = vector.broadcast %cst_167 : f32 to vector<2x16xf32>
    %738 = arith.addf %737, %736 : vector<2x16xf32>
    %739 = arith.divf %737, %738 : vector<2x16xf32>
    %740 = arith.mulf %731, %713 : vector<2x16xf32>
    %741 = arith.mulf %725, %733 : vector<2x16xf32>
    %742 = arith.addf %740, %741 : vector<2x16xf32>
    %743 = math.tanh %742 : vector<2x16xf32>
    %744 = arith.mulf %739, %743 : vector<2x16xf32>
    %745 = vector.extract_strided_slice %711 {offsets = [0, 4, 0], sizes = [2, 1, 64], strides = [1, 1, 1]} : vector<2x6x64xf32> to vector<2x1x64xf32>
    %746 = vector.shape_cast %745 : vector<2x1x64xf32> to vector<2x64xf32>
    %cst_168 = arith.constant dense<0.000000e+00> : vector<2x64xf32>
    %747 = tpu.matmul %744, %26, %cst_168 {dimension_numbers = #tpu.dot_dimension_numbers<[1], [0], [0], [1], [0, 0, 1, 1], [], []>} : vector<2x16xf32>, vector<16x64xf32>, vector<2x64xf32> -> vector<2x64xf32>
    %748 = arith.addf %746, %747 : vector<2x64xf32>
    %749 = vector.broadcast %24 : vector<1x64xf32> to vector<2x64xf32>
    %750 = arith.addf %748, %749 : vector<2x64xf32>
    %751 = vector.extract_strided_slice %750 {offsets = [0, 0], sizes = [2, 16], strides = [1, 1]} : vector<2x64xf32> to vector<2x16xf32>
    %752 = arith.negf %751 : vector<2x16xf32>
    %753 = math.exp %752 : vector<2x16xf32>
    %cst_169 = arith.constant 1.000000e+00 : f32
    %754 = vector.broadcast %cst_169 : f32 to vector<2x16xf32>
    %755 = arith.addf %754, %753 : vector<2x16xf32>
    %756 = arith.divf %754, %755 : vector<2x16xf32>
    %757 = vector.extract_strided_slice %750 {offsets = [0, 16], sizes = [2, 16], strides = [1, 1]} : vector<2x64xf32> to vector<2x16xf32>
    %758 = arith.negf %757 : vector<2x16xf32>
    %759 = math.exp %758 : vector<2x16xf32>
    %cst_170 = arith.constant 1.000000e+00 : f32
    %760 = vector.broadcast %cst_170 : f32 to vector<2x16xf32>
    %761 = arith.addf %760, %759 : vector<2x16xf32>
    %762 = arith.divf %760, %761 : vector<2x16xf32>
    %763 = vector.extract_strided_slice %750 {offsets = [0, 32], sizes = [2, 16], strides = [1, 1]} : vector<2x64xf32> to vector<2x16xf32>
    %764 = math.tanh %763 : vector<2x16xf32>
    %765 = vector.extract_strided_slice %750 {offsets = [0, 48], sizes = [2, 16], strides = [1, 1]} : vector<2x64xf32> to vector<2x16xf32>
    %766 = arith.negf %765 : vector<2x16xf32>
    %767 = math.exp %766 : vector<2x16xf32>
    %cst_171 = arith.constant 1.000000e+00 : f32
    %768 = vector.broadcast %cst_171 : f32 to vector<2x16xf32>
    %769 = arith.addf %768, %767 : vector<2x16xf32>
    %770 = arith.divf %768, %769 : vector<2x16xf32>
    %771 = arith.mulf %762, %742 : vector<2x16xf32>
    %772 = arith.mulf %756, %764 : vector<2x16xf32>
    %773 = arith.addf %771, %772 : vector<2x16xf32>
    %774 = math.tanh %773 : vector<2x16xf32>
    %775 = arith.mulf %770, %774 : vector<2x16xf32>
    %776 = vector.extract_strided_slice %711 {offsets = [0, 3, 0], sizes = [2, 1, 64], strides = [1, 1, 1]} : vector<2x6x64xf32> to vector<2x1x64xf32>
    %777 = vector.shape_cast %776 : vector<2x1x64xf32> to vector<2x64xf32>
    %cst_172 = arith.constant dense<0.000000e+00> : vector<2x64xf32>
    %778 = tpu.matmul %775, %26, %cst_172 {dimension_numbers = #tpu.dot_dimension_numbers<[1], [0], [0], [1], [0, 0, 1, 1], [], []>} : vector<2x16xf32>, vector<16x64xf32>, vector<2x64xf32> -> vector<2x64xf32>
    %779 = arith.addf %777, %778 : vector<2x64xf32>
    %780 = vector.broadcast %24 : vector<1x64xf32> to vector<2x64xf32>
    %781 = arith.addf %779, %780 : vector<2x64xf32>
    %782 = vector.extract_strided_slice %781 {offsets = [0, 0], sizes = [2, 16], strides = [1, 1]} : vector<2x64xf32> to vector<2x16xf32>
    %783 = arith.negf %782 : vector<2x16xf32>
    %784 = math.exp %783 : vector<2x16xf32>
    %cst_173 = arith.constant 1.000000e+00 : f32
    %785 = vector.broadcast %cst_173 : f32 to vector<2x16xf32>
    %786 = arith.addf %785, %784 : vector<2x16xf32>
    %787 = arith.divf %785, %786 : vector<2x16xf32>
    %788 = vector.extract_strided_slice %781 {offsets = [0, 16], sizes = [2, 16], strides = [1, 1]} : vector<2x64xf32> to vector<2x16xf32>
    %789 = arith.negf %788 : vector<2x16xf32>
    %790 = math.exp %789 : vector<2x16xf32>
    %cst_174 = arith.constant 1.000000e+00 : f32
    %791 = vector.broadcast %cst_174 : f32 to vector<2x16xf32>
    %792 = arith.addf %791, %790 : vector<2x16xf32>
    %793 = arith.divf %791, %792 : vector<2x16xf32>
    %794 = vector.extract_strided_slice %781 {offsets = [0, 32], sizes = [2, 16], strides = [1, 1]} : vector<2x64xf32> to vector<2x16xf32>
    %795 = math.tanh %794 : vector<2x16xf32>
    %796 = vector.extract_strided_slice %781 {offsets = [0, 48], sizes = [2, 16], strides = [1, 1]} : vector<2x64xf32> to vector<2x16xf32>
    %797 = arith.negf %796 : vector<2x16xf32>
    %798 = math.exp %797 : vector<2x16xf32>
    %cst_175 = arith.constant 1.000000e+00 : f32
    %799 = vector.broadcast %cst_175 : f32 to vector<2x16xf32>
    %800 = arith.addf %799, %798 : vector<2x16xf32>
    %801 = arith.divf %799, %800 : vector<2x16xf32>
    %802 = arith.mulf %793, %773 : vector<2x16xf32>
    %803 = arith.mulf %787, %795 : vector<2x16xf32>
    %804 = arith.addf %802, %803 : vector<2x16xf32>
    %805 = math.tanh %804 : vector<2x16xf32>
    %806 = arith.mulf %801, %805 : vector<2x16xf32>
    %807 = vector.extract_strided_slice %711 {offsets = [0, 2, 0], sizes = [2, 1, 64], strides = [1, 1, 1]} : vector<2x6x64xf32> to vector<2x1x64xf32>
    %808 = vector.shape_cast %807 : vector<2x1x64xf32> to vector<2x64xf32>
    %cst_176 = arith.constant dense<0.000000e+00> : vector<2x64xf32>
    %809 = tpu.matmul %806, %26, %cst_176 {dimension_numbers = #tpu.dot_dimension_numbers<[1], [0], [0], [1], [0, 0, 1, 1], [], []>} : vector<2x16xf32>, vector<16x64xf32>, vector<2x64xf32> -> vector<2x64xf32>
    %810 = arith.addf %808, %809 : vector<2x64xf32>
    %811 = vector.broadcast %24 : vector<1x64xf32> to vector<2x64xf32>
    %812 = arith.addf %810, %811 : vector<2x64xf32>
    %813 = vector.extract_strided_slice %812 {offsets = [0, 0], sizes = [2, 16], strides = [1, 1]} : vector<2x64xf32> to vector<2x16xf32>
    %814 = arith.negf %813 : vector<2x16xf32>
    %815 = math.exp %814 : vector<2x16xf32>
    %cst_177 = arith.constant 1.000000e+00 : f32
    %816 = vector.broadcast %cst_177 : f32 to vector<2x16xf32>
    %817 = arith.addf %816, %815 : vector<2x16xf32>
    %818 = arith.divf %816, %817 : vector<2x16xf32>
    %819 = vector.extract_strided_slice %812 {offsets = [0, 16], sizes = [2, 16], strides = [1, 1]} : vector<2x64xf32> to vector<2x16xf32>
    %820 = arith.negf %819 : vector<2x16xf32>
    %821 = math.exp %820 : vector<2x16xf32>
    %cst_178 = arith.constant 1.000000e+00 : f32
    %822 = vector.broadcast %cst_178 : f32 to vector<2x16xf32>
    %823 = arith.addf %822, %821 : vector<2x16xf32>
    %824 = arith.divf %822, %823 : vector<2x16xf32>
    %825 = vector.extract_strided_slice %812 {offsets = [0, 32], sizes = [2, 16], strides = [1, 1]} : vector<2x64xf32> to vector<2x16xf32>
    %826 = math.tanh %825 : vector<2x16xf32>
    %827 = vector.extract_strided_slice %812 {offsets = [0, 48], sizes = [2, 16], strides = [1, 1]} : vector<2x64xf32> to vector<2x16xf32>
    %828 = arith.negf %827 : vector<2x16xf32>
    %829 = math.exp %828 : vector<2x16xf32>
    %cst_179 = arith.constant 1.000000e+00 : f32
    %830 = vector.broadcast %cst_179 : f32 to vector<2x16xf32>
    %831 = arith.addf %830, %829 : vector<2x16xf32>
    %832 = arith.divf %830, %831 : vector<2x16xf32>
    %833 = arith.mulf %824, %804 : vector<2x16xf32>
    %834 = arith.mulf %818, %826 : vector<2x16xf32>
    %835 = arith.addf %833, %834 : vector<2x16xf32>
    %836 = math.tanh %835 : vector<2x16xf32>
    %837 = arith.mulf %832, %836 : vector<2x16xf32>
    %838 = vector.extract_strided_slice %711 {offsets = [0, 1, 0], sizes = [2, 1, 64], strides = [1, 1, 1]} : vector<2x6x64xf32> to vector<2x1x64xf32>
    %839 = vector.shape_cast %838 : vector<2x1x64xf32> to vector<2x64xf32>
    %cst_180 = arith.constant dense<0.000000e+00> : vector<2x64xf32>
    %840 = tpu.matmul %837, %26, %cst_180 {dimension_numbers = #tpu.dot_dimension_numbers<[1], [0], [0], [1], [0, 0, 1, 1], [], []>} : vector<2x16xf32>, vector<16x64xf32>, vector<2x64xf32> -> vector<2x64xf32>
    %841 = arith.addf %839, %840 : vector<2x64xf32>
    %842 = vector.broadcast %24 : vector<1x64xf32> to vector<2x64xf32>
    %843 = arith.addf %841, %842 : vector<2x64xf32>
    %844 = vector.extract_strided_slice %843 {offsets = [0, 0], sizes = [2, 16], strides = [1, 1]} : vector<2x64xf32> to vector<2x16xf32>
    %845 = arith.negf %844 : vector<2x16xf32>
    %846 = math.exp %845 : vector<2x16xf32>
    %cst_181 = arith.constant 1.000000e+00 : f32
    %847 = vector.broadcast %cst_181 : f32 to vector<2x16xf32>
    %848 = arith.addf %847, %846 : vector<2x16xf32>
    %849 = arith.divf %847, %848 : vector<2x16xf32>
    %850 = vector.extract_strided_slice %843 {offsets = [0, 16], sizes = [2, 16], strides = [1, 1]} : vector<2x64xf32> to vector<2x16xf32>
    %851 = arith.negf %850 : vector<2x16xf32>
    %852 = math.exp %851 : vector<2x16xf32>
    %cst_182 = arith.constant 1.000000e+00 : f32
    %853 = vector.broadcast %cst_182 : f32 to vector<2x16xf32>
    %854 = arith.addf %853, %852 : vector<2x16xf32>
    %855 = arith.divf %853, %854 : vector<2x16xf32>
    %856 = vector.extract_strided_slice %843 {offsets = [0, 32], sizes = [2, 16], strides = [1, 1]} : vector<2x64xf32> to vector<2x16xf32>
    %857 = math.tanh %856 : vector<2x16xf32>
    %858 = vector.extract_strided_slice %843 {offsets = [0, 48], sizes = [2, 16], strides = [1, 1]} : vector<2x64xf32> to vector<2x16xf32>
    %859 = arith.negf %858 : vector<2x16xf32>
    %860 = math.exp %859 : vector<2x16xf32>
    %cst_183 = arith.constant 1.000000e+00 : f32
    %861 = vector.broadcast %cst_183 : f32 to vector<2x16xf32>
    %862 = arith.addf %861, %860 : vector<2x16xf32>
    %863 = arith.divf %861, %862 : vector<2x16xf32>
    %864 = arith.mulf %855, %835 : vector<2x16xf32>
    %865 = arith.mulf %849, %857 : vector<2x16xf32>
    %866 = arith.addf %864, %865 : vector<2x16xf32>
    %867 = math.tanh %866 : vector<2x16xf32>
    %868 = arith.mulf %863, %867 : vector<2x16xf32>
    %869 = vector.extract_strided_slice %711 {offsets = [0, 0, 0], sizes = [2, 1, 64], strides = [1, 1, 1]} : vector<2x6x64xf32> to vector<2x1x64xf32>
    %870 = vector.shape_cast %869 : vector<2x1x64xf32> to vector<2x64xf32>
    %cst_184 = arith.constant dense<0.000000e+00> : vector<2x64xf32>
    %871 = tpu.matmul %868, %26, %cst_184 {dimension_numbers = #tpu.dot_dimension_numbers<[1], [0], [0], [1], [0, 0, 1, 1], [], []>} : vector<2x16xf32>, vector<16x64xf32>, vector<2x64xf32> -> vector<2x64xf32>
    %872 = arith.addf %870, %871 : vector<2x64xf32>
    %873 = vector.broadcast %24 : vector<1x64xf32> to vector<2x64xf32>
    %874 = arith.addf %872, %873 : vector<2x64xf32>
    %875 = vector.extract_strided_slice %874 {offsets = [0, 0], sizes = [2, 16], strides = [1, 1]} : vector<2x64xf32> to vector<2x16xf32>
    %876 = arith.negf %875 : vector<2x16xf32>
    %877 = math.exp %876 : vector<2x16xf32>
    %cst_185 = arith.constant 1.000000e+00 : f32
    %878 = vector.broadcast %cst_185 : f32 to vector<2x16xf32>
    %879 = arith.addf %878, %877 : vector<2x16xf32>
    %880 = arith.divf %878, %879 : vector<2x16xf32>
    %881 = vector.extract_strided_slice %874 {offsets = [0, 16], sizes = [2, 16], strides = [1, 1]} : vector<2x64xf32> to vector<2x16xf32>
    %882 = arith.negf %881 : vector<2x16xf32>
    %883 = math.exp %882 : vector<2x16xf32>
    %cst_186 = arith.constant 1.000000e+00 : f32
    %884 = vector.broadcast %cst_186 : f32 to vector<2x16xf32>
    %885 = arith.addf %884, %883 : vector<2x16xf32>
    %886 = arith.divf %884, %885 : vector<2x16xf32>
    %887 = vector.extract_strided_slice %874 {offsets = [0, 32], sizes = [2, 16], strides = [1, 1]} : vector<2x64xf32> to vector<2x16xf32>
    %888 = math.tanh %887 : vector<2x16xf32>
    %889 = vector.extract_strided_slice %874 {offsets = [0, 48], sizes = [2, 16], strides = [1, 1]} : vector<2x64xf32> to vector<2x16xf32>
    %890 = arith.negf %889 : vector<2x16xf32>
    %891 = math.exp %890 : vector<2x16xf32>
    %cst_187 = arith.constant 1.000000e+00 : f32
    %892 = vector.broadcast %cst_187 : f32 to vector<2x16xf32>
    %893 = arith.addf %892, %891 : vector<2x16xf32>
    %894 = arith.divf %892, %893 : vector<2x16xf32>
    %895 = arith.mulf %886, %866 : vector<2x16xf32>
    %896 = arith.mulf %880, %888 : vector<2x16xf32>
    %897 = arith.addf %895, %896 : vector<2x16xf32>
    %898 = math.tanh %897 : vector<2x16xf32>
    %899 = arith.mulf %894, %898 : vector<2x16xf32>
    %900 = tpu.concatenate %551, %899 in 1 : vector<2x16xf32>, vector<2x16xf32> -> vector<2x32xf32>
    %901 = vector.shape_cast %900 : vector<2x32xf32> to vector<2x1x32xf32>
    %902 = tpu.concatenate %582, %868 in 1 : vector<2x16xf32>, vector<2x16xf32> -> vector<2x32xf32>
    %903 = vector.shape_cast %902 : vector<2x32xf32> to vector<2x1x32xf32>
    %904 = tpu.concatenate %613, %837 in 1 : vector<2x16xf32>, vector<2x16xf32> -> vector<2x32xf32>
    %905 = vector.shape_cast %904 : vector<2x32xf32> to vector<2x1x32xf32>
    %906 = tpu.concatenate %644, %806 in 1 : vector<2x16xf32>, vector<2x16xf32> -> vector<2x32xf32>
    %907 = vector.shape_cast %906 : vector<2x32xf32> to vector<2x1x32xf32>
    %908 = tpu.concatenate %675, %775 in 1 : vector<2x16xf32>, vector<2x16xf32> -> vector<2x32xf32>
    %909 = vector.shape_cast %908 : vector<2x32xf32> to vector<2x1x32xf32>
    %910 = tpu.concatenate %706, %744 in 1 : vector<2x16xf32>, vector<2x16xf32> -> vector<2x32xf32>
    %911 = vector.shape_cast %910 : vector<2x32xf32> to vector<2x1x32xf32>
    %912 = tpu.concatenate %901, %903, %905, %907, %909, %911 in 1 : vector<2x1x32xf32>, vector<2x1x32xf32>, vector<2x1x32xf32>, vector<2x1x32xf32>, vector<2x1x32xf32>, vector<2x1x32xf32> -> vector<2x6x32xf32>
    %913 = vector.shape_cast %912 : vector<2x6x32xf32> to vector<12x32xf32>
    %cst_188 = arith.constant dense<0.000000e+00> : vector<12x16xf32>
    %914 = tpu.matmul %913, %33, %cst_188 {dimension_numbers = #tpu.dot_dimension_numbers<[1], [0], [0], [1], [0, 0, 1, 1], [], []>} : vector<12x32xf32>, vector<32x16xf32>, vector<12x16xf32> -> vector<12x16xf32>
    %915 = vector.broadcast %32 : vector<1x16xf32> to vector<12x16xf32>
    %916 = arith.addf %914, %915 : vector<12x16xf32>
    %917 = vector.shape_cast %916 : vector<12x16xf32> to vector<2x6x16xf32>
    %918 = arith.addf %917, %114 : vector<2x6x16xf32>
    %919 = vector.extract_strided_slice %918 {offsets = [0, 0, 0], sizes = [2, 4, 16], strides = [1, 1, 1]} : vector<2x6x16xf32> to vector<2x4x16xf32>
    %920 = vector.shape_cast %919 : vector<2x4x16xf32> to vector<8x16xf32>
    %921 = vector.extract_strided_slice %918 {offsets = [0, 1, 0], sizes = [2, 4, 16], strides = [1, 1, 1]} : vector<2x6x16xf32> to vector<2x4x16xf32>
    %922 = vector.shape_cast %921 : vector<2x4x16xf32> to vector<8x16xf32>
    %923 = vector.extract_strided_slice %918 {offsets = [0, 2, 0], sizes = [2, 4, 16], strides = [1, 1, 1]} : vector<2x6x16xf32> to vector<2x4x16xf32>
    %924 = vector.shape_cast %923 : vector<2x4x16xf32> to vector<8x16xf32>
    %925 = tpu.concatenate %920, %922, %924 in 1 : vector<8x16xf32>, vector<8x16xf32>, vector<8x16xf32> -> vector<8x48xf32>
    %cst_189 = arith.constant dense<0.000000e+00> : vector<8x32xf32>
    %926 = tpu.matmul %925, %1, %cst_189 {dimension_numbers = #tpu.dot_dimension_numbers<[1], [0], [0], [1], [0, 0, 1, 1], [], []>} : vector<8x48xf32>, vector<48x32xf32>, vector<8x32xf32> -> vector<8x32xf32>
    %927 = vector.broadcast %0 : vector<1x32xf32> to vector<8x32xf32>
    %928 = arith.addf %926, %927 : vector<8x32xf32>
    %929 = vector.extract_strided_slice %928 {offsets = [0, 0], sizes = [8, 16], strides = [1, 1]} : vector<8x32xf32> to vector<8x16xf32>
    %930 = vector.extract_strided_slice %928 {offsets = [0, 16], sizes = [8, 16], strides = [1, 1]} : vector<8x32xf32> to vector<8x16xf32>
    %931 = arith.negf %930 : vector<8x16xf32>
    %932 = math.exp %931 : vector<8x16xf32>
    %cst_190 = arith.constant 1.000000e+00 : f32
    %933 = vector.broadcast %cst_190 : f32 to vector<8x16xf32>
    %934 = arith.addf %933, %932 : vector<8x16xf32>
    %935 = arith.divf %933, %934 : vector<8x16xf32>
    %936 = arith.mulf %929, %935 : vector<8x16xf32>
    %937 = vector.shape_cast %936 : vector<8x16xf32> to vector<2x4x16xf32>
    %938 = vector.shape_cast %937 : vector<2x4x16xf32> to vector<8x16xf32>
    %cst_191 = arith.constant dense<0.000000e+00> : vector<8x64xf32>
    %939 = tpu.matmul %938, %3, %cst_191 {dimension_numbers = #tpu.dot_dimension_numbers<[1], [0], [0], [1], [0, 0, 1, 1], [], []>} : vector<8x16xf32>, vector<16x64xf32>, vector<8x64xf32> -> vector<8x64xf32>
    %940 = vector.extract_strided_slice %939 {offsets = [0, 0], sizes = [8, 8], strides = [1, 1]} : vector<8x64xf32> to vector<8x8xf32>
    %941 = vector.shape_cast %940 : vector<8x8xf32> to vector<2x4x1x8xf32>
    %942 = vector.extract_strided_slice %939 {offsets = [0, 32], sizes = [8, 8], strides = [1, 1]} : vector<8x64xf32> to vector<8x8xf32>
    %943 = vector.shape_cast %942 : vector<8x8xf32> to vector<2x4x1x8xf32>
    %944 = vector.extract_strided_slice %939 {offsets = [0, 8], sizes = [8, 8], strides = [1, 1]} : vector<8x64xf32> to vector<8x8xf32>
    %945 = vector.shape_cast %944 : vector<8x8xf32> to vector<2x4x1x8xf32>
    %946 = vector.extract_strided_slice %939 {offsets = [0, 40], sizes = [8, 8], strides = [1, 1]} : vector<8x64xf32> to vector<8x8xf32>
    %947 = vector.shape_cast %946 : vector<8x8xf32> to vector<2x4x1x8xf32>
    %948 = vector.extract_strided_slice %939 {offsets = [0, 16], sizes = [8, 8], strides = [1, 1]} : vector<8x64xf32> to vector<8x8xf32>
    %949 = vector.shape_cast %948 : vector<8x8xf32> to vector<2x4x1x8xf32>
    %950 = vector.extract_strided_slice %939 {offsets = [0, 48], sizes = [8, 8], strides = [1, 1]} : vector<8x64xf32> to vector<8x8xf32>
    %951 = vector.shape_cast %950 : vector<8x8xf32> to vector<2x4x1x8xf32>
    %952 = vector.extract_strided_slice %939 {offsets = [0, 24], sizes = [8, 8], strides = [1, 1]} : vector<8x64xf32> to vector<8x8xf32>
    %953 = vector.shape_cast %952 : vector<8x8xf32> to vector<2x4x1x8xf32>
    %954 = vector.extract_strided_slice %939 {offsets = [0, 56], sizes = [8, 8], strides = [1, 1]} : vector<8x64xf32> to vector<8x8xf32>
    %955 = vector.shape_cast %954 : vector<8x8xf32> to vector<2x4x1x8xf32>
    %956 = tpu.concatenate %941, %945, %949, %953 in 2 : vector<2x4x1x8xf32>, vector<2x4x1x8xf32>, vector<2x4x1x8xf32>, vector<2x4x1x8xf32> -> vector<2x4x4x8xf32>
    %957 = tpu.concatenate %943, %947, %951, %955 in 2 : vector<2x4x1x8xf32>, vector<2x4x1x8xf32>, vector<2x4x1x8xf32>, vector<2x4x1x8xf32> -> vector<2x4x4x8xf32>
    %cst_192 = arith.constant 0.000000e+00 : f32
    %958 = vector.broadcast %cst_192 : f32 to vector<2x1x4x8xf32>
    %959 = tpu.concatenate %956, %958 in 1 : vector<2x4x4x8xf32>, vector<2x1x4x8xf32> -> vector<2x5x4x8xf32>
    %960 = tpu.concatenate %958, %957 in 1 : vector<2x1x4x8xf32>, vector<2x4x4x8xf32> -> vector<2x5x4x8xf32>
    %961 = arith.addf %959, %960 : vector<2x5x4x8xf32>
    %962 = vector.shape_cast %961 : vector<2x5x4x8xf32> to vector<2x20x8xf32>
    %963 = vector.broadcast %2 : vector<1x1x8xf32> to vector<2x20x8xf32>
    %964 = arith.addf %962, %963 : vector<2x20x8xf32>
    %cst_193 = arith.constant 0.000000e+00 : f32
    %965 = vector.broadcast %cst_193 : f32 to vector<2x20x8xf32>
    %966 = arith.maximumf %964, %965 : vector<2x20x8xf32>
    %967 = vector.extract_strided_slice %76 {offsets = [0, 5, 0], sizes = [2, 20, 8], strides = [1, 1, 1]} : vector<2x31x8xf32> to vector<2x20x8xf32>
    %968 = arith.addf %966, %967 : vector<2x20x8xf32>
    %969 = vector.extract_strided_slice %968 {offsets = [0, 0, 0], sizes = [2, 18, 8], strides = [1, 1, 1]} : vector<2x20x8xf32> to vector<2x18x8xf32>
    %970 = vector.shape_cast %969 : vector<2x18x8xf32> to vector<36x8xf32>
    %971 = vector.extract_strided_slice %968 {offsets = [0, 1, 0], sizes = [2, 18, 8], strides = [1, 1, 1]} : vector<2x20x8xf32> to vector<2x18x8xf32>
    %972 = vector.shape_cast %971 : vector<2x18x8xf32> to vector<36x8xf32>
    %973 = vector.extract_strided_slice %968 {offsets = [0, 2, 0], sizes = [2, 18, 8], strides = [1, 1, 1]} : vector<2x20x8xf32> to vector<2x18x8xf32>
    %974 = vector.shape_cast %973 : vector<2x18x8xf32> to vector<36x8xf32>
    %975 = tpu.concatenate %970, %972, %974 in 1 : vector<36x8xf32>, vector<36x8xf32>, vector<36x8xf32> -> vector<36x24xf32>
    %cst_194 = arith.constant dense<0.000000e+00> : vector<36x16xf32>
    %976 = tpu.matmul %975, %5, %cst_194 {dimension_numbers = #tpu.dot_dimension_numbers<[1], [0], [0], [1], [0, 0, 1, 1], [], []>} : vector<36x24xf32>, vector<24x16xf32>, vector<36x16xf32> -> vector<36x16xf32>
    %977 = vector.broadcast %4 : vector<1x16xf32> to vector<36x16xf32>
    %978 = arith.addf %976, %977 : vector<36x16xf32>
    %979 = vector.extract_strided_slice %978 {offsets = [0, 0], sizes = [36, 8], strides = [1, 1]} : vector<36x16xf32> to vector<36x8xf32>
    %980 = vector.extract_strided_slice %978 {offsets = [0, 8], sizes = [36, 8], strides = [1, 1]} : vector<36x16xf32> to vector<36x8xf32>
    %981 = arith.negf %980 : vector<36x8xf32>
    %982 = math.exp %981 : vector<36x8xf32>
    %cst_195 = arith.constant 1.000000e+00 : f32
    %983 = vector.broadcast %cst_195 : f32 to vector<36x8xf32>
    %984 = arith.addf %983, %982 : vector<36x8xf32>
    %985 = arith.divf %983, %984 : vector<36x8xf32>
    %986 = arith.mulf %979, %985 : vector<36x8xf32>
    %987 = vector.shape_cast %986 : vector<36x8xf32> to vector<2x18x8xf32>
    %988 = vector.shape_cast %987 : vector<2x18x8xf32> to vector<36x8xf32>
    %cst_196 = arith.constant dense<0.000000e+00> : vector<36x32xf32>
    %989 = tpu.matmul %988, %7, %cst_196 {dimension_numbers = #tpu.dot_dimension_numbers<[1], [0], [0], [1], [0, 0, 1, 1], [], []>} : vector<36x8xf32>, vector<8x32xf32>, vector<36x32xf32> -> vector<36x32xf32>
    %990 = vector.extract_strided_slice %989 {offsets = [0, 0], sizes = [36, 4], strides = [1, 1]} : vector<36x32xf32> to vector<36x4xf32>
    %991 = vector.shape_cast %990 : vector<36x4xf32> to vector<2x18x1x4xf32>
    %992 = vector.extract_strided_slice %989 {offsets = [0, 16], sizes = [36, 4], strides = [1, 1]} : vector<36x32xf32> to vector<36x4xf32>
    %993 = vector.shape_cast %992 : vector<36x4xf32> to vector<2x18x1x4xf32>
    %994 = vector.extract_strided_slice %989 {offsets = [0, 4], sizes = [36, 4], strides = [1, 1]} : vector<36x32xf32> to vector<36x4xf32>
    %995 = vector.shape_cast %994 : vector<36x4xf32> to vector<2x18x1x4xf32>
    %996 = vector.extract_strided_slice %989 {offsets = [0, 20], sizes = [36, 4], strides = [1, 1]} : vector<36x32xf32> to vector<36x4xf32>
    %997 = vector.shape_cast %996 : vector<36x4xf32> to vector<2x18x1x4xf32>
    %998 = vector.extract_strided_slice %989 {offsets = [0, 8], sizes = [36, 4], strides = [1, 1]} : vector<36x32xf32> to vector<36x4xf32>
    %999 = vector.shape_cast %998 : vector<36x4xf32> to vector<2x18x1x4xf32>
    %1000 = vector.extract_strided_slice %989 {offsets = [0, 24], sizes = [36, 4], strides = [1, 1]} : vector<36x32xf32> to vector<36x4xf32>
    %1001 = vector.shape_cast %1000 : vector<36x4xf32> to vector<2x18x1x4xf32>
    %1002 = vector.extract_strided_slice %989 {offsets = [0, 12], sizes = [36, 4], strides = [1, 1]} : vector<36x32xf32> to vector<36x4xf32>
    %1003 = vector.shape_cast %1002 : vector<36x4xf32> to vector<2x18x1x4xf32>
    %1004 = vector.extract_strided_slice %989 {offsets = [0, 28], sizes = [36, 4], strides = [1, 1]} : vector<36x32xf32> to vector<36x4xf32>
    %1005 = vector.shape_cast %1004 : vector<36x4xf32> to vector<2x18x1x4xf32>
    %1006 = tpu.concatenate %991, %995, %999, %1003 in 2 : vector<2x18x1x4xf32>, vector<2x18x1x4xf32>, vector<2x18x1x4xf32>, vector<2x18x1x4xf32> -> vector<2x18x4x4xf32>
    %1007 = tpu.concatenate %993, %997, %1001, %1005 in 2 : vector<2x18x1x4xf32>, vector<2x18x1x4xf32>, vector<2x18x1x4xf32>, vector<2x18x1x4xf32> -> vector<2x18x4x4xf32>
    %cst_197 = arith.constant 0.000000e+00 : f32
    %1008 = vector.broadcast %cst_197 : f32 to vector<2x1x4x4xf32>
    %1009 = tpu.concatenate %1006, %1008 in 1 : vector<2x18x4x4xf32>, vector<2x1x4x4xf32> -> vector<2x19x4x4xf32>
    %1010 = tpu.concatenate %1008, %1007 in 1 : vector<2x1x4x4xf32>, vector<2x18x4x4xf32> -> vector<2x19x4x4xf32>
    %1011 = arith.addf %1009, %1010 : vector<2x19x4x4xf32>
    %1012 = vector.shape_cast %1011 : vector<2x19x4x4xf32> to vector<2x76x4xf32>
    %1013 = vector.broadcast %6 : vector<1x1x4xf32> to vector<2x76x4xf32>
    %1014 = arith.addf %1012, %1013 : vector<2x76x4xf32>
    %c0_198 = arith.constant 0 : index
    %c0_199 = arith.constant 0 : index
    %c0_200 = arith.constant 0 : index
    %1015 = vector.load %arg36[%c0_198, %c0_199, %c0_200] : memref<2x76x4xf32, #tpu.memory_space<vmem>>, vector<2x76x4xf32>
    tpu.vector_store %arg36[%c0_198, %c0_199, %c0_200], %1014 {strides = array<i32>} : memref<2x76x4xf32, #tpu.memory_space<vmem>>, vector<2x76x4xf32>,
    return
  }
  func.func @transform_0(%arg0: i32) -> (i32, i32, i32, i32) {
    %c0_i32 = arith.constant 0 : i32
    %c0_i32_0 = arith.constant 0 : i32
    %c0_i32_1 = arith.constant 0 : i32
    %c0_i32_2 = arith.constant 0 : i32
    %c0_i32_3 = arith.constant 0 : i32
    return %c0_i32, %c0_i32_0, %c0_i32_1, %c0_i32_2 : i32, i32, i32, i32
  }
  func.func @transform_1(%arg0: i32) -> (i32, i32) {
    %c0_i32 = arith.constant 0 : i32
    %c0_i32_0 = arith.constant 0 : i32
    %c0_i32_1 = arith.constant 0 : i32
    return %c0_i32, %c0_i32_0 : i32, i32
  }
  func.func @transform_2(%arg0: i32) -> (i32, i32) {
    %c0_i32 = arith.constant 0 : i32
    %c0_i32_0 = arith.constant 0 : i32
    %c0_i32_1 = arith.constant 0 : i32
    return %c0_i32, %c0_i32_0 : i32, i32
  }
  func.func @transform_3(%arg0: i32) -> (i32, i32, i32) {
    %c0_i32 = arith.constant 0 : i32
    %c0_i32_0 = arith.constant 0 : i32
    %c0_i32_1 = arith.constant 0 : i32
    %c0_i32_2 = arith.constant 0 : i32
    return %c0_i32, %c0_i32_0, %c0_i32_1 : i32, i32, i32
  }
  func.func @transform_4(%arg0: i32) -> (i32, i32) {
    %c0_i32 = arith.constant 0 : i32
    %c0_i32_0 = arith.constant 0 : i32
    %c0_i32_1 = arith.constant 0 : i32
    return %c0_i32, %c0_i32_0 : i32, i32
  }
  func.func @transform_5(%arg0: i32) -> (i32, i32) {
    %c0_i32 = arith.constant 0 : i32
    %c0_i32_0 = arith.constant 0 : i32
    %c0_i32_1 = arith.constant 0 : i32
    return %c0_i32, %c0_i32_0 : i32, i32
  }
  func.func @transform_6(%arg0: i32) -> (i32, i32) {
    %c0_i32 = arith.constant 0 : i32
    %c0_i32_0 = arith.constant 0 : i32
    %c0_i32_1 = arith.constant 0 : i32
    return %c0_i32, %c0_i32_0 : i32, i32
  }
  func.func @transform_7(%arg0: i32) -> (i32, i32, i32) {
    %c0_i32 = arith.constant 0 : i32
    %c0_i32_0 = arith.constant 0 : i32
    %c0_i32_1 = arith.constant 0 : i32
    %c0_i32_2 = arith.constant 0 : i32
    return %c0_i32, %c0_i32_0, %c0_i32_1 : i32, i32, i32
  }
  func.func @transform_8(%arg0: i32) -> (i32, i32) {
    %c0_i32 = arith.constant 0 : i32
    %c0_i32_0 = arith.constant 0 : i32
    %c0_i32_1 = arith.constant 0 : i32
    return %c0_i32, %c0_i32_0 : i32, i32
  }
  func.func @transform_9(%arg0: i32) -> (i32, i32) {
    %c0_i32 = arith.constant 0 : i32
    %c0_i32_0 = arith.constant 0 : i32
    %c0_i32_1 = arith.constant 0 : i32
    return %c0_i32, %c0_i32_0 : i32, i32
  }
  func.func @transform_10(%arg0: i32) -> (i32, i32) {
    %c0_i32 = arith.constant 0 : i32
    %c0_i32_0 = arith.constant 0 : i32
    %c0_i32_1 = arith.constant 0 : i32
    return %c0_i32, %c0_i32_0 : i32, i32
  }
  func.func @transform_11(%arg0: i32) -> (i32, i32) {
    %c0_i32 = arith.constant 0 : i32
    %c0_i32_0 = arith.constant 0 : i32
    %c0_i32_1 = arith.constant 0 : i32
    return %c0_i32, %c0_i32_0 : i32, i32
  }
  func.func @transform_12(%arg0: i32) -> (i32, i32) {
    %c0_i32 = arith.constant 0 : i32
    %c0_i32_0 = arith.constant 0 : i32
    %c0_i32_1 = arith.constant 0 : i32
    return %c0_i32, %c0_i32_0 : i32, i32
  }
  func.func @transform_13(%arg0: i32) -> (i32, i32) {
    %c0_i32 = arith.constant 0 : i32
    %c0_i32_0 = arith.constant 0 : i32
    %c0_i32_1 = arith.constant 0 : i32
    return %c0_i32, %c0_i32_0 : i32, i32
  }
  func.func @transform_14(%arg0: i32) -> (i32, i32) {
    %c0_i32 = arith.constant 0 : i32
    %c0_i32_0 = arith.constant 0 : i32
    %c0_i32_1 = arith.constant 0 : i32
    return %c0_i32, %c0_i32_0 : i32, i32
  }
  func.func @transform_15(%arg0: i32) -> (i32, i32) {
    %c0_i32 = arith.constant 0 : i32
    %c0_i32_0 = arith.constant 0 : i32
    %c0_i32_1 = arith.constant 0 : i32
    return %c0_i32, %c0_i32_0 : i32, i32
  }
  func.func @transform_16(%arg0: i32) -> (i32, i32) {
    %c0_i32 = arith.constant 0 : i32
    %c0_i32_0 = arith.constant 0 : i32
    %c0_i32_1 = arith.constant 0 : i32
    return %c0_i32, %c0_i32_0 : i32, i32
  }
  func.func @transform_17(%arg0: i32) -> (i32, i32) {
    %c0_i32 = arith.constant 0 : i32
    %c0_i32_0 = arith.constant 0 : i32
    %c0_i32_1 = arith.constant 0 : i32
    return %c0_i32, %c0_i32_0 : i32, i32
  }
  func.func @transform_18(%arg0: i32) -> (i32, i32) {
    %c0_i32 = arith.constant 0 : i32
    %c0_i32_0 = arith.constant 0 : i32
    %c0_i32_1 = arith.constant 0 : i32
    return %c0_i32, %c0_i32_0 : i32, i32
  }
  func.func @transform_19(%arg0: i32) -> (i32, i32) {
    %c0_i32 = arith.constant 0 : i32
    %c0_i32_0 = arith.constant 0 : i32
    %c0_i32_1 = arith.constant 0 : i32
    return %c0_i32, %c0_i32_0 : i32, i32
  }
  func.func @transform_20(%arg0: i32) -> (i32, i32) {
    %c0_i32 = arith.constant 0 : i32
    %c0_i32_0 = arith.constant 0 : i32
    %c0_i32_1 = arith.constant 0 : i32
    return %c0_i32, %c0_i32_0 : i32, i32
  }
  func.func @transform_21(%arg0: i32) -> (i32, i32) {
    %c0_i32 = arith.constant 0 : i32
    %c0_i32_0 = arith.constant 0 : i32
    %c0_i32_1 = arith.constant 0 : i32
    return %c0_i32, %c0_i32_0 : i32, i32
  }
  func.func @transform_22(%arg0: i32) -> (i32, i32) {
    %c0_i32 = arith.constant 0 : i32
    %c0_i32_0 = arith.constant 0 : i32
    %c0_i32_1 = arith.constant 0 : i32
    return %c0_i32, %c0_i32_0 : i32, i32
  }
  func.func @transform_23(%arg0: i32) -> (i32, i32) {
    %c0_i32 = arith.constant 0 : i32
    %c0_i32_0 = arith.constant 0 : i32
    %c0_i32_1 = arith.constant 0 : i32
    return %c0_i32, %c0_i32_0 : i32, i32
  }
  func.func @transform_24(%arg0: i32) -> (i32, i32) {
    %c0_i32 = arith.constant 0 : i32
    %c0_i32_0 = arith.constant 0 : i32
    %c0_i32_1 = arith.constant 0 : i32
    return %c0_i32, %c0_i32_0 : i32, i32
  }
  func.func @transform_25(%arg0: i32) -> (i32, i32) {
    %c0_i32 = arith.constant 0 : i32
    %c0_i32_0 = arith.constant 0 : i32
    %c0_i32_1 = arith.constant 0 : i32
    return %c0_i32, %c0_i32_0 : i32, i32
  }
  func.func @transform_26(%arg0: i32) -> (i32, i32) {
    %c0_i32 = arith.constant 0 : i32
    %c0_i32_0 = arith.constant 0 : i32
    %c0_i32_1 = arith.constant 0 : i32
    return %c0_i32, %c0_i32_0 : i32, i32
  }
  func.func @transform_27(%arg0: i32) -> (i32, i32) {
    %c0_i32 = arith.constant 0 : i32
    %c0_i32_0 = arith.constant 0 : i32
    %c0_i32_1 = arith.constant 0 : i32
    return %c0_i32, %c0_i32_0 : i32, i32
  }
  func.func @transform_28(%arg0: i32) -> (i32, i32) {
    %c0_i32 = arith.constant 0 : i32
    %c0_i32_0 = arith.constant 0 : i32
    %c0_i32_1 = arith.constant 0 : i32
    return %c0_i32, %c0_i32_0 : i32, i32
  }
  func.func @transform_29(%arg0: i32) -> (i32, i32) {
    %c0_i32 = arith.constant 0 : i32
    %c0_i32_0 = arith.constant 0 : i32
    %c0_i32_1 = arith.constant 0 : i32
    return %c0_i32, %c0_i32_0 : i32, i32
  }
  func.func @transform_30(%arg0: i32) -> (i32, i32) {
    %c0_i32 = arith.constant 0 : i32
    %c0_i32_0 = arith.constant 0 : i32
    %c0_i32_1 = arith.constant 0 : i32
    return %c0_i32, %c0_i32_0 : i32, i32
  }
  func.func @transform_31(%arg0: i32) -> (i32, i32) {
    %c0_i32 = arith.constant 0 : i32
    %c0_i32_0 = arith.constant 0 : i32
    %c0_i32_1 = arith.constant 0 : i32
    return %c0_i32, %c0_i32_0 : i32, i32
  }
  func.func @transform_32(%arg0: i32) -> (i32, i32) {
    %c0_i32 = arith.constant 0 : i32
    %c0_i32_0 = arith.constant 0 : i32
    %c0_i32_1 = arith.constant 0 : i32
    return %c0_i32, %c0_i32_0 : i32, i32
  }
  func.func @transform_33(%arg0: i32) -> (i32, i32) {
    %c0_i32 = arith.constant 0 : i32
    %c0_i32_0 = arith.constant 0 : i32
    %c0_i32_1 = arith.constant 0 : i32
    return %c0_i32, %c0_i32_0 : i32, i32
  }
  func.func @transform_34(%arg0: i32) -> (i32, i32) {
    %c0_i32 = arith.constant 0 : i32
    %c0_i32_0 = arith.constant 0 : i32
    %c0_i32_1 = arith.constant 0 : i32
    return %c0_i32, %c0_i32_0 : i32, i32
  }
  func.func @transform_35(%arg0: i32) -> (i32, i32, i32) {
    %c0_i32 = arith.constant 0 : i32
    %c0_i32_0 = arith.constant 0 : i32
    %c0_i32_1 = arith.constant 0 : i32
    %c0_i32_2 = arith.constant 0 : i32
    return %c0_i32, %c0_i32_0, %c0_i32_1 : i32, i32, i32
  }
}

</mosaic_0001>

<bundles_post_ra>
// kernel: demucs_wrapper_forward.1
= control target key start
LH: loop header
LB: loop body
LE: loop exit
PB: predicated region body
PF: predicated region fallthrough
CT: control target
= control target key end

     0   :  { %vm434_vm0 = vcmask 1041409   ;;  %vm436_vm1 = vcmask 1042434   ;;  %vm438_vm2 = vcmask 1043459   ;;  %vm12347_vm3 = vcmask 1044484   ;;  %s7821_s6 = smov 2   ;;  %s7822_s7 = smov 6   ;;  %s12206_s0 = inlined_call_operand.smem [shape: u32[36], index: -1, kind: input, shape index: {}] }
   0x1   :  { %s7875_s5 = sld [smem:[%s12206_s0]]   ;;  %vm442_vm4 = vcmask 1045509   ;;  %vm12346_vm5 = vcmask 1046534   ;;  %vm446_vm6 = vcmask 1047559   ;;  %s7823_s8 = smov 4   ;;  %vm1243_vm7 = vcmask 15360  }
   0x2   :  { %s7824_s9 = smov 8   ;;  %s7825_s10 = smov 14   ;;  %vm12323_vm8 = vcmask 31744   ;;  %vm1261_vm9 = vcmask 48128   ;;  %vm12344_vm10 = vcmask 64512   ;;  %vm1279_vm11 = vcmask 80896  }
   0x3   :  { %s7826_s11 = smov 10   ;;  %s7827_s12 = smov 12   ;;  %vm1288_vm12 = vcmask 97280   ;;  %vm1297_vm13 = vcmask 113664   ;;  %vm1309_vm14 = vcmask 130048  }
   0x4   :  { %s9039_s15 = sld [smem:[%s12206_s0 + %s7827_s12]]   ;;  %s7828_s16 = smov 9  }
   0x5   :  { %s9399_s19 = sld [smem:[%s12206_s0 + %s7828_s16]]   ;;  %s7829_s20 = smov 11  }
   0x6   :  { %s7128_s23 = sld [smem:[%s12206_s0 + %s7829_s20]]   ;;  %s7830_s27 = smov 120  }
   0x7   :  { %v212_v0 = vld [vmem:[%s7875_s5] sm:$0xff]  ;;  %v213_v1 = vld [vmem:[%s7875_s5 + $0x8] sm:$0xff]  ;;  %v214_v2 = vld [vmem:[%s7875_s5 + $0x10] sm:$0xff]  ;;  %s9748_s26 = sld [smem:[%s12206_s0 + %s7826_s11]]   ;;  %s7831_s28 = smov 16  }
   0x8   :  { %v215_v3 = vld [vmem:[%s7875_s5 + $0x18] sm:$0xff]  ;;  %v228_v4 = vld [vmem:[%s7875_s5 + $0x80] sm:$0xff]  ;;  %v229_v5 = vld [vmem:[%s7875_s5 + $0x88] sm:$0xff]  ;;  %s7832_s29 = smov 24   ;;  %s7833_s30 = smov 32  }
   0x9   :  { %v230_v6 = vld [vmem:[%s7875_s5 + $0x90] sm:$0xff]  ;;  %v231_v7 = vld [vmem:[%s7875_s5 + $0x98] sm:$0xff]  ;;  %v7885_v8 = vadd.f32 %v228_v4, %v212_v0  ;;  %v7887_v9 = vadd.f32 %v229_v5, %v213_v1  ;;  %v216_v44 = vld [vmem:[%s7875_s5 + $0x20] sm:$0xff]  ;;  %s7834_s1 = smov 40   ;;  %s7835_s2 = smov 48  }
   0xa   :  { %v7889_v10 = vadd.f32 %v230_v6, %v214_v2  ;;  %v7891_v11 = vadd.f32 %v231_v7, %v215_v3  ;;  %v232_v45 = vld [vmem:[%s7875_s5 + $0xa0] sm:$0xff]  ;;  %v217_v50 = vld [vmem:[%s7875_s5 + $0x28] sm:$0xff]  ;;  %s7836_s3 = smov 56   ;;  %s7837_s4 = smov 13  }
   0xb   :  { %v7894_v12 = vrot.slane %v7885_v8, 4  ;;  %v7897_v13 = vrot.slane %v7887_v9, 4  ;;  %v503_v14 = vperm.slane %v7885_v8, 1  ;;  %v505_v15 = vperm.slane %v7887_v9, 1  ;;  %v233_v51 = vld [vmem:[%s7875_s5 + $0xa8] sm:$0xff]  ;;  %s7131_s18 = sld [smem:[%s12206_s0 + %s7825_s10]]   ;;  %s7839_s25 = smov 23  }
   0xc   :  { %v7902_v16 = vrot.slane %v7889_v10, 4  ;;  %v7905_v17 = vrot.slane %v7891_v11, 4  ;;  %v507_v18 = vperm.slane %v7889_v10, 1  ;;  %v509_v19 = vperm.slane %v7891_v11, 1  ;;  %s7141_s24 = sld [smem:[%s12206_s0 + %s7832_s29]]   ;;  %s7844_s16 = smov 96  }
   0xd   :  { %v504_v20 = vperm.slane %v7894_v12, 1  ;;  %v506_v21 = vperm.slane %v7897_v13, 1  ;;  %v783_v22 = vperm.slane %v7885_v8, 3  ;;  %v784_v23 = vperm.slane %v7894_v12, 3  ;;  %s7845_s17 = smov 80  }
   0xe   :  { %v508_v24 = vperm.slane %v7902_v16, 1  ;;  %v510_v25 = vperm.slane %v7905_v17, 1  ;;  %v785_v26 = vperm.slane %v7887_v9, 3  ;;  %v786_v27 = vperm.slane %v7897_v13, 3 }
   0xf   :  { %v565_v28 = vsel %vm434_vm0, %v504_v20, %v503_v14  ;;  %v787_v29 = vperm.slane %v7889_v10, 3  ;;  %v788_v30 = vperm.slane %v7902_v16, 3  ;;  %v789_v31 = vperm.slane %v7891_v11, 3 }
  0x10   :  { %v566_v32 = vsel %vm436_vm1, %v505_v15, %v565_v28  ;;  %v790_v33 = vperm.slane %v7905_v17, 3  ;;  %v845_v34 = vsel %vm434_vm0, %v784_v23, %v783_v22  ;;  %v643_v35 = vperm.slane %v7885_v8, 2 }
  0x11   :  { %v567_v36 = vsel %vm438_vm2, %v506_v21, %v566_v32  ;;  %v846_v37 = vsel %vm436_vm1, %v785_v26, %v845_v34  ;;  %v644_v38 = vperm.slane %v7894_v12, 2  ;;  %v645_v39 = vperm.slane %v7887_v9, 2  ;;  %v218_v34 = vld [vmem:[%s7875_s5 + $0x30] sm:$0xff] }
  0x12   :  { %v568_v40 = vsel %vm12347_vm3, %v507_v18, %v567_v36  ;;  %v847_v41 = vsel %vm438_vm2, %v786_v27, %v846_v37  ;;  %v646_v42 = vperm.slane %v7897_v13, 2  ;;  %v647_v43 = vperm.slane %v7889_v10, 2 }
  0x13   :  { %v569_v46 = vsel %vm442_vm4, %v508_v24, %v568_v40  ;;  %v848_v47 = vsel %vm12347_vm3, %v787_v29, %v847_v41  ;;  %v648_v48 = vperm.slane %v7902_v16, 2  ;;  %v649_v49 = vperm.slane %v7891_v11, 2 }
  0x14   :  { %v570_v52 = vsel %vm12346_vm5, %v509_v19, %v569_v46  ;;  %v849_v53 = vsel %vm442_vm4, %v788_v30, %v848_v47  ;;  %v650_v54 = vperm.slane %v7905_v17, 2  ;;  %v705_v55 = vsel %vm434_vm0, %v644_v38, %v643_v35  ;;  %v234_v35 = vld [vmem:[%s7875_s5 + $0xb0] sm:$0xff] }
  0x15   :  { %v571_v56 = vsel %vm446_vm6, %v510_v25, %v570_v52  ;;  %v850_v57 = vsel %vm12346_vm5, %v789_v31, %v849_v53  ;;  %v706_v58 = vsel %vm436_vm1, %v645_v39, %v705_v55  ;;  %v7978_v59 = vadd.f32 %v232_v45, %v216_v44  ;;  %v219_v44 = vld [vmem:[%s7875_s5 + $0x38] sm:$0xff] }
  0x16   :  { %619 = vrot.lane.b32.xlu0 %v571_v56, %s7821_s6  ;;  %v851_v60 = vsel %vm446_vm6, %v790_v33, %v850_v57  ;;  %v707_v61 = vsel %vm438_vm2, %v646_v42, %v706_v58  ;;  %v7987_v62 = vadd.f32 %v233_v51, %v217_v50  ;;  %v12213_v63 = vperm.slane %v7894_v12, 0  ;;  %v235_v45 = vld [vmem:[%s7875_s5 + $0xb8] sm:$0xff] }
  0x17   :  { %899 = vrot.lane.b32.xlu1 %v851_v60, %s7822_s7  ;;  %v708_v0 = vsel %vm12347_vm3, %v647_v43, %v707_v61  ;;  %v7995_v1 = vrot.slane %v7978_v59, 4  ;;  %v12212_v2 = vperm.slane %v7887_v9, 0  ;;  %v12211_v3 = vperm.slane %v7897_v13, 0 }
  0x18   :  { %v709_v4 = vsel %vm442_vm4, %v648_v48, %v708_v0  ;;  %v12210_v5 = vperm.slane %v7889_v10, 0  ;;  %v12209_v6 = vperm.slane %v7902_v16, 0  ;;  %v12208_v7 = vperm.slane %v7891_v11, 0 }
  0x19   :  { %v710_v14 = vsel %vm12346_vm5, %v649_v49, %v709_v4  ;;  %v12207_v22 = vperm.slane %v7905_v17, 0  ;;  %v380_v28 = vperm.slane %v7978_v59, 0  ;;  %v381_v32 = vperm.slane %v7995_v1, 0 }
  0x1a   :  { %v711_v36 = vsel %vm446_vm6, %v650_v54, %v710_v14  ;;  %v382_v37 = vperm.slane %v7987_v62, 0  ;;  %v925_v40 = vsel %vm434_vm0, %v12212_v2, %v12213_v63  ;;  %v791_v41 = vperm.slane %v7978_v59, 3 }
  0x1b   :  { %v448_v46 = vsel %vm434_vm0, %v381_v32, %v380_v28  ;;  %v926_v47 = vsel %vm436_vm1, %v12211_v3, %v925_v40  ;;  %v792_v50 = vperm.slane %v7995_v1, 3  ;;  %v1165_v51 = vsel %vm434_vm0, %v785_v26, %v784_v23 }
  0x1c   :  { %v8040_v52 = vsel %vm436_vm1, %v382_v37, %v448_v46  ;;  %v927_v53 = vsel %vm438_vm2, %v12210_v5, %v926_v47  ;;  %v1166_v55 = vsel %vm436_vm1, %v786_v27, %v1165_v51  ;;  %v8048_v56 = vadd.f32 %v234_v35, %v218_v34  ;;  %v220_v46 = vld [vmem:[%s7875_s5 + $0x40] sm:$0xff] }
  0x1d   :  { %v928_v57 = vsel %vm12347_vm3, %v12209_v6, %v927_v53  ;;  %v852_v23 = vsel %vm434_vm0, %v792_v50, %v791_v41  ;;  %v1167_v26 = vsel %vm438_vm2, %v787_v29, %v1166_v55  ;;  %v8059_v58 = vadd.f32 %v235_v45, %v219_v44  ;;  %v236_v55 = vld [vmem:[%s7875_s5 + $0xc0] sm:$0xff] }
  0x1e   :  { %759 = vrot.lane.b32.xlu0 %v711_v36, %s7823_s8  ;;  %v929_v27 = vsel %vm442_vm4, %v12208_v7, %v928_v57  ;;  %v1168_v60 = vsel %vm12347_vm3, %v788_v30, %v1167_v26  ;;  %v8069_v61 = vrot.slane %v7987_v62, 4  ;;  %v8072_v0 = vrot.slane %v8048_v56, 4  ;;  %v237_v57 = vld [vmem:[%s7875_s5 + $0xc8] sm:$0xff] }
  0x1f   :  { %v930_v29 = vsel %vm12346_vm5, %v12207_v22, %v929_v27  ;;  %v1169_v4 = vsel %vm442_vm4, %v789_v31, %v1168_v60  ;;  %v8081_v14 = vrot.slane %v8059_v58, 4  ;;  %v511_v30 = vperm.slane %v7978_v59, 1 }
  0x20   :  { %v931_v34 = vsel %vm446_vm6, %v380_v28, %v930_v29  ;;  %v1170_v35 = vsel %vm12346_vm5, %v790_v33, %v1169_v4  ;;  %v512_v36 = vperm.slane %v7995_v1, 1  ;;  %v513_v40 = vperm.slane %v7987_v62, 1 }
  0x21   :  { %979 = vrot.lane.b32.xlu1 %v931_v34, %s7824_s9  ;;  %v1171_v31 = vsel %vm446_vm6, %v791_v41, %v1170_v35  ;;  %v514_v44 = vperm.slane %v8069_v61, 1  ;;  %v515_v45 = vperm.slane %v8048_v56, 1  ;;  %v516_v28 = vperm.slane %v8072_v0, 1  ;;  %v221_v41 = vld [vmem:[%s7875_s5 + $0x48] sm:$0xff] }
  0x22   :  { %v12215_v47 = vperm.slane %v8059_v58, 1  ;;  %v12214_v33 = vperm.slane %v8081_v14, 1  ;;  %v572_v51 = vsel %vm434_vm0, %v512_v36, %v511_v30  ;;  %v793_v53 = vperm.slane %v7987_v62, 3 }
  0x23   :  { %v573_v26 = vsel %vm436_vm1, %v513_v40, %v572_v51  ;;  %v794_v27 = vperm.slane %v8069_v61, 3  ;;  %v795_v60 = vperm.slane %v8048_v56, 3  ;;  %v796_v29 = vperm.slane %v8072_v0, 3 }
  0x24   :  { %v574_v4 = vsel %vm438_vm2, %v514_v44, %v573_v26  ;;  %v797_v34 = vperm.slane %v8059_v58, 3  ;;  %v798_v35 = vperm.slane %v8081_v14, 3  ;;  %v853_v22 = vsel %vm436_vm1, %v793_v53, %v852_v23 }
  0x25   :  { %v575_v51 = vsel %vm12347_vm3, %v515_v45, %v574_v4  ;;  %v854_v7 = vsel %vm438_vm2, %v794_v27, %v853_v22  ;;  %v8127_v6 = vadd.f32 %v236_v55, %v220_v46  ;;  %v8129_v5 = vadd.f32 %v237_v57, %v221_v41 }
  0x26   :  { %1219 = vrot.lane.b32.xlu0 %v1171_v31, %s7825_s10  ;;  %v576_v26 = vsel %vm442_vm4, %v516_v28, %v575_v51  ;;  %v855_v23 = vsel %vm12347_vm3, %v795_v60, %v854_v7  ;;  %v12217_v4 = vperm.slane %v8069_v61, 0  ;;  %v12221_v3 = vperm.slane %v8048_v56, 0 }
  0x27   :  { %v577_v22 = vsel %vm12346_vm5, %v12215_v47, %v576_v26  ;;  %v856_v31 = vsel %vm442_vm4, %v796_v29, %v855_v23  ;;  %v8147_v46 = vrot.slane %v8127_v6, 4  ;;  %v12220_v41 = vperm.slane %v8072_v0, 0 }
  0x28   :  { %v578_v7 = vsel %vm446_vm6, %v12214_v33, %v577_v22  ;;  %v857_v55 = vsel %vm12346_vm5, %v797_v34, %v856_v31  ;;  %v12219_v57 = vperm.slane %v8059_v58, 0  ;;  %v12218_v51 = vperm.slane %v8081_v14, 0 }
  0x29   :  { %621 = vrot.lane.b32.xlu1 %v578_v7, %s7821_s6  ;;  %v858_v26 = vsel %vm446_vm6, %v798_v35, %v857_v55  ;;  %v388_v23 = vperm.slane %v8127_v6, 0  ;;  %v12216_v2 = vperm.slane %v8147_v46, 0  ;;  %v390_v22 = vperm.slane %v8129_v5, 0 }
  0x2a   :  { %v932_v31 = vsel %vm434_vm0, %v382_v37, %v381_v32  ;;  %v1005_v7 = vsel %vm434_vm0, %v505_v15, %v504_v20  ;;  %v652_v55 = vperm.slane %v7995_v1, 2  ;;  %v653_v63 = vperm.slane %v7987_v62, 2  ;;  %v243_v62 = vld [vmem:[%s7875_s5 + $0xf8] sm:$0xff] }
  0x2b   :  { %v455_v33 = vsel %vm434_vm0, %v12216_v2, %v388_v23  ;;  %v933_v47 = vsel %vm436_vm1, %v12217_v4, %v932_v31  ;;  %v1006_v32 = vsel %vm436_vm1, %v506_v21, %v1005_v7  ;;  %v654_v37 = vperm.slane %v8069_v61, 2 }
  0x2c   :  { %v8190_v15 = vsel %vm436_vm1, %v390_v22, %v455_v33  ;;  %v934_v20 = vsel %vm438_vm2, %v12221_v3, %v933_v47  ;;  %v1007_v2 = vsel %vm438_vm2, %v507_v18, %v1006_v32  ;;  %v655_v31 = vperm.slane %v8048_v56, 2  ;;  %v241_v3 = vld [vmem:[%s7875_s5 + $0xe8] sm:$0xff] }
  0x2d   :  { %v935_v21 = vsel %vm12347_vm3, %v12220_v41, %v934_v20  ;;  %v1008_v7 = vsel %vm12347_vm3, %v508_v24, %v1007_v2  ;;  %v656_v33 = vperm.slane %v8072_v0, 2  ;;  %v657_v4 = vperm.slane %v8059_v58, 2  ;;  %v225_v41 = vld [vmem:[%s7875_s5 + $0x68] sm:$0xff] }
  0x2e   :  { %901 = vrot.lane.b32.xlu0 %v858_v26, %s7822_s7  ;;  %v936_v18 = vsel %vm442_vm4, %v12219_v57, %v935_v21  ;;  %v1009_v47 = vsel %vm442_vm4, %v509_v19, %v1008_v7  ;;  %v658_v32 = vperm.slane %v8081_v14, 2  ;;  %v659_v20 = vperm.slane %v8127_v6, 2 }
  0x2f   :  { %v937_v24 = vsel %vm12346_vm5, %v12218_v51, %v936_v18  ;;  %v1010_v2 = vsel %vm12346_vm5, %v510_v25, %v1009_v47  ;;  %v660_v26 = vperm.slane %v8147_v46, 2  ;;  %v1092_v21 = vsel %vm434_vm0, %v653_v63, %v652_v55  ;;  %v238_v51 = vld [vmem:[%s7875_s5 + $0xd0] sm:$0xff] }
  0x30   :  { %v938_v19 = vsel %vm446_vm6, %v388_v23, %v937_v24  ;;  %v1011_v7 = vsel %vm446_vm6, %v511_v30, %v1010_v2  ;;  %v1093_v18 = vsel %vm436_vm1, %v654_v37, %v1092_v21  ;;  %v799_v25 = vperm.slane %v8127_v6, 3 }
  0x31   :  { %981 = vrot.lane.b32.xlu1 %v938_v19, %s7824_s9  ;;  %1059 = vrot.lane.b32.xlu2 %v1011_v7, %s7826_s11  ;;  %v719_v23 = vsel %vm434_vm0, %v660_v26, %v659_v20  ;;  %v1094_v30 = vsel %vm438_vm2, %v655_v31, %v1093_v18  ;;  %v800_v47 = vperm.slane %v8147_v46, 3  ;;  %v1172_v24 = vsel %vm434_vm0, %v793_v53, %v792_v50  ;;  %v222_v18 = vld [vmem:[%s7875_s5 + $0x50] sm:$0xff] }
  0x32   :  { %v1095_v2 = vsel %vm12347_vm3, %v656_v33, %v1094_v30  ;;  %v1173_v21 = vsel %vm436_vm1, %v794_v27, %v1172_v24  ;;  %v651_v19 = vperm.slane %v7978_v59, 2  ;;  %v1085_v7 = vsel %vm434_vm0, %v645_v39, %v644_v38  ;;  %v223_v30 = vld [vmem:[%s7875_s5 + $0x58] sm:$0xff] }
  0x33   :  { %v1096_v50 = vsel %vm442_vm4, %v657_v4, %v1095_v2  ;;  %v859_v53 = vsel %vm434_vm0, %v800_v47, %v799_v25  ;;  %v1174_v59 = vsel %vm438_vm2, %v795_v60, %v1173_v21  ;;  %v1086_v27 = vsel %vm436_vm1, %v646_v42, %v1085_v7  ;;  %v239_v38 = vld [vmem:[%s7875_s5 + $0xd8] sm:$0xff] }
  0x34   :  { %v1097_v39 = vsel %vm12346_vm5, %v658_v32, %v1096_v50  ;;  %v1175_v24 = vsel %vm12347_vm3, %v796_v29, %v1174_v59  ;;  %v712_v2 = vsel %vm434_vm0, %v652_v55, %v651_v19  ;;  %v1087_v60 = vsel %vm438_vm2, %v647_v43, %v1086_v27 }
  0x35   :  { %v1098_v21 = vsel %vm446_vm6, %v659_v20, %v1097_v39  ;;  %v1176_v42 = vsel %vm442_vm4, %v797_v34, %v1175_v24  ;;  %v1088_v7 = vsel %vm12347_vm3, %v648_v48, %v1087_v60  ;;  %v8293_v50 = vadd.f32 %v238_v51, %v222_v18  ;;  %v240_v39 = vld [vmem:[%s7875_s5 + $0xe0] sm:$0xff] }
  0x36   :  { %1141 = vrot.lane.b32.xlu0 %v1098_v21, %s7827_s12  ;;  %v1177_v29 = vsel %vm12346_vm5, %v798_v35, %v1176_v42  ;;  %v1089_v43 = vsel %vm442_vm4, %v649_v49, %v1088_v7  ;;  %v8302_v55 = vadd.f32 %v239_v38, %v223_v30  ;;  %v8305_v34 = vrot.slane %v8129_v5, 4 }
  0x37   :  { %v1178_v48 = vsel %vm446_vm6, %v799_v25, %v1177_v29  ;;  %v1090_v51 = vsel %vm12346_vm5, %v650_v54, %v1089_v43  ;;  %v8312_v20 = vrot.slane %v8293_v50, 4  ;;  %v661_v35 = vperm.slane %v8129_v5, 2 }
  0x38   :  { %v1091_v49 = vsel %vm446_vm6, %v651_v19, %v1090_v51  ;;  %v8317_v18 = vrot.slane %v8302_v55, 4  ;;  %v662_v59 = vperm.slane %v8305_v34, 2  ;;  %v663_v27 = vperm.slane %v8293_v50, 2  ;;  %v224_v19 = vld [vmem:[%s7875_s5 + $0x60] sm:$0xff] }
  0x39   :  { %1221 = vrot.lane.b32.xlu1 %v1178_v48, %s7825_s10  ;;  %1139 = vrot.lane.b32.xlu2 %v1091_v49, %s7827_s12  ;;  %v664_v54 = vperm.slane %v8312_v20, 2  ;;  %v665_v25 = vperm.slane %v8302_v55, 2  ;;  %v720_v30 = vsel %vm436_vm1, %v661_v35, %v719_v23  ;;  %v801_v38 = vperm.slane %v8129_v5, 3 }
  0x3a   :  { %v666_v24 = vperm.slane %v8317_v18, 2  ;;  %v721_v60 = vsel %vm438_vm2, %v662_v59, %v720_v30  ;;  %v12227_v21 = vperm.slane %v8305_v34, 3  ;;  %v12225_v42 = vperm.slane %v8293_v50, 3 }
  0x3b   :  { %v722_v7 = vsel %vm12347_vm3, %v663_v27, %v721_v60  ;;  %v12224_v29 = vperm.slane %v8312_v20, 3  ;;  %v12223_v23 = vperm.slane %v8302_v55, 3  ;;  %v12222_v43 = vperm.slane %v8317_v18, 3 }
  0x3c   :  { %v723_v48 = vsel %vm442_vm4, %v664_v54, %v722_v7  ;;  %v860_v51 = vsel %vm436_vm1, %v801_v38, %v859_v53  ;;  %v713_v49 = vsel %vm436_vm1, %v653_v63, %v712_v2  ;;  %v8348_v30 = vadd.f32 %v240_v39, %v224_v19 }
  0x3d   :  { %v724_v60 = vsel %vm12346_vm5, %v665_v25, %v723_v48  ;;  %v861_v57 = vsel %vm438_vm2, %v12227_v21, %v860_v51  ;;  %v714_v7 = vsel %vm438_vm2, %v654_v37, %v713_v49  ;;  %v520_v53 = vperm.slane %v8147_v46, 1 }
  0x3e   :  { %v725_v63 = vsel %vm446_vm6, %v666_v24, %v724_v60  ;;  %v862_v2 = vsel %vm12347_vm3, %v12225_v42, %v861_v57  ;;  %v715_v19 = vsel %vm12347_vm3, %v655_v31, %v714_v7  ;;  %v8370_v39 = vrot.slane %v8348_v30, 4 }
  0x3f   :  { %763 = vrot.lane.b32.xlu0 %v725_v63, %s7823_s8  ;;  %v863_v37 = vsel %vm442_vm4, %v12224_v29, %v862_v2  ;;  %v716_v48 = vsel %vm442_vm4, %v656_v33, %v715_v19  ;;  %v521_v51 = vperm.slane %v8129_v5, 1  ;;  %v522_v57 = vperm.slane %v8305_v34, 1  ;;  %v265_v5 = vld [vmem:[%s7875_s5 + $0x1a8] sm:$0xff] }
  0x40   :  { %v864_v31 = vsel %vm12346_vm5, %v12223_v23, %v863_v37  ;;  %v717_v49 = vsel %vm12346_vm5, %v657_v4, %v716_v48  ;;  %v523_v60 = vperm.slane %v8293_v50, 1  ;;  %v524_v7 = vperm.slane %v8312_v20, 1 }
  0x41   :  { %v865_v33 = vsel %vm446_vm6, %v12222_v43, %v864_v31  ;;  %v718_v63 = vsel %vm446_vm6, %v658_v32, %v717_v49  ;;  %v525_v2 = vperm.slane %v8302_v55, 1  ;;  %v526_v19 = vperm.slane %v8317_v18, 1 }
  0x42   :  { %903 = vrot.lane.b32.xlu1 %v865_v33, %s7822_s7  ;;  %761 = vrot.lane.b32.xlu2 %v718_v63, %s7823_s8  ;;  %v527_v4 = vperm.slane %v8348_v30, 1  ;;  %v528_v37 = vperm.slane %v8370_v39, 1  ;;  %v1019_v48 = vsel %vm434_vm0, %v521_v51, %v520_v53  ;;  %v667_v32 = vperm.slane %v8348_v30, 2 }
  0x43   :  { %v1020_v31 = vsel %vm436_vm1, %v522_v57, %v1019_v48  ;;  %v12226_v49 = vperm.slane %v8370_v39, 2  ;;  %v1099_v33 = vsel %vm434_vm0, %v661_v35, %v660_v26  ;;  %v519_v63 = vperm.slane %v8127_v6, 1  ;;  %v226_v26 = vld [vmem:[%s7875_s5 + $0x70] sm:$0xff] }
  0x44   :  { %v586_v43 = vsel %vm434_vm0, %v528_v37, %v527_v4  ;;  %v1021_v48 = vsel %vm438_vm2, %v523_v60, %v1020_v31  ;;  %v1100_v23 = vsel %vm436_vm1, %v662_v59, %v1099_v33  ;;  %v1012_v6 = vsel %vm434_vm0, %v513_v40, %v512_v36  ;;  %v242_v35 = vld [vmem:[%s7875_s5 + $0xf0] sm:$0xff]  ;;  %v227_v31 = vld [vmem:[%s7875_s5 + $0x78] sm:$0xff] }
  0x45   :  { %v1022_v29 = vsel %vm12347_vm3, %v524_v7, %v1021_v48  ;;  %v726_v42 = vsel %vm434_vm0, %v12226_v49, %v667_v32  ;;  %v1101_v59 = vsel %vm438_vm2, %v663_v27, %v1100_v23  ;;  %v579_v1 = vsel %vm434_vm0, %v520_v53, %v519_v63  ;;  %v244_v48 = vld [vmem:[%s7875_s5 + $0x100] sm:$0xff] }
  0x46   :  { %v1023_v36 = vsel %vm442_vm4, %v525_v2, %v1022_v29  ;;  %v1102_v40 = vsel %vm12347_vm3, %v664_v54, %v1101_v59  ;;  %v1013_v33 = vsel %vm436_vm1, %v514_v44, %v1012_v6  ;;  %v260_v49 = vld [vmem:[%s7875_s5 + $0x180] sm:$0xff]  ;;  %v8452_v21 = vadd.f32 %v241_v3, %v225_v41 }
  0x47   :  { %v1024_v27 = vsel %vm12346_vm5, %v526_v19, %v1023_v36  ;;  %v1103_v29 = vsel %vm442_vm4, %v665_v25, %v1102_v40  ;;  %v1014_v54 = vsel %vm438_vm2, %v515_v45, %v1013_v33  ;;  %v8463_v23 = vadd.f32 %v242_v35, %v226_v26 }
  0x48   :  { %v1025_v44 = vsel %vm446_vm6, %v527_v4, %v1024_v27  ;;  %v1104_v3 = vsel %vm12346_vm5, %v666_v24, %v1103_v29  ;;  %v1015_v41 = vsel %vm12347_vm3, %v516_v28, %v1014_v54  ;;  %v8472_v53 = vadd.f32 %v243_v62, %v227_v31  ;;  %v245_v29 = vld [vmem:[%s7875_s5 + $0x108] sm:$0xff] }
  0x49   :  { %12357 = vst [vmem:[#allocation2_spill] sm:$0xff] %v8463_v23  ;;  %1063 = vrot.lane.b32.xlu0 %v1025_v44, %s7826_s11  ;;  %v1105_v25 = vsel %vm446_vm6, %v667_v32, %v1104_v3  ;;  %v12359_v45 = vperm.slane %v8059_v58, 1  ;;  %v8479_v26 = vadd.f32 %v260_v49, %v244_v48  ;;  %v8482_v4 = vrot.slane %v8452_v21, 4  ;;  %v261_v54 = vld [vmem:[%s7875_s5 + $0x188] sm:$0xff] }
  0x4a   :  { %12358 = vst [vmem:[#allocation3_spill] sm:$0xff] %v8472_v53  ;;  %1143 = vrot.lane.b32.xlu1 %v1105_v25, %s7827_s12  ;;  %v12361_v28 = vperm.slane %v8081_v14, 1  ;;  %v8489_v35 = vrot.slane %v8463_v23, 4  ;;  %v529_v32 = vperm.slane %v8452_v21, 1  ;;  %v531_v59 = vperm.slane %v8463_v23, 1 }
  0x4b   :  { %v1016_v6 = vsel %vm442_vm4, %v12359_v45, %v1015_v41  ;;  %12360 = vst [vmem:[#allocation4_spill] sm:$0xff] %v8479_v26  ;;  %v530_v31 = vperm.slane %v8482_v4, 1  ;;  %v533_v62 = vperm.slane %v8472_v53, 1  ;;  %v534_v36 = vperm.slane %v8479_v26, 1 }
  0x4c   :  { %v1017_v24 = vsel %vm12346_vm5, %v12361_v28, %v1016_v6  ;;  %12362 = vst [vmem:[#allocation5_spill] sm:$0xff] %v8489_v35  ;;  %v532_v40 = vperm.slane %v8489_v35, 1  ;;  %v587_v33 = vsel %vm436_vm1, %v529_v32, %v586_v43  ;;  %v12240_v48 = vperm.slane %v8452_v21, 2 }
  0x4d   :  { %v1018_v49 = vsel %vm446_vm6, %v519_v63, %v1017_v24  ;;  %v12232_v27 = vperm.slane %v8482_v4, 2  ;;  %v588_v63 = vsel %vm438_vm2, %v530_v31, %v587_v33  ;;  %v12231_v44 = vperm.slane %v8463_v23, 2 }
  0x4e   :  { %1061 = vrot.lane.b32.xlu2 %v1018_v49, %s7826_s11  ;;  %v12229_v3 = vperm.slane %v8489_v35, 2  ;;  %v12228_v41 = vperm.slane %v8472_v53, 2  ;;  %v589_v25 = vsel %vm12347_vm3, %v531_v59, %v588_v63  ;;  %v674_v43 = vperm.slane %v8479_v26, 2 }
  0x4f   :  { %v727_v45 = vsel %vm436_vm1, %v12240_v48, %v726_v42  ;;  %v580_v6 = vsel %vm436_vm1, %v521_v51, %v579_v1  ;;  %v590_v28 = vsel %vm442_vm4, %v532_v40, %v589_v25  ;;  %v8527_v33 = vadd.f32 %v261_v54, %v245_v29 }
  0x50   :  { %v728_v24 = vsel %vm438_vm2, %v12232_v27, %v727_v45  ;;  %v581_v49 = vsel %vm438_vm2, %v522_v57, %v580_v6  ;;  %v591_v42 = vsel %vm12346_vm5, %v533_v62, %v590_v28  ;;  %v8539_v63 = vrot.slane %v8472_v53, 4 }
  0x51   :  { %v729_v51 = vsel %vm12347_vm3, %v12231_v44, %v728_v24  ;;  %v582_v1 = vsel %vm12347_vm3, %v523_v60, %v581_v49  ;;  %v592_v25 = vsel %vm446_vm6, %v534_v36, %v591_v42  ;;  %v8549_v54 = vrot.slane %v8479_v26, 4 }
  0x52   :  { %v730_v57 = vsel %vm442_vm4, %v12229_v3, %v729_v51  ;;  %v583_v29 = vsel %vm442_vm4, %v524_v7, %v582_v1  ;;  %625 = vrot.lane.b32.xlu0 %v592_v25, %s7821_s6  ;;  %v8559_v45 = vrot.slane %v8527_v33, 4  ;;  %v397_v6 = vperm.slane %v8370_v39, 0 }
  0x53   :  { %v731_v60 = vsel %vm12346_vm5, %v12228_v41, %v730_v57  ;;  %v584_v36 = vsel %vm12346_vm5, %v525_v2, %v583_v29  ;;  %v398_v24 = vperm.slane %v8452_v21, 0  ;;  %v12230_v49 = vperm.slane %v8482_v4, 0 }
  0x54   :  { %v732_v7 = vsel %vm446_vm6, %v674_v43, %v731_v60  ;;  %v585_v28 = vsel %vm446_vm6, %v526_v19, %v584_v36  ;;  %v12233_v2 = vperm.slane %v8463_v23, 0  ;;  %v12234_v42 = vperm.slane %v8489_v35, 0 }
  0x55   :  { %765 = vrot.lane.b32.xlu1 %v732_v7, %s7823_s8  ;;  %v12235_v51 = vperm.slane %v8472_v53, 0  ;;  %v404_v43 = vperm.slane %v8549_v54, 0  ;;  %v12243_v1 = vperm.slane %v8527_v33, 0  ;;  %v12242_v19 = vperm.slane %v8559_v45, 0 }
  0x56   :  { %623 = vrot.lane.b32.xlu2 %v585_v28, %s7821_s6  ;;  %v923_v25 = vperm.slane %v8539_v63, 0  ;;  %v946_v57 = vsel %vm434_vm0, %v398_v24, %v397_v6  ;;  %v535_v60 = vperm.slane %v8549_v54, 1  ;;  %v12239_v36 = vperm.slane %v8527_v33, 1 }
  0x57   :  { %v947_v29 = vsel %vm436_vm1, %v12230_v49, %v946_v57  ;;  %v1003_v7 = vperm.slane %v8539_v63, 1  ;;  %v469_v28 = vsel %vm434_vm0, %v12243_v1, %v404_v43  ;;  %v1026_v3 = vsel %vm434_vm0, %v529_v32, %v528_v37 }
  0x58   :  { %v948_v41 = vsel %vm438_vm2, %v12233_v2, %v947_v29  ;;  %v12237_v57 = vperm.slane %v8305_v34, 0  ;;  %v8597_v49 = vsel %vm436_vm1, %v12242_v19, %v469_v28  ;;  %v593_v27 = vsel %vm434_vm0, %v12239_v36, %v535_v60 }
  0x59   :  { %12363 = vst [vmem:[#allocation6_spill] sm:$0xff] %v8597_v49  ;;  %v949_v44 = vsel %vm12347_vm3, %v12234_v42, %v948_v41  ;;  %v1027_v29 = vsel %vm436_vm1, %v530_v31, %v1026_v3  ;;  %v12236_v28 = vperm.slane %v8293_v50, 0  ;;  %v12238_v2 = vperm.slane %v8312_v20, 0 }
  0x5a   :  { %v950_v37 = vsel %vm442_vm4, %v12235_v51, %v949_v44  ;;  %v1028_v32 = vsel %vm438_vm2, %v531_v59, %v1027_v29  ;;  %v12241_v31 = vperm.slane %v8302_v55, 0  ;;  %v12244_v44 = vperm.slane %v8317_v18, 0 }
  0x5b   :  { %v951_v41 = vsel %vm12346_vm5, %v923_v25, %v950_v37  ;;  %v1029_v42 = vsel %vm12347_vm3, %v532_v40, %v1028_v32  ;;  %v396_v29 = vperm.slane %v8348_v30, 0  ;;  %v12364_v25 = vperm.slane %v8147_v46, 0 }
  0x5c   :  { %v952_v3 = vsel %vm446_vm6, %v404_v43, %v951_v41  ;;  %v1030_v59 = vsel %vm442_vm4, %v533_v62, %v1029_v42  ;;  %v808_v62 = vperm.slane %v8370_v39, 3  ;;  %v809_v42 = vperm.slane %v8452_v21, 3 }
  0x5d   :  { %v939_v40 = vsel %vm434_vm0, %v390_v22, %v12364_v25  ;;  %985 = vrot.lane.b32.xlu0 %v952_v3, %s7824_s9  ;;  %v1031_v37 = vsel %vm12346_vm5, %v1003_v7, %v1030_v59  ;;  %v462_v41 = vsel %vm434_vm0, %v397_v6, %v396_v29  ;;  %v810_v7 = vperm.slane %v8482_v4, 3  ;;  %v246_v3 = vld [vmem:[%s7875_s5 + $0x110] sm:$0xff] }
  0x5e   :  { %v940_v43 = vsel %vm436_vm1, %v12237_v57, %v939_v40  ;;  %v1032_v32 = vsel %vm446_vm6, %v535_v60, %v1031_v37  ;;  %v262_v59 = vld [vmem:[%s7875_s5 + $0x190] sm:$0xff]  ;;  %v8647_v25 = vsel %vm436_vm1, %v398_v24, %v462_v41  ;;  %v811_v6 = vperm.slane %v8463_v23, 3  ;;  %v247_v37 = vld [vmem:[%s7875_s5 + $0x118] sm:$0xff]  ;;  %v248_v41 = vld [vmem:[%s7875_s5 + $0x120] sm:$0xff] }
  0x5f   :  { %v941_v22 = vsel %vm438_vm2, %v12236_v28, %v940_v43  ;;  %1065 = vrot.lane.b32.xlu1 %v1032_v32, %s7826_s11  ;;  %v12247_v40 = vperm.slane %v8489_v35, 3  ;;  %v263_v43 = vld [vmem:[%s7875_s5 + $0x198] sm:$0xff]  ;;  %v12246_v28 = vperm.slane %v8472_v53, 3  ;;  %v815_v32 = vperm.slane %v8549_v54, 3  ;;  %v264_v57 = vld [vmem:[%s7875_s5 + $0x1a0] sm:$0xff] }
  0x60   :  { %v942_v60 = vsel %vm12347_vm3, %v12238_v2, %v941_v22  ;;  %v12245_v24 = vperm.slane %v8527_v33, 3  ;;  %v1163_v2 = vperm.slane %v8539_v63, 3  ;;  %v1186_v36 = vsel %vm434_vm0, %v809_v42, %v808_v62 }
  0x61   :  { %v943_v51 = vsel %vm442_vm4, %v12241_v31, %v942_v60  ;;  %v8671_v48 = vadd.f32 %v262_v59, %v246_v3  ;;  %v1187_v19 = vsel %vm436_vm1, %v810_v7, %v1186_v36  ;;  %v8680_v1 = vadd.f32 %v263_v43, %v247_v37 }
  0x62   :  { %v944_v22 = vsel %vm12346_vm5, %v12244_v44, %v943_v51  ;;  %v873_v31 = vsel %vm434_vm0, %v12245_v24, %v815_v32  ;;  %v1188_v51 = vsel %vm438_vm2, %v811_v6, %v1187_v19  ;;  %v8686_v3 = vadd.f32 %v264_v57, %v248_v41 }
  0x63   :  { %12365 = vst [vmem:[#allocation7_spill] sm:$0xff] %v8671_v48  ;;  %v945_v60 = vsel %vm446_vm6, %v396_v29, %v944_v22  ;;  %v8689_v29 = vrot.slane %v8671_v48, 4  ;;  %v12253_v59 = vperm.slane %v8559_v45, 1  ;;  %v1189_v22 = vsel %vm12347_vm3, %v12247_v40, %v1188_v51 }
  0x64   :  { %983 = vrot.lane.b32.xlu2 %v945_v60, %s7824_s9  ;;  %v8696_v36 = vrot.slane %v8680_v1, 4  ;;  %v12252_v37 = vperm.slane %v8671_v48, 1  ;;  %v12248_v43 = vperm.slane %v8680_v1, 1  ;;  %v1190_v19 = vsel %vm442_vm4, %v12246_v28, %v1189_v22 }
  0x65   :  { %v12250_v57 = vperm.slane %v8689_v29, 1  ;;  %v12251_v41 = vperm.slane %v8686_v3, 1  ;;  %v594_v60 = vsel %vm436_vm1, %v12253_v59, %v593_v27  ;;  %v1191_v51 = vsel %vm12346_vm5, %v1163_v2, %v1190_v19 }
  0x66   :  { %v12249_v44 = vperm.slane %v8696_v36, 1  ;;  %v595_v24 = vsel %vm438_vm2, %v12252_v37, %v594_v60  ;;  %v807_v22 = vperm.slane %v8348_v30, 3  ;;  %v1192_v28 = vsel %vm446_vm6, %v815_v32, %v1191_v51  ;;  %v249_v60 = vld [vmem:[%s7875_s5 + $0x128] sm:$0xff] }
  0x67   :  { %v596_v40 = vsel %vm12347_vm3, %v12250_v57, %v595_v24  ;;  %v1179_v27 = vsel %vm434_vm0, %v801_v38, %v800_v47  ;;  %v817_v2 = vperm.slane %v8559_v45, 3  ;;  %1225 = vrot.lane.b32.xlu0 %v1192_v28, %s7825_s10  ;;  %v12366_v19 = vperm.slane %v8305_v34, 3 }
  0x68   :  { %v597_v30 = vsel %vm442_vm4, %v12248_v43, %v596_v40  ;;  %v866_v32 = vsel %vm434_vm0, %v808_v62, %v807_v22  ;;  %v818_v46 = vperm.slane %v8671_v48, 3  ;;  %v12367_v38 = vperm.slane %v8293_v50, 3 }
  0x69   :  { %v1180_v24 = vsel %vm436_vm1, %v12366_v19, %v1179_v27  ;;  %v598_v47 = vsel %vm12346_vm5, %v12249_v44, %v597_v30  ;;  %v12255_v40 = vperm.slane %v8689_v29, 3  ;;  %v12254_v62 = vperm.slane %v8680_v1, 3 }
  0x6a   :  { %v1181_v28 = vsel %vm438_vm2, %v12367_v38, %v1180_v24  ;;  %v599_v51 = vsel %vm446_vm6, %v12251_v41, %v598_v47  ;;  %v12368_v27 = vperm.slane %v8312_v20, 3  ;;  %v12256_v43 = vperm.slane %v8696_v36, 3 }
  0x6b   :  { %v12267_v30 = vperm.slane %v8686_v3, 3  ;;  %627 = vrot.lane.b32.xlu1 %v599_v51, %s7821_s6  ;;  %v12369_v24 = vperm.slane %v8302_v55, 3  ;;  %v874_v44 = vsel %vm436_vm1, %v817_v2, %v873_v31  ;;  %v8758_v57 = vadd.f32 %v265_v5, %v249_v60 }
  0x6c   :  { %v1182_v19 = vsel %vm12347_vm3, %v12368_v27, %v1181_v28  ;;  %v8761_v47 = vrot.slane %v8686_v3, 4  ;;  %v12370_v28 = vperm.slane %v8317_v18, 3  ;;  %v875_v51 = vsel %vm438_vm2, %v818_v46, %v874_v44 }
  0x6d   :  { %v1183_v38 = vsel %vm442_vm4, %v12369_v24, %v1182_v19  ;;  %v12258_v41 = vperm.slane %v8671_v48, 0  ;;  %v12257_v19 = vperm.slane %v8689_v29, 0  ;;  %v876_v31 = vsel %vm12347_vm3, %v12255_v40, %v875_v51 }
  0x6e   :  { %v1184_v27 = vsel %vm12346_vm5, %v12370_v28, %v1183_v38  ;;  %v8776_v60 = vrot.slane %v8758_v57, 4  ;;  %v12259_v5 = vperm.slane %v8680_v1, 0  ;;  %v877_v44 = vsel %vm442_vm4, %v12254_v62, %v876_v31 }
  0x6f   :  { %v1185_v24 = vsel %vm446_vm6, %v807_v22, %v1184_v27  ;;  %v12260_v38 = vperm.slane %v8696_v36, 0  ;;  %v12262_v28 = vperm.slane %v8686_v3, 0  ;;  %v412_v22 = vperm.slane %v8761_v47, 0 }
  0x70   :  { %1223 = vrot.lane.b32.xlu2 %v1185_v24, %s7825_s10  ;;  %v878_v27 = vsel %vm12346_vm5, %v12256_v43, %v877_v44  ;;  %v12263_v51 = vperm.slane %v8758_v57, 0  ;;  %v12261_v37 = vperm.slane %v8776_v60, 0  ;;  %v12371_v24 = vperm.slane %v8527_v33, 0 }
  0x71   :  { %v12372_v59 = vperm.slane %v8559_v45, 0  ;;  %v879_v62 = vsel %vm446_vm6, %v12267_v30, %v878_v27  ;;  %v814_v44 = vperm.slane %v8479_v26, 3  ;;  %v867_v43 = vsel %vm436_vm1, %v809_v42, %v866_v32 }
  0x72   :  { %907 = vrot.lane.b32.xlu0 %v879_v62, %s7822_s7  ;;  %v12407_v26 = vperm.slane %v8680_v1, 1 }
  0x73   :  { %v953_v31 = vsel %vm434_vm0, %v12372_v59, %v12371_v24  ;;  %v476_v59 = vsel %vm434_vm0, %v12263_v51, %v412_v22  ;;  %v868_v24 = vsel %vm438_vm2, %v810_v7, %v867_v43  ;;  %v12374_v43 = vperm.slane %v8489_v35, 3  ;;  %v266_v51 = vld [vmem:[%s7875_s5 + $0x1b0] sm:$0xff] }
  0x74   :  { %v954_v40 = vsel %vm436_vm1, %v12258_v41, %v953_v31  ;;  %v676_v31 = vperm.slane %v8527_v33, 2  ;;  %v8820_v42 = vsel %vm436_vm1, %v12261_v37, %v476_v59  ;;  %v869_v62 = vsel %vm12347_vm3, %v811_v6, %v868_v24 }
  0x75   :  { %v955_v27 = vsel %vm438_vm2, %v12257_v19, %v954_v40  ;;  %12373 = vst [vmem:[#allocation8_spill] sm:$0xff] %v8820_v42  ;;  %v12264_v40 = vperm.slane %v8559_v45, 2  ;;  %v870_v19 = vsel %vm442_vm4, %v12374_v43, %v869_v62  ;;  %v12265_v59 = vperm.slane %v8671_v48, 2 }
  0x76   :  { %v956_v32 = vsel %vm12347_vm3, %v12259_v5, %v955_v27  ;;  %v12268_v41 = vperm.slane %v8689_v29, 2  ;;  %v12375_v6 = vperm.slane %v8472_v53, 3  ;;  %v12270_v5 = vperm.slane %v8680_v1, 2 }
  0x77   :  { %v957_v7 = vsel %vm442_vm4, %v12260_v38, %v956_v32  ;;  %v683_v37 = vperm.slane %v8761_v47, 2  ;;  %v252_v32 = vld [vmem:[%s7875_s5 + $0x140] sm:$0xff] }
  0x78   :  { %v958_v27 = vsel %vm12346_vm5, %v12262_v28, %v957_v7  ;;  %v871_v24 = vsel %vm12346_vm5, %v12375_v6, %v870_v19  ;;  %v12266_v19 = vperm.slane %v8758_v57, 2  ;;  %v1113_v7 = vsel %vm434_vm0, %v12264_v40, %v676_v31  ;;  %v250_v28 = vld [vmem:[%s7875_s5 + $0x130] sm:$0xff] }
  0x79   :  { %v959_v62 = vsel %vm446_vm6, %v412_v22, %v958_v27  ;;  %v872_v43 = vsel %vm446_vm6, %v814_v44, %v871_v24  ;;  %v823_v22 = vperm.slane %v8761_v47, 3  ;;  %v12269_v44 = vperm.slane %v8758_v57, 3 }
  0x7a   :  { %987 = vrot.lane.b32.xlu1 %v959_v62, %s7824_s9  ;;  %905 = vrot.lane.b32.xlu2 %v872_v43, %s7822_s7  ;;  %v1114_v27 = vsel %vm436_vm1, %v12265_v59, %v1113_v7  ;;  %v12376_v6 = vperm.slane %v8527_v33, 3  ;;  %v675_v62 = vperm.slane %v8549_v54, 2  ;;  %v1083_v43 = vperm.slane %v8539_v63, 2  ;;  %v267_v63 = vld [vmem:[%s7875_s5 + $0x1b8] sm:$0xff] }
  0x7b   :  { %v740_v40 = vsel %vm434_vm0, %v12266_v19, %v683_v37  ;;  %v1115_v7 = vsel %vm438_vm2, %v12268_v41, %v1114_v27  ;;  %v880_v59 = vsel %vm434_vm0, %v12269_v44, %v823_v22  ;;  %v12377_v19 = vperm.slane %v8689_v29, 3 }
  0x7c   :  { %v1193_v24 = vsel %vm434_vm0, %v817_v2, %v12376_v6  ;;  %v251_v2 = vld [vmem:[%s7875_s5 + $0x138] sm:$0xff]  ;;  %v1116_v6 = vsel %vm12347_vm3, %v12270_v5, %v1115_v7  ;;  %v733_v27 = vsel %vm434_vm0, %v676_v31, %v675_v62  ;;  %v12378_v41 = vperm.slane %v8370_v39, 2 }
  0x7d   :  { %v1194_v54 = vsel %vm436_vm1, %v818_v46, %v1193_v24  ;;  %v12379_v44 = vperm.slane %v8452_v21, 2  ;;  %v268_v46 = vld [vmem:[%s7875_s5 + $0x1c0] sm:$0xff]  ;;  %v12380_v24 = vperm.slane %v8696_v36, 2  ;;  %v12381_v7 = vperm.slane %v8680_v1, 3 }
  0x7e   :  { %v1195_v30 = vsel %vm438_vm2, %v12377_v19, %v1194_v54  ;;  %v12382_v19 = vperm.slane %v8482_v4, 2  ;;  %v8906_v54 = vadd.f32 %v266_v51, %v250_v28  ;;  %v12383_v21 = vperm.slane %v8686_v3, 2 }
  0x7f   :  { %v1106_v38 = vsel %vm434_vm0, %v12379_v44, %v12378_v41  ;;  %v1117_v49 = vsel %vm442_vm4, %v12380_v24, %v1116_v6  ;;  %v1196_v5 = vsel %vm12347_vm3, %v12381_v7, %v1195_v30  ;;  %v12384_v41 = vperm.slane %v8696_v36, 3 }
  0x80   :  { %v1107_v31 = vsel %vm436_vm1, %v12382_v19, %v1106_v38  ;;  %v1118_v39 = vsel %vm12346_vm5, %v12383_v21, %v1117_v49  ;;  %v12385_v6 = vperm.slane %v8463_v23, 2  ;;  %v8917_v42 = vadd.f32 %v267_v63, %v251_v2 }
  0x81   :  { %v1197_v44 = vsel %vm442_vm4, %v12384_v41, %v1196_v5  ;;  %v1119_v30 = vsel %vm446_vm6, %v683_v37, %v1118_v39  ;;  %v12386_v38 = vperm.slane %v8686_v3, 3  ;;  %v12387_v51 = vperm.slane %v8489_v35, 2 }
  0x82   :  { %v1108_v24 = vsel %vm438_vm2, %v12385_v6, %v1107_v31  ;;  %v8926_v7 = vadd.f32 %v268_v46, %v252_v32  ;;  %1147 = vrot.lane.b32.xlu0 %v1119_v30, %s7827_s12  ;;  %v12388_v2 = vperm.slane %v8472_v53, 2  ;;  %v8934_v63 = vrot.slane %v8906_v54, 4  ;;  %v253_v6 = vld [vmem:[%s7875_s5 + $0x148] sm:$0xff] }
  0x83   :  { %v1198_v28 = vsel %vm12346_vm5, %v12386_v38, %v1197_v44  ;;  %v1109_v49 = vsel %vm12347_vm3, %v12387_v51, %v1108_v24  ;;  %v8937_v19 = vrot.slane %v8917_v42, 4  ;;  %v685_v46 = vperm.slane %v8776_v60, 2  ;;  %v269_v24 = vld [vmem:[%s7875_s5 + $0x1c8] sm:$0xff] }
  0x84   :  { %v1199_v5 = vsel %vm446_vm6, %v823_v22, %v1198_v28  ;;  %v1110_v37 = vsel %vm442_vm4, %v12388_v2, %v1109_v49  ;;  %v686_v31 = vperm.slane %v8906_v54, 2  ;;  %v12279_v22 = vperm.slane %v8917_v42, 2 }
  0x85   :  { %1227 = vrot.lane.b32.xlu1 %v1199_v5, %s7825_s10  ;;  %v1111_v32 = vsel %vm12346_vm5, %v1083_v43, %v1110_v37  ;;  %v687_v39 = vperm.slane %v8934_v63, 2  ;;  %v12278_v41 = vperm.slane %v8937_v19, 2  ;;  %v12275_v44 = vperm.slane %v8926_v7, 2 }
  0x86   :  { %v1112_v21 = vsel %vm446_vm6, %v675_v62, %v1111_v32  ;;  %v741_v43 = vsel %vm436_vm1, %v685_v46, %v740_v40  ;;  %v12274_v30 = vperm.slane %v8776_v60, 3  ;;  %v12272_v38 = vperm.slane %v8906_v54, 3 }
  0x87   :  { %1145 = vrot.lane.b32.xlu2 %v1112_v21, %s7827_s12  ;;  %v12271_v28 = vperm.slane %v8934_v63, 3  ;;  %v742_v62 = vsel %vm438_vm2, %v686_v31, %v741_v43  ;;  %v12273_v51 = vperm.slane %v8917_v42, 3  ;;  %v12389_v37 = vperm.slane %v8559_v45, 2 }
  0x88   :  { %v743_v2 = vsel %vm12347_vm3, %v687_v39, %v742_v62  ;;  %v881_v40 = vsel %vm436_vm1, %v12274_v30, %v880_v59  ;;  %v8966_v21 = vadd.f32 %v269_v24, %v253_v6  ;;  %v12390_v62 = vperm.slane %v8671_v48, 2 }
  0x89   :  { %v734_v32 = vsel %vm436_vm1, %v12389_v37, %v733_v27  ;;  %v744_v43 = vsel %vm442_vm4, %v12279_v22, %v743_v2  ;;  %v882_v5 = vsel %vm438_vm2, %v12272_v38, %v881_v40  ;;  %v8978_v59 = vrot.slane %v8926_v7, 4 }
  0x8a   :  { %v735_v49 = vsel %vm438_vm2, %v12390_v62, %v734_v32  ;;  %v745_v27 = vsel %vm12346_vm5, %v12278_v41, %v744_v43  ;;  %v883_v6 = vsel %vm12347_vm3, %v12271_v28, %v882_v5  ;;  %v12391_v24 = vperm.slane %v8689_v29, 2  ;;  %v270_v41 = vld [vmem:[%s7875_s5 + $0x1d0] sm:$0xff] }
  0x8b   :  { %v544_v40 = vperm.slane %v8758_v57, 1  ;;  %v746_v37 = vsel %vm446_vm6, %v12275_v44, %v745_v27  ;;  %v884_v32 = vsel %vm442_vm4, %v12273_v51, %v883_v6  ;;  %v12392_v43 = vperm.slane %v8680_v1, 2  ;;  %v9033_v44 = vpop.permute.xlu0 %619  ;;  %v9079_v23 = vpop.permute.xlu2 %1059 }
  0x8c   :  { %v736_v2 = vsel %vm12347_vm3, %v12391_v24, %v735_v49  ;;  %v12277_v5 = vperm.slane %v8776_v60, 1  ;;  %769 = vrot.lane.b32.xlu0 %v746_v37, %s7823_s8  ;;  %v12393_v49 = vperm.slane %v8937_v19, 3  ;;  %v12394_v28 = vperm.slane %v8696_v36, 2 }
  0x8d   :  { %v737_v62 = vsel %vm442_vm4, %v12392_v43, %v736_v2  ;;  %v12276_v38 = vperm.slane %v8906_v54, 1  ;;  %v12281_v6 = vperm.slane %v8934_v63, 1  ;;  %v12395_v51 = vperm.slane %v8926_v7, 3 }
  0x8e   :  { %v885_v24 = vsel %vm12346_vm5, %v12393_v49, %v884_v32  ;;  %v738_v27 = vsel %vm12346_vm5, %v12394_v28, %v737_v62  ;;  %v12396_v43 = vperm.slane %v8686_v3, 2  ;;  %v12284_v30 = vperm.slane %v8917_v42, 1  ;;  %v9051_v28 = vpop.permute.xlu1 %899  ;;  %v271_v32 = vld [vmem:[%s7875_s5 + $0x1d8] sm:$0xff] }
  0x8f   :  { %v886_v2 = vsel %vm446_vm6, %v12395_v51, %v885_v24  ;;  %v551_v62 = vperm.slane %v8978_v59, 1  ;;  %v12280_v51 = vperm.slane %v8966_v21, 1  ;;  %v1040_v49 = vsel %vm434_vm0, %v12277_v5, %v544_v40 }
  0x90   :  { %v739_v37 = vsel %vm446_vm6, %v12396_v43, %v738_v27  ;;  %909 = vrot.lane.b32.xlu1 %v886_v2, %s7822_s7  ;;  %v1041_v24 = vsel %vm436_vm1, %v12276_v38, %v1040_v49  ;;  %v691_v27 = vperm.slane %v8978_v59, 2  ;;  %v12285_v2 = vperm.slane %v8966_v21, 2 }
  0x91   :  { %767 = vrot.lane.b32.xlu2 %v739_v37, %s7823_s8  ;;  %v12397_v43 = vperm.slane %v8758_v57, 2  ;;  %v607_v49 = vsel %vm434_vm0, %v12280_v51, %v551_v62  ;;  %v1042_v38 = vsel %vm438_vm2, %v12281_v6, %v1041_v24  ;;  %v12398_v6 = vperm.slane %v8527_v33, 1 }
  0x92   :  { %v1043_v22 = vsel %vm12347_vm3, %v12284_v30, %v1042_v38  ;;  %v747_v51 = vsel %vm434_vm0, %v12285_v2, %v691_v27  ;;  %v12400_v53 = vperm.slane %v8937_v19, 1  ;;  %v12401_v38 = vperm.slane %v8917_v42, 2 }
  0x93   :  { %v1120_v37 = vsel %vm434_vm0, %v685_v46, %v12397_v43  ;;  %v543_v46 = vperm.slane %v8761_v47, 1  ;;  %v254_v43 = vld [vmem:[%s7875_s5 + $0x150] sm:$0xff] }
  0x94   :  { %v1121_v5 = vsel %vm436_vm1, %v686_v31, %v1120_v37  ;;  %v12399_v31 = vperm.slane %v8559_v45, 1  ;;  %v255_v37 = vld [vmem:[%s7875_s5 + $0x158] sm:$0xff]  ;;  %v1044_v35 = vsel %vm442_vm4, %v12400_v53, %v1043_v22  ;;  %v272_v45 = vld [vmem:[%s7875_s5 + $0x1e0] sm:$0xff]  ;;  %v12404_v53 = vperm.slane %v8937_v19, 2 }
  0x95   :  { %v1122_v24 = vsel %vm438_vm2, %v687_v39, %v1121_v5  ;;  %v600_v2 = vsel %vm434_vm0, %v544_v40, %v543_v46  ;;  %v12402_v39 = vperm.slane %v8671_v48, 1  ;;  %v256_v5 = vld [vmem:[%s7875_s5 + $0x160] sm:$0xff] }
  0x96   :  { %v1033_v47 = vsel %vm434_vm0, %v12399_v31, %v12398_v6  ;;  %v1123_v30 = vsel %vm12347_vm3, %v12401_v38, %v1122_v24  ;;  %v12403_v6 = vperm.slane %v8926_v7, 1  ;;  %v12405_v24 = vperm.slane %v8689_v29, 1 }
  0x97   :  { %v1034_v33 = vsel %vm436_vm1, %v12402_v39, %v1033_v47  ;;  %v1124_v22 = vsel %vm442_vm4, %v12404_v53, %v1123_v30  ;;  %v9090_v38 = vadd.f32 %v270_v41, %v254_v43  ;;  %v12406_v39 = vperm.slane %v8926_v7, 2  ;;  %v165_v53 = vld [vmem:[%s9039_s15] sm:$0xff] }
  0x98   :  { %v1045_v31 = vsel %vm12346_vm5, %v12403_v6, %v1044_v35  ;;  %v1035_v40 = vsel %vm438_vm2, %v12405_v24, %v1034_v33  ;;  %v9099_v6 = vadd.f32 %v271_v32, %v255_v37  ;;  %v12408_v41 = vperm.slane %v8696_v36, 1  ;;  %v166_v24 = vld [vmem:[%s9039_s15 + $0x8] sm:$0xff]  ;;  %s7133_s15 = sld [smem:[%s12206_s0 + %s7831_s28]]  }
  0x99   :  { %v1046_v47 = vsel %vm446_vm6, %v551_v62, %v1045_v31  ;;  %v1125_v48 = vsel %vm12346_vm5, %v12406_v39, %v1124_v22  ;;  %v1036_v35 = vsel %vm12347_vm3, %v12407_v26, %v1035_v40  ;;  %v9106_v62 = vadd.f32 %v272_v45, %v256_v5  ;;  %v9126_v22 = vpop.permute.xlu0 %759  ;;  %1348 = vmatpush.msra.mxu0 %v166_v24 }
  0x9a   :  { %1069 = vrot.lane.b32.xlu0 %v1046_v47, %s7826_s11  ;;  %v1126_v30 = vsel %vm446_vm6, %v691_v27, %v1125_v48  ;;  %v1037_v43 = vsel %vm442_vm4, %v12408_v41, %v1036_v35  ;;  %v9109_v33 = vrot.slane %v8966_v21, 4  ;;  %v12409_v26 = vperm.slane %v8686_v3, 1 }
  0x9b   :  { %1149 = vrot.lane.b32.xlu1 %v1126_v30, %s7827_s12  ;;  %v9116_v37 = vrot.slane %v9090_v38, 4  ;;  %v9119_v48 = vrot.slane %v9099_v6, 4  ;;  %v12290_v27 = vperm.slane %v9090_v38, 1  ;;  %v556_v31 = vperm.slane %v9099_v6, 1  ;;  %1349 = vmatpush.msra.mxu0 %v165_v53 }
  0x9c   :  { %v1038_v32 = vsel %vm12346_vm5, %v12409_v26, %v1037_v43  ;;  %v12289_v45 = vperm.slane %v9109_v33, 1  ;;  %v12291_v39 = vperm.slane %v9109_v33, 2  ;;  %v12296_v41 = vperm.slane %v9099_v6, 2 }
  0x9d   :  { %v1039_v5 = vsel %vm446_vm6, %v543_v46, %v1038_v32  ;;  %v12293_v40 = vperm.slane %v9116_v37, 1  ;;  %v12295_v47 = vperm.slane %v9119_v48, 1  ;;  %v12292_v46 = vperm.slane %v9090_v38, 2 }
  0x9e   :  { %1067 = vrot.lane.b32.xlu2 %v1039_v5, %s7826_s11  ;;  %v608_v35 = vsel %vm436_vm1, %v12289_v45, %v607_v49  ;;  %v12294_v30 = vperm.slane %v9116_v37, 2  ;;  %v748_v5 = vsel %vm436_vm1, %v12291_v39, %v747_v51  ;;  %v12410_v49 = vperm.slane %v8776_v60, 1  ;;  %v9150_v45 = vpop.permute.xlu1 %979 }
  0x9f   :  { %v609_v26 = vsel %vm438_vm2, %v12290_v27, %v608_v35  ;;  %v749_v35 = vsel %vm438_vm2, %v12292_v46, %v748_v5  ;;  %v12411_v27 = vperm.slane %v8906_v54, 1  ;;  %v372_v51 = vperm.slane %v7885_v8, 0  ;;  %v257_v5 = vld [vmem:[%s7875_s5 + $0x168] sm:$0xff] }
  0xa0   :  { %v601_v24 = vsel %vm436_vm1, %v12410_v49, %v600_v2  ;;  %v610_v43 = vsel %vm12347_vm3, %v12293_v40, %v609_v26  ;;  %v750_v49 = vsel %vm12347_vm3, %v12294_v30, %v749_v35  ;;  %v12412_v26 = vperm.slane %v8934_v63, 1  ;;  %v273_v46 = vld [vmem:[%s7875_s5 + $0x1e8] sm:$0xff]  ;;  %v9174_v40 = vpop.permute.xlu2 %1139 }
  0xa1   :  { %v602_v32 = vsel %vm438_vm2, %v12411_v27, %v601_v24  ;;  %v611_v2 = vsel %vm442_vm4, %v556_v31, %v610_v43  ;;  %v751_v27 = vsel %vm442_vm4, %v12296_v41, %v750_v49  ;;  %v12413_v53 = vperm.slane %v8917_v42, 1 }
  0xa2   :  { %v603_v39 = vsel %vm12347_vm3, %v12412_v26, %v602_v32  ;;  %v612_v8 = vsel %vm12346_vm5, %v12295_v47, %v611_v2  ;;  %v12414_v24 = vperm.slane %v7894_v12, 0  ;;  %v12415_v35 = vperm.slane %v9106_v62, 1 }
  0xa3   :  { %v604_v43 = vsel %vm442_vm4, %v12413_v53, %v603_v39  ;;  %v12416_v30 = vperm.slane %v9119_v48, 2  ;;  %v12417_v47 = vperm.slane %v8937_v19, 1  ;;  %v12418_v41 = vperm.slane %v7887_v9, 0 }
  0xa4   :  { %v435_v32 = vsel %vm434_vm0, %v12414_v24, %v372_v51  ;;  %v613_v26 = vsel %vm446_vm6, %v12415_v35, %v612_v8  ;;  %v12419_v12 = vperm.slane %v9106_v62, 2  ;;  %v12420_v8 = vperm.slane %v8926_v7, 1 }
  0xa5   :  { %v752_v2 = vsel %vm12346_vm5, %v12416_v30, %v751_v27  ;;  %v605_v49 = vsel %vm12346_vm5, %v12417_v47, %v604_v43  ;;  %v437_v39 = vsel %vm436_vm1, %v12418_v41, %v435_v32  ;;  %631 = vrot.lane.b32.xlu0 %v613_v26, %s7821_s6  ;;  %v12421_v30 = vperm.slane %v7897_v13, 0  ;;  %v9212_v47 = vpop.permute.xlu0 %1219 }
  0xa6   :  { %v753_v51 = vsel %vm446_vm6, %v12419_v12, %v752_v2  ;;  %v606_v53 = vsel %vm446_vm6, %v12420_v8, %v605_v49  ;;  %v9210_v24 = vadd.f32 %v273_v46, %v257_v5  ;;  %v12422_v9 = vperm.slane %v7889_v10, 0  ;;  %v9236_v8 = vpop.permute.xlu1 %621 }
  0xa7   :  { %v439_v27 = vsel %vm438_vm2, %v12421_v30, %v437_v39  ;;  %771 = vrot.lane.b32.xlu1 %v753_v51, %s7823_s8  ;;  %629 = vrot.lane.b32.xlu2 %v606_v53, %s7821_s6  ;;  %v9220_v43 = vrot.slane %v9106_v62, 4  ;;  %v421_v32 = vperm.slane %v8966_v21, 0  ;;  %v422_v13 = vperm.slane %v9109_v33, 0 }
  0xa8   :  { %v441_v41 = vsel %vm12347_vm3, %v12422_v9, %v439_v27  ;;  %v12423_v46 = vperm.slane %v7902_v16, 0  ;;  %v12297_v35 = vperm.slane %v9090_v38, 0  ;;  %v12300_v26 = vperm.slane %v9116_v37, 0 }
  0xa9   :  { %v12299_v2 = vperm.slane %v9099_v6, 0  ;;  %v12424_v10 = vperm.slane %v7891_v11, 0  ;;  %v12301_v39 = vperm.slane %v9119_v48, 0  ;;  %v12302_v12 = vperm.slane %v9106_v62, 0 }
  0xaa   :  { %v443_v5 = vsel %vm442_vm4, %v12423_v46, %v441_v41  ;;  %v428_v51 = vperm.slane %v9220_v43, 0  ;;  %v12425_v16 = vperm.slane %v7905_v17, 0  ;;  %v12298_v30 = vperm.slane %v9210_v24, 0 }
  0xab   :  { %v445_v49 = vsel %vm12346_vm5, %v12424_v10, %v443_v5  ;;  %v967_v27 = vsel %vm434_vm0, %v422_v13, %v421_v32  ;;  %v12426_v46 = vperm.slane %v8966_v21, 1  ;;  %v12427_v5 = vperm.slane %v9109_v33, 1  ;;  %v9275_v10 = vpop.permute.xlu2 %761 }
  0xac   :  { %v447_v53 = vsel %vm446_vm6, %v12425_v16, %v445_v49  ;;  %v968_v41 = vsel %vm436_vm1, %v12297_v35, %v967_v27  ;;  %v9258_v49 = vsel %vm434_vm0, %v12298_v30, %v428_v51  ;;  %v12428_v16 = vperm.slane %v9090_v38, 1 }
  0xad   :  { %v1244_v9 = vsel %vm1243_vm7, %v447_v53, %v9033_v44  ;;  %v1047_v17 = vsel %vm434_vm0, %v12427_v5, %v12426_v46  ;;  %v969_v44 = vsel %vm438_vm2, %v12300_v26, %v968_v41  ;;  %v12303_v27 = vperm.slane %v8934_v63, 0 }
  0xae   :  { %v1048_v53 = vsel %vm436_vm1, %v12428_v16, %v1047_v17  ;;  %v970_v46 = vsel %vm12347_vm3, %v12299_v2, %v969_v44  ;;  %v12429_v5 = vperm.slane %v9116_v37, 1  ;;  %v420_v16 = vperm.slane %v8978_v59, 0  ;;  %v9285_v2 = vpop.permute.xlu0 %901 }
  0xaf   :  { %v971_v41 = vsel %vm442_vm4, %v12301_v39, %v970_v46  ;;  %v12431_v46 = vperm.slane %v8758_v57, 0  ;;  %v12432_v39 = vperm.slane %v8776_v60, 0  ;;  %v12433_v44 = vperm.slane %v9106_v62, 1 }
  0xb0   :  { %v1049_v35 = vsel %vm438_vm2, %v12429_v5, %v1048_v53  ;;  %v972_v53 = vsel %vm12346_vm5, %v12302_v12, %v971_v41  ;;  %v12430_v5 = vperm.slane %v9119_v48, 1  ;;  %v483_v30 = vsel %vm434_vm0, %v421_v32, %v420_v16 }
  0xb1   :  { %v1050_v17 = vsel %vm12347_vm3, %v556_v31, %v1049_v35  ;;  %v960_v31 = vsel %vm434_vm0, %v12432_v39, %v12431_v46  ;;  %v973_v35 = vsel %vm446_vm6, %v428_v51, %v972_v53  ;;  %v12434_v41 = vperm.slane %v8906_v54, 0  ;;  %v9318_v51 = vpop.permute.xlu1 %981 }
  0xb2   :  { %v1051_v26 = vsel %vm442_vm4, %v12430_v5, %v1050_v17  ;;  %991 = vrot.lane.b32.xlu0 %v973_v35, %s7824_s9  ;;  %v12435_v17 = vperm.slane %v9220_v43, 1  ;;  %v9311_v5 = vsel %vm436_vm1, %v422_v13, %v483_v30  ;;  %v1253_v32 = vsel %vm12323_vm8, %v1244_v9, %v9126_v22  ;;  %v258_v9 = vld [vmem:[%s7875_s5 + $0x170] sm:$0xff] }
  0xb3   :  { %v1052_v11 = vsel %vm12346_vm5, %v12433_v44, %v1051_v26  ;;  %v961_v12 = vsel %vm436_vm1, %v12434_v41, %v960_v31  ;;  %v12436_v44 = vperm.slane %v8917_v42, 0  ;;  %v12437_v13 = vperm.slane %v8937_v19, 0 }
  0xb4   :  { %v1053_v39 = vsel %vm446_vm6, %v12435_v17, %v1052_v11  ;;  %v962_v26 = vsel %vm438_vm2, %v12303_v27, %v961_v12  ;;  %v1262_v22 = vsel %vm1261_vm9, %v1253_v32, %v9051_v28  ;;  %v832_v30 = vperm.slane %v8966_v21, 3  ;;  %v259_v17 = vld [vmem:[%s7875_s5 + $0x178] sm:$0xff] }
  0xb5   :  { %1071 = vrot.lane.b32.xlu1 %v1053_v39, %s7826_s11  ;;  %v963_v11 = vsel %vm12347_vm3, %v12436_v44, %v962_v26  ;;  %v12438_v53 = vperm.slane %v8926_v7, 0  ;;  %v1271_v31 = vsel %vm12344_vm10, %v1262_v22, %v9150_v45  ;;  %v12304_v35 = vperm.slane %v9109_v33, 3  ;;  %v274_v39 = vld [vmem:[%s7875_s5 + $0x1f0] sm:$0xff]  ;;  %v275_v26 = vld [vmem:[%s7875_s5 + $0x1f8] sm:$0xff] }
  0xb6   :  { %v964_v12 = vsel %vm442_vm4, %v12437_v13, %v963_v11  ;;  %v12305_v41 = vperm.slane %v9090_v38, 3  ;;  %v1280_v32 = vsel %vm1279_vm11, %v1271_v31, %v9079_v23  ;;  %v12308_v44 = vperm.slane %v9116_v37, 3 }
  0xb7   :  { %v965_v46 = vsel %vm12346_vm5, %v12438_v53, %v964_v12  ;;  %v12306_v11 = vperm.slane %v9099_v6, 3  ;;  %v1289_v45 = vsel %vm1288_vm12, %v1280_v32, %v9174_v40  ;;  %v12309_v13 = vperm.slane %v9119_v48, 3  ;;  %v9352_v53 = vpop.permute.xlu0 %1141  ;;  %v9364_v40 = vpop.permute.xlu2 %1061 }
  0xb8   :  { %v966_v28 = vsel %vm446_vm6, %v420_v16, %v965_v46  ;;  %v839_v22 = vperm.slane %v9220_v43, 3  ;;  %v1207_v23 = vsel %vm434_vm0, %v12304_v35, %v832_v30  ;;  %v9357_v16 = vadd.f32 %v274_v39, %v258_v9 }
  0xb9   :  { %989 = vrot.lane.b32.xlu2 %v966_v28, %s7824_s9  ;;  %v9359_v46 = vadd.f32 %v275_v26, %v259_v17  ;;  %v9362_v31 = vrot.slane %v9210_v24, 4  ;;  %v1208_v28 = vsel %vm436_vm1, %v12305_v41, %v1207_v23  ;;  %v12307_v32 = vperm.slane %v9210_v24, 1  ;;  %v9384_v41 = vpop.permute.xlu1 %1221 }
  0xba   :  { %v831_v27 = vperm.slane %v8978_v59, 3  ;;  %v12439_v12 = vperm.slane %v8758_v57, 3  ;;  %v12440_v9 = vperm.slane %v8776_v60, 3  ;;  %v1209_v39 = vsel %vm438_vm2, %v12308_v44, %v1208_v28 }
  0xbb   :  { %v9380_v26 = vrot.slane %v9357_v16, 4  ;;  %v12310_v35 = vperm.slane %v9362_v31, 1  ;;  %v12311_v23 = vperm.slane %v9357_v16, 1  ;;  %v1210_v57 = vsel %vm12347_vm3, %v12306_v11, %v1209_v39 }
  0xbc   :  { %v1200_v17 = vsel %vm434_vm0, %v12440_v9, %v12439_v12  ;;  %v12441_v59 = vperm.slane %v9220_v43, 1  ;;  %v887_v28 = vsel %vm434_vm0, %v832_v30, %v831_v27  ;;  %v1211_v9 = vsel %vm442_vm4, %v12309_v13, %v1210_v57 }
  0xbd   :  { %v12444_v57 = vperm.slane %v8934_v63, 3  ;;  %v12445_v39 = vperm.slane %v8069_v61, 0  ;;  %v12449_v61 = vperm.slane %v9359_v46, 1 }
  0xbe   :  { %v614_v12 = vsel %vm434_vm0, %v12307_v32, %v12441_v59  ;;  %v12442_v59 = vperm.slane %v8906_v54, 3  ;;  %v12443_v32 = vperm.slane %v9106_v62, 3 }
  0xbf   :  { %v615_v11 = vsel %vm436_vm1, %v12310_v35, %v614_v12  ;;  %v450_v12 = vsel %vm438_vm2, %v12445_v39, %v8040_v52 }
  0xc0   :  { %v1201_v30 = vsel %vm436_vm1, %v12442_v59, %v1200_v17  ;;  %v1212_v44 = vsel %vm12346_vm5, %v12443_v32, %v1211_v9  ;;  %v616_v60 = vsel %vm438_vm2, %v12311_v23, %v615_v11  ;;  %v12446_v17 = vperm.slane %v9380_v26, 1 }
  0xc1   :  { %v1202_v13 = vsel %vm438_vm2, %v12444_v57, %v1201_v30  ;;  %v1213_v35 = vsel %vm446_vm6, %v839_v22, %v1212_v44  ;;  %v12447_v32 = vperm.slane %v8917_v42, 3  ;;  %v12448_v11 = vperm.slane %v8048_v56, 0 }
  0xc2   :  { %v617_v59 = vsel %vm12347_vm3, %v12446_v17, %v616_v60  ;;  %1231 = vrot.lane.b32.xlu0 %v1213_v35, %s7825_s10  ;;  %v12450_v44 = vperm.slane %v8937_v19, 3  ;;  %v12451_v60 = vperm.slane %v8072_v0, 0  ;;  %v12452_v56 = vperm.slane %v8926_v7, 3  ;;  %v9453_v17 = vpop.permute.xlu0 %763 }
  0xc3   :  { %v1203_v9 = vsel %vm12347_vm3, %v12447_v32, %v1202_v13  ;;  %v451_v23 = vsel %vm12347_vm3, %v12448_v11, %v450_v12  ;;  %v618_v52 = vsel %vm442_vm4, %v12449_v61, %v617_v59  ;;  %v12453_v35 = vperm.slane %v8059_v58, 0 }
  0xc4   :  { %v1204_v39 = vsel %vm442_vm4, %v12450_v44, %v1203_v9  ;;  %v452_v30 = vsel %vm442_vm4, %v12451_v60, %v451_v23  ;;  %633 = vrot.lane.b32.xlu1 %v618_v52, %s7821_s6  ;;  %v1298_v12 = vsel %vm1297_vm13, %v1289_v45, %v9212_v47  ;;  %v12454_v23 = vperm.slane %v8081_v14, 0  ;;  %v9468_v14 = vpop.permute.xlu2 %623 }
  0xc5   :  { %v1205_v13 = vsel %vm12346_vm5, %v12452_v56, %v1204_v39  ;;  %v453_v57 = vsel %vm12346_vm5, %v12453_v35, %v452_v30  ;;  %7153 = vmatmul.msk.f32.vlgmr.msra.gmra.mxu0 %vm1309_vm14, %v1298_v12  ;;  %v840_v32 = vperm.slane %v9210_v24, 3  ;;  %v841_v58 = vperm.slane %v9362_v31, 3  ;;  %v9481_v56 = vpop.permute.xlu1 %903 }
  0xc6   :  { %v1206_v0 = vsel %vm446_vm6, %v831_v27, %v1205_v13  ;;  %v454_v59 = vsel %vm446_vm6, %v12454_v23, %v453_v57  ;;  %v842_v45 = vperm.slane %v9357_v16, 3  ;;  %v843_v9 = vperm.slane %v9380_v26, 3 }
  0xc7   :  { %1229 = vrot.lane.b32.xlu2 %v1206_v0, %s7825_s10  ;;  %v1245_v47 = vsel %vm1243_vm7, %v454_v59, %v9236_v8  ;;  %v844_v27 = vperm.slane %v9359_v46, 3  ;;  %v894_v61 = vsel %vm434_vm0, %v840_v32, %v839_v22  ;;  %v9474_v52 = vrot.slane %v9359_v46, 4 }
  0xc8   :  { %v1254_v11 = vsel %vm12323_vm8, %v1245_v47, %v9275_v10  ;;  %v430_v44 = vperm.slane %v9362_v31, 0  ;;  %v895_v8 = vsel %vm436_vm1, %v841_v58, %v894_v61  ;;  %v12314_v39 = vperm.slane %v9357_v16, 0 }
  0xc9   :  { %v12313_v60 = vperm.slane %v9380_v26, 0  ;;  %v12312_v30 = vperm.slane %v9359_v46, 0  ;;  %v896_v13 = vsel %vm438_vm2, %v842_v45, %v895_v8  ;;  %v924_v10 = vperm.slane %v9474_v52, 0 }
  0xca   :  { %v12455_v22 = vperm.slane %v9210_v24, 0  ;;  %v12456_v57 = vperm.slane %v9109_v33, 3  ;;  %v897_v0 = vsel %vm12347_vm3, %v843_v9, %v896_v13  ;;  %v12457_v59 = vperm.slane %v9090_v38, 3 }
  0xcb   :  { %v1263_v61 = vsel %vm1261_vm9, %v1254_v11, %v9285_v2  ;;  %v898_v8 = vsel %vm442_vm4, %v844_v27, %v897_v0  ;;  %v12459_v2 = vperm.slane %v9099_v6, 3  ;;  %v700_v0 = vperm.slane %v9210_v24, 2 }
  0xcc   :  { %v974_v35 = vsel %vm434_vm0, %v430_v44, %v12455_v22  ;;  %v888_v12 = vsel %vm436_vm1, %v12456_v57, %v887_v28  ;;  %v12458_v28 = vperm.slane %v9116_v37, 3  ;;  %913 = vrot.lane.b32.xlu0 %v898_v8, %s7822_s7  ;;  %v12461_v8 = vperm.slane %v9106_v62, 3 }
  0xcd   :  { %v975_v23 = vsel %vm436_vm1, %v12314_v39, %v974_v35  ;;  %v889_v47 = vsel %vm438_vm2, %v12457_v59, %v888_v12  ;;  %v1272_v35 = vsel %vm12344_vm10, %v1263_v61, %v9318_v51  ;;  %v12460_v59 = vperm.slane %v9119_v48, 3 }
  0xce   :  { %v976_v22 = vsel %vm438_vm2, %v12313_v60, %v975_v23  ;;  %v890_v13 = vsel %vm12347_vm3, %v12458_v28, %v889_v47  ;;  %v1281_v12 = vsel %vm1279_vm11, %v1272_v35, %v9364_v40  ;;  %v701_v47 = vperm.slane %v9362_v31, 2  ;;  %v984_v60 = vpop.permute.xlu2 %983 }
  0xcf   :  { %v977_v57 = vsel %vm12347_vm3, %v12312_v30, %v976_v22  ;;  %v891_v11 = vsel %vm442_vm4, %v12459_v2, %v890_v13  ;;  %v702_v61 = vperm.slane %v9357_v16, 2  ;;  %v703_v40 = vperm.slane %v9380_v26, 2  ;;  %v1064_v13 = vpop.permute.xlu0 %1063 }
  0xd0   :  { %v978_v23 = vsel %vm442_vm4, %v924_v10, %v977_v57  ;;  %v892_v51 = vsel %vm12346_vm5, %v12460_v59, %v891_v11  ;;  %v704_v28 = vperm.slane %v9359_v46, 2  ;;  %v1084_v10 = vperm.slane %v9474_v52, 2 }
  0xd1   :  { %993 = vrot.lane.b32.xlu1 %v978_v23, %s7824_s9  ;;  %v893_v22 = vsel %vm446_vm6, %v12461_v8, %v892_v51  ;;  %v1134_v35 = vsel %vm434_vm0, %v701_v47, %v700_v0  ;;  %v1164_v57 = vperm.slane %v9474_v52, 3  ;;  %v1214_v2 = vsel %vm434_vm0, %v841_v58, %v840_v32 }
  0xd2   :  { %911 = vrot.lane.b32.xlu2 %v893_v22, %s7822_s7  ;;  %v699_v11 = vperm.slane %v9220_v43, 2  ;;  %v1135_v23 = vsel %vm436_vm1, %v702_v61, %v1134_v35  ;;  %v1215_v59 = vsel %vm436_vm1, %v842_v45, %v1214_v2  ;;  %v12462_v51 = vperm.slane %v8966_v21, 2 }
  0xd3   :  { %v12463_v8 = vperm.slane %v9109_v33, 2  ;;  %v1290_v22 = vsel %vm1288_vm12, %v1281_v12, %v9352_v53  ;;  %v1136_v39 = vsel %vm438_vm2, %v703_v40, %v1135_v23  ;;  %v1216_v32 = vsel %vm438_vm2, %v843_v9, %v1215_v59  ;;  %v1144_v23 = vpop.permute.xlu1 %1143 }
  0xd4   :  { %v12464_v43 = vperm.slane %v9090_v38, 2  ;;  %v12465_v45 = vperm.slane %v8305_v34, 0  ;;  %v1137_v33 = vsel %vm12347_vm3, %v704_v28, %v1136_v39  ;;  %v1217_v35 = vsel %vm12347_vm3, %v844_v27, %v1216_v32 }
  0xd5   :  { %v1127_v30 = vsel %vm434_vm0, %v12463_v8, %v12462_v51  ;;  %v12466_v53 = vperm.slane %v9116_v37, 2  ;;  %v12467_v2 = vperm.slane %v8293_v50, 0  ;;  %v1218_v59 = vsel %vm442_vm4, %v1164_v57, %v1217_v35 }
  0xd6   :  { %v1128_v58 = vsel %vm436_vm1, %v12464_v43, %v1127_v30  ;;  %v457_v21 = vsel %vm438_vm2, %v12465_v45, %v8190_v15  ;;  %v1138_v30 = vsel %vm442_vm4, %v1084_v10, %v1137_v33  ;;  %v12468_v34 = vperm.slane %v9099_v6, 2 }
  0xd7   :  { %v1129_v12 = vsel %vm438_vm2, %v12466_v53, %v1128_v58  ;;  %v458_v9 = vsel %vm12347_vm3, %v12467_v2, %v457_v21  ;;  %v12469_v39 = vperm.slane %v8312_v20, 0  ;;  %1153 = vrot.lane.b32.xlu0 %v1138_v30, %s7827_s12  ;;  %v12470_v51 = vperm.slane %v9119_v48, 2 }
  0xd8   :  { %v1130_v15 = vsel %vm12347_vm3, %v12468_v34, %v1129_v12  ;;  %v12471_v8 = vperm.slane %v8302_v55, 0  ;;  %v1299_v57 = vsel %vm1297_vm13, %v1290_v22, %v9384_v41  ;;  %v754_v32 = vsel %vm434_vm0, %v700_v0, %v699_v11  ;;  %v12480_v34 = vld [vmem:[#allocation5_spill] sm:$0xff] }
  0xd9   :  { %v459_v27 = vsel %vm442_vm4, %v12469_v39, %v458_v9  ;;  %v1131_v50 = vsel %vm442_vm4, %v12470_v51, %v1130_v15  ;;  %v12472_v43 = vperm.slane %v9106_v62, 2  ;;  %v12473_v58 = vperm.slane %v8317_v18, 0  ;;  %7154 = vmatmul.msk.f32.gmra.mxu0 %vm1309_vm14, %v1299_v57  ;;  %1233 = vrot.lane.b32.xlu1 %v1218_v59, %s7825_s10  ;;  %v12478_v9 = vld [vmem:[#allocation2_spill] sm:$0xff]  ;;  %v1224_v59 = vpop.permute.xlu2 %1223  ;;  %s7861_s10 = smov 104  }
  0xda   :  { %v460_v10 = vsel %vm12346_vm5, %v12471_v8, %v459_v27  ;;  %v755_v21 = vsel %vm436_vm1, %v701_v47, %v754_v32  ;;  %v12474_v33 = vperm.slane %v9210_v24, 1  ;;  %v12475_v47 = vperm.slane %v9362_v31, 1 }
  0xdb   :  { %v1132_v20 = vsel %vm12346_vm5, %v12472_v43, %v1131_v50  ;;  %v461_v45 = vsel %vm446_vm6, %v12473_v58, %v460_v10  ;;  %v756_v0 = vsel %vm438_vm2, %v702_v61, %v755_v21  ;;  %v626_v61 = vpop.permute.xlu0 %625  ;;  %v12481_v15 = vperm.slane %v12480_v34, 0  ;;  %v12487_v21 = vld [vmem:[#allocation8_spill] sm:$0xff] }
  0xdc   :  { %v1133_v55 = vsel %vm446_vm6, %v699_v11, %v1132_v20  ;;  %v1246_v41 = vsel %vm1243_vm7, %v461_v45, %v9468_v14  ;;  %v1054_v35 = vsel %vm434_vm0, %v12475_v47, %v12474_v33  ;;  %v12476_v11 = vperm.slane %v8482_v4, 0 }
  0xdd   :  { %1151 = vrot.lane.b32.xlu2 %v1133_v55, %s7827_s12  ;;  %v1255_v18 = vsel %vm12323_vm8, %v1246_v41, %v9453_v17  ;;  %v757_v12 = vsel %vm12347_vm3, %v703_v40, %v756_v0  ;;  %v12477_v17 = vld [vmem:[#allocation4_spill] sm:$0xff]  ;;  %v12482_v39 = vperm.slane %v9357_v16, 1  ;;  %v12483_v40 = vld [vmem:[#allocation3_spill] sm:$0xff]  ;;  %v12485_v57 = vperm.slane %v9380_v26, 1  ;;  %s10053_s12 = sld [smem:[%s12206_s0 + %s7837_s4]]  }
  0xde   :  { %v1264_v22 = vsel %vm1261_vm9, %v1255_v18, %v9481_v56  ;;  %v464_v14 = vsel %vm438_vm2, %v12476_v11, %v8647_v25  ;;  %v403_v2 = vperm.slane %v12477_v17, 0  ;;  %v12479_v56 = vperm.slane %v12478_v9, 0  ;;  %v12494_v17 = vld [vmem:[#allocation7_spill] sm:$0xff] }
  0xdf   :  { %v1273_v53 = vsel %vm12344_vm10, %v1264_v22, %v984_v60  ;;  %v1055_v60 = vsel %vm436_vm1, %v12482_v39, %v1054_v35  ;;  %v12484_v27 = vperm.slane %v12483_v40, 0  ;;  %v758_v50 = vsel %vm442_vm4, %v704_v28, %v757_v12  ;;  %v12493_v12 = vld [vmem:[#allocation6_spill] sm:$0xff] }
  0xe0   :  { %v465_v24 = vsel %vm12347_vm3, %v12479_v56, %v464_v14  ;;  %v1282_v30 = vsel %vm1279_vm11, %v1273_v53, %v1064_v13  ;;  %v766_v13 = vpop.permute.xlu1 %765  ;;  %v1004_v32 = vperm.slane %v9474_v52, 1  ;;  %v12486_v20 = vperm.slane %v9359_v46, 1 }
  0xe1   :  { %v466_v4 = vsel %vm442_vm4, %v12481_v15, %v465_v24  ;;  %v1291_v25 = vsel %vm1288_vm12, %v1282_v30, %v1144_v23  ;;  %v1056_v23 = vsel %vm438_vm2, %v12485_v57, %v1055_v60  ;;  %v906_v58 = vpop.permute.xlu2 %905  ;;  %v12488_v55 = vperm.slane %v8906_v54, 0 }
  0xe2   :  { %v467_v51 = vsel %vm12346_vm5, %v12484_v27, %v466_v4  ;;  %v1300_v8 = vsel %vm1297_vm13, %v1291_v25, %v1224_v59  ;;  %v1057_v28 = vsel %vm12347_vm3, %v12486_v20, %v1056_v23  ;;  %v12489_v18 = vperm.slane %v8934_v63, 0 }
  0xe3   :  { %7155 = vmatmul.msk.f32.gmra.mxu0 %vm1309_vm14, %v1300_v8  ;;  %v468_v10 = vsel %vm446_vm6, %v403_v2, %v467_v51  ;;  %v986_v45 = vpop.permute.xlu0 %985  ;;  %v478_v41 = vsel %vm438_vm2, %v12488_v55, %v12487_v21  ;;  %v1058_v52 = vsel %vm442_vm4, %v1004_v32, %v1057_v28  ;;  %v12490_v33 = vperm.slane %v8917_v42, 0 }
  0xe4   :  { %v1247_v43 = vsel %vm1243_vm7, %v468_v10, %v626_v61  ;;  %v479_v22 = vsel %vm12347_vm3, %v12489_v18, %v478_v41  ;;  %v12491_v35 = vperm.slane %v8937_v19, 0  ;;  %v12492_v61 = vperm.slane %v8926_v7, 0 }
  0xe5   :  { %773 = vrot.lane.b32.xlu2 %v758_v50, %s7823_s8  ;;  %v1256_v0 = vsel %vm12323_vm8, %v1247_v43, %v766_v13  ;;  %v480_v47 = vsel %vm442_vm4, %v12490_v33, %v479_v22  ;;  %v12495_v42 = vperm.slane %v12494_v17, 0  ;;  %v12496_v9 = vperm.slane %v8689_v29, 0 }
  0xe6   :  { %v481_v11 = vsel %vm12346_vm5, %v12491_v35, %v480_v47  ;;  %v1265_v54 = vsel %vm1261_vm9, %v1256_v0, %v906_v58  ;;  %v12497_v59 = vperm.slane %v8680_v1, 0  ;;  %v12498_v25 = vperm.slane %v8696_v36, 0 }
  0xe7   :  { %v482_v53 = vsel %vm446_vm6, %v12492_v61, %v481_v11  ;;  %v1274_v63 = vsel %vm12344_vm10, %v1265_v54, %v986_v45  ;;  %v471_v2 = vsel %vm438_vm2, %v12495_v42, %v12493_v12  ;;  %v12499_v29 = vperm.slane %v8686_v3, 0 }
  0xe8   :  { %v1066_v14 = vpop.permute.xlu1 %1065  ;;  %v472_v56 = vsel %vm12347_vm3, %v12496_v9, %v471_v2  ;;  %v12500_v18 = vperm.slane %v9090_v38, 0  ;;  %v12501_v47 = vperm.slane %v9116_v37, 0  ;;  %v12502_v54 = vperm.slane %v9099_v6, 0  ;;  %v164_v2 = vld [vmem:[%s7128_s23] sm:$0xff]  ;;  %s7149_s23 = sld [smem:[%s12206_s0 + %s7833_s30]]  }
  0xe9   :  { %v1283_v19 = vsel %vm1279_vm11, %v1274_v63, %v1066_v14  ;;  %v1146_v24 = vpop.permute.xlu2 %1145  ;;  %v473_v34 = vsel %vm442_vm4, %v12497_v59, %v472_v56  ;;  %v12504_v6 = vperm.slane %v9106_v62, 0  ;;  %1425 = vmatpush.msrb.mxu0 %v164_v2  ;;  %7305 = vmatpush.msra.mxu1 %v164_v2  ;;  %v491_v56 = vsel %vm436_vm1, %v430_v44, %v9258_v49 }
  0xea   :  { %v1292_v7 = vsel %vm1288_vm12, %v1283_v19, %v1146_v24  ;;  %v474_v39 = vsel %vm12346_vm5, %v12498_v25, %v473_v34  ;;  %v485_v22 = vsel %vm438_vm2, %v12500_v18, %v9311_v5  ;;  %v12503_v5 = vperm.slane %v9119_v48, 0 }
  0xeb   :  { %v1226_v30 = vpop.permute.xlu0 %1225  ;;  %v475_v60 = vsel %vm446_vm6, %v12499_v29, %v474_v39  ;;  %v486_v35 = vsel %vm12347_vm3, %v12501_v47, %v485_v22  ;;  %v12507_v49 = vperm.slane %v9359_v46, 0 }
  0xec   :  { %v1301_v15 = vsel %vm1297_vm13, %v1292_v7, %v1226_v30  ;;  %v487_v14 = vsel %vm442_vm4, %v12502_v54, %v486_v35  ;;  %v12505_v30 = vperm.slane %v9357_v16, 0 }
  0xed   :  { %1073 = vrot.lane.b32.xlu2 %v1058_v52, %s7826_s11  ;;  %7156 = vmatmul.msk.f32.gmra.mxu0 %vm1309_vm14, %v1301_v15  ;;  %v488_v63 = vsel %vm12346_vm5, %v12503_v5, %v487_v14  ;;  %v12506_v15 = vperm.slane %v9380_v26, 0  ;;  %v9761_v5 = vld [vmem:[%s9748_s26] ss:$0 sm:$0xff]  ;;  %s7841_s11 = smov 112  }
  0xee   :  { %v489_v37 = vsel %vm446_vm6, %v12504_v6, %v488_v63  ;;  %v492_v7 = vsel %vm438_vm2, %v12505_v30, %v491_v56 }
  0xf0   :  { %v628_v4 = vpop.permute.xlu1 %627 }
  0xf1   :  { %v768_v40 = vpop.permute.xlu2 %767  ;;  %v1248_v27 = vsel %vm1243_vm7, %v475_v60, %v628_v4  ;;  %v493_v4 = vsel %vm12347_vm3, %v12506_v15, %v492_v7 }
  0xf2   :  { %v1257_v1 = vsel %vm12323_vm8, %v1248_v27, %v768_v40  ;;  %v494_v44 = vsel %vm442_vm4, %v12507_v49, %v493_v4 }
  0xf3   :  { %v908_v51 = vpop.permute.xlu0 %907 }
  0xf4   :  { %v1266_v8 = vsel %vm1261_vm9, %v1257_v1, %v908_v51 }
  0xf8   :  { %v988_v50 = vpop.permute.xlu1 %987 }
  0xf9   :  { %v1275_v13 = vsel %vm12344_vm10, %v1266_v8, %v988_v50  ;;  %v1068_v10 = vpop.permute.xlu2 %1067 }
  0xfa   :  { %v1284_v36 = vsel %vm1279_vm11, %v1275_v13, %v1068_v10  ;;  %v7352_v10 = vld [vmem:[%s9399_s19] ss:$0 sm:$0xff]  ;;  %s7838_s19 = smov 15  }
  0xfb   :  { %v1148_v57 = vpop.permute.xlu0 %1147  ;;  %s7132_s22 = sld [smem:[%s12206_s0 + %s7838_s19]]  }
  0xfc   :  { %v1293_v23 = vsel %vm1288_vm12, %v1284_v36, %v1148_v57  ;;  %s7121_s19 = sld [smem:[%s12206_s0 + %s7823_s8]]   ;;  %s7860_s8 = smov 3  }
 0x100   :  { %v1228_v3 = vpop.permute.xlu1 %1227 }
 0x101   :  { %v1302_v32 = vsel %vm1297_vm13, %v1293_v23, %v1228_v3  ;;  %v630_v43 = vpop.permute.xlu2 %629 }
 0x102   :  { %7157 = vmatmul.msk.f32.gmra.mxu0 %vm1309_vm14, %v1302_v32  ;;  %v1249_v58 = vsel %vm1243_vm7, %v482_v53, %v630_v43 }
 0x103   :  { %v770_v20 = vpop.permute.xlu0 %769 }
 0x104   :  { %v1258_v45 = vsel %vm12323_vm8, %v1249_v58, %v770_v20 }
 0x108   :  { %v910_v28 = vpop.permute.xlu1 %909 }
 0x109   :  { %v1267_v55 = vsel %vm1261_vm9, %v1258_v45, %v910_v28 }
 0x10c   :  { %v1070_v41 = vpop.permute.xlu0 %1069 }
 0x110   :  { %v1150_v0 = vpop.permute.xlu1 %1149 }
 0x113   :  { %v990_v21 = vpop.permute.xlu2 %989 }
 0x114   :  { %v1276_v52 = vsel %vm12344_vm10, %v1267_v55, %v990_v21 }
 0x115   :  { %v1285_v33 = vsel %vm1279_vm11, %v1276_v52, %v1070_v41 }
 0x116   :  { %v1294_v11 = vsel %vm1288_vm12, %v1285_v33, %v1150_v0 }
 0x117   :  { %v632_v38 = vpop.permute.xlu0 %631 }
 0x118   :  { %v1250_v17 = vsel %vm1243_vm7, %v489_v37, %v632_v38 }
 0x119   :  { %v772_v12 = vpop.permute.xlu1 %771 }
 0x11a   :  { %v1259_v19 = vsel %vm12323_vm8, %v1250_v17, %v772_v12 }
 0x121   :  { %v1230_v61 = vpop.permute.xlu2 %1229 }
 0x122   :  { %v1303_v53 = vsel %vm1297_vm13, %v1294_v11, %v1230_v61 }
 0x123   :  { %7158 = vmatmul.msk.f32.gmra.mxu0 %vm1309_vm14, %v1303_v53 }
 0x124   :  { %v992_v9 = vpop.permute.xlu0 %991 }
 0x127   :  { %v1072_v48 = vpop.permute.xlu1 %1071 }
 0x12c   :  { %v912_v42 = vpop.permute.xlu2 %911 }
 0x12d   :  { %v1268_v24 = vsel %vm1261_vm9, %v1259_v19, %v912_v42 }
 0x12e   :  { %v1277_v62 = vsel %vm12344_vm10, %v1268_v24, %v992_v9 }
 0x12f   :  { %v1286_v34 = vsel %vm1279_vm11, %v1277_v62, %v1072_v48 }
 0x134   :  { %v1232_v31 = vpop.permute.xlu0 %1231 }
 0x136   :  { %v634_v39 = vpop.permute.xlu1 %633 }
 0x137   :  { %v1152_v59 = vpop.permute.xlu2 %1151  ;;  %v1251_v29 = vsel %vm1243_vm7, %v494_v44, %v634_v39 }
 0x138   :  { %v1295_v25 = vsel %vm1288_vm12, %v1286_v34, %v1152_v59 }
 0x139   :  { %v1304_v16 = vsel %vm1297_vm13, %v1295_v25, %v1232_v31 }
 0x13a   :  { %7159 = vmatmul.msk.f32.gmra.mxu0 %vm1309_vm14, %v1304_v16 }
 0x13e   :  { %v914_v40 = vpop.permute.xlu0 %913 }
 0x13f   :  { %v774_v60 = vpop.permute.xlu2 %773 }
 0x140   :  { %v1260_v26 = vsel %vm12323_vm8, %v1251_v29, %v774_v60 }
 0x141   :  { %v1269_v27 = vsel %vm1261_vm9, %v1260_v26, %v914_v40 }
 0x142   :  { %v1351_v57 = vpop.f32.mrf.mxu0 }
 0x143   :  { %v994_v51 = vpop.permute.xlu1 %993  ;;  %v1352_v3 = vadd.f32 %v7352_v10, %v1351_v57 }
 0x144   :  { %v1278_v1 = vsel %vm12344_vm10, %v1269_v27, %v994_v51 }
 0x145   :  { %v1375_v32 = vmax.f32 %v1352_v3, 0.0 }
 0x147   :  { %v1074_v46 = vpop.permute.xlu2 %1073 }
 0x148   :  { %v1287_v50 = vsel %vm1279_vm11, %v1278_v1, %v1074_v46 }
 0x149   :  { %v1154_v8 = vpop.permute.xlu0 %1153 }
 0x14a   :  { %v1296_v13 = vsel %vm1288_vm12, %v1287_v50, %v1154_v8 }
 0x14b   :  { %v1234_v36 = vpop.permute.xlu1 %1233 }
 0x14c   :  { %v1305_v23 = vsel %vm1297_vm13, %v1296_v13, %v1234_v36 }
 0x14d   :  { %7160 = vmatmul.msk.f32.gmra.mxu0 %vm1309_vm14, %v1305_v23 }
 0x155   :  { %7161 = vmatmul.msk.f32.vlgmr.msrb.gmra.mxu0 %vm12344_vm10, %v1375_v32 }
 0x156   :  { %v1354_v43 = vpop.f32.mrf.mxu0 }
 0x157   :  { %v1355_v20 = vadd.f32 %v7352_v10, %v1354_v43 }
 0x159   :  { %v1376_v28 = vmax.f32 %v1355_v20, 0.0 }
 0x15b   :  { %7162 = vmatmul.msk.f32.vlgmr.msra.gmra.mxu1 %vm12344_vm10, %v1376_v28 }
 0x160   :  { %v1357_v58 = vpop.f32.mrf.mxu0 }
 0x161   :  { %v1358_v45 = vadd.f32 %v7352_v10, %v1357_v58 }
 0x163   :  { %v1377_v21 = vmax.f32 %v1358_v45, 0.0 }
 0x165   :  { %7163 = vmatmul.msk.f32.gmra.mxu1 %vm12344_vm10, %v1377_v21 }
 0x16a   :  { %v1360_v55 = vpop.f32.mrf.mxu0 }
 0x16b   :  { %v1361_v41 = vadd.f32 %v7352_v10, %v1360_v55 }
 0x16d   :  { %v1378_v0 = vmax.f32 %v1361_v41, 0.0 }
 0x16f   :  { %7164 = vmatmul.msk.f32.gmra.mxu1 %vm12344_vm10, %v1378_v0 }
 0x17f   :  { %v1363_v18 = vpop.f32.mrf.mxu0 }
 0x180   :  { %v1364_v22 = vadd.f32 %v7352_v10, %v1363_v18 }
 0x182   :  { %v1379_v52 = vmax.f32 %v1364_v22, 0.0 }
 0x184   :  { %7165 = vmatmul.msk.f32.gmra.mxu1 %vm12344_vm10, %v1379_v52 }
 0x1a0   :  { %v1366_v33 = vpop.f32.mrf.mxu0 }
 0x1a1   :  { %v1367_v47 = vadd.f32 %v7352_v10, %v1366_v33 }
 0x1a3   :  { %v1380_v35 = vmax.f32 %v1367_v47, 0.0 }
 0x1a5   :  { %7166 = vmatmul.msk.f32.gmra.mxu1 %vm12344_vm10, %v1380_v35 }
 0x1b7   :  { %v1369_v11 = vpop.f32.mrf.mxu0 }
 0x1b8   :  { %v1370_v54 = vadd.f32 %v7352_v10, %v1369_v11 }
 0x1ba   :  { %v1381_v14 = vmax.f32 %v1370_v54, 0.0 }
 0x1bc   :  { %7167 = vmatmul.msk.f32.gmra.mxu1 %vm12344_vm10, %v1381_v14 }
 0x1ca   :  { %v1372_v61 = vpop.f32.mrf.mxu0 }
 0x1cb   :  { %v1373_v53 = vadd.f32 %v7352_v10, %v1372_v61 }
 0x1cd   :  { %v1382_v38 = vmax.f32 %v1373_v53, 0.0 }
 0x1cf   :  { %7168 = vmatmul.msk.f32.gmra.mxu1 %vm12344_vm10, %v1382_v38 }
 0x1d2   :  { %v1427_v63 = vpop.f32.mrf.mxu0 }
 0x1d3   :  { %v9764_v12 = vadd.f32 %v9761_v5, %v1427_v63 }
 0x1d5   :  { %v7169_v6 = vmul.f32 -1.442695, %v9764_v12 }
 0x1d7   :  { %7369 = vpow2.f32 %v7169_v6 }
 0x1d8   :  { %v1430_v37 = vpop.f32.mrf.mxu1 }
 0x1d9   :  { %v9768_v17 = vadd.f32 %v9761_v5, %v1430_v37 }
 0x1db   :  { %v7170_v42 = vmul.f32 -1.442695, %v9768_v17 }
 0x1dd   :  { %7371 = vpow2.f32 %v7170_v42  ;;  %v7370_v2 = vpop.eup %7369 }
 0x1de   :  { %v1475_v19 = vadd.f32 1.0, %v7370_v2 }
 0x1e0   :  { %7373 = vrcp.f32 %v1475_v19  ;;  %v1494_v15 = vand.u32 2147483648, %v1475_v19  ;;  %v1492_v49 = vand.u32 2147483647, %v1475_v19  ;;  %vm1488_vm2 = vweird.f32 %v1475_v19 }
 0x1e2   :  { %v1433_v9 = vpop.f32.mrf.mxu1  ;;  %v1495_v16 = vor.u32 1.1754944e-38, %v1494_v15  ;;  %vm1493_vm6 = vcmp.eq.f32.partialorder %v1492_v49, 8.507059e+37 }
 0x1e3   :  { %v9772_v48 = vadd.f32 %v9761_v5, %v1433_v9  ;;  %v7372_v56 = vpop.eup %7371 }
 0x1e4   :  { %v1476_v62 = vadd.f32 1.0, %v7372_v56 }
 0x1e5   :  { %v7171_v24 = vmul.f32 -1.442695, %v9772_v48 }
 0x1e6   :  { %v7374_v30 = vpop.eup %7373  ;;  %v1509_v26 = vand.u32 2147483648, %v1476_v62  ;;  %v1507_v51 = vand.u32 2147483647, %v1476_v62  ;;  %vm1503_vm9 = vweird.f32 %v1476_v62 }
 0x1e7   :  { %7375 = vpow2.f32 %v7171_v24  ;;  %v1484_v7 = vmul.f32 %v7374_v30, %v1475_v19  ;;  %vm1489_vm15 = vweird.f32 %v7374_v30 }
 0x1e8   :  { %7377 = vrcp.f32 %v1476_v62  ;;  %vm1490_vm4 = vmor %vm1488_vm2, %vm1489_vm15  ;;  %v1510_v13 = vor.u32 1.1754944e-38, %v1509_v26  ;;  %vm1508_vm12 = vcmp.eq.f32.partialorder %v1507_v51, 8.507059e+37 }
 0x1e9   :  { %v1485_v59 = vsub.f32 1.0, %v1484_v7 }
 0x1eb   :  { %v1486_v31 = vmul.f32 %v7374_v30, %v1485_v59 }
 0x1ec   :  { %v1436_v1 = vpop.f32.mrf.mxu1 }
 0x1ed   :  { %v7376_v34 = vpop.eup %7375  ;;  %v1487_v39 = vadd.f32 %v7374_v30, %v1486_v31  ;;  %v9777_v50 = vadd.f32 %v9761_v5, %v1436_v1 }
 0x1ee   :  { %v7378_v4 = vpop.eup %7377  ;;  %v1477_v25 = vadd.f32 1.0, %v7376_v34 }
 0x1ef   :  { %v1499_v44 = vmul.f32 %v7378_v4, %v1476_v62  ;;  %v1491_v60 = vsel %vm1490_vm4, %v7374_v30, %v1487_v39  ;;  %vm1504_vm7 = vweird.f32 %v7378_v4  ;;  %v7172_v36 = vmul.f32 -1.442695, %v9777_v50 }
 0x1f0   :  { %7379 = vrcp.f32 %v1477_v25  ;;  %v1496_v40 = vsel %vm1493_vm6, %v1495_v16, %v1491_v60  ;;  %vm1505_vm11 = vmor %vm1503_vm9, %vm1504_vm7  ;;  %v1524_v32 = vand.u32 2147483648, %v1477_v25  ;;  %v1522_v20 = vand.u32 2147483647, %v1477_v25 }
 0x1f1   :  { %v1500_v29 = vsub.f32 1.0, %v1499_v44  ;;  %1611 = vrot.lane.b32.xlu2 %v1496_v40, %s7830_s27  ;;  %7381 = vpow2.f32 %v7172_v36  ;;  %vm1518_vm15 = vweird.f32 %v1477_v25 }
 0x1f2   :  { %v1525_v58 = vor.u32 1.1754944e-38, %v1524_v32  ;;  %vm1523_vm4 = vcmp.eq.f32.partialorder %v1522_v20, 8.507059e+37 }
 0x1f3   :  { %v1501_v27 = vmul.f32 %v7378_v4, %v1500_v29 }
 0x1f5   :  { %v1502_v46 = vadd.f32 %v7378_v4, %v1501_v27 }
 0x1f6   :  { %v7380_v8 = vpop.eup %7379 }
 0x1f7   :  { %v1506_v10 = vsel %vm1505_vm11, %v7378_v4, %v1502_v46  ;;  %v1514_v57 = vmul.f32 %v7380_v8, %v1477_v25  ;;  %vm1519_vm13 = vweird.f32 %v7380_v8  ;;  %v7382_v45 = vpop.eup %7381 }
 0x1f8   :  { %v1511_v23 = vsel %vm1508_vm12, %v1510_v13, %v1506_v10  ;;  %vm1520_vm2 = vmor %vm1518_vm15, %vm1519_vm13  ;;  %v1478_v55 = vadd.f32 1.0, %v7382_v45 }
 0x1f9   :  { %1613 = vrot.lane.b32.xlu0 %v1511_v23, %s7830_s27  ;;  %v1515_v3 = vsub.f32 1.0, %v1514_v57 }
 0x1fa   :  { %7383 = vrcp.f32 %v1478_v55  ;;  %v1539_v35 = vand.u32 2147483648, %v1478_v55  ;;  %v1537_v54 = vand.u32 2147483647, %v1478_v55  ;;  %vm1533_vm7 = vweird.f32 %v1478_v55 }
 0x1fb   :  { %v1516_v43 = vmul.f32 %v7380_v8, %v1515_v3 }
 0x1fc   :  { %v1540_v61 = vor.u32 1.1754944e-38, %v1539_v35  ;;  %vm1538_vm11 = vcmp.eq.f32.partialorder %v1537_v54, 8.507059e+37 }
 0x1fd   :  { %v1517_v28 = vadd.f32 %v7380_v8, %v1516_v43 }
 0x1ff   :  { %v1521_v21 = vsel %vm1520_vm2, %v7380_v8, %v1517_v28 }
 0x200   :  { %v1526_v41 = vsel %vm1523_vm4, %v1525_v58, %v1521_v21  ;;  %v7384_v0 = vpop.eup %7383 }
 0x201   :  { %1615 = vrot.lane.b32.xlu1 %v1526_v41, %s7830_s27  ;;  %v1439_v18 = vpop.f32.mrf.mxu1  ;;  %v1529_v22 = vmul.f32 %v7384_v0, %v1478_v55  ;;  %vm1534_vm6 = vweird.f32 %v7384_v0 }
 0x202   :  { %v9783_v52 = vadd.f32 %v9761_v5, %v1439_v18  ;;  %vm1535_vm9 = vmor %vm1533_vm7, %vm1534_vm6 }
 0x203   :  { %v1530_v33 = vsub.f32 1.0, %v1529_v22 }
 0x204   :  { %v7173_v47 = vmul.f32 -1.442695, %v9783_v52 }
 0x205   :  { %v1531_v11 = vmul.f32 %v7384_v0, %v1530_v33 }
 0x206   :  { %7385 = vpow2.f32 %v7173_v47 }
 0x207   :  { %v1532_v14 = vadd.f32 %v7384_v0, %v1531_v11 }
 0x209   :  { %v1536_v53 = vsel %vm1535_vm9, %v7384_v0, %v1532_v14 }
 0x20a   :  { %v1541_v38 = vsel %vm1538_vm11, %v1540_v61, %v1536_v53 }
 0x20b   :  { %1617 = vrot.lane.b32.xlu2 %v1541_v38, %s7830_s27 }
 0x20c   :  { %v7386_v63 = vpop.eup %7385 }
 0x20d   :  { %v1479_v6 = vadd.f32 1.0, %v7386_v63 }
 0x20f   :  { %7387 = vrcp.f32 %v1479_v6  ;;  %v1554_v19 = vand.u32 2147483648, %v1479_v6  ;;  %v1552_v56 = vand.u32 2147483647, %v1479_v6  ;;  %vm1548_vm13 = vweird.f32 %v1479_v6 }
 0x211   :  { %v1555_v62 = vor.u32 1.1754944e-38, %v1554_v19  ;;  %vm1553_vm2 = vcmp.eq.f32.partialorder %v1552_v56, 8.507059e+37 }
 0x215   :  { %v7388_v37 = vpop.eup %7387 }
 0x216   :  { %v1544_v42 = vmul.f32 %v7388_v37, %v1479_v6  ;;  %vm1549_vm12 = vweird.f32 %v7388_v37 }
 0x217   :  { %vm1550_vm15 = vmor %vm1548_vm13, %vm1549_vm12 }
 0x218   :  { %v1545_v2 = vsub.f32 1.0, %v1544_v42 }
 0x21a   :  { %v1546_v9 = vmul.f32 %v7388_v37, %v1545_v2 }
 0x21c   :  { %v1547_v24 = vadd.f32 %v7388_v37, %v1546_v9 }
 0x21e   :  { %v1551_v30 = vsel %vm1550_vm15, %v7388_v37, %v1547_v24 }
 0x21f   :  { %v1556_v59 = vsel %vm1553_vm2, %v1555_v62, %v1551_v30 }
 0x220   :  { %1619 = vrot.lane.b32.xlu0 %v1556_v59, %s7830_s27 }
 0x222   :  { %v1442_v7 = vpop.f32.mrf.mxu1 }
 0x223   :  { %v9788_v34 = vadd.f32 %v9761_v5, %v1442_v7 }
 0x225   :  { %v7174_v15 = vmul.f32 -1.442695, %v9788_v34 }
 0x227   :  { %7389 = vpow2.f32 %v7174_v15 }
 0x22d   :  { %v7390_v4 = vpop.eup %7389 }
 0x22e   :  { %v1480_v25 = vadd.f32 1.0, %v7390_v4 }
 0x230   :  { %7391 = vrcp.f32 %v1480_v25  ;;  %v1569_v60 = vand.u32 2147483648, %v1480_v25  ;;  %v1567_v40 = vand.u32 2147483647, %v1480_v25  ;;  %vm1563_vm6 = vweird.f32 %v1480_v25 }
 0x232   :  { %v1570_v51 = vor.u32 1.1754944e-38, %v1569_v60  ;;  %vm1568_vm9 = vcmp.eq.f32.partialorder %v1567_v40, 8.507059e+37 }
 0x236   :  { %v7392_v31 = vpop.eup %7391 }
 0x237   :  { %v1559_v44 = vmul.f32 %v7392_v31, %v1480_v25  ;;  %vm1564_vm4 = vweird.f32 %v7392_v31 }
 0x238   :  { %vm1565_vm7 = vmor %vm1563_vm6, %vm1564_vm4 }
 0x239   :  { %v1445_v49 = vpop.f32.mrf.mxu1  ;;  %v1560_v16 = vsub.f32 1.0, %v1559_v44 }
 0x23a   :  { %v9793_v39 = vadd.f32 %v9761_v5, %v1445_v49 }
 0x23b   :  { %v1561_v26 = vmul.f32 %v7392_v31, %v1560_v16 }
 0x23c   :  { %v7175_v29 = vmul.f32 -1.442695, %v9793_v39 }
 0x23d   :  { %v1562_v27 = vadd.f32 %v7392_v31, %v1561_v26 }
 0x23e   :  { %7393 = vpow2.f32 %v7175_v29 }
 0x23f   :  { %v1566_v1 = vsel %vm1565_vm7, %v7392_v31, %v1562_v27 }
 0x240   :  { %v1571_v46 = vsel %vm1568_vm9, %v1570_v51, %v1566_v1  ;;  %vm12325_vm9 = vcmask 195584  }
 0x241   :  { %1621 = vrot.lane.b32.xlu1 %v1571_v46, %s7830_s27 }
 0x244   :  { %v7394_v8 = vpop.eup %7393 }
 0x245   :  { %v1481_v13 = vadd.f32 1.0, %v7394_v8 }
 0x247   :  { %7395 = vrcp.f32 %v1481_v13  ;;  %v1584_v58 = vand.u32 2147483648, %v1481_v13  ;;  %v1582_v45 = vand.u32 2147483647, %v1481_v13  ;;  %vm1578_vm12 = vweird.f32 %v1481_v13 }
 0x249   :  { %v1585_v55 = vor.u32 1.1754944e-38, %v1584_v58  ;;  %vm1583_vm15 = vcmp.eq.f32.partialorder %v1582_v45, 8.507059e+37 }
 0x24b   :  { %v1612_v10 = vpop.permute.xlu2 %1611 }
 0x24c   :  { %v9798_v36 = vmul.f32 %v1612_v10, %v9764_v12  ;;  %v1448_v57 = vpop.f32.mrf.mxu1 }
 0x24d   :  { %v7396_v23 = vpop.eup %7395  ;;  %v9801_v3 = vadd.f32 %v9761_v5, %v1448_v57 }
 0x24e   :  { %v1654_v32 = vrot.slane %v9798_v36, 4  ;;  %1699 = vst [vmem:[#allocation1] ss:$9 sm:$0xff] %v9798_v36  ;;  %v1574_v20 = vmul.f32 %v7396_v23, %v1481_v13  ;;  %vm1579_vm11 = vweird.f32 %v7396_v23  ;;  %v1651_v49 = vrot.slane %v9798_v36, 1 }
 0x24f   :  { %v7176_v43 = vmul.f32 -1.442695, %v9801_v3  ;;  %vm1580_vm13 = vmor %vm1578_vm12, %vm1579_vm11  ;;  %v1652_v1 = vrot.slane %v9798_v36, 2  ;;  %v9901_v46 = vrot.slane %v9798_v36, 6  ;;  %vm12348_vm11 = vcmask 261120  }
 0x250   :  { %1701 = vst [vmem:[#allocation1 + $0x1] ss:$9 sm:$0xff] %v1654_v32  ;;  %v1575_v28 = vsub.f32 1.0, %v1574_v20  ;;  %vm1921_vm12 = vcmask 326656  }
 0x251   :  { %7397 = vpow2.f32 %v7176_v43  ;;  %12516 = vst [vmem:[#allocation10_spill] sm:$0xff] %v9901_v46 }
 0x252   :  { %v1576_v12 = vmul.f32 %v7396_v23, %v1575_v28 }
 0x254   :  { %v1577_v21 = vadd.f32 %v7396_v23, %v1576_v12 }
 0x256   :  { %v1581_v0 = vsel %vm1580_vm13, %v7396_v23, %v1577_v21  ;;  %vm12345_vm13 = vcmask 392192  }
 0x257   :  { %v7398_v5 = vpop.eup %7397  ;;  %v1586_v18 = vsel %vm1583_vm15, %v1585_v55, %v1581_v0  ;;  %v9946_v55 = vrot.slane %v9798_v36, 7  ;;  %vm1927_vm15 = vcmask 457728  }
 0x258   :  { %v1482_v41 = vadd.f32 1.0, %v7398_v5  ;;  %1623 = vrot.lane.b32.xlu2 %v1586_v18, %s7830_s27  ;;  %v1653_v5 = vrot.slane %v9798_v36, 3 }
 0x259   :  { %12521 = vst [vmem:[#allocation15_spill] sm:$0xff] %v9946_v55 }
 0x25a   :  { %7399 = vrcp.f32 %v1482_v41  ;;  %v1599_v47 = vand.u32 2147483648, %v1482_v41  ;;  %vm1593_vm2 = vweird.f32 %v1482_v41  ;;  %v1597_v11 = vand.u32 2147483647, %v1482_v41 }
 0x25c   :  { %v1600_v14 = vor.u32 1.1754944e-38, %v1599_v47  ;;  %vm1598_vm7 = vcmp.eq.f32.partialorder %v1597_v11, 8.507059e+37 }
 0x260   :  { %v7400_v22 = vpop.eup %7399 }
 0x261   :  { %v1589_v33 = vmul.f32 %v7400_v22, %v1482_v41  ;;  %vm1594_vm4 = vweird.f32 %v7400_v22 }
 0x262   :  { %vm1595_vm6 = vmor %vm1593_vm2, %vm1594_vm4  ;;  %vm1933_vm2 = vcmask 523264  }
 0x263   :  { %v1590_v35 = vsub.f32 1.0, %v1589_v33 }
 0x265   :  { %v1591_v54 = vmul.f32 %v7400_v22, %v1590_v35  ;;  %v1618_v37 = vpop.permute.xlu2 %1617 }
 0x266   :  { %v9818_v2 = vmul.f32 %v1618_v37, %v9777_v50 }
 0x267   :  { %v1592_v61 = vadd.f32 %v7400_v22, %v1591_v54 }
 0x268   :  { %12509 = vst [vmem:[#allocation2_spill] sm:$0xff] %v9818_v2  ;;  %v1675_v19 = vrot.slane %v9818_v2, 7  ;;  %v1672_v37 = vrot.slane %v9818_v2, 1 }
 0x269   :  { %v1596_v38 = vsel %vm1595_vm6, %v7400_v22, %v1592_v61 }
 0x26a   :  { %v1601_v6 = vsel %vm1598_vm7, %v1600_v14, %v1596_v38  ;;  %1711 = vst [vmem:[#allocation1 + $0x6] ss:$9 sm:$0xff] %v1675_v19 }
 0x26b   :  { %v1614_v53 = vpop.permute.xlu0 %1613  ;;  %1625 = vrot.lane.b32.xlu0 %v1601_v6, %s7830_s27 }
 0x26c   :  { %v9810_v63 = vmul.f32 %v1614_v53, %v9768_v17 }
 0x26e   :  { %12508 = vst [vmem:[#allocation4_spill] sm:$0xff] %v9810_v63  ;;  %v9814_v42 = vrot.slane %v9810_v63, 4  ;;  %v9870_v16 = vrot.slane %v9810_v63, 5  ;;  %v9906_v13 = vrot.slane %v9810_v63, 2  ;;  %v9909_v10 = vrot.slane %v9810_v63, 6 }
 0x26f   :  { %1703 = vst [vmem:[#allocation1 + $0x2] ss:$9 sm:$0xff] %v9810_v63  ;;  %v9951_v0 = vrot.slane %v9810_v63, 3  ;;  %v9954_v18 = vrot.slane %v9810_v63, 7 }
 0x270   :  { %1705 = vst [vmem:[#allocation1 + $0x3] ss:$9 sm:$0xff] %v9814_v42 }
 0x271   :  { %12514 = vst [vmem:[#allocation7_spill] sm:$0xff] %v9870_v16 }
 0x272   :  { %12517 = vst [vmem:[#allocation11_spill] sm:$0xff] %v9909_v10 }
 0x273   :  { %v1616_v9 = vpop.permute.xlu1 %1615  ;;  %12522 = vst [vmem:[#allocation16_spill] sm:$0xff] %v9954_v18 }
 0x274   :  { %v9823_v17 = vmul.f32 %v1616_v9, %v9772_v48 }
 0x276   :  { %12510 = vst [vmem:[#allocation5_spill] sm:$0xff] %v9823_v17  ;;  %v9826_v56 = vrot.slane %v9823_v17, 4  ;;  %v9874_v29 = vrot.slane %v9823_v17, 1  ;;  %v9878_v60 = vrot.slane %v9823_v17, 5  ;;  %v9913_v57 = vrot.slane %v9823_v17, 2 }
 0x277   :  { %1707 = vst [vmem:[#allocation1 + $0x4] ss:$9 sm:$0xff] %v9823_v17  ;;  %v9917_v23 = vrot.slane %v9823_v17, 6  ;;  %v9958_v22 = vrot.slane %v9823_v17, 3  ;;  %v9962_v33 = vrot.slane %v9823_v17, 7 }
 0x278   :  { %1709 = vst [vmem:[#allocation1 + $0x5] ss:$9 sm:$0xff] %v9826_v56 }
 0x279   :  { %12515 = vst [vmem:[#allocation9_spill] sm:$0xff] %v9878_v60 }
 0x27a   :  { %12518 = vst [vmem:[#allocation12_spill] sm:$0xff] %v9917_v23 }
 0x27b   :  { %12523 = vst [vmem:[#allocation17_spill] sm:$0xff] %v9962_v33 }
 0x292   :  { %v1620_v24 = vpop.permute.xlu0 %1619 }
 0x293   :  { %v9831_v50 = vmul.f32 %v1620_v24, %v9783_v52 }
 0x295   :  { %v1678_v62 = vrot.slane %v9831_v50, 3  ;;  %v9837_v30 = vrot.slane %v9831_v50, 7  ;;  %v9883_v26 = vrot.slane %v9831_v50, 4  ;;  %v1676_v43 = vrot.slane %v9831_v50, 1 }
 0x296   :  { %v9923_v20 = vrot.slane %v9831_v50, 5  ;;  %v1677_v47 = vrot.slane %v9831_v50, 2  ;;  %v9968_v35 = vrot.slane %v9831_v50, 6 }
 0x297   :  { %1713 = vst [vmem:[#allocation1 + $0x7] ss:$9 sm:$0xff] %v1678_v62 }
 0x29e   :  { %v9839_v48 = vld [vmem:[#allocation1] sm:$0xff] }
 0x29f   :  { %1715 = vst [vmem:[#allocation1] ss:$9 sm:$0xff] %v9837_v30 }
 0x2b2   :  { %v1624_v7 = vpop.permute.xlu2 %1623 }
 0x2b3   :  { %v9843_v59 = vmul.f32 %v1624_v7, %v9793_v39  ;;  %v1622_v15 = vpop.permute.xlu1 %1621  ;;  %v9867_v39 = vrot.slane %v9810_v63, 1 }
 0x2b4   :  { %v9846_v52 = vmul.f32 %v1622_v15, %v9788_v34  ;;  %v9862_v34 = vrot.slane %v9798_v36, 5 }
 0x2b5   :  { %v9849_v4 = vrot.slane %v9843_v59, 3  ;;  %v9894_v51 = vrot.slane %v9843_v59, 4  ;;  %v9934_v45 = vrot.slane %v9843_v59, 1  ;;  %v9939_v21 = vrot.slane %v9843_v59, 5 }
 0x2b6   :  { %12511 = vst [vmem:[#allocation3_spill] sm:$0xff] %v9846_v52  ;;  %v9853_v25 = vrot.slane %v9846_v52, 3  ;;  %v9856_v31 = vrot.slane %v9846_v52, 7  ;;  %v9889_v40 = vrot.slane %v9846_v52, 4  ;;  %v9928_v28 = vrot.slane %v9846_v52, 1 }
 0x2b7   :  { %12512 = vst [vmem:[#allocation8_spill] sm:$0xff] %v9849_v4  ;;  %v9931_v58 = vrot.slane %v9846_v52, 5  ;;  %v9973_v11 = vrot.slane %v9846_v52, 2  ;;  %v9976_v54 = vrot.slane %v9846_v52, 6  ;;  %v9979_v61 = vrot.slane %v9843_v59, 2 }
 0x2b8   :  { %1718 = vst [vmem:[#allocation1 + $0x3] ss:$9 sm:$0xff] %v9849_v4  ;;  %v9984_v53 = vrot.slane %v9843_v59, 6  ;;  %v12315_v36 = vrot.slane %v9843_v59, 7 }
 0x2b9   :  { %12513 = vst [vmem:[#allocation6_spill] sm:$0xff] %v9853_v25 }
 0x2ba   :  { %1716 = vst [vmem:[#allocation1 + $0x1] ss:$9 sm:$0xff] %v9853_v25 }
 0x2bb   :  { %1717 = vst [vmem:[#allocation1 + $0x2] ss:$9 sm:$0xff] %v9856_v31 }
 0x2bc   :  { %12519 = vst [vmem:[#allocation13_spill] sm:$0xff] %v9928_v28 }
 0x2bd   :  { %12520 = vst [vmem:[#allocation14_spill] sm:$0xff] %v9934_v45 }
 0x2be   :  { %12524 = vst [vmem:[#allocation18_spill] sm:$0xff] %v9973_v11 }
 0x2bf   :  { %12525 = vst [vmem:[#allocation19_spill] sm:$0xff] %v9979_v61 }
 0x2c2   :  { %v9864_v44 = vld [vmem:[#allocation1] sm:$0xff] }
 0x2c3   :  { %1722 = vst [vmem:[#allocation1] ss:$9 sm:$0xff] %v1651_v49  ;;  %v1674_v49 = vrot.slane %v9818_v2, 3 }
 0x2c4   :  { %1724 = vst [vmem:[#allocation1 + $0x1] ss:$9 sm:$0xff] %v9862_v34 }
 0x2c5   :  { %1726 = vst [vmem:[#allocation1 + $0x2] ss:$9 sm:$0xff] %v9867_v39 }
 0x2c6   :  { %1728 = vst [vmem:[#allocation1 + $0x3] ss:$9 sm:$0xff] %v9870_v16 }
 0x2c7   :  { %1730 = vst [vmem:[#allocation1 + $0x4] ss:$9 sm:$0xff] %v9874_v29 }
 0x2c8   :  { %1732 = vst [vmem:[#allocation1 + $0x5] ss:$9 sm:$0xff] %v9878_v60 }
 0x2c9   :  { %1734 = vst [vmem:[#allocation1 + $0x6] ss:$9 sm:$0xff] %v9831_v50 }
 0x2ca   :  { %1736 = vst [vmem:[#allocation1 + $0x7] ss:$9 sm:$0xff] %v9883_v26 }
 0x2d1   :  { %v1737_v27 = vld [vmem:[#allocation1] sm:$0xff] }
 0x2d2   :  { %1738 = vst [vmem:[#allocation1] ss:$9 sm:$0xff] %v9846_v52  ;;  %1743 = vrot.lane.b32.xlu1 %v1737_v27, %s7824_s9 }
 0x2d3   :  { %1739 = vst [vmem:[#allocation1 + $0x1] ss:$9 sm:$0xff] %v9889_v40 }
 0x2d4   :  { %1740 = vst [vmem:[#allocation1 + $0x2] ss:$9 sm:$0xff] %v9843_v59 }
 0x2d5   :  { %1741 = vst [vmem:[#allocation1 + $0x3] ss:$9 sm:$0xff] %v9894_v51 }
 0x2dc   :  { %v9903_v8 = vld [vmem:[#allocation1] sm:$0xff] }
 0x2dd   :  { %1749 = vst [vmem:[#allocation1] ss:$9 sm:$0xff] %v1652_v1  ;;  %v1626_v19 = vpop.permute.xlu0 %1625 }
 0x2de   :  { %1751 = vst [vmem:[#allocation1 + $0x1] ss:$9 sm:$0xff] %v9901_v46  ;;  %v1642_v24 = vmul.f32 %v1626_v19, %v9801_v3 }
 0x2df   :  { %1753 = vst [vmem:[#allocation1 + $0x2] ss:$9 sm:$0xff] %v9906_v13 }
 0x2e0   :  { %1755 = vst [vmem:[#allocation1 + $0x3] ss:$9 sm:$0xff] %v9909_v10  ;;  %v1697_v7 = vrot.slane %v1642_v24, 1  ;;  %v1698_v1 = vrot.slane %v1642_v24, 2 }
 0x2e1   :  { %1757 = vst [vmem:[#allocation1 + $0x4] ss:$9 sm:$0xff] %v9913_v57 }
 0x2e2   :  { %1759 = vst [vmem:[#allocation1 + $0x5] ss:$9 sm:$0xff] %v9917_v23 }
 0x2e3   :  { %1761 = vst [vmem:[#allocation1 + $0x6] ss:$9 sm:$0xff] %v1676_v43  ;;  %v178_v43 = vld [vmem:[%s7133_s15 + $0x38] sm:$0xff] }
 0x2e4   :  { %1763 = vst [vmem:[#allocation1 + $0x7] ss:$9 sm:$0xff] %v9923_v20  ;;  %1948 = vmatpush.msra.mxu2 %v178_v43 }
 0x2eb   :  { %v1764_v12 = vld [vmem:[#allocation1] sm:$0xff] }
 0x2ec   :  { %1765 = vst [vmem:[#allocation1] ss:$9 sm:$0xff] %v9928_v28  ;;  %1770 = vrot.lane.b32.xlu2 %v1764_v12, %s7831_s28  ;;  %v177_v12 = vld [vmem:[%s7133_s15 + $0x30] sm:$0xff] }
 0x2ed   :  { %1766 = vst [vmem:[#allocation1 + $0x1] ss:$9 sm:$0xff] %v9931_v58  ;;  %1949 = vmatpush.msra.mxu2 %v177_v12 }
 0x2ee   :  { %1767 = vst [vmem:[#allocation1 + $0x2] ss:$9 sm:$0xff] %v9934_v45 }
 0x2ef   :  { %1768 = vst [vmem:[#allocation1 + $0x3] ss:$9 sm:$0xff] %v9939_v21 }
 0x2f6   :  { %v9948_v41 = vld [vmem:[#allocation1] sm:$0xff] }
 0x2f7   :  { %1776 = vst [vmem:[#allocation1] ss:$9 sm:$0xff] %v1653_v5  ;;  %v176_v5 = vld [vmem:[%s7133_s15 + $0x28] sm:$0xff] }
 0x2f8   :  { %1778 = vst [vmem:[#allocation1 + $0x1] ss:$9 sm:$0xff] %v9946_v55  ;;  %1950 = vmatpush.msra.mxu2 %v176_v5 }
 0x2f9   :  { %1780 = vst [vmem:[#allocation1 + $0x2] ss:$9 sm:$0xff] %v9951_v0 }
 0x2fa   :  { %1782 = vst [vmem:[#allocation1 + $0x3] ss:$9 sm:$0xff] %v9954_v18 }
 0x2fb   :  { %1784 = vst [vmem:[#allocation1 + $0x4] ss:$9 sm:$0xff] %v9958_v22 }
 0x2fc   :  { %1786 = vst [vmem:[#allocation1 + $0x5] ss:$9 sm:$0xff] %v9962_v33 }
 0x2fd   :  { %1788 = vst [vmem:[#allocation1 + $0x6] ss:$9 sm:$0xff] %v1677_v47  ;;  %v174_v47 = vld [vmem:[%s7133_s15 + $0x18] sm:$0xff] }
 0x2fe   :  { %1790 = vst [vmem:[#allocation1 + $0x7] ss:$9 sm:$0xff] %v9968_v35 }
 0x305   :  { %v1791_v14 = vld [vmem:[#allocation1] sm:$0xff] }
 0x306   :  { %1792 = vst [vmem:[#allocation1] ss:$9 sm:$0xff] %v9973_v11  ;;  %1797 = vrot.lane.b32.xlu0 %v1791_v14, %s7832_s29  ;;  %v173_v14 = vld [vmem:[%s7133_s15 + $0x10] sm:$0xff] }
 0x307   :  { %1793 = vst [vmem:[#allocation1 + $0x1] ss:$9 sm:$0xff] %v9976_v54 }
 0x308   :  { %1794 = vst [vmem:[#allocation1 + $0x2] ss:$9 sm:$0xff] %v9979_v61 }
 0x309   :  { %1795 = vst [vmem:[#allocation1 + $0x3] ss:$9 sm:$0xff] %v9984_v53 }
 0x310   :  { %v9989_v38 = vld [vmem:[#allocation1] sm:$0xff] }
 0x311   :  { %1803 = vst [vmem:[#allocation1] ss:$9 sm:$0xff] %v1654_v32 }
 0x312   :  { %1805 = vst [vmem:[#allocation1 + $0x1] ss:$9 sm:$0xff] %v9810_v63 }
 0x313   :  { %1807 = vst [vmem:[#allocation1 + $0x2] ss:$9 sm:$0xff] %v9814_v42 }
 0x314   :  { %1809 = vst [vmem:[#allocation1 + $0x3] ss:$9 sm:$0xff] %v9823_v17 }
 0x315   :  { %1811 = vst [vmem:[#allocation1 + $0x4] ss:$9 sm:$0xff] %v9826_v56 }
 0x316   :  { %1813 = vst [vmem:[#allocation1 + $0x5] ss:$9 sm:$0xff] %v9818_v2 }
 0x317   :  { %1815 = vst [vmem:[#allocation1 + $0x6] ss:$9 sm:$0xff] %v1678_v62  ;;  %v1673_v62 = vrot.slane %v9818_v2, 2 }
 0x318   :  { %1817 = vst [vmem:[#allocation1 + $0x7] ss:$9 sm:$0xff] %v9837_v30 }
 0x31f   :  { %v1818_v6 = vld [vmem:[#allocation1] sm:$0xff] }
 0x320   :  { %1819 = vst [vmem:[#allocation1] ss:$9 sm:$0xff] %v9853_v25  ;;  %1824 = vrot.lane.b32.xlu1 %v1818_v6, %s7833_s30  ;;  %v171_v6 = vld [vmem:[%s7133_s15] sm:$0xff] }
 0x321   :  { %1820 = vst [vmem:[#allocation1 + $0x1] ss:$9 sm:$0xff] %v9856_v31 }
 0x322   :  { %1821 = vst [vmem:[#allocation1 + $0x2] ss:$9 sm:$0xff] %v9849_v4 }
 0x323   :  { %1822 = vst [vmem:[#allocation1 + $0x3] ss:$9 sm:$0xff] %v12315_v36 }
 0x32a   :  { %v1823_v32 = vld [vmem:[#allocation1] sm:$0xff] }
 0x32b   :  { %1830 = vst [vmem:[#allocation1] ss:$9 sm:$0xff] %v9862_v34 }
 0x32c   :  { %1832 = vst [vmem:[#allocation1 + $0x1] ss:$9 sm:$0xff] %v9867_v39 }
 0x32d   :  { %1834 = vst [vmem:[#allocation1 + $0x2] ss:$9 sm:$0xff] %v9870_v16 }
 0x32e   :  { %1836 = vst [vmem:[#allocation1 + $0x3] ss:$9 sm:$0xff] %v9874_v29 }
 0x32f   :  { %1838 = vst [vmem:[#allocation1 + $0x4] ss:$9 sm:$0xff] %v9878_v60 }
 0x330   :  { %1840 = vst [vmem:[#allocation1 + $0x5] ss:$9 sm:$0xff] %v1672_v37 }
 0x331   :  { %1842 = vst [vmem:[#allocation1 + $0x6] ss:$9 sm:$0xff] %v9883_v26 }
 0x332   :  { %1844 = vst [vmem:[#allocation1 + $0x7] ss:$9 sm:$0xff] %v9846_v52 }
 0x339   :  { %v1845_v9 = vld [vmem:[#allocation1] sm:$0xff] }
 0x33a   :  { %1846 = vst [vmem:[#allocation1] ss:$9 sm:$0xff] %v9889_v40  ;;  %1851 = vrot.lane.b32.xlu2 %v1845_v9, %s7834_s1 }
 0x33b   :  { %1847 = vst [vmem:[#allocation1 + $0x1] ss:$9 sm:$0xff] %v9843_v59 }
 0x33c   :  { %1848 = vst [vmem:[#allocation1 + $0x2] ss:$9 sm:$0xff] %v9894_v51 }
 0x33d   :  { %1849 = vst [vmem:[#allocation1 + $0x3] ss:$9 sm:$0xff] %v1642_v24 }
 0x342   :  { %1745 = vrot.lane.b32.xlu2 %v9903_v8, %s7824_s9 }
 0x344   :  { %v1850_v50 = vld [vmem:[#allocation1] sm:$0xff]  ;;  %v1744_v37 = vpop.permute.xlu1 %1743 }
 0x345   :  { %1857 = vst [vmem:[#allocation1] ss:$9 sm:$0xff] %v9901_v46  ;;  %v1911_v24 = vsel %vm12344_vm10, %v9839_v48, %v1744_v37 }
 0x346   :  { %1859 = vst [vmem:[#allocation1 + $0x1] ss:$9 sm:$0xff] %v9906_v13 }
 0x347   :  { %1861 = vst [vmem:[#allocation1 + $0x2] ss:$9 sm:$0xff] %v9909_v10 }
 0x348   :  { %1863 = vst [vmem:[#allocation1 + $0x3] ss:$9 sm:$0xff] %v9913_v57 }
 0x349   :  { %1865 = vst [vmem:[#allocation1 + $0x4] ss:$9 sm:$0xff] %v9917_v23 }
 0x34a   :  { %1867 = vst [vmem:[#allocation1 + $0x5] ss:$9 sm:$0xff] %v1673_v62  ;;  %1826 = vrot.lane.b32.xlu2 %v1823_v32, %s7833_s30  ;;  %v1771_v32 = vpop.permute.xlu2 %1770 }
 0x34b   :  { %1869 = vst [vmem:[#allocation1 + $0x6] ss:$9 sm:$0xff] %v9923_v20  ;;  %v1913_v62 = vsel %vm1309_vm14, %v1911_v24, %v1771_v32 }
 0x34c   :  { %1871 = vst [vmem:[#allocation1 + $0x7] ss:$9 sm:$0xff] %v9928_v28 }
 0x353   :  { %v1872_v3 = vld [vmem:[#allocation1] sm:$0xff] }
 0x354   :  { %1878 = vrot.lane.b32.xlu0 %v1872_v3, %s7835_s2  ;;  %1873 = vst [vmem:[#allocation1] ss:$9 sm:$0xff] %v9931_v58 }
 0x355   :  { %1874 = vst [vmem:[#allocation1 + $0x1] ss:$9 sm:$0xff] %v9934_v45 }
 0x356   :  { %1875 = vst [vmem:[#allocation1 + $0x2] ss:$9 sm:$0xff] %v9939_v21 }
 0x357   :  { %1876 = vst [vmem:[#allocation1 + $0x3] ss:$9 sm:$0xff] %v1697_v7 }
 0x35c   :  { %1772 = vrot.lane.b32.xlu0 %v9948_v41, %s7831_s28  ;;  %v175_v41 = vld [vmem:[%s7133_s15 + $0x20] sm:$0xff] }
 0x35d   :  { %1951 = vmatpush.msra.mxu2 %v175_v41 }
 0x35e   :  { %v1877_v15 = vld [vmem:[#allocation1] sm:$0xff] }
 0x35f   :  { %1884 = vst [vmem:[#allocation1] ss:$9 sm:$0xff] %v9946_v55  ;;  %1952 = vmatpush.msra.mxu2 %v174_v47 }
 0x360   :  { %1886 = vst [vmem:[#allocation1 + $0x1] ss:$9 sm:$0xff] %v9951_v0 }
 0x361   :  { %1888 = vst [vmem:[#allocation1 + $0x2] ss:$9 sm:$0xff] %v9954_v18  ;;  %1953 = vmatpush.msra.mxu2 %v173_v14 }
 0x362   :  { %1890 = vst [vmem:[#allocation1 + $0x3] ss:$9 sm:$0xff] %v9958_v22 }
 0x363   :  { %1892 = vst [vmem:[#allocation1 + $0x4] ss:$9 sm:$0xff] %v9962_v33 }
 0x364   :  { %1853 = vrot.lane.b32.xlu0 %v1850_v50, %s7834_s1  ;;  %1894 = vst [vmem:[#allocation1 + $0x5] ss:$9 sm:$0xff] %v1674_v49 }
 0x365   :  { %1896 = vst [vmem:[#allocation1 + $0x6] ss:$9 sm:$0xff] %v9968_v35 }
 0x366   :  { %1898 = vst [vmem:[#allocation1 + $0x7] ss:$9 sm:$0xff] %v9973_v11 }
 0x36d   :  { %v1899_v27 = vld [vmem:[#allocation1] sm:$0xff] }
 0x36e   :  { %1905 = vrot.lane.b32.xlu1 %v1899_v27, %s7836_s3  ;;  %1900 = vst [vmem:[#allocation1] ss:$9 sm:$0xff] %v9976_v54 }
 0x36f   :  { %1901 = vst [vmem:[#allocation1 + $0x1] ss:$9 sm:$0xff] %v9979_v61 }
 0x370   :  { %1902 = vst [vmem:[#allocation1 + $0x2] ss:$9 sm:$0xff] %v9984_v53 }
 0x371   :  { %1903 = vst [vmem:[#allocation1 + $0x3] ss:$9 sm:$0xff] %v1698_v1 }
 0x376   :  { %1799 = vrot.lane.b32.xlu1 %v9989_v38, %s7832_s29  ;;  %v172_v38 = vld [vmem:[%s7133_s15 + $0x8] sm:$0xff]  ;;  %s7840_s29 = smov 22  }
 0x377   :  { %1954 = vmatpush.msra.mxu2 %v172_v38  ;;  %s7139_s5 = sld [smem:[%s12206_s0 + %s7840_s29]]   ;;  %s7849_s29 = smov 17  }
 0x378   :  { %v1904_v8 = vld [vmem:[#allocation1] sm:$0xff]  ;;  %v1798_v19 = vpop.permute.xlu0 %1797 }
 0x379   :  { %1907 = vrot.lane.b32.xlu2 %v1904_v8, %s7836_s3  ;;  %1955 = vmatpush.msra.mxu2 %v171_v6  ;;  %v1916_v3 = vsel %vm12325_vm9, %v1913_v62, %v1798_v19  ;;  %v7354_v62 = vld [vmem:[%s10053_s12] ss:$0 sm:$0xff]  ;;  %s7843_s12 = smov 21  }
 0x37a   :  { %s10125_s15 = sld [smem:[%s12206_s0 + %s7843_s12]]   ;;  %s7850_s12 = smov 30  }
 0x37e   :  { %1880 = vrot.lane.b32.xlu1 %v1877_v15, %s7835_s2  ;;  %s7140_s2 = sld [smem:[%s12206_s0 + %s7839_s25]]   ;;  %s7848_s25 = smov 18  }
 0x392   :  { %v1825_v50 = vpop.permute.xlu1 %1824 }
 0x393   :  { %v1919_v15 = vsel %vm12348_vm11, %v1916_v3, %v1825_v50  ;;  %v169_v50 = vld [vmem:[%s7132_s22] sm:$0xff] }
 0x394   :  { %v1852_v9 = vpop.permute.xlu2 %1851 }
 0x395   :  { %v1922_v27 = vsel %vm1921_vm12, %v1919_v15, %v1852_v9 }
 0x39c   :  { %v1746_v49 = vpop.permute.xlu2 %1745 }
 0x39d   :  { %v1912_v12 = vsel %vm12344_vm10, %v9864_v44, %v1746_v49  ;;  %v170_v44 = vld [vmem:[%s7132_s22 + $0x8] sm:$0xff]  ;;  %s7847_s22 = smov 19  }
 0x39e   :  { %1988 = vmatpush.msra.mxu3 %v170_v44 }
 0x3a0   :  { %1989 = vmatpush.msra.mxu3 %v169_v50 }
 0x3a4   :  { %v1827_v41 = vpop.permute.xlu2 %1826 }
 0x3c6   :  { %v1879_v7 = vpop.permute.xlu0 %1878 }
 0x3c7   :  { %v1925_v1 = vsel %vm12345_vm13, %v1922_v27, %v1879_v7 }
 0x3ce   :  { %v1773_v43 = vpop.permute.xlu0 %1772 }
 0x3cf   :  { %v1914_v47 = vsel %vm1309_vm14, %v1912_v12, %v1773_v43  ;;  %v10099_v43 = vld [vmem:[%s7140_s2 + $0x8] sm:$0xff]  ;;  %v189_v12 = vld [vmem:[%s7141_s24] sm:$0xff] }
 0x3d0   :  { %2112 = vmatpush.msrb.mxu2 %v10099_v43 }
 0x3d3   :  { %v1908_v19 = vpop.permute.xlu2 %1907 }
 0x3d6   :  { %v1854_v6 = vpop.permute.xlu0 %1853 }
 0x3e0   :  { %v1906_v48 = vpop.permute.xlu1 %1905 }
 0x3e1   :  { %v1928_v8 = vsel %vm1927_vm15, %v1925_v1, %v1906_v48  ;;  %v10097_v48 = vld [vmem:[%s7131_s18] ss:$0 sm:$0xff]  ;;  %s7846_s18 = smov 20  }
 0x3e2   :  { %7177 = vmatmul.msk.f32.vlgmr.msra.gmra.mxu2 %vm1933_vm2, %v1928_v8  ;;  %v190_v8 = vld [vmem:[%s7141_s24 + $0x8] sm:$0xff]  ;;  %s7137_s21 = sld [smem:[%s12206_s0 + %s7846_s18]]   ;;  %s7851_s18 = smov 31  }
 0x3e3   :  { %2076 = vmatpush.msrb.mxu3 %v190_v8  ;;  %v10128_v8 = vld [vmem:[%s7139_s5] ss:$0 sm:$0xff]  ;;  %s7136_s24 = sld [smem:[%s12206_s0 + %s7847_s22]]  }
 0x3e4   :  { %s7134_s5 = sld [smem:[%s12206_s0 + %s7849_s29]]   ;;  %s7864_s29 = smov 7  }
 0x3e5   :  { %2077 = vmatpush.msrb.mxu3 %v189_v12  ;;  %s11087_s22 = sld [smem:[%s12206_s0 + %s7860_s8]]  }
 0x3e8   :  { %v1800_v5 = vpop.permute.xlu1 %1799 }
 0x3e9   :  { %v1917_v14 = vsel %vm12325_vm9, %v1914_v47, %v1800_v5 }
 0x3ea   :  { %v1920_v38 = vsel %vm12348_vm11, %v1917_v14, %v1827_v41  ;;  %v10102_v41 = vld [vmem:[%s7140_s2] sm:$0xff]  ;;  %s7135_s2 = sld [smem:[%s12206_s0 + %s7848_s25]]  }
 0x3eb   :  { %v1923_v32 = vsel %vm1921_vm12, %v1920_v38, %v1854_v6  ;;  %2113 = vmatpush.msrb.mxu2 %v10102_v41 }
 0x3ed   :  { %2347 = vmatpush.msra.mxu2 %v10099_v43 }
 0x3ef   :  { %2348 = vmatpush.msra.mxu2 %v10102_v41 }
 0x3f0   :  { %v1881_v37 = vpop.permute.xlu1 %1880 }
 0x3f1   :  { %v1926_v9 = vsel %vm12345_vm13, %v1923_v32, %v1881_v37 }
 0x3f2   :  { %v1929_v24 = vsel %vm1927_vm15, %v1926_v9, %v1908_v19 }
 0x3f3   :  { %7178 = vmatmul.msk.f32.gmra.mxu2 %vm1933_vm2, %v1929_v24 }
 0x465   :  { %v1957_v3 = vpop.f32.mrf.mxu2 }
 0x466   :  { %v1958_v7 = vadd.f32 %v7354_v62, %v1957_v3 }
 0x468   :  { %v1963_v15 = vmax.f32 %v1958_v7, 0.0 }
 0x46a   :  { %7179 = vmatmul.msk.f32.vlgmr.msra.gmra.mxu3 %vm1309_vm14, %v1963_v15  ;;  %v12316_v15 = vmov 0.0  }
 0x46b   :  { %2228 = vmatpush.msra.mxu3 %v10099_v43  ;;  %2114 = vmatmul.f32.vlgmr.msrb.gmra.mxu2 %v12316_v15 }
 0x46c   :  { %2583 = vmatpush.msrb.mxu2 %v10099_v43 }
 0x46d   :  { %2229 = vmatpush.msra.mxu3 %v10102_v41 }
 0x46e   :  { %2584 = vmatpush.msrb.mxu2 %v10102_v41 }
 0x476   :  { %v1960_v49 = vpop.f32.mrf.mxu2 }
 0x477   :  { %v1961_v27 = vadd.f32 %v7354_v62, %v1960_v49 }
 0x479   :  { %v1964_v1 = vmax.f32 %v1961_v27, 0.0 }
 0x47b   :  { %7180 = vmatmul.msk.f32.gmra.mxu3 %vm1309_vm14, %v1964_v1 }
 0x4ed   :  { %v1991_v5 = vpop.f32.mrf.mxu3 }
 0x4ee   :  { %v1992_v47 = vadd.f32 %v10097_v48, %v1991_v5  ;;  %v2115_v12 = vpop.f32.mrf.mxu2  ;;  %v10131_v5 = vld [vmem:[%s10125_s15] ss:$0 sm:$0xff] }
 0x4f0   :  { %v7181_v14 = vmul.f32 -1.442695, %v1992_v47 }
 0x4f2   :  { %7401 = vpow2.f32 %v7181_v14 }
 0x4f8   :  { %v7402_v38 = vpop.eup %7401 }
 0x4f9   :  { %v2003_v6 = vadd.f32 1.0, %v7402_v38  ;;  %v2119_v38 = vrot.slane %v2115_v12, 1 }
 0x4fb   :  { %7403 = vrcp.f32 %v2003_v6  ;;  %v2016_v9 = vand.u32 2147483648, %v2003_v6  ;;  %v2014_v44 = vand.u32 2147483647, %v2003_v6  ;;  %vm2010_vm6 = vweird.f32 %v2003_v6 }
 0x4fd   :  { %v2017_v62 = vor.u32 1.1754944e-38, %v2016_v9  ;;  %vm2015_vm12 = vcmp.eq.f32.partialorder %v2014_v44, 8.507059e+37 }
 0x4fe   :  { %v1994_v1 = vpop.f32.mrf.mxu3 }
 0x501   :  { %v7404_v32 = vpop.eup %7403 }
 0x502   :  { %v2006_v37 = vmul.f32 %v7404_v32, %v2003_v6  ;;  %vm2011_vm4 = vweird.f32 %v7404_v32 }
 0x503   :  { %vm2012_vm7 = vmor %vm2010_vm6, %vm2011_vm4 }
 0x504   :  { %v2007_v19 = vsub.f32 1.0, %v2006_v37  ;;  %v10139_v37 = vrot.slane %v10131_v5, 1 }
 0x506   :  { %v2008_v24 = vmul.f32 %v7404_v32, %v2007_v19 }
 0x508   :  { %v2009_v50 = vadd.f32 %v7404_v32, %v2008_v24 }
 0x50a   :  { %v2013_v3 = vsel %vm2012_vm7, %v7404_v32, %v2009_v50 }
 0x50b   :  { %v2018_v7 = vsel %vm2015_vm12, %v2017_v62, %v2013_v3  ;;  %v10148_v3 = vadd.f32 %v10097_v48, %v1994_v1 }
 0x50c   :  { %2037 = vrot.lane.b32.xlu0 %v2018_v7, %s7841_s11 }
 0x57e   :  { %v2038_v49 = vpop.permute.xlu0 %2037 }
 0x57f   :  { %v10117_v27 = vmul.f32 %v2038_v49, %v1992_v47  ;;  %v7182_v49 = vmul.f32 -1.442695, %v10148_v3 }
 0x581   :  { %7183 = vmatmul.msk.f32.vlgmr.msrb.gmra.mxu3 %vm1309_vm14, %v10117_v27 }
 0x582   :  { %2466 = vmatpush.msrb.mxu3 %v10099_v43 }
 0x584   :  { %2467 = vmatpush.msrb.mxu3 %v10102_v41 }
 0x604   :  { %v2079_v47 = vpop.f32.mrf.mxu3 }
 0x605   :  { %v10134_v14 = vadd.f32 %v10128_v8, %v2079_v47 }
 0x607   :  { %v12318_v6 = vrot.slane %v10134_v14, 6  ;;  %v2122_v32 = vadd.f32 %v2115_v12, %v10134_v14 }
 0x609   :  { %v2123_v19 = vadd.f32 %v2119_v38, %v12318_v6  ;;  %v2129_v9 = vadd.f32 %v10131_v5, %v2122_v32 }
 0x60b   :  { %v2130_v24 = vadd.f32 %v10139_v37, %v2123_v19  ;;  %7405 = vtanh.f32 %v2129_v9  ;;  %v7185_v38 = vmul.f32 -1.442695, %v2129_v9 }
 0x60d   :  { %7407 = vtanh.f32 %v2130_v24  ;;  %v7186_v62 = vmul.f32 -1.442695, %v2130_v24 }
 0x60f   :  { %7409 = vpow2.f32 %v7186_v62 }
 0x610   :  { %7411 = vpow2.f32 %v7182_v49 }
 0x611   :  { %v7406_v44 = vpop.eup %7405 }
 0x612   :  { %2175 = vrot.lane.b32.xlu1 %v7406_v44, %s7844_s16 }
 0x613   :  { %v7408_v50 = vpop.eup %7407 }
 0x614   :  { %2177 = vrot.lane.b32.xlu2 %v7408_v50, %s7844_s16 }
 0x615   :  { %v7410_v7 = vpop.eup %7409 }
 0x616   :  { %v2138_v12 = vadd.f32 1.0, %v7410_v7  ;;  %v7412_v47 = vpop.eup %7411 }
 0x617   :  { %v2004_v19 = vadd.f32 1.0, %v7412_v47 }
 0x618   :  { %7413 = vrcp.f32 %v2138_v12  ;;  %v2165_v6 = vand.u32 2147483648, %v2138_v12  ;;  %vm2159_vm2 = vweird.f32 %v2138_v12  ;;  %v2163_v7 = vand.u32 2147483647, %v2138_v12 }
 0x619   :  { %7415 = vpow2.f32 %v7185_v38  ;;  %vm2025_vm12 = vweird.f32 %v2004_v19 }
 0x61a   :  { %7417 = vrcp.f32 %v2004_v19  ;;  %v2166_v4 = vor.u32 1.1754944e-38, %v2165_v6  ;;  %vm2164_vm6 = vcmp.eq.f32.partialorder %v2163_v7, 8.507059e+37 }
 0x61e   :  { %v7414_v32 = vpop.eup %7413 }
 0x61f   :  { %v2155_v44 = vmul.f32 %v7414_v32, %v2138_v12  ;;  %v7416_v50 = vpop.eup %7415  ;;  %vm2160_vm15 = vweird.f32 %v7414_v32 }
 0x620   :  { %v7418_v24 = vpop.eup %7417  ;;  %v2137_v62 = vadd.f32 1.0, %v7416_v50  ;;  %vm2161_vm4 = vmor %vm2159_vm2, %vm2160_vm15  ;;  %v2029_v50 = vand.u32 2147483647, %v2004_v19 }
 0x621   :  { %v2156_v36 = vsub.f32 1.0, %v2155_v44  ;;  %v2021_v48 = vmul.f32 %v7418_v24, %v2004_v19  ;;  %vm2026_vm7 = vweird.f32 %v7418_v24 }
 0x622   :  { %7419 = vrcp.f32 %v2137_v62  ;;  %vm2027_vm8 = vmor %vm2025_vm12, %vm2026_vm7  ;;  %vm2030_vm15 = vcmp.eq.f32.partialorder %v2029_v50, 8.507059e+37 }
 0x623   :  { %v2157_v15 = vmul.f32 %v7414_v32, %v2156_v36  ;;  %v2022_v49 = vsub.f32 1.0, %v2021_v48 }
 0x625   :  { %v2158_v1 = vadd.f32 %v7414_v32, %v2157_v15  ;;  %v2023_v38 = vmul.f32 %v7418_v24, %v2022_v49  ;;  %v2031_v15 = vand.u32 2147483648, %v2004_v19 }
 0x627   :  { %v2162_v9 = vsel %vm2161_vm4, %v7414_v32, %v2158_v1  ;;  %v2024_v36 = vadd.f32 %v7418_v24, %v2023_v38  ;;  %v2032_v11 = vor.u32 1.1754944e-38, %v2031_v15  ;;  %vm2144_vm4 = vweird.f32 %v2137_v62 }
 0x628   :  { %v7420_v47 = vpop.eup %7419  ;;  %v2167_v44 = vsel %vm2164_vm6, %v2166_v4, %v2162_v9  ;;  %v2150_v4 = vand.u32 2147483648, %v2137_v62 }
 0x629   :  { %v2140_v25 = vmul.f32 %v7420_v47, %v2137_v62  ;;  %v2028_v48 = vsel %vm2027_vm8, %v7418_v24, %v2024_v36  ;;  %vm2145_vm2 = vweird.f32 %v7420_v47 }
 0x62a   :  { %v2033_v6 = vsel %vm2030_vm15, %v2032_v11, %v2028_v48  ;;  %vm2146_vm6 = vmor %vm2144_vm4, %vm2145_vm2  ;;  %v2151_v7 = vor.u32 1.1754944e-38, %v2150_v4 }
 0x62b   :  { %v2141_v12 = vsub.f32 1.0, %v2140_v25  ;;  %v2172_v25 = vmul.f32 0.0, %v2167_v44 }
 0x62d   :  { %v2142_v32 = vmul.f32 %v7420_v47, %v2141_v12 }
 0x62f   :  { %v2143_v1 = vadd.f32 %v7420_v47, %v2142_v32 }
 0x66e   :  { %v2178_v61 = vpop.permute.xlu2 %2177 }
 0x66f   :  { %v2182_v45 = vmul.f32 %v2178_v61, %v2167_v44  ;;  %v2148_v61 = vand.u32 2147483647, %v2137_v62 }
 0x671   :  { %2187 = vrot.lane.b32.xlu1 %v2182_v45, %s7831_s28  ;;  %v2147_v45 = vsel %vm2146_vm6, %v7420_v47, %v2143_v1  ;;  %vm2149_vm9 = vcmp.eq.f32.partialorder %v2148_v61, 8.507059e+37 }
 0x672   :  { %v2152_v19 = vsel %vm2149_vm9, %v2151_v7, %v2147_v45 }
 0x673   :  { %v2171_v62 = vmul.f32 0.0, %v2152_v19 }
 0x679   :  { %2039 = vrot.lane.b32.xlu1 %v2033_v6, %s7841_s11 }
 0x684   :  { %v2176_v49 = vpop.permute.xlu1 %2175 }
 0x685   :  { %v2181_v9 = vmul.f32 %v2176_v49, %v2152_v19 }
 0x687   :  { %2185 = vrot.lane.b32.xlu0 %v2181_v9, %s7831_s28 }
 0x6e3   :  { %v2188_v24 = vpop.permute.xlu1 %2187 }
 0x6e4   :  { %v10154_v11 = vadd.f32 %v2188_v24, %v2172_v25  ;;  %v10180_v25 = vrot.slane %v10131_v5, 7 }
 0x6e6   :  { %7421 = vtanh.f32 %v10154_v11 }
 0x6eb   :  { %v2040_v38 = vpop.permute.xlu1 %2039 }
 0x6ec   :  { %v7422_v36 = vpop.eup %7421  ;;  %v10158_v15 = vmul.f32 %v2040_v38, %v10148_v3 }
 0x6ed   :  { %2199 = vrot.lane.b32.xlu0 %v7422_v36, %s7833_s30 }
 0x6ee   :  { %7184 = vmatmul.msk.f32.gmra.mxu3 %vm1309_vm14, %v10158_v15 }
 0x6f9   :  { %v2186_v47 = vpop.permute.xlu0 %2185 }
 0x6fa   :  { %v10163_v50 = vadd.f32 %v2186_v47, %v2171_v62 }
 0x6fc   :  { %7423 = vtanh.f32 %v10163_v50 }
 0x702   :  { %v7424_v12 = vpop.eup %7423 }
 0x703   :  { %2197 = vrot.lane.b32.xlu2 %v7424_v12, %s7833_s30 }
 0x75d   :  { %v2198_v48 = vpop.permute.xlu2 %2197 }
 0x75e   :  { %v2203_v6 = vmul.f32 %v2198_v48, %v2152_v19  ;;  %v12526_v19 = vrot.slane %v10134_v14, 6 }
 0x75f   :  { %v2200_v32 = vpop.permute.xlu0 %2199 }
 0x760   :  { %v2204_v1 = vmul.f32 %v2200_v32, %v2167_v44  ;;  %v2207_v3 = vperm.slane %v2203_v6, 0 }
 0x762   :  { %v2208_v4 = vperm.slane %v2204_v1, 0 }
 0x764   :  { %v2209_v61 = vsel %vm434_vm0, %v2208_v4, %v2207_v3 }
 0x765   :  { %2210 = vrot.lane.b32.xlu2 %v2209_v61, %s7845_s17 }
 0x771   :  { %v10175_v7 = vpop.f32.mrf.mxu3 }
 0x7bf   :  { %v10169_v45 = vpop.permute.xlu2 %2210 }
 0x7c0   :  { %7187 = vmatmul.msk.f32.vlgmr.msra.gmra.mxu3 %vm1309_vm14, %v10169_v45 }
 0x7c1   :  { %2702 = vmatpush.msra.mxu3 %v10099_v43 }
 0x7c3   :  { %2703 = vmatpush.msra.mxu3 %v10102_v41 }
 0x843   :  { %v2231_v49 = vpop.f32.mrf.mxu3 }
 0x844   :  { %v2235_v44 = vrot.slane %v2231_v49, 7  ;;  %v2239_v9 = vadd.f32 %v2231_v49, %v12526_v19 }
 0x846   :  { %v2238_v24 = vadd.f32 %v2235_v44, %v10134_v14  ;;  %v2243_v38 = vadd.f32 %v10131_v5, %v2239_v9 }
 0x848   :  { %v2242_v36 = vadd.f32 %v10180_v25, %v2238_v24  ;;  %7425 = vtanh.f32 %v2243_v38  ;;  %v7189_v62 = vmul.f32 -1.442695, %v2243_v38 }
 0x84a   :  { %7427 = vtanh.f32 %v2242_v36  ;;  %v7188_v47 = vmul.f32 -1.442695, %v2242_v36 }
 0x84b   :  { %7429 = vpow2.f32 %v7189_v62 }
 0x84c   :  { %7431 = vpow2.f32 %v7188_v47 }
 0x84e   :  { %v7426_v43 = vpop.eup %7425 }
 0x84f   :  { %2296 = vrot.lane.b32.xlu1 %v7426_v43, %s7844_s16 }
 0x850   :  { %v7428_v41 = vpop.eup %7427 }
 0x851   :  { %2294 = vrot.lane.b32.xlu0 %v7428_v41, %s7844_s16  ;;  %v7430_v12 = vpop.eup %7429 }
 0x852   :  { %v7432_v48 = vpop.eup %7431  ;;  %v2251_v6 = vadd.f32 1.0, %v7430_v12 }
 0x853   :  { %v2250_v32 = vadd.f32 1.0, %v7432_v48 }
 0x854   :  { %7433 = vrcp.f32 %v2251_v6  ;;  %v2278_v38 = vand.u32 2147483648, %v2251_v6  ;;  %vm2272_vm9 = vweird.f32 %v2251_v6  ;;  %v2276_v36 = vand.u32 2147483647, %v2251_v6 }
 0x855   :  { %7435 = vrcp.f32 %v2250_v32  ;;  %v2263_v62 = vand.u32 2147483648, %v2250_v32  ;;  %vm2257_vm15 = vweird.f32 %v2250_v32  ;;  %v2261_v12 = vand.u32 2147483647, %v2250_v32 }
 0x856   :  { %v2279_v47 = vor.u32 1.1754944e-38, %v2278_v38  ;;  %vm2277_vm2 = vcmp.eq.f32.partialorder %v2276_v36, 8.507059e+37 }
 0x857   :  { %vm2262_vm6 = vcmp.eq.f32.partialorder %v2261_v12, 8.507059e+37 }
 0x85a   :  { %v7434_v1 = vpop.eup %7433 }
 0x85b   :  { %v7436_v3 = vpop.eup %7435  ;;  %v2268_v4 = vmul.f32 %v7434_v1, %v2251_v6  ;;  %vm2273_vm8 = vweird.f32 %v7434_v1 }
 0x85c   :  { %v2253_v61 = vmul.f32 %v7436_v3, %v2250_v32  ;;  %vm2274_vm7 = vmor %vm2272_vm9, %vm2273_vm8  ;;  %vm2258_vm12 = vweird.f32 %v7436_v3 }
 0x85d   :  { %v2269_v49 = vsub.f32 1.0, %v2268_v4  ;;  %vm2259_vm4 = vmor %vm2257_vm15, %vm2258_vm12 }
 0x85e   :  { %v2254_v44 = vsub.f32 1.0, %v2253_v61 }
 0x85f   :  { %v2270_v19 = vmul.f32 %v7434_v1, %v2269_v49 }
 0x860   :  { %v2255_v9 = vmul.f32 %v7436_v3, %v2254_v44  ;;  %v2264_v44 = vor.u32 1.1754944e-38, %v2263_v62 }
 0x861   :  { %v2271_v24 = vadd.f32 %v7434_v1, %v2270_v19 }
 0x862   :  { %v2256_v43 = vadd.f32 %v7436_v3, %v2255_v9 }
 0x863   :  { %v2275_v41 = vsel %vm2274_vm7, %v7434_v1, %v2271_v24  ;;  %v2286_v1 = vrot.slane %v10163_v50, 7 }
 0x864   :  { %v2280_v4 = vsel %vm2277_vm2, %v2279_v47, %v2275_v41  ;;  %v2260_v61 = vsel %vm2259_vm4, %v7436_v3, %v2256_v43  ;;  %v2287_v3 = vrot.slane %v10154_v11, 7 }
 0x865   :  { %v2265_v28 = vsel %vm2262_vm6, %v2264_v44, %v2260_v61 }
 0x866   :  { %v2290_v9 = vmul.f32 %v2286_v1, %v2265_v28  ;;  %v2291_v36 = vmul.f32 %v2287_v3, %v2280_v4 }
 0x8c1   :  { %v2297_v48 = vpop.permute.xlu1 %2296 }
 0x8c2   :  { %v2301_v49 = vmul.f32 %v2297_v48, %v2280_v4 }
 0x8c3   :  { %v2295_v19 = vpop.permute.xlu0 %2294 }
 0x8c4   :  { %2306 = vrot.lane.b32.xlu0 %v2301_v49, %s7831_s28  ;;  %v2300_v6 = vmul.f32 %v2295_v19, %v2265_v28 }
 0x8c6   :  { %2304 = vrot.lane.b32.xlu2 %v2300_v6, %s7831_s28  ;;  %v2087_v6 = vrot.slane %v10134_v14, 2 }
 0x920   :  { %v2305_v24 = vpop.permute.xlu2 %2304 }
 0x921   :  { %v10190_v32 = vadd.f32 %v2305_v24, %v2290_v9 }
 0x923   :  { %7437 = vtanh.f32 %v10190_v32 }
 0x929   :  { %v7438_v38 = vpop.eup %7437 }
 0x92a   :  { %2316 = vrot.lane.b32.xlu1 %v7438_v38, %s7833_s30 }
 0x936   :  { %v2307_v43 = vpop.permute.xlu0 %2306 }
 0x937   :  { %v10195_v41 = vadd.f32 %v2307_v43, %v2291_v36 }
 0x939   :  { %7439 = vtanh.f32 %v10195_v41 }
 0x93f   :  { %v7440_v62 = vpop.eup %7439 }
 0x940   :  { %2318 = vrot.lane.b32.xlu2 %v7440_v62, %s7833_s30 }
 0x99a   :  { %v2319_v50 = vpop.permute.xlu2 %2318 }
 0x99b   :  { %v2323_v47 = vmul.f32 %v2319_v50, %v2280_v4  ;;  %v10208_v4 = vadd.f32 %v10128_v8, %v10175_v7 }
 0x99c   :  { %v2317_v12 = vpop.permute.xlu1 %2316 }
 0x99d   :  { %v2322_v48 = vmul.f32 %v2317_v12, %v2265_v28  ;;  %v2327_v61 = vperm.slane %v2323_v47, 1 }
 0x99f   :  { %v2326_v49 = vperm.slane %v2322_v48, 1 }
 0x9a1   :  { %v2328_v44 = vsel %vm434_vm0, %v2327_v61, %v2326_v49  ;;  %v10201_v19 = vsel %vm436_vm1, %v2327_v61, %v2326_v49 }
 0x9a2   :  { %2329 = vrot.lane.b32.xlu0 %v2328_v44, %s7845_s17 }
 0xa14   :  { %v2330_v11 = vpop.permute.xlu0 %2329 }
 0xa15   :  { %7190 = vmatmul.msk.f32.vlgmr.msra.gmra.mxu2 %vm1309_vm14, %v2330_v11 }
 0xa98   :  { %v2350_v1 = vpop.f32.mrf.mxu2 }
 0xa99   :  { %v2354_v28 = vrot.slane %v2350_v1, 1  ;;  %v2357_v9 = vadd.f32 %v2350_v1, %v2087_v6 }
 0xa9b   :  { %v2358_v24 = vadd.f32 %v2354_v28, %v10208_v4  ;;  %v2359_v38 = vadd.f32 %v10131_v5, %v2357_v9 }
 0xa9d   :  { %v2360_v3 = vadd.f32 %v2358_v24, %v10139_v37  ;;  %7441 = vtanh.f32 %v2359_v38  ;;  %v7191_v50 = vmul.f32 -1.442695, %v2359_v38 }
 0xa9f   :  { %7443 = vtanh.f32 %v2360_v3  ;;  %v7192_v8 = vmul.f32 -1.442695, %v2360_v3 }
 0xaa1   :  { %7445 = vpow2.f32 %v7192_v8 }
 0xaa3   :  { %v7442_v36 = vpop.eup %7441 }
 0xaa4   :  { %2413 = vrot.lane.b32.xlu1 %v7442_v36, %s7844_s16 }
 0xaa5   :  { %v7444_v43 = vpop.eup %7443 }
 0xaa6   :  { %2415 = vrot.lane.b32.xlu2 %v7444_v43, %s7844_s16 }
 0xaa7   :  { %v7446_v7 = vpop.eup %7445 }
 0xaa8   :  { %v2368_v62 = vadd.f32 1.0, %v7446_v7 }
 0xaaa   :  { %7447 = vrcp.f32 %v2368_v62  ;;  %v2395_v1 = vand.u32 2147483648, %v2368_v62  ;;  %vm2389_vm9 = vweird.f32 %v2368_v62  ;;  %v2393_v28 = vand.u32 2147483647, %v2368_v62 }
 0xaab   :  { %7449 = vpow2.f32 %v7191_v50 }
 0xaac   :  { %v2396_v24 = vor.u32 1.1754944e-38, %v2395_v1  ;;  %vm2394_vm12 = vcmp.eq.f32.partialorder %v2393_v28, 8.507059e+37  ;;  %v7194_v28 = vrot.slane %v10195_v41, 9 }
 0xab0   :  { %v7448_v47 = vpop.eup %7447 }
 0xab1   :  { %v2385_v12 = vmul.f32 %v7448_v47, %v2368_v62  ;;  %v7450_v61 = vpop.eup %7449  ;;  %vm2390_vm8 = vweird.f32 %v7448_v47 }
 0xab2   :  { %v2367_v49 = vadd.f32 1.0, %v7450_v61  ;;  %vm2391_vm7 = vmor %vm2389_vm9, %vm2390_vm8 }
 0xab3   :  { %v2386_v48 = vsub.f32 1.0, %v2385_v12 }
 0xab4   :  { %7451 = vrcp.f32 %v2367_v49  ;;  %vm2374_vm2 = vweird.f32 %v2367_v49  ;;  %v2378_v61 = vand.u32 2147483647, %v2367_v49 }
 0xab5   :  { %v2387_v44 = vmul.f32 %v7448_v47, %v2386_v48  ;;  %v2380_v48 = vand.u32 2147483648, %v2367_v49 }
 0xab6   :  { %vm2379_vm6 = vcmp.eq.f32.partialorder %v2378_v61, 8.507059e+37 }
 0xab7   :  { %v2388_v11 = vadd.f32 %v7448_v47, %v2387_v44  ;;  %v2381_v44 = vor.u32 1.1754944e-38, %v2380_v48 }
 0xab9   :  { %v2392_v9 = vsel %vm2391_vm7, %v7448_v47, %v2388_v11 }
 0xaba   :  { %v7452_v3 = vpop.eup %7451  ;;  %v2397_v38 = vsel %vm2394_vm12, %v2396_v24, %v2392_v9 }
 0xabb   :  { %v2370_v8 = vmul.f32 %v7452_v3, %v2367_v49  ;;  %vm2375_vm15 = vweird.f32 %v7452_v3  ;;  %v2410_v9 = vmul.f32 %v7194_v28, %v2397_v38  ;;  %v7193_v49 = vrot.slane %v10190_v32, 9 }
 0xabc   :  { %vm2376_vm4 = vmor %vm2374_vm2, %vm2375_vm15 }
 0xabd   :  { %v2371_v7 = vsub.f32 1.0, %v2370_v8 }
 0xabf   :  { %v2372_v50 = vmul.f32 %v7452_v3, %v2371_v7 }
 0xac1   :  { %v2373_v12 = vadd.f32 %v7452_v3, %v2372_v50 }
 0xac3   :  { %v2377_v62 = vsel %vm2376_vm4, %v7452_v3, %v2373_v12 }
 0xac4   :  { %v2382_v11 = vsel %vm2379_vm6, %v2381_v44, %v2377_v62 }
 0xac5   :  { %v2409_v3 = vmul.f32 %v7193_v49, %v2382_v11 }
 0xb00   :  { %v2416_v36 = vpop.permute.xlu2 %2415 }
 0xb01   :  { %v2420_v43 = vmul.f32 %v2416_v36, %v2397_v38 }
 0xb03   :  { %2425 = vrot.lane.b32.xlu1 %v2420_v43, %s7831_s28 }
 0xb16   :  { %v2414_v47 = vpop.permute.xlu1 %2413 }
 0xb17   :  { %v2419_v1 = vmul.f32 %v2414_v47, %v2382_v11 }
 0xb19   :  { %2423 = vrot.lane.b32.xlu0 %v2419_v1, %s7831_s28 }
 0xb75   :  { %v2426_v24 = vpop.permute.xlu1 %2425 }
 0xb76   :  { %v10220_v36 = vadd.f32 %v2426_v24, %v2410_v9 }
 0xb78   :  { %7453 = vtanh.f32 %v10220_v36 }
 0xb7e   :  { %v7454_v43 = vpop.eup %7453 }
 0xb7f   :  { %2437 = vrot.lane.b32.xlu0 %v7454_v43, %s7833_s30 }
 0xb8b   :  { %v2424_v8 = vpop.permute.xlu0 %2423 }
 0xb8c   :  { %v10225_v7 = vadd.f32 %v2424_v8, %v2409_v3 }
 0xb8e   :  { %7455 = vtanh.f32 %v10225_v7 }
 0xb94   :  { %v7456_v50 = vpop.eup %7455 }
 0xb95   :  { %2435 = vrot.lane.b32.xlu2 %v7456_v50, %s7833_s30 }
 0xbef   :  { %v2436_v41 = vpop.permute.xlu2 %2435 }
 0xbf0   :  { %v2441_v12 = vmul.f32 %v2436_v41, %v2382_v11 }
 0xbf1   :  { %v2438_v48 = vpop.permute.xlu0 %2437 }
 0xbf2   :  { %v2442_v61 = vmul.f32 %v2438_v48, %v2397_v38  ;;  %v2445_v62 = vperm.slane %v2441_v12, 0 }
 0xbf4   :  { %v2446_v44 = vperm.slane %v2442_v61, 0 }
 0xbf6   :  { %v2447_v47 = vsel %vm434_vm0, %v2446_v44, %v2445_v62 }
 0xbf7   :  { %2448 = vrot.lane.b32.xlu1 %v2447_v47, %s7845_s17 }
 0xc69   :  { %v10231_v32 = vpop.permute.xlu1 %2448 }
 0xc6a   :  { %7195 = vmatmul.msk.f32.vlgmr.msrb.gmra.mxu3 %vm1309_vm14, %v10231_v32 }
 0xced   :  { %v2469_v1 = vpop.f32.mrf.mxu3 }
 0xcee   :  { %v2473_v28 = vrot.slane %v2469_v1, 7  ;;  %v2477_v9 = vadd.f32 %v2469_v1, %v10208_v4 }
 0xcf0   :  { %v2476_v11 = vadd.f32 %v2473_v28, %v2087_v6  ;;  %v2479_v38 = vadd.f32 %v10131_v5, %v2477_v9 }
 0xcf2   :  { %v2478_v24 = vadd.f32 %v2476_v11, %v10180_v25  ;;  %7457 = vtanh.f32 %v2479_v38  ;;  %v7197_v41 = vmul.f32 -1.442695, %v2479_v38 }
 0xcf4   :  { %7459 = vtanh.f32 %v2478_v24  ;;  %v7196_v3 = vmul.f32 -1.442695, %v2478_v24 }
 0xcf6   :  { %7461 = vpow2.f32 %v7196_v3 }
 0xcf8   :  { %v7458_v43 = vpop.eup %7457 }
 0xcf9   :  { %2532 = vrot.lane.b32.xlu0 %v7458_v43, %s7844_s16 }
 0xcfa   :  { %v7460_v49 = vpop.eup %7459 }
 0xcfb   :  { %2530 = vrot.lane.b32.xlu2 %v7460_v49, %s7844_s16 }
 0xcfc   :  { %v7462_v8 = vpop.eup %7461 }
 0xcfd   :  { %v2486_v50 = vadd.f32 1.0, %v7462_v8 }
 0xcff   :  { %7463 = vrcp.f32 %v2486_v50  ;;  %v2499_v1 = vand.u32 2147483648, %v2486_v50  ;;  %vm2493_vm9 = vweird.f32 %v2486_v50  ;;  %v2497_v28 = vand.u32 2147483647, %v2486_v50 }
 0xd00   :  { %7465 = vpow2.f32 %v7197_v41 }
 0xd01   :  { %v2500_v11 = vor.u32 1.1754944e-38, %v2499_v1  ;;  %vm2498_vm12 = vcmp.eq.f32.partialorder %v2497_v28, 8.507059e+37  ;;  %v2523_v28 = vrot.slane %v10220_v36, 7 }
 0xd05   :  { %v7464_v12 = vpop.eup %7463 }
 0xd06   :  { %v2489_v6 = vmul.f32 %v7464_v12, %v2486_v50  ;;  %v7466_v61 = vpop.eup %7465  ;;  %vm2494_vm8 = vweird.f32 %v7464_v12 }
 0xd07   :  { %v2487_v62 = vadd.f32 1.0, %v7466_v61  ;;  %vm2495_vm7 = vmor %vm2493_vm9, %vm2494_vm8 }
 0xd08   :  { %v2490_v48 = vsub.f32 1.0, %v2489_v6 }
 0xd09   :  { %7467 = vrcp.f32 %v2487_v62  ;;  %vm2508_vm2 = vweird.f32 %v2487_v62  ;;  %v2512_v61 = vand.u32 2147483647, %v2487_v62 }
 0xd0a   :  { %v2491_v44 = vmul.f32 %v7464_v12, %v2490_v48  ;;  %v2514_v48 = vand.u32 2147483648, %v2487_v62 }
 0xd0b   :  { %vm2513_vm6 = vcmp.eq.f32.partialorder %v2512_v61, 8.507059e+37 }
 0xd0c   :  { %v2492_v47 = vadd.f32 %v7464_v12, %v2491_v44  ;;  %v2515_v44 = vor.u32 1.1754944e-38, %v2514_v48 }
 0xd0e   :  { %v2496_v9 = vsel %vm2495_vm7, %v7464_v12, %v2492_v47 }
 0xd0f   :  { %v7468_v24 = vpop.eup %7467  ;;  %v2501_v38 = vsel %vm2498_vm12, %v2500_v11, %v2496_v9  ;;  %v2522_v11 = vrot.slane %v10225_v7, 7 }
 0xd10   :  { %v2504_v3 = vmul.f32 %v7468_v24, %v2487_v62  ;;  %vm2509_vm15 = vweird.f32 %v7468_v24 }
 0xd11   :  { %vm2510_vm4 = vmor %vm2508_vm2, %vm2509_vm15 }
 0xd12   :  { %v2505_v8 = vsub.f32 1.0, %v2504_v3  ;;  %v2526_v3 = vmul.f32 %v2522_v11, %v2501_v38  ;;  %v12328_v11 = vrot.slane %v10208_v4, 2 }
 0xd14   :  { %v2506_v41 = vmul.f32 %v7468_v24, %v2505_v8 }
 0xd16   :  { %v2507_v6 = vadd.f32 %v7468_v24, %v2506_v41 }
 0xd18   :  { %v2511_v50 = vsel %vm2510_vm4, %v7468_v24, %v2507_v6 }
 0xd19   :  { %v2516_v47 = vsel %vm2513_vm6, %v2515_v44, %v2511_v50 }
 0xd1a   :  { %v2527_v9 = vmul.f32 %v2523_v28, %v2516_v47  ;;  %v12327_v28 = vrot.slane %v10134_v14, 4 }
 0xd55   :  { %v2531_v43 = vpop.permute.xlu2 %2530 }
 0xd56   :  { %v2536_v49 = vmul.f32 %v2531_v43, %v2501_v38 }
 0xd58   :  { %2540 = vrot.lane.b32.xlu1 %v2536_v49, %s7831_s28 }
 0xd6b   :  { %v2533_v12 = vpop.permute.xlu0 %2532 }
 0xd6c   :  { %v2537_v1 = vmul.f32 %v2533_v12, %v2516_v47 }
 0xd6e   :  { %2542 = vrot.lane.b32.xlu2 %v2537_v1, %s7831_s28 }
 0xdc8   :  { %v2543_v43 = vpop.permute.xlu2 %2542 }
 0xdc9   :  { %v10246_v49 = vadd.f32 %v2543_v43, %v2527_v9 }
 0xdca   :  { %v2541_v62 = vpop.permute.xlu1 %2540 }
 0xdcb   :  { %7469 = vtanh.f32 %v10246_v49  ;;  %v10249_v24 = vadd.f32 %v2541_v62, %v2526_v3 }
 0xdcd   :  { %7471 = vtanh.f32 %v10249_v24 }
 0xdd1   :  { %v7470_v8 = vpop.eup %7469 }
 0xdd2   :  { %2554 = vrot.lane.b32.xlu1 %v7470_v8, %s7833_s30 }
 0xdd3   :  { %v7472_v41 = vpop.eup %7471 }
 0xdd4   :  { %2552 = vrot.lane.b32.xlu0 %v7472_v41, %s7833_s30 }
 0xe44   :  { %v2555_v36 = vpop.permute.xlu1 %2554 }
 0xe45   :  { %v2559_v6 = vmul.f32 %v2555_v36, %v2516_v47 }
 0xe46   :  { %v2553_v7 = vpop.permute.xlu0 %2552 }
 0xe47   :  { %v2558_v48 = vmul.f32 %v2553_v7, %v2501_v38  ;;  %v2563_v61 = vperm.slane %v2559_v6, 1 }
 0xe49   :  { %v2562_v50 = vperm.slane %v2558_v48, 1 }
 0xe4b   :  { %v2564_v44 = vsel %vm434_vm0, %v2563_v61, %v2562_v50  ;;  %v10256_v12 = vsel %vm436_vm1, %v2563_v61, %v2562_v50 }
 0xe4c   :  { %2565 = vrot.lane.b32.xlu2 %v2564_v44, %s7845_s17 }
 0xea6   :  { %v2566_v1 = vpop.permute.xlu2 %2565 }
 0xea7   :  { %7198 = vmatmul.msk.f32.vlgmr.msrb.gmra.mxu2 %vm1309_vm14, %v2566_v1 }
 0xf2a   :  { %v2586_v9 = vpop.f32.mrf.mxu2 }
 0xf2b   :  { %v2590_v47 = vrot.slane %v2586_v9, 1  ;;  %v2593_v38 = vadd.f32 %v2586_v9, %v12327_v28 }
 0xf2d   :  { %v2594_v43 = vadd.f32 %v2590_v47, %v12328_v11  ;;  %v2595_v3 = vadd.f32 %v10131_v5, %v2593_v38 }
 0xf2f   :  { %v2596_v62 = vadd.f32 %v2594_v43, %v10139_v37  ;;  %7473 = vtanh.f32 %v2595_v3  ;;  %v7199_v36 = vmul.f32 -1.442695, %v2595_v3 }
 0xf31   :  { %7475 = vtanh.f32 %v2596_v62  ;;  %v7200_v6 = vmul.f32 -1.442695, %v2596_v62 }
 0xf32   :  { %7477 = vpow2.f32 %v7199_v36 }
 0xf33   :  { %7479 = vpow2.f32 %v7200_v6 }
 0xf35   :  { %v7474_v8 = vpop.eup %7473 }
 0xf36   :  { %2649 = vrot.lane.b32.xlu0 %v7474_v8, %s7844_s16 }
 0xf37   :  { %v7476_v41 = vpop.eup %7475 }
 0xf38   :  { %2651 = vrot.lane.b32.xlu1 %v7476_v41, %s7844_s16  ;;  %v7478_v7 = vpop.eup %7477 }
 0xf39   :  { %v7480_v48 = vpop.eup %7479  ;;  %v2603_v61 = vadd.f32 1.0, %v7478_v7 }
 0xf3a   :  { %v2604_v50 = vadd.f32 1.0, %v7480_v48 }
 0xf3b   :  { %7481 = vrcp.f32 %v2603_v61  ;;  %v2616_v3 = vand.u32 2147483648, %v2603_v61  ;;  %vm2610_vm9 = vweird.f32 %v2603_v61  ;;  %v2614_v62 = vand.u32 2147483647, %v2603_v61 }
 0xf3c   :  { %7483 = vrcp.f32 %v2604_v50  ;;  %v2631_v6 = vand.u32 2147483648, %v2604_v50  ;;  %vm2625_vm15 = vweird.f32 %v2604_v50  ;;  %v2629_v48 = vand.u32 2147483647, %v2604_v50 }
 0xf3d   :  { %v2617_v7 = vor.u32 1.1754944e-38, %v2616_v3  ;;  %vm2615_vm2 = vcmp.eq.f32.partialorder %v2614_v62, 8.507059e+37 }
 0xf3e   :  { %vm2630_vm6 = vcmp.eq.f32.partialorder %v2629_v48, 8.507059e+37 }
 0xf41   :  { %v7482_v5 = vpop.eup %7481 }
 0xf42   :  { %v7484_v37 = vpop.eup %7483  ;;  %v2606_v44 = vmul.f32 %v7482_v5, %v2603_v61  ;;  %vm2611_vm8 = vweird.f32 %v7482_v5 }
 0xf43   :  { %v2621_v1 = vmul.f32 %v7484_v37, %v2604_v50  ;;  %vm2612_vm7 = vmor %vm2610_vm9, %vm2611_vm8  ;;  %vm2626_vm12 = vweird.f32 %v7484_v37 }
 0xf44   :  { %v2607_v9 = vsub.f32 1.0, %v2606_v44  ;;  %vm2627_vm4 = vmor %vm2625_vm15, %vm2626_vm12 }
 0xf45   :  { %v2622_v47 = vsub.f32 1.0, %v2621_v1 }
 0xf46   :  { %v2608_v38 = vmul.f32 %v7482_v5, %v2607_v9 }
 0xf47   :  { %v2623_v43 = vmul.f32 %v7484_v37, %v2622_v47  ;;  %v2632_v47 = vor.u32 1.1754944e-38, %v2631_v6 }
 0xf48   :  { %v2609_v8 = vadd.f32 %v7482_v5, %v2608_v38 }
 0xf49   :  { %v2624_v41 = vadd.f32 %v7484_v37, %v2623_v43 }
 0xf4a   :  { %v2613_v36 = vsel %vm2612_vm7, %v7482_v5, %v2609_v8  ;;  %v7201_v5 = vrot.slane %v10249_v24, 9 }
 0xf4b   :  { %v2618_v44 = vsel %vm2615_vm2, %v2617_v7, %v2613_v36  ;;  %v2628_v1 = vsel %vm2627_vm4, %v7484_v37, %v2624_v41 }
 0xf4c   :  { %v2633_v11 = vsel %vm2630_vm6, %v2632_v47, %v2628_v1  ;;  %v2645_v43 = vmul.f32 %v7201_v5, %v2618_v44  ;;  %v12527_v5 = vmov 0.0  }
 0xfa8   :  { %v2650_v28 = vpop.permute.xlu0 %2649 }
 0xfa9   :  { %v2655_v9 = vmul.f32 %v2650_v28, %v2618_v44  ;;  %v7202_v28 = vrot.slane %v10246_v49, 9  ;;  %v184_v49 = vld [vmem:[%s7137_s21 + $0x8] sm:$0xff] }
 0xfaa   :  { %v2652_v38 = vpop.permute.xlu1 %2651  ;;  %2813 = vmatpush.msrb.mxu3 %v184_v49 }
 0xfab   :  { %2659 = vrot.lane.b32.xlu2 %v2655_v9, %s7831_s28  ;;  %v2656_v61 = vmul.f32 %v2652_v38, %v2633_v11  ;;  %v2646_v37 = vmul.f32 %v7202_v28, %v2633_v11  ;;  %v183_v38 = vld [vmem:[%s7137_s21] sm:$0xff]  ;;  %s7148_s21 = sld [smem:[%s12206_s0 + %s7851_s18]]  }
 0xfac   :  { %2814 = vmatpush.msrb.mxu3 %v183_v38  ;;  %v7358_v28 = vld [vmem:[%s7135_s2] ss:$0 sm:$0xff]  ;;  %s7853_s2 = smov 29  }
 0xfad   :  { %2661 = vrot.lane.b32.xlu0 %v2656_v61, %s7831_s28  ;;  %s10555_s4 = sld [smem:[%s12206_s0 + %s7853_s2]]  }
 0xfae   :  { %s7125_s2 = sld [smem:[%s12206_s0 + %s7824_s9]]  }
0x1005   :  { %v2660_v8 = vpop.permute.xlu2 %2659 }
0x1006   :  { %v10273_v50 = vadd.f32 %v2660_v8, %v2645_v43 }
0x1008   :  { %7485 = vtanh.f32 %v10273_v50 }
0x100e   :  { %v7486_v3 = vpop.eup %7485 }
0x100f   :  { %2671 = vrot.lane.b32.xlu1 %v7486_v3, %s7833_s30 }
0x101f   :  { %v2662_v62 = vpop.permute.xlu0 %2661 }
0x1020   :  { %v10278_v41 = vadd.f32 %v2662_v62, %v2646_v37 }
0x1022   :  { %7487 = vtanh.f32 %v10278_v41 }
0x1028   :  { %v7488_v36 = vpop.eup %7487 }
0x1029   :  { %2673 = vrot.lane.b32.xlu2 %v7488_v36, %s7833_s30  ;;  %v10311_v36 = vld [vmem:[%s7134_s5] ss:$0 sm:$0xff]  ;;  %s7854_s5 = smov 26  }
0x102a   :  { %s10562_s14 = sld [smem:[%s12206_s0 + %s7854_s5]]  }
0x102b   :  { %s11506_s5 = sld [smem:[%s12206_s0 + %s7864_s29]]  }
0x1081   :  { %v2672_v24 = vpop.permute.xlu1 %2671 }
0x1082   :  { %v2677_v6 = vmul.f32 %v2672_v24, %v2618_v44  ;;  %v181_v44 = vld [vmem:[%s7136_s24] sm:$0xff] }
0x1083   :  { %v2674_v7 = vpop.permute.xlu2 %2673 }
0x1084   :  { %v2678_v48 = vmul.f32 %v2674_v7, %v2633_v11  ;;  %v2681_v1 = vperm.slane %v2677_v6, 0  ;;  %v182_v11 = vld [vmem:[%s7136_s24 + $0x8] sm:$0xff]  ;;  %s7852_s24 = smov 28  }
0x1085   :  { %2962 = vmatpush.msra.mxu0 %v182_v11  ;;  %3319 = vmatpush.msra.mxu2 %v182_v11  ;;  %s7145_s1 = sld [smem:[%s12206_s0 + %s7852_s24]]   ;;  %s7857_s24 = smov 33  }
0x1086   :  { %v2682_v9 = vperm.slane %v2678_v48, 0  ;;  %3436 = vmatpush.msrb.mxu1 %v182_v11 }
0x1087   :  { %2963 = vmatpush.msra.mxu0 %v181_v44  ;;  %3320 = vmatpush.msra.mxu2 %v181_v44 }
0x1088   :  { %v2683_v47 = vsel %vm434_vm0, %v2682_v9, %v2681_v1  ;;  %3437 = vmatpush.msrb.mxu1 %v181_v44  ;;  %v10318_v9 = vrot.slane %v10311_v36, 7 }
0x1089   :  { %2684 = vrot.lane.b32.xlu0 %v2683_v47, %s7845_s17  ;;  %3083 = vmatpush.msrb.mxu0 %v182_v11 }
0x108b   :  { %3084 = vmatpush.msrb.mxu0 %v181_v44 }
0x10fb   :  { %v10290_v61 = vpop.permute.xlu0 %2684 }
0x10fc   :  { %7203 = vmatmul.msk.f32.vlgmr.msra.gmra.mxu3 %vm1309_vm14, %v10290_v61 }
0x10fd   :  { %2846 = vmatpush.msra.mxu3 %v182_v11 }
0x10ff   :  { %2847 = vmatpush.msra.mxu3 %v181_v44 }
0x1104   :  { %7206 = vmatmul.msk.f32.vlgmr.msrb.gmra.mxu3 %vm1309_vm14, %v10117_v27 }
0x1105   :  { %3200 = vmatpush.msrb.mxu3 %v182_v11 }
0x1107   :  { %3201 = vmatpush.msrb.mxu3 %v181_v44 }
0x110c   :  { %7207 = vmatmul.msk.f32.gmra.mxu3 %vm1309_vm14, %v10158_v15 }
0x1114   :  { %2848 = vmatmul.f32.vlgmr.msra.gmra.mxu3 %v12527_v5 }
0x117f   :  { %v10305_v43 = vpop.f32.mrf.mxu3 }
0x1187   :  { %v2816_v8 = vpop.f32.mrf.mxu3 }
0x1188   :  { %v10309_v62 = vadd.f32 %v7358_v28, %v2816_v8 }
0x118a   :  { %v12330_v7 = vrot.slane %v10309_v62, 4 }
0x118f   :  { %v2819_v3 = vpop.f32.mrf.mxu3 }
0x1190   :  { %v10307_v37 = vadd.f32 %v7358_v28, %v2819_v3 }
0x1192   :  { %v12329_v24 = vrot.slane %v10307_v37, 2 }
0x1197   :  { %v2849_v6 = vpop.f32.mrf.mxu3 }
0x1198   :  { %v2853_v48 = vrot.slane %v2849_v6, 7  ;;  %v2857_v1 = vadd.f32 %v2849_v6, %v12329_v24 }
0x119a   :  { %v2856_v47 = vadd.f32 %v2853_v48, %v12330_v7  ;;  %v2864_v49 = vadd.f32 %v10311_v36, %v2857_v1 }
0x119c   :  { %v2863_v38 = vadd.f32 %v10318_v9, %v2856_v47  ;;  %7489 = vtanh.f32 %v2864_v49  ;;  %v7209_v8 = vmul.f32 -1.442695, %v2864_v49 }
0x119e   :  { %7491 = vtanh.f32 %v2863_v38  ;;  %v7208_v48 = vmul.f32 -1.442695, %v2863_v38 }
0x119f   :  { %7493 = vpow2.f32 %v7209_v8 }
0x11a2   :  { %v7490_v11 = vpop.eup %7489 }
0x11a3   :  { %2911 = vrot.lane.b32.xlu2 %v7490_v11, %s7844_s16 }
0x11a4   :  { %v7492_v44 = vpop.eup %7491 }
0x11a5   :  { %2909 = vrot.lane.b32.xlu1 %v7492_v44, %s7844_s16  ;;  %v7494_v3 = vpop.eup %7493 }
0x11a6   :  { %v2872_v28 = vadd.f32 1.0, %v7494_v3 }
0x11a8   :  { %7495 = vrcp.f32 %v2872_v28  ;;  %v2899_v2 = vand.u32 2147483648, %v2872_v28  ;;  %vm2893_vm9 = vweird.f32 %v2872_v28  ;;  %v2897_v11 = vand.u32 2147483647, %v2872_v28 }
0x11a9   :  { %7497 = vpow2.f32 %v7208_v48 }
0x11aa   :  { %v2900_v49 = vor.u32 1.1754944e-38, %v2899_v2  ;;  %vm2898_vm12 = vcmp.eq.f32.partialorder %v2897_v11, 8.507059e+37 }
0x11ae   :  { %v7496_v6 = vpop.eup %7495 }
0x11af   :  { %v2889_v24 = vmul.f32 %v7496_v6, %v2872_v28  ;;  %v7498_v47 = vpop.eup %7497  ;;  %vm2894_vm8 = vweird.f32 %v7496_v6 }
0x11b0   :  { %v2871_v33 = vadd.f32 1.0, %v7498_v47  ;;  %vm2895_vm7 = vmor %vm2893_vm9, %vm2894_vm8 }
0x11b1   :  { %v2890_v7 = vsub.f32 1.0, %v2889_v24 }
0x11b2   :  { %7499 = vrcp.f32 %v2871_v33  ;;  %v2884_v60 = vand.u32 2147483648, %v2871_v33  ;;  %vm2878_vm2 = vweird.f32 %v2871_v33  ;;  %v2882_v47 = vand.u32 2147483647, %v2871_v33 }
0x11b3   :  { %v2891_v1 = vmul.f32 %v7496_v6, %v2890_v7 }
0x11b4   :  { %vm2883_vm6 = vcmp.eq.f32.partialorder %v2882_v47, 8.507059e+37 }
0x11b5   :  { %v2892_v52 = vadd.f32 %v7496_v6, %v2891_v1 }
0x11b7   :  { %v2896_v44 = vsel %vm2895_vm7, %v7496_v6, %v2892_v52  ;;  %v2885_v52 = vor.u32 1.1754944e-38, %v2884_v60 }
0x11b8   :  { %v2901_v3 = vsel %vm2898_vm12, %v2900_v49, %v2896_v44  ;;  %v7500_v24 = vpop.eup %7499 }
0x11b9   :  { %v2874_v38 = vmul.f32 %v7500_v24, %v2871_v33  ;;  %vm2879_vm15 = vweird.f32 %v7500_v24  ;;  %v2906_v44 = vmul.f32 0.0, %v2901_v3 }
0x11ba   :  { %vm2880_vm4 = vmor %vm2878_vm2, %vm2879_vm15 }
0x11bb   :  { %v2875_v7 = vsub.f32 1.0, %v2874_v38 }
0x11bd   :  { %v2876_v48 = vmul.f32 %v7500_v24, %v2875_v7 }
0x11bf   :  { %v2877_v1 = vadd.f32 %v7500_v24, %v2876_v48 }
0x11c1   :  { %v2881_v28 = vsel %vm2880_vm4, %v7500_v24, %v2877_v1 }
0x11c2   :  { %v2886_v6 = vsel %vm2883_vm6, %v2885_v52, %v2881_v28 }
0x11c3   :  { %v2905_v38 = vmul.f32 0.0, %v2886_v6 }
0x11fd   :  { %v2912_v8 = vpop.permute.xlu2 %2911 }
0x11fe   :  { %v2916_v23 = vmul.f32 %v2912_v8, %v2901_v3 }
0x1200   :  { %2921 = vrot.lane.b32.xlu1 %v2916_v23, %s7831_s28 }
0x1217   :  { %v2910_v2 = vpop.permute.xlu1 %2909 }
0x1218   :  { %v2915_v11 = vmul.f32 %v2910_v2, %v2886_v6 }
0x121a   :  { %2919 = vrot.lane.b32.xlu0 %v2915_v11, %s7831_s28 }
0x1272   :  { %v2922_v23 = vpop.permute.xlu1 %2921 }
0x1273   :  { %v10328_v49 = vadd.f32 %v2922_v23, %v2906_v44 }
0x1275   :  { %7501 = vtanh.f32 %v10328_v49 }
0x127b   :  { %v7502_v8 = vpop.eup %7501 }
0x127c   :  { %2933 = vrot.lane.b32.xlu0 %v7502_v8, %s7833_s30 }
0x128c   :  { %v2920_v33 = vpop.permute.xlu0 %2919 }
0x128d   :  { %v10332_v7 = vadd.f32 %v2920_v33, %v2905_v38  ;;  %v12528_v38 = vrot.slane %v10309_v62, 4 }
0x128f   :  { %7503 = vtanh.f32 %v10332_v7 }
0x1295   :  { %v7504_v60 = vpop.eup %7503 }
0x1296   :  { %2931 = vrot.lane.b32.xlu2 %v7504_v60, %s7833_s30 }
0x12ee   :  { %v2934_v24 = vpop.permute.xlu0 %2933 }
0x12ef   :  { %v2938_v48 = vmul.f32 %v2934_v24, %v2901_v3  ;;  %v10345_v3 = vrot.slane %v10311_v36, 1 }
0x12f0   :  { %v2932_v1 = vpop.permute.xlu2 %2931 }
0x12f1   :  { %v2937_v47 = vmul.f32 %v2932_v1, %v2886_v6  ;;  %v2942_v28 = vperm.slane %v2938_v48, 1  ;;  %v12529_v6 = vrot.slane %v10307_v37, 2 }
0x12f3   :  { %v2941_v52 = vperm.slane %v2937_v47, 1 }
0x12f5   :  { %v2943_v2 = vsel %vm434_vm0, %v2942_v28, %v2941_v52  ;;  %v10338_v11 = vsel %vm436_vm1, %v2942_v28, %v2941_v52 }
0x12f6   :  { %2944 = vrot.lane.b32.xlu1 %v2943_v2, %s7845_s17 }
0x1368   :  { %v2945_v44 = vpop.permute.xlu1 %2944 }
0x1369   :  { %7210 = vmatmul.msk.f32.vlgmr.msra.gmra.mxu0 %vm1309_vm14, %v2945_v44 }
0x13e6   :  { %v2965_v23 = vpop.f32.mrf.mxu0 }
0x13e7   :  { %v2969_v8 = vrot.slane %v2965_v23, 1  ;;  %v2972_v33 = vadd.f32 %v2965_v23, %v12528_v38 }
0x13e9   :  { %v2973_v60 = vadd.f32 %v2969_v8, %v12529_v6  ;;  %v2976_v24 = vadd.f32 %v10311_v36, %v2972_v33 }
0x13eb   :  { %v2977_v48 = vadd.f32 %v10345_v3, %v2973_v60  ;;  %7505 = vtanh.f32 %v2976_v24  ;;  %v7211_v28 = vmul.f32 -1.442695, %v2976_v24 }
0x13ed   :  { %7507 = vtanh.f32 %v2977_v48  ;;  %v7212_v8 = vmul.f32 -1.442695, %v2977_v48 }
0x13ee   :  { %7509 = vpow2.f32 %v7211_v28 }
0x13f1   :  { %v7506_v1 = vpop.eup %7505 }
0x13f2   :  { %3030 = vrot.lane.b32.xlu2 %v7506_v1, %s7844_s16 }
0x13f3   :  { %v7508_v47 = vpop.eup %7507 }
0x13f4   :  { %3032 = vrot.lane.b32.xlu0 %v7508_v47, %s7844_s16  ;;  %v7510_v52 = vpop.eup %7509 }
0x13f5   :  { %v2984_v2 = vadd.f32 1.0, %v7510_v52 }
0x13f7   :  { %7511 = vrcp.f32 %v2984_v2  ;;  %v2997_v17 = vand.u32 2147483648, %v2984_v2  ;;  %vm2991_vm9 = vweird.f32 %v2984_v2  ;;  %v2995_v1 = vand.u32 2147483647, %v2984_v2 }
0x13f8   :  { %7513 = vpow2.f32 %v7212_v8 }
0x13f9   :  { %v2998_v24 = vor.u32 1.1754944e-38, %v2997_v17  ;;  %vm2996_vm12 = vcmp.eq.f32.partialorder %v2995_v1, 8.507059e+37 }
0x13fd   :  { %v7512_v44 = vpop.eup %7511 }
0x13fe   :  { %v2987_v23 = vmul.f32 %v7512_v44, %v2984_v2  ;;  %v7514_v6 = vpop.eup %7513  ;;  %vm2992_vm8 = vweird.f32 %v7512_v44 }
0x13ff   :  { %v2985_v18 = vadd.f32 1.0, %v7514_v6  ;;  %vm2993_vm7 = vmor %vm2991_vm9, %vm2992_vm8 }
0x1400   :  { %v2988_v38 = vsub.f32 1.0, %v2987_v23 }
0x1401   :  { %7515 = vrcp.f32 %v2985_v18  ;;  %v3012_v16 = vand.u32 2147483648, %v2985_v18  ;;  %vm3006_vm2 = vweird.f32 %v2985_v18  ;;  %v3010_v6 = vand.u32 2147483647, %v2985_v18 }
0x1402   :  { %v2989_v33 = vmul.f32 %v7512_v44, %v2988_v38 }
0x1403   :  { %vm3011_vm6 = vcmp.eq.f32.partialorder %v3010_v6, 8.507059e+37 }
0x1404   :  { %v2990_v60 = vadd.f32 %v7512_v44, %v2989_v33 }
0x1406   :  { %v2994_v47 = vsel %vm2993_vm7, %v7512_v44, %v2990_v60  ;;  %v3013_v44 = vor.u32 1.1754944e-38, %v3012_v16 }
0x1407   :  { %v2999_v52 = vsel %vm2996_vm12, %v2998_v24, %v2994_v47  ;;  %v7516_v48 = vpop.eup %7515  ;;  %v7214_v24 = vrot.slane %v10328_v49, 9 }
0x1408   :  { %v3002_v23 = vmul.f32 %v7516_v48, %v2985_v18  ;;  %vm3007_vm15 = vweird.f32 %v7516_v48 }
0x1409   :  { %vm3008_vm4 = vmor %vm3006_vm2, %vm3007_vm15 }
0x140a   :  { %v3003_v8 = vsub.f32 1.0, %v3002_v23 }
0x140c   :  { %v3004_v38 = vmul.f32 %v7516_v48, %v3003_v8 }
0x140e   :  { %v3005_v33 = vadd.f32 %v7516_v48, %v3004_v38 }
0x1410   :  { %v3009_v2 = vsel %vm3008_vm4, %v7516_v48, %v3005_v33 }
0x1411   :  { %v3014_v60 = vsel %vm3011_vm6, %v3013_v44, %v3009_v2 }
0x1412   :  { %v3027_v8 = vmul.f32 %v7214_v24, %v3014_v60 }
0x144c   :  { %v3031_v28 = vpop.permute.xlu2 %3030 }
0x144d   :  { %v3036_v10 = vmul.f32 %v3031_v28, %v2999_v52 }
0x144f   :  { %3040 = vrot.lane.b32.xlu1 %v3036_v10, %s7831_s28  ;;  %v7213_v10 = vrot.slane %v10332_v7, 9 }
0x1451   :  { %v3026_v47 = vmul.f32 %v7213_v10, %v2999_v52 }
0x1466   :  { %v3033_v17 = vpop.permute.xlu0 %3032 }
0x1467   :  { %v3037_v1 = vmul.f32 %v3033_v17, %v3014_v60 }
0x1469   :  { %3042 = vrot.lane.b32.xlu2 %v3037_v1, %s7831_s28 }
0x14c1   :  { %v3041_v28 = vpop.permute.xlu1 %3040 }
0x14c2   :  { %v10357_v23 = vadd.f32 %v3041_v28, %v3026_v47  ;;  %v12340_v47 = vrot.slane %v10309_v62, 2 }
0x14c3   :  { %v3043_v18 = vpop.permute.xlu2 %3042 }
0x14c4   :  { %7517 = vtanh.f32 %v10357_v23  ;;  %v10360_v48 = vadd.f32 %v3043_v18, %v3027_v8 }
0x14c6   :  { %7519 = vtanh.f32 %v10360_v48 }
0x14ca   :  { %v7518_v16 = vpop.eup %7517 }
0x14cb   :  { %3052 = vrot.lane.b32.xlu0 %v7518_v16, %s7833_s30 }
0x14cc   :  { %v7520_v38 = vpop.eup %7519 }
0x14cd   :  { %3054 = vrot.lane.b32.xlu1 %v7520_v38, %s7833_s30 }
0x153d   :  { %v3053_v7 = vpop.permute.xlu0 %3052 }
0x153e   :  { %v3058_v33 = vmul.f32 %v3053_v7, %v2999_v52 }
0x153f   :  { %v3055_v49 = vpop.permute.xlu1 %3054 }
0x1540   :  { %v3059_v6 = vmul.f32 %v3055_v49, %v3014_v60  ;;  %v3062_v2 = vperm.slane %v3058_v33, 0 }
0x1542   :  { %v3063_v44 = vperm.slane %v3059_v6, 0 }
0x1544   :  { %v10366_v17 = vsel %vm434_vm0, %v3063_v44, %v3062_v2 }
0x1545   :  { %3065 = vrot.lane.b32.xlu2 %v10366_v17, %s7845_s17 }
0x159f   :  { %v3066_v1 = vpop.permute.xlu2 %3065 }
0x15a0   :  { %7215 = vmatmul.msk.f32.vlgmr.msrb.gmra.mxu0 %vm1309_vm14, %v3066_v1 }
0x161d   :  { %v3086_v10 = vpop.f32.mrf.mxu0 }
0x161e   :  { %v3090_v24 = vrot.slane %v3086_v10, 7  ;;  %v3094_v28 = vadd.f32 %v3086_v10, %v10307_v37 }
0x1620   :  { %v3093_v52 = vadd.f32 %v3090_v24, %v12340_v47  ;;  %v3096_v60 = vadd.f32 %v10311_v36, %v3094_v28 }
0x1622   :  { %v3095_v8 = vadd.f32 %v3093_v52, %v10318_v9  ;;  %7521 = vtanh.f32 %v3096_v60  ;;  %v7217_v38 = vmul.f32 -1.442695, %v3096_v60 }
0x1624   :  { %7523 = vtanh.f32 %v3095_v8  ;;  %v7216_v7 = vmul.f32 -1.442695, %v3095_v8 }
0x1625   :  { %7525 = vpow2.f32 %v7217_v38 }
0x1626   :  { %7527 = vpow2.f32 %v7216_v7 }
0x1628   :  { %v7522_v18 = vpop.eup %7521 }
0x1629   :  { %3149 = vrot.lane.b32.xlu1 %v7522_v18, %s7844_s16 }
0x162a   :  { %v7524_v16 = vpop.eup %7523 }
0x162b   :  { %3147 = vrot.lane.b32.xlu0 %v7524_v16, %s7844_s16  ;;  %v7526_v33 = vpop.eup %7525 }
0x162c   :  { %v7528_v49 = vpop.eup %7527  ;;  %v3104_v6 = vadd.f32 1.0, %v7526_v33 }
0x162d   :  { %v3103_v2 = vadd.f32 1.0, %v7528_v49 }
0x162e   :  { %7529 = vrcp.f32 %v3104_v6  ;;  %v3131_v60 = vand.u32 2147483648, %v3104_v6  ;;  %vm3125_vm9 = vweird.f32 %v3104_v6  ;;  %v3129_v8 = vand.u32 2147483647, %v3104_v6 }
0x162f   :  { %7531 = vrcp.f32 %v3103_v2  ;;  %v3116_v7 = vand.u32 2147483648, %v3103_v2  ;;  %vm3110_vm15 = vweird.f32 %v3103_v2  ;;  %v3114_v49 = vand.u32 2147483647, %v3103_v2 }
0x1630   :  { %v3132_v33 = vor.u32 1.1754944e-38, %v3131_v60  ;;  %vm3130_vm2 = vcmp.eq.f32.partialorder %v3129_v8, 8.507059e+37 }
0x1631   :  { %vm3115_vm6 = vcmp.eq.f32.partialorder %v3114_v49, 8.507059e+37 }
0x1634   :  { %v7530_v44 = vpop.eup %7529 }
0x1635   :  { %v7532_v1 = vpop.eup %7531  ;;  %v3121_v10 = vmul.f32 %v7530_v44, %v3104_v6  ;;  %vm3126_vm8 = vweird.f32 %v7530_v44 }
0x1636   :  { %v3106_v24 = vmul.f32 %v7532_v1, %v3103_v2  ;;  %vm3127_vm7 = vmor %vm3125_vm9, %vm3126_vm8  ;;  %vm3111_vm12 = vweird.f32 %v7532_v1 }
0x1637   :  { %v3122_v28 = vsub.f32 1.0, %v3121_v10  ;;  %vm3112_vm4 = vmor %vm3110_vm15, %vm3111_vm12 }
0x1638   :  { %v3107_v52 = vsub.f32 1.0, %v3106_v24 }
0x1639   :  { %v3123_v18 = vmul.f32 %v7530_v44, %v3122_v28 }
0x163a   :  { %v3108_v47 = vmul.f32 %v7532_v1, %v3107_v52  ;;  %v3117_v52 = vor.u32 1.1754944e-38, %v3116_v7 }
0x163b   :  { %v3124_v63 = vadd.f32 %v7530_v44, %v3123_v18 }
0x163c   :  { %v3109_v16 = vadd.f32 %v7532_v1, %v3108_v47 }
0x163d   :  { %v3128_v38 = vsel %vm3127_vm7, %v7530_v44, %v3124_v63  ;;  %v3139_v63 = vrot.slane %v10357_v23, 7 }
0x163e   :  { %v3133_v10 = vsel %vm3130_vm2, %v3132_v33, %v3128_v38  ;;  %v3113_v24 = vsel %vm3112_vm4, %v7532_v1, %v3109_v16 }
0x163f   :  { %v3118_v46 = vsel %vm3115_vm6, %v3117_v52, %v3113_v24 }
0x1640   :  { %v3143_v47 = vmul.f32 %v3139_v63, %v3118_v46 }
0x169b   :  { %v3150_v55 = vpop.permute.xlu1 %3149 }
0x169c   :  { %v3154_v28 = vmul.f32 %v3150_v55, %v3133_v10  ;;  %v3140_v55 = vrot.slane %v10360_v48, 7 }
0x169d   :  { %v3148_v18 = vpop.permute.xlu0 %3147 }
0x169e   :  { %3159 = vrot.lane.b32.xlu0 %v3154_v28, %s7831_s28  ;;  %v3153_v6 = vmul.f32 %v3148_v18, %v3118_v46  ;;  %v3144_v1 = vmul.f32 %v3140_v55, %v3133_v10 }
0x16a0   :  { %3157 = vrot.lane.b32.xlu2 %v3153_v6, %s7831_s28 }
0x16fa   :  { %v3158_v44 = vpop.permute.xlu2 %3157 }
0x16fb   :  { %v10382_v2 = vadd.f32 %v3158_v44, %v3143_v47  ;;  %v12530_v47 = vrot.slane %v10309_v62, 2 }
0x16fd   :  { %7533 = vtanh.f32 %v10382_v2 }
0x1703   :  { %v7534_v60 = vpop.eup %7533 }
0x1704   :  { %3169 = vrot.lane.b32.xlu1 %v7534_v60, %s7833_s30 }
0x1710   :  { %v3160_v8 = vpop.permute.xlu0 %3159 }
0x1711   :  { %v10387_v16 = vadd.f32 %v3160_v8, %v3144_v1 }
0x1713   :  { %7535 = vtanh.f32 %v10387_v16 }
0x1719   :  { %v7536_v38 = vpop.eup %7535 }
0x171a   :  { %3171 = vrot.lane.b32.xlu2 %v7536_v38, %s7833_s30 }
0x1774   :  { %v3172_v23 = vpop.permute.xlu2 %3171 }
0x1775   :  { %v3176_v7 = vmul.f32 %v3172_v23, %v3133_v10 }
0x1776   :  { %v3170_v33 = vpop.permute.xlu1 %3169 }
0x1777   :  { %v3175_v49 = vmul.f32 %v3170_v33, %v3118_v46  ;;  %v3180_v24 = vperm.slane %v3176_v7, 1 }
0x1779   :  { %v3179_v28 = vperm.slane %v3175_v49, 1 }
0x177b   :  { %v3181_v52 = vsel %vm434_vm0, %v3180_v24, %v3179_v28  ;;  %v10393_v18 = vsel %vm436_vm1, %v3180_v24, %v3179_v28 }
0x177c   :  { %3182 = vrot.lane.b32.xlu0 %v3181_v52, %s7845_s17 }
0x17ee   :  { %v3183_v48 = vpop.permute.xlu0 %3182 }
0x17ef   :  { %7218 = vmatmul.msk.f32.vlgmr.msrb.gmra.mxu3 %vm1309_vm14, %v3183_v48 }
0x1872   :  { %v3203_v6 = vpop.f32.mrf.mxu3 }
0x1873   :  { %v3207_v63 = vrot.slane %v3203_v6, 1  ;;  %v3210_v44 = vadd.f32 %v3203_v6, %v12530_v47 }
0x1875   :  { %v3211_v10 = vadd.f32 %v3207_v63, %v10307_v37  ;;  %v3212_v46 = vadd.f32 %v10311_v36, %v3210_v44 }
0x1877   :  { %v3213_v60 = vadd.f32 %v3211_v10, %v10345_v3  ;;  %7537 = vtanh.f32 %v3212_v46  ;;  %v7219_v7 = vmul.f32 -1.442695, %v3212_v46 }
0x1879   :  { %7539 = vtanh.f32 %v3213_v60  ;;  %v7220_v8 = vmul.f32 -1.442695, %v3213_v60 }
0x187b   :  { %7541 = vpow2.f32 %v7220_v8 }
0x187d   :  { %v7538_v55 = vpop.eup %7537 }
0x187e   :  { %3266 = vrot.lane.b32.xlu1 %v7538_v55, %s7844_s16 }
0x187f   :  { %v7540_v1 = vpop.eup %7539 }
0x1880   :  { %3268 = vrot.lane.b32.xlu2 %v7540_v1, %s7844_s16 }
0x1881   :  { %v7542_v38 = vpop.eup %7541 }
0x1882   :  { %v3221_v23 = vadd.f32 1.0, %v7542_v38 }
0x1884   :  { %7543 = vrcp.f32 %v3221_v23  ;;  %v3248_v6 = vand.u32 2147483648, %v3221_v23  ;;  %vm3242_vm9 = vweird.f32 %v3221_v23  ;;  %v3246_v63 = vand.u32 2147483647, %v3221_v23 }
0x1885   :  { %7545 = vpow2.f32 %v7219_v7 }
0x1886   :  { %v3249_v44 = vor.u32 1.1754944e-38, %v3248_v6  ;;  %vm3247_vm12 = vcmp.eq.f32.partialorder %v3246_v63, 8.507059e+37  ;;  %v7222_v6 = vrot.slane %v10387_v16, 9 }
0x188a   :  { %v7544_v33 = vpop.eup %7543 }
0x188b   :  { %v3238_v37 = vmul.f32 %v7544_v33, %v3221_v23  ;;  %v7546_v24 = vpop.eup %7545  ;;  %vm3243_vm8 = vweird.f32 %v7544_v33 }
0x188c   :  { %v3220_v28 = vadd.f32 1.0, %v7546_v24  ;;  %vm3244_vm7 = vmor %vm3242_vm9, %vm3243_vm8 }
0x188d   :  { %v3239_v49 = vsub.f32 1.0, %v3238_v37 }
0x188e   :  { %7547 = vrcp.f32 %v3220_v28  ;;  %v3233_v37 = vand.u32 2147483648, %v3220_v28  ;;  %vm3227_vm2 = vweird.f32 %v3220_v28 }
0x188f   :  { %v3240_v52 = vmul.f32 %v7544_v33, %v3239_v49  ;;  %v3231_v49 = vand.u32 2147483647, %v3220_v28 }
0x1890   :  { %v3234_v24 = vor.u32 1.1754944e-38, %v3233_v37 }
0x1891   :  { %v3241_v48 = vadd.f32 %v7544_v33, %v3240_v52  ;;  %vm3232_vm6 = vcmp.eq.f32.partialorder %v3231_v49, 8.507059e+37 }
0x1893   :  { %v3245_v47 = vsel %vm3244_vm7, %v7544_v33, %v3241_v48 }
0x1894   :  { %v7548_v10 = vpop.eup %7547  ;;  %v3250_v46 = vsel %vm3247_vm12, %v3249_v44, %v3245_v47 }
0x1895   :  { %v3223_v1 = vmul.f32 %v7548_v10, %v3220_v28  ;;  %vm3228_vm15 = vweird.f32 %v7548_v10  ;;  %v3263_v63 = vmul.f32 %v7222_v6, %v3250_v46  ;;  %v7221_v28 = vrot.slane %v10382_v2, 9 }
0x1896   :  { %vm3229_vm4 = vmor %vm3227_vm2, %vm3228_vm15 }
0x1897   :  { %v3224_v8 = vsub.f32 1.0, %v3223_v1 }
0x1899   :  { %v3225_v38 = vmul.f32 %v7548_v10, %v3224_v8 }
0x189b   :  { %v3226_v7 = vadd.f32 %v7548_v10, %v3225_v38 }
0x189d   :  { %v3230_v23 = vsel %vm3229_vm4, %v7548_v10, %v3226_v7 }
0x189e   :  { %v3235_v52 = vsel %vm3232_vm6, %v3234_v24, %v3230_v23 }
0x189f   :  { %v3262_v10 = vmul.f32 %v7221_v28, %v3235_v52 }
0x18da   :  { %v3269_v60 = vpop.permute.xlu2 %3268 }
0x18db   :  { %v3273_v55 = vmul.f32 %v3269_v60, %v3250_v46 }
0x18dd   :  { %3278 = vrot.lane.b32.xlu1 %v3273_v55, %s7831_s28 }
0x18f0   :  { %v3267_v33 = vpop.permute.xlu1 %3266 }
0x18f1   :  { %v3272_v48 = vmul.f32 %v3267_v33, %v3235_v52  ;;  %v2826_v33 = vrot.slane %v10309_v62, 6 }
0x18f3   :  { %3276 = vrot.lane.b32.xlu0 %v3272_v48, %s7831_s28 }
0x194f   :  { %v3279_v47 = vpop.permute.xlu1 %3278 }
0x1950   :  { %v10407_v44 = vadd.f32 %v3279_v47, %v3263_v63 }
0x1952   :  { %7549 = vtanh.f32 %v10407_v44 }
0x1958   :  { %v7550_v60 = vpop.eup %7549 }
0x1959   :  { %3290 = vrot.lane.b32.xlu0 %v7550_v60, %s7833_s30 }
0x1965   :  { %v3277_v55 = vpop.permute.xlu0 %3276 }
0x1966   :  { %v10412_v1 = vadd.f32 %v3277_v55, %v3262_v10 }
0x1968   :  { %7551 = vtanh.f32 %v10412_v1 }
0x196e   :  { %v7552_v8 = vpop.eup %7551 }
0x196f   :  { %3288 = vrot.lane.b32.xlu2 %v7552_v8, %s7833_s30 }
0x19c9   :  { %v3289_v16 = vpop.permute.xlu2 %3288 }
0x19ca   :  { %v3294_v38 = vmul.f32 %v3289_v16, %v3235_v52 }
0x19cb   :  { %v3291_v7 = vpop.permute.xlu0 %3290 }
0x19cc   :  { %v3295_v37 = vmul.f32 %v3291_v7, %v3250_v46  ;;  %v3298_v49 = vperm.slane %v3294_v38, 0 }
0x19ce   :  { %v3299_v23 = vperm.slane %v3295_v37, 0 }
0x19d0   :  { %v10417_v24 = vsel %vm434_vm0, %v3299_v23, %v3298_v49 }
0x19d1   :  { %3301 = vrot.lane.b32.xlu1 %v10417_v24, %s7845_s17 }
0x1a43   :  { %v3302_v2 = vpop.permute.xlu1 %3301 }
0x1a44   :  { %7223 = vmatmul.msk.f32.vlgmr.msra.gmra.mxu2 %vm1309_vm14, %v3302_v2 }
0x1ac7   :  { %v3322_v48 = vpop.f32.mrf.mxu2 }
0x1ac8   :  { %v3326_v6 = vrot.slane %v3322_v48, 7  ;;  %v3330_v52 = vadd.f32 %v3322_v48, %v2826_v33 }
0x1aca   :  { %v3329_v46 = vadd.f32 %v3326_v6, %v10309_v62  ;;  %v3332_v63 = vadd.f32 %v10311_v36, %v3330_v52 }
0x1acc   :  { %v3331_v47 = vadd.f32 %v3329_v46, %v10318_v9  ;;  %7553 = vtanh.f32 %v3332_v63  ;;  %v7225_v16 = vmul.f32 -1.442695, %v3332_v63 }
0x1ace   :  { %7555 = vtanh.f32 %v3331_v47  ;;  %v7224_v10 = vmul.f32 -1.442695, %v3331_v47 }
0x1ad0   :  { %7557 = vpow2.f32 %v7224_v10 }
0x1ad2   :  { %v7554_v60 = vpop.eup %7553 }
0x1ad3   :  { %3385 = vrot.lane.b32.xlu0 %v7554_v60, %s7844_s16 }
0x1ad4   :  { %v7556_v28 = vpop.eup %7555 }
0x1ad5   :  { %3383 = vrot.lane.b32.xlu2 %v7556_v28, %s7844_s16 }
0x1ad6   :  { %v7558_v55 = vpop.eup %7557 }
0x1ad7   :  { %v3339_v8 = vadd.f32 1.0, %v7558_v55 }
0x1ad9   :  { %7559 = vrcp.f32 %v3339_v8  ;;  %v3352_v48 = vand.u32 2147483648, %v3339_v8  ;;  %vm3346_vm9 = vweird.f32 %v3339_v8  ;;  %v3350_v6 = vand.u32 2147483647, %v3339_v8 }
0x1ada   :  { %7561 = vpow2.f32 %v7225_v16 }
0x1adb   :  { %v3353_v46 = vor.u32 1.1754944e-38, %v3352_v48  ;;  %vm3351_vm12 = vcmp.eq.f32.partialorder %v3350_v6, 8.507059e+37  ;;  %v3376_v6 = vrot.slane %v10407_v44, 7  ;;  %v12532_v44 = vrot.slane %v10134_v14, 4 }
0x1adf   :  { %v7560_v38 = vpop.eup %7559 }
0x1ae0   :  { %v3342_v7 = vmul.f32 %v7560_v38, %v3339_v8  ;;  %v7562_v49 = vpop.eup %7561  ;;  %vm3347_vm8 = vweird.f32 %v7560_v38 }
0x1ae1   :  { %v3340_v9 = vadd.f32 1.0, %v7562_v49  ;;  %vm3348_vm7 = vmor %vm3346_vm9, %vm3347_vm8 }
0x1ae2   :  { %v3343_v37 = vsub.f32 1.0, %v3342_v7 }
0x1ae3   :  { %7563 = vrcp.f32 %v3340_v9  ;;  %vm3361_vm2 = vweird.f32 %v3340_v9  ;;  %v3365_v49 = vand.u32 2147483647, %v3340_v9 }
0x1ae4   :  { %v3344_v23 = vmul.f32 %v7560_v38, %v3343_v37  ;;  %v3367_v37 = vand.u32 2147483648, %v3340_v9 }
0x1ae5   :  { %vm3366_vm6 = vcmp.eq.f32.partialorder %v3365_v49, 8.507059e+37 }
0x1ae6   :  { %v3345_v2 = vadd.f32 %v7560_v38, %v3344_v23  ;;  %v3368_v23 = vor.u32 1.1754944e-38, %v3367_v37 }
0x1ae8   :  { %v3349_v52 = vsel %vm3348_vm7, %v7560_v38, %v3345_v2 }
0x1ae9   :  { %v7564_v47 = vpop.eup %7563  ;;  %v3354_v63 = vsel %vm3351_vm12, %v3353_v46, %v3349_v52  ;;  %v3375_v46 = vrot.slane %v10412_v1, 7  ;;  %v7817_v1 = vld [vmem:[%s10125_s15] ss:$0 sm:$0xff]  ;;  %s10519_s15 = sld [smem:[%s12206_s0 + %s7850_s12]]   ;;  %s7865_s12 = smov 116  }
0x1aea   :  { %v3357_v10 = vmul.f32 %v7564_v47, %v3340_v9  ;;  %vm3362_vm15 = vweird.f32 %v7564_v47  ;;  %v2709_v9 = vrot.slane %v10305_v43, 7 }
0x1aeb   :  { %vm3363_vm4 = vmor %vm3361_vm2, %vm3362_vm15 }
0x1aec   :  { %v3358_v55 = vsub.f32 1.0, %v3357_v10  ;;  %v3379_v10 = vmul.f32 %v3375_v46, %v3354_v63  ;;  %v2712_v37 = vadd.f32 %v2709_v9, %v12532_v44 }
0x1aee   :  { %v3359_v16 = vmul.f32 %v7564_v47, %v3358_v55 }
0x1af0   :  { %v3360_v7 = vadd.f32 %v7564_v47, %v3359_v16 }
0x1af2   :  { %v3364_v8 = vsel %vm3363_vm4, %v7564_v47, %v3360_v7  ;;  %v12531_v47 = vrot.slane %v10208_v4, 2 }
0x1af3   :  { %v3369_v2 = vsel %vm3366_vm6, %v3368_v23, %v3364_v8  ;;  %v2714_v23 = vadd.f32 %v2712_v37, %v10180_v25 }
0x1af4   :  { %v3380_v52 = vmul.f32 %v3376_v6, %v3369_v2  ;;  %v2713_v55 = vadd.f32 %v10305_v43, %v12531_v47 }
0x1af5   :  { %v7204_v14 = vmul.f32 -1.442695, %v2714_v23 }
0x1af6   :  { %v2715_v49 = vadd.f32 %v7817_v1, %v2713_v55 }
0x1b2f   :  { %v3384_v60 = vpop.permute.xlu2 %3383 }
0x1b30   :  { %v3389_v28 = vmul.f32 %v3384_v60, %v3354_v63 }
0x1b32   :  { %3393 = vrot.lane.b32.xlu1 %v3389_v28, %s7831_s28 }
0x1b45   :  { %v3386_v38 = vpop.permute.xlu0 %3385 }
0x1b46   :  { %v3390_v48 = vmul.f32 %v3386_v38, %v3369_v2 }
0x1b48   :  { %3395 = vrot.lane.b32.xlu2 %v3390_v48, %s7831_s28 }
0x1ba2   :  { %v3396_v60 = vpop.permute.xlu2 %3395 }
0x1ba3   :  { %v10434_v28 = vadd.f32 %v3396_v60, %v3380_v52 }
0x1ba4   :  { %v3394_v16 = vpop.permute.xlu1 %3393 }
0x1ba5   :  { %7565 = vtanh.f32 %v10434_v28  ;;  %v10441_v7 = vadd.f32 %v3394_v16, %v3379_v10 }
0x1ba7   :  { %7567 = vtanh.f32 %v10441_v7 }
0x1ba8   :  { %7569 = vtanh.f32 %v2715_v49 }
0x1ba9   :  { %7571 = vtanh.f32 %v2714_v23 }
0x1baa   :  { %7573 = vpow2.f32 %v7204_v14 }
0x1bab   :  { %v7566_v8 = vpop.eup %7565 }
0x1bac   :  { %3407 = vrot.lane.b32.xlu1 %v7566_v8, %s7833_s30 }
0x1bad   :  { %v7568_v4 = vpop.eup %7567 }
0x1bae   :  { %3405 = vrot.lane.b32.xlu0 %v7568_v4, %s7833_s30  ;;  %v7570_v43 = vpop.eup %7569 }
0x1baf   :  { %v7572_v38 = vpop.eup %7571 }
0x1bb0   :  { %v7574_v48 = vpop.eup %7573 }
0x1bb1   :  { %v2722_v6 = vadd.f32 1.0, %v7574_v48 }
0x1bb3   :  { %7575 = vrcp.f32 %v2722_v6  ;;  %v2735_v44 = vand.u32 2147483648, %v2722_v6  ;;  %vm2729_vm9 = vweird.f32 %v2722_v6  ;;  %v2733_v8 = vand.u32 2147483647, %v2722_v6 }
0x1bb4   :  { %2768 = vrot.lane.b32.xlu1 %v7570_v43, %s7844_s16 }
0x1bb5   :  { %vm2734_vm12 = vcmp.eq.f32.partialorder %v2733_v8, 8.507059e+37 }
0x1bb6   :  { %2766 = vrot.lane.b32.xlu0 %v7572_v38, %s7844_s16  ;;  %v2736_v38 = vor.u32 1.1754944e-38, %v2735_v44 }
0x1bb9   :  { %v7576_v52 = vpop.eup %7575 }
0x1bba   :  { %v2725_v25 = vmul.f32 %v7576_v52, %v2722_v6  ;;  %vm2730_vm8 = vweird.f32 %v7576_v52  ;;  %v7205_v6 = vmul.f32 -1.442695, %v2715_v49 }
0x1bbb   :  { %vm2731_vm7 = vmor %vm2729_vm9, %vm2730_vm8 }
0x1bbc   :  { %v2726_v46 = vsub.f32 1.0, %v2725_v25  ;;  %7577 = vpow2.f32 %v7205_v6 }
0x1bbe   :  { %v2727_v9 = vmul.f32 %v7576_v52, %v2726_v46 }
0x1bc0   :  { %v2728_v16 = vadd.f32 %v7576_v52, %v2727_v9 }
0x1bc2   :  { %v2732_v4 = vsel %vm2731_vm7, %v7576_v52, %v2728_v16  ;;  %v7578_v52 = vpop.eup %7577 }
0x1bc3   :  { %v2723_v25 = vadd.f32 1.0, %v7578_v52 }
0x1bc5   :  { %7579 = vrcp.f32 %v2723_v25  ;;  %vm2744_vm2 = vweird.f32 %v2723_v25 }
0x1bcb   :  { %v7580_v46 = vpop.eup %7579 }
0x1bcc   :  { %vm2745_vm15 = vweird.f32 %v7580_v46 }
0x1bcd   :  { %vm2746_vm4 = vmor %vm2744_vm2, %vm2745_vm15 }
0x1c1e   :  { %v3408_v60 = vpop.permute.xlu1 %3407 }
0x1c1f   :  { %v3412_v10 = vmul.f32 %v3408_v60, %v3369_v2  ;;  %v2740_v60 = vmul.f32 %v7580_v46, %v2723_v25 }
0x1c20   :  { %v3406_v47 = vpop.permute.xlu0 %3405 }
0x1c21   :  { %v3411_v55 = vmul.f32 %v3406_v47, %v3354_v63  ;;  %v3416_v37 = vperm.slane %v3412_v10, 1  ;;  %v10457_v63 = vsel %vm2734_vm12, %v2736_v38, %v2732_v4  ;;  %v2750_v4 = vand.u32 2147483648, %v2723_v25 }
0x1c22   :  { %v2748_v38 = vand.u32 2147483647, %v2723_v25 }
0x1c23   :  { %v3415_v1 = vperm.slane %v3411_v55, 1  ;;  %v2741_v55 = vsub.f32 1.0, %v2740_v60 }
0x1c24   :  { %vm2749_vm6 = vcmp.eq.f32.partialorder %v2748_v38, 8.507059e+37 }
0x1c25   :  { %v3417_v23 = vsel %vm434_vm0, %v3416_v37, %v3415_v1  ;;  %v10454_v43 = vsel %vm436_vm1, %v3416_v37, %v3415_v1  ;;  %v2742_v1 = vmul.f32 %v7580_v46, %v2741_v55 }
0x1c26   :  { %3418 = vrot.lane.b32.xlu2 %v3417_v23, %s7845_s17  ;;  %v2769_v49 = vpop.permute.xlu1 %2768 }
0x1c27   :  { %v2743_v8 = vadd.f32 %v7580_v46, %v2742_v1 }
0x1c28   :  { %v2767_v2 = vpop.permute.xlu0 %2766 }
0x1c29   :  { %v2772_v14 = vmul.f32 %v2767_v2, %v10457_v63  ;;  %v2758_v2 = vrot.slane %v10273_v50, 7 }
0x1c2b   :  { %2776 = vrot.lane.b32.xlu1 %v2772_v14, %s7831_s28  ;;  %v2751_v14 = vor.u32 1.1754944e-38, %v2750_v4 }
0x1c80   :  { %v3419_v48 = vpop.permute.xlu2 %3418 }
0x1c81   :  { %7226 = vmatmul.msk.f32.vlgmr.msrb.gmra.mxu1 %vm1309_vm14, %v3419_v48 }
0x1cfe   :  { %v3439_v9 = vpop.f32.mrf.mxu1 }
0x1cff   :  { %v3443_v10 = vrot.slane %v3439_v9, 1  ;;  %v3446_v47 = vadd.f32 %v3439_v9, %v10309_v62 }
0x1d01   :  { %v3447_v16 = vadd.f32 %v3443_v10, %v2826_v33  ;;  %v3448_v44 = vadd.f32 %v10311_v36, %v3446_v47  ;;  %v2747_v33 = vsel %vm2746_vm4, %v7580_v46, %v2743_v8  ;;  %v2777_v36 = vpop.permute.xlu1 %2776 }
0x1d02   :  { %v10471_v48 = vsel %vm2749_vm6, %v2751_v14, %v2747_v33 }
0x1d03   :  { %v3449_v37 = vadd.f32 %v3447_v16, %v10345_v3  ;;  %7581 = vtanh.f32 %v3448_v44  ;;  %v2762_v3 = vmul.f32 %v2758_v2, %v10457_v63  ;;  %v2773_v52 = vmul.f32 %v2769_v49, %v10471_v48 }
0x1d04   :  { %v7227_v50 = vmul.f32 -1.442695, %v3448_v44 }
0x1d05   :  { %7583 = vtanh.f32 %v3449_v37  ;;  %v2782_v6 = vadd.f32 %v2777_v36, %v2762_v3  ;;  %v7228_v47 = vmul.f32 -1.442695, %v3449_v37  ;;  %v2759_v36 = vrot.slane %v10278_v41, 7 }
0x1d07   :  { %7585 = vtanh.f32 %v2782_v6  ;;  %v2763_v14 = vmul.f32 %v2759_v36, %v10471_v48 }
0x1d08   :  { %7587 = vpow2.f32 %v7227_v50 }
0x1d09   :  { %v7582_v23 = vpop.eup %7581 }
0x1d0a   :  { %3502 = vrot.lane.b32.xlu2 %v7582_v23, %s7844_s16 }
0x1d0b   :  { %v7584_v62 = vpop.eup %7583 }
0x1d0c   :  { %3504 = vrot.lane.b32.xlu0 %v7584_v62, %s7844_s16 }
0x1d0d   :  { %v7586_v25 = vpop.eup %7585 }
0x1d0e   :  { %v7588_v46 = vpop.eup %7587 }
0x1d0f   :  { %v3456_v60 = vadd.f32 1.0, %v7588_v46 }
0x1d11   :  { %7589 = vrcp.f32 %v3456_v60  ;;  %v3469_v49 = vand.u32 2147483648, %v3456_v60  ;;  %vm3463_vm9 = vweird.f32 %v3456_v60  ;;  %v3467_v4 = vand.u32 2147483647, %v3456_v60 }
0x1d12   :  { %2778 = vrot.lane.b32.xlu2 %v2773_v52, %s7831_s28  ;;  %7591 = vpow2.f32 %v7228_v47 }
0x1d13   :  { %v3470_v44 = vor.u32 1.1754944e-38, %v3469_v49  ;;  %vm3468_vm12 = vcmp.eq.f32.partialorder %v3467_v4, 8.507059e+37 }
0x1d17   :  { %v7590_v9 = vpop.eup %7589 }
0x1d18   :  { %v3459_v10 = vmul.f32 %v7590_v9, %v3456_v60  ;;  %v7592_v1 = vpop.eup %7591  ;;  %vm3464_vm8 = vweird.f32 %v7590_v9 }
0x1d19   :  { %v3457_v23 = vadd.f32 1.0, %v7592_v1  ;;  %vm3465_vm7 = vmor %vm3463_vm9, %vm3464_vm8  ;;  %vm3628_vm8 = vcmask 1040384   ;;  %vm3631_vm9 = vcmask 1041408  }
0x1d1a   :  { %2788 = vrot.lane.b32.xlu2 %v7586_v25, %s7833_s30  ;;  %v3460_v55 = vsub.f32 1.0, %v3459_v10 }
0x1d1b   :  { %7593 = vrcp.f32 %v3457_v23  ;;  %vm3478_vm2 = vweird.f32 %v3457_v23  ;;  %v3482_v10 = vand.u32 2147483647, %v3457_v23 }
0x1d1c   :  { %v3461_v16 = vmul.f32 %v7590_v9, %v3460_v55 }
0x1d1d   :  { %vm3483_vm6 = vcmp.eq.f32.partialorder %v3482_v10, 8.507059e+37 }
0x1d1e   :  { %v3462_v8 = vadd.f32 %v7590_v9, %v3461_v16 }
0x1d20   :  { %v3466_v38 = vsel %vm3465_vm7, %v7590_v9, %v3462_v8  ;;  %v3484_v9 = vand.u32 2147483648, %v3457_v23  ;;  %v7229_v8 = vrot.slane %v10441_v7, 9  ;;  %v7230_v7 = vrot.slane %v10434_v28, 9 }
0x1d21   :  { %v3471_v62 = vsel %vm3468_vm12, %v3470_v44, %v3466_v38  ;;  %v7594_v37 = vpop.eup %7593  ;;  %vm3634_vm7 = vcmask 1042432   ;;  %vm3637_vm12 = vcmask 1043456  }
0x1d22   :  { %v3474_v6 = vmul.f32 %v7594_v37, %v3457_v23  ;;  %vm3479_vm15 = vweird.f32 %v7594_v37  ;;  %v3485_v55 = vor.u32 1.1754944e-38, %v3484_v9  ;;  %v3498_v49 = vmul.f32 %v7229_v8, %v3471_v62  ;;  %v202_v8 = vld [vmem:[%s7148_s21 + $0x8] sm:$0xff] }
0x1d23   :  { %vm3480_vm4 = vmor %vm3478_vm2, %vm3479_vm15  ;;  %3716 = vmatpush.msra.mxu3 %v202_v8  ;;  %3832 = vmatpush.msrb.mxu2 %v202_v8  ;;  %vm3640_vm15 = vcmask 1044480  }
0x1d24   :  { %v3475_v25 = vsub.f32 1.0, %v3474_v6  ;;  %3951 = vmatpush.msra.mxu1 %v202_v8 }
0x1d26   :  { %v3476_v50 = vmul.f32 %v7594_v37, %v3475_v25 }
0x1d28   :  { %v3477_v60 = vadd.f32 %v7594_v37, %v3476_v50 }
0x1d2a   :  { %v3481_v47 = vsel %vm3480_vm4, %v7594_v37, %v3477_v60 }
0x1d2b   :  { %v3486_v41 = vsel %vm3483_vm6, %v3485_v55, %v3481_v47 }
0x1d2c   :  { %v3499_v36 = vmul.f32 %v7230_v7, %v3486_v41 }
0x1d64   :  { %v3503_v2 = vpop.permute.xlu2 %3502 }
0x1d65   :  { %v3508_v33 = vmul.f32 %v3503_v2, %v3471_v62 }
0x1d67   :  { %3512 = vrot.lane.b32.xlu0 %v3508_v33, %s7831_s28 }
0x1d6c   :  { %v2779_v3 = vpop.permute.xlu2 %2778 }
0x1d6d   :  { %v2783_v52 = vadd.f32 %v2779_v3, %v2763_v14 }
0x1d6f   :  { %7595 = vtanh.f32 %v2783_v52 }
0x1d74   :  { %v2789_v44 = vpop.permute.xlu2 %2788 }
0x1d75   :  { %v7596_v46 = vpop.eup %7595 }
0x1d76   :  { %2790 = vrot.lane.b32.xlu0 %v7596_v46, %s7833_s30 }
0x1d7e   :  { %3546 = vrot.lane.b32.xlu0 %v10201_v19, %s7845_s17  ;;  %v3505_v16 = vpop.permute.xlu0 %3504 }
0x1d7f   :  { %v3509_v1 = vmul.f32 %v3505_v16, %v3486_v41 }
0x1d81   :  { %3514 = vrot.lane.b32.xlu1 %v3509_v1, %s7831_s28 }
0x1d86   :  { %3572 = vrot.lane.b32.xlu0 %v10393_v18, %s7844_s16  ;;  %v2794_v18 = vmul.f32 %v2789_v44, %v10457_v63 }
0x1d8e   :  { %3561 = vrot.lane.b32.xlu0 %v10417_v24, %s7844_s16  ;;  %v3591_v24 = vperm.slane %v2794_v18, 1 }
0x1dd9   :  { %v3513_v23 = vpop.permute.xlu0 %3512 }
0x1dda   :  { %v3518_v4 = vadd.f32 %v3513_v23, %v3498_v49  ;;  %v206_v49 = vld [vmem:[%s7149_s23 + $0x18] sm:$0xff]  ;;  %v201_v23 = vld [vmem:[%s7148_s21] sm:$0xff]  ;;  %s7856_s21 = smov 25  }
0x1ddb   :  { %3681 = vmatpush.msra.mxu0 %v206_v49  ;;  %3717 = vmatpush.msra.mxu3 %v201_v23 }
0x1ddc   :  { %7597 = vtanh.f32 %v3518_v4  ;;  %v205_v4 = vld [vmem:[%s7149_s23 + $0x10] sm:$0xff]  ;;  %3718 = vmatmul.f32.vlgmr.msra.gmra.mxu3 %v12527_v5  ;;  %3833 = vmatpush.msrb.mxu2 %v201_v23 }
0x1ddd   :  { %3682 = vmatpush.msra.mxu0 %v205_v4  ;;  %3952 = vmatpush.msra.mxu1 %v201_v23 }
0x1dde   :  { %4070 = vmatpush.msrb.mxu3 %v202_v8  ;;  %4187 = vmatpush.msra.mxu2 %v202_v8 }
0x1ddf   :  { %4306 = vmatpush.msrb.mxu1 %v202_v8 }
0x1de0   :  { %4071 = vmatpush.msrb.mxu3 %v201_v23  ;;  %4188 = vmatpush.msra.mxu2 %v201_v23 }
0x1de1   :  { %4307 = vmatpush.msrb.mxu1 %v201_v23 }
0x1de2   :  { %v7598_v38 = vpop.eup %7597 }
0x1de3   :  { %3524 = vrot.lane.b32.xlu1 %v7598_v38, %s7833_s30  ;;  %v204_v38 = vld [vmem:[%s7149_s23 + $0x8] sm:$0xff] }
0x1de4   :  { %3683 = vmatpush.msra.mxu0 %v204_v38 }
0x1de8   :  { %v2791_v19 = vpop.permute.xlu0 %2790 }
0x1de9   :  { %v2795_v2 = vmul.f32 %v2791_v19, %v10471_v48  ;;  %v203_v19 = vld [vmem:[%s7149_s23] sm:$0xff]  ;;  %s10677_s23 = sld [smem:[%s12206_s0 + %s7856_s21]]  }
0x1dea   :  { %3684 = vmatpush.msra.mxu0 %v203_v19 }
0x1deb   :  { %3550 = vrot.lane.b32.xlu1 %v10454_v43, %s7844_s16  ;;  %v3592_v33 = vperm.slane %v2795_v2, 1 }
0x1ded   :  { %v3593_v37 = vsel %vm436_vm1, %v3592_v33, %v3591_v24  ;;  %v198_v33 = vld [vmem:[%s7145_s1 + $0x18] sm:$0xff]  ;;  %v197_v24 = vld [vmem:[%s7145_s1 + $0x10] sm:$0xff] }
0x1dee   :  { %4432 = vmatpush.msrb.mxu0 %v198_v33  ;;  %v10567_v33 = vld [vmem:[%s10519_s15] ss:$0 sm:$0xff]  ;;  %s7855_s15 = smov 27  }
0x1def   :  { %s7144_s20 = sld [smem:[%s12206_s0 + %s7855_s15]]  }
0x1df0   :  { %v3547_v52 = vpop.permute.xlu0 %3546  ;;  %4433 = vmatpush.msrb.mxu0 %v197_v24  ;;  %s7119_s15 = sld [smem:[%s12206_s0 + %s7821_s6]]  }
0x1df3   :  { %3594 = vrot.lane.b32.xlu1 %v3593_v37, %s7845_s17  ;;  %v3515_v14 = vpop.permute.xlu1 %3514 }
0x1df4   :  { %v3519_v3 = vadd.f32 %v3515_v14, %v3499_v36  ;;  %v196_v36 = vld [vmem:[%s7145_s1 + $0x8] sm:$0xff] }
0x1df5   :  { %4434 = vmatpush.msrb.mxu0 %v196_v36 }
0x1df6   :  { %7599 = vtanh.f32 %v3519_v3 }
0x1dfc   :  { %v7600_v6 = vpop.eup %7599 }
0x1dfd   :  { %3526 = vrot.lane.b32.xlu2 %v7600_v6, %s7833_s30 }
0x1e05   :  { %3568 = vrot.lane.b32.xlu2 %v10256_v12, %s7845_s17 }
0x1e0d   :  { %3598 = vrot.lane.b32.xlu2 %v10338_v11, %s7844_s16  ;;  %v3573_v11 = vpop.permute.xlu0 %3572 }
0x1e15   :  { %3583 = vrot.lane.b32.xlu2 %v10366_v17, %s7844_s16  ;;  %v3562_v44 = vpop.permute.xlu0 %3561 }
0x1e16   :  { %v3564_v18 = vsel %vm1309_vm14, %v10231_v32, %v3562_v44 }
0x1e17   :  { %v3566_v37 = vrot.slane %v3564_v18, 1  ;;  %v3612_v14 = vperm.slane %v3564_v18, 0 }
0x1e55   :  { %v3525_v28 = vpop.permute.xlu1 %3524 }
0x1e56   :  { %v3530_v43 = vmul.f32 %v3525_v28, %v3471_v62 }
0x1e57   :  { %v3527_v63 = vpop.permute.xlu2 %3526 }
0x1e58   :  { %v3531_v48 = vmul.f32 %v3527_v63, %v3486_v41  ;;  %v3535_v25 = vperm.slane %v3530_v43, 0  ;;  %v195_v63 = vld [vmem:[%s7145_s1] sm:$0xff]  ;;  %s10955_s1 = sld [smem:[%s12206_s0 + %s7857_s24]]  }
0x1e59   :  { %4435 = vmatpush.msrb.mxu0 %v195_v63 }
0x1e5a   :  { %v3536_v50 = vperm.slane %v3531_v48, 0 }
0x1e5c   :  { %v3537_v60 = vsel %vm434_vm0, %v3536_v50, %v3535_v25  ;;  %v3613_v50 = vperm.slane %v3566_v37, 0 }
0x1e5d   :  { %v3551_v46 = vpop.permute.xlu1 %3550  ;;  %3538 = vrot.lane.b32.xlu1 %v3537_v60, %s7844_s16 }
0x1e5e   :  { %v3553_v9 = vsel %vm1309_vm14, %v3547_v52, %v3551_v46 }
0x1e5f   :  { %3555 = vst [vmem:[#allocation1] sm:$0xff] %v3553_v9  ;;  %v3569_v12 = vpop.permute.xlu2 %3568  ;;  %v3719_v24 = vpop.f32.mrf.mxu3 }
0x1e60   :  { %v3575_v62 = vsel %vm1309_vm14, %v3569_v12, %v3573_v11 }
0x1e65   :  { %v3595_v55 = vpop.permute.xlu1 %3594 }
0x1e66   :  { %v10506_v10 = vld [vmem:[#allocation1 + $0x1] ss:$9 sm:$0xff] }
0x1e67   :  { %v10508_v17 = vld [vmem:[#allocation1 + $0x2] ss:$9 sm:$0xff]  ;;  %v3599_v47 = vpop.permute.xlu2 %3598  ;;  %v3608_v3 = vperm.slane %v10506_v10, 0 }
0x1e68   :  { %3577 = vst [vmem:[#allocation1] sm:$0xff] %v3575_v62  ;;  %v3601_v1 = vsel %vm1309_vm14, %v3595_v55, %v3599_v47 }
0x1e6f   :  { %v10511_v41 = vld [vmem:[#allocation1 + $0x1] ss:$9 sm:$0xff]  ;;  %v3584_v2 = vpop.permute.xlu2 %3583 }
0x1e70   :  { %v10513_v16 = vld [vmem:[#allocation1 + $0x2] ss:$9 sm:$0xff]  ;;  %v3586_v7 = vsel %vm1309_vm14, %v10290_v61, %v3584_v2  ;;  %v3609_v61 = vperm.slane %v10508_v17, 0  ;;  %v3616_v52 = vperm.slane %v10511_v41, 0 }
0x1e71   :  { %3603 = vst [vmem:[#allocation1] sm:$0xff] %v3601_v1  ;;  %v3588_v43 = vrot.slane %v3586_v7, 1  ;;  %v3620_v60 = vperm.slane %v3586_v7, 0  ;;  %v3617_v12 = vperm.slane %v10513_v16, 0  ;;  %v10570_v7 = vld [vmem:[%s10555_s4] ss:$0 sm:$0xff] }
0x1e73   :  { %v3621_v17 = vperm.slane %v3588_v43, 0 }
0x1e78   :  { %v3605_v28 = vld [vmem:[#allocation1 + $0x1] ss:$9 sm:$0xff] }
0x1e79   :  { %v3607_v46 = vld [vmem:[#allocation1 + $0x2] ss:$9 sm:$0xff]  ;;  %v3624_v11 = vperm.slane %v3605_v28, 0  ;;  %v10578_v28 = vrot.slane %v10570_v7, 1 }
0x1e7a   :  { %v3625_v55 = vperm.slane %v3607_v46, 0 }
0x1ecf   :  { %v3539_v6 = vpop.permute.xlu1 %3538 }
0x1ed0   :  { %v3541_v32 = vsel %vm1309_vm14, %v10169_v45, %v3539_v6 }
0x1ed1   :  { %v3543_v48 = vrot.slane %v3541_v32, 1  ;;  %v3629_v25 = vsel %vm3628_vm8, %v3541_v32, %v3608_v3 }
0x1ed2   :  { %v3632_v9 = vsel %vm3631_vm9, %v3629_v25, %v3612_v14  ;;  %v3723_v14 = vrot.slane %v3719_v24, 1 }
0x1ed3   :  { %v3630_v45 = vsel %vm3628_vm8, %v3543_v48, %v3609_v61  ;;  %v3635_v10 = vsel %vm3634_vm7, %v3632_v9, %v3616_v52 }
0x1ed4   :  { %v3633_v62 = vsel %vm3631_vm9, %v3630_v45, %v3613_v50  ;;  %v3638_v47 = vsel %vm3637_vm12, %v3635_v10, %v3620_v60 }
0x1ed5   :  { %v3636_v41 = vsel %vm3634_vm7, %v3633_v62, %v3617_v12  ;;  %v3641_v1 = vsel %vm3640_vm15, %v3638_v47, %v3624_v11 }
0x1ed6   :  { %v3639_v8 = vsel %vm3637_vm12, %v3636_v41, %v3621_v17  ;;  %v3645_v49 = vrot.slane %v3641_v1, 2  ;;  %v3646_v16 = vrot.slane %v3641_v1, 4  ;;  %3652 = vst [vmem:[#allocation1] ss:$4 sm:$0xff] %v3641_v1 }
0x1ed7   :  { %v3642_v23 = vsel %vm3640_vm15, %v3639_v8, %v3625_v55 }
0x1ed8   :  { %v3647_v4 = vrot.slane %v3642_v23, 2  ;;  %v3648_v38 = vrot.slane %v3642_v23, 4  ;;  %3654 = vst [vmem:[#allocation1 + $0x1] ss:$4 sm:$0xff] %v3645_v49 }
0x1ed9   :  { %3656 = vst [vmem:[#allocation1 + $0x2] ss:$4 sm:$0xff] %v3646_v16 }
0x1eda   :  { %3660 = vst [vmem:[#allocation1 + $0x20] ss:$4 sm:$0xff] %v3647_v4 }
0x1edb   :  { %3662 = vst [vmem:[#allocation1 + $0x21] ss:$4 sm:$0xff] %v3648_v38 }
0x1edc   :  { %3658 = vst [vmem:[#allocation1 + $0x3] ss:$4 sm:$0xff] %v3642_v23 }
0x1ee2   :  { %v3664_v19 = vld.sshfl [vmem:[#allocation1 + $0x20] sm:$0xff pattern:$0x73625140] }
0x1ee3   :  { %4411 = vst [vmem:[#allocation1 + $0x20] ss:$4 sm:$0xff] %v3647_v4  ;;  %v3663_v44 = vld.sshfl [vmem:[#allocation1] sm:$0xff pattern:$0x73625140] }
0x1ee4   :  { %4413 = vst [vmem:[#allocation1 + $0x21] ss:$4 sm:$0xff] %v3648_v38  ;;  %7231 = vmatmul.msk.f32.vlgmr.msra.gmra.mxu0 %vm12348_vm11, %v3663_v44 }
0x1ee5   :  { %4403 = vst [vmem:[#allocation1] ss:$4 sm:$0xff] %v3641_v1 }
0x1ee6   :  { %4405 = vst [vmem:[#allocation1 + $0x1] ss:$4 sm:$0xff] %v3645_v49 }
0x1ee7   :  { %4407 = vst [vmem:[#allocation1 + $0x2] ss:$4 sm:$0xff] %v3646_v16 }
0x1ee8   :  { %4409 = vst [vmem:[#allocation1 + $0x3] ss:$4 sm:$0xff] %v3642_v23 }
0x1eeb   :  { %v4415_v18 = vld.sshfl [vmem:[#allocation1 + $0x20] sm:$0xff pattern:$0x73625140] }
0x1eec   :  { %7232 = vmatmul.msk.f32.gmra.mxu0 %vm12348_vm11, %v3664_v19 }
0x1eef   :  { %v4414_v2 = vld.sshfl [vmem:[#allocation1] sm:$0xff pattern:$0x73625140] }
0x1ef4   :  { %7254 = vmatmul.msk.f32.vlgmr.msrb.gmra.mxu0 %vm12348_vm11, %v4414_v2 }
0x1efc   :  { %7255 = vmatmul.msk.f32.gmra.mxu0 %vm12348_vm11, %v4415_v18 }
0x1f61   :  { %v3686_v37 = vpop.f32.mrf.mxu0 }
0x1f62   :  { %v10573_v36 = vadd.f32 %v10567_v33, %v3686_v37 }
0x1f64   :  { %v3696_v3 = vrot.slane %v10573_v36, 6  ;;  %v3726_v6 = vadd.f32 %v3719_v24, %v10573_v36 }
0x1f66   :  { %v3727_v43 = vadd.f32 %v3723_v14, %v3696_v3  ;;  %v3733_v32 = vadd.f32 %v10570_v7, %v3726_v6 }
0x1f68   :  { %v3734_v63 = vadd.f32 %v10578_v28, %v3727_v43  ;;  %7601 = vtanh.f32 %v3733_v32  ;;  %v7233_v52 = vmul.f32 -1.442695, %v3733_v32 }
0x1f6a   :  { %7603 = vtanh.f32 %v3734_v63  ;;  %v7234_v25 = vmul.f32 -1.442695, %v3734_v63 }
0x1f6b   :  { %7605 = vpow2.f32 %v7233_v52 }
0x1f6c   :  { %7607 = vpow2.f32 %v7234_v25 }
0x1f6e   :  { %v7602_v61 = vpop.eup %7601 }
0x1f6f   :  { %3779 = vrot.lane.b32.xlu0 %v7602_v61, %s7844_s16 }
0x1f70   :  { %v7604_v48 = vpop.eup %7603 }
0x1f71   :  { %3781 = vrot.lane.b32.xlu1 %v7604_v48, %s7844_s16  ;;  %v7606_v50 = vpop.eup %7605 }
0x1f72   :  { %v7608_v46 = vpop.eup %7607  ;;  %v3741_v60 = vadd.f32 1.0, %v7606_v50 }
0x1f73   :  { %v3742_v9 = vadd.f32 1.0, %v7608_v46 }
0x1f74   :  { %7609 = vrcp.f32 %v3741_v60  ;;  %v3754_v1 = vand.u32 2147483648, %v3741_v60  ;;  %vm3748_vm4 = vweird.f32 %v3741_v60  ;;  %v3752_v8 = vand.u32 2147483647, %v3741_v60 }
0x1f75   :  { %7611 = vrcp.f32 %v3742_v9  ;;  %v3769_v23 = vand.u32 2147483648, %v3742_v9  ;;  %vm3763_vm13 = vweird.f32 %v3742_v9  ;;  %v3767_v38 = vand.u32 2147483647, %v3742_v9 }
0x1f76   :  { %v3755_v4 = vor.u32 1.1754944e-38, %v3754_v1  ;;  %vm3753_vm5 = vcmp.eq.f32.partialorder %v3752_v8, 8.507059e+37 }
0x1f77   :  { %v3770_v24 = vor.u32 1.1754944e-38, %v3769_v23  ;;  %vm3768_vm11 = vcmp.eq.f32.partialorder %v3767_v38, 8.507059e+37 }
0x1f7a   :  { %v7610_v12 = vpop.eup %7609 }
0x1f7b   :  { %v7612_v11 = vpop.eup %7611  ;;  %v3744_v45 = vmul.f32 %v7610_v12, %v3741_v60  ;;  %vm3749_vm2 = vweird.f32 %v7610_v12 }
0x1f7c   :  { %v3759_v10 = vmul.f32 %v7612_v11, %v3742_v9  ;;  %vm3750_vm6 = vmor %vm3748_vm4, %vm3749_vm2  ;;  %vm3764_vm10 = vweird.f32 %v7612_v11 }
0x1f7d   :  { %v3745_v17 = vsub.f32 1.0, %v3744_v45  ;;  %vm3765_vm3 = vmor %vm3763_vm13, %vm3764_vm10 }
0x1f7e   :  { %v3760_v62 = vsub.f32 1.0, %v3759_v10 }
0x1f7f   :  { %v3746_v47 = vmul.f32 %v7610_v12, %v3745_v17 }
0x1f80   :  { %v3761_v55 = vmul.f32 %v7612_v11, %v3760_v62 }
0x1f81   :  { %v3747_v41 = vadd.f32 %v7610_v12, %v3746_v47 }
0x1f82   :  { %v3762_v49 = vadd.f32 %v7612_v11, %v3761_v55 }
0x1f83   :  { %v3751_v16 = vsel %vm3750_vm6, %v7610_v12, %v3747_v41  ;;  %v10605_v41 = vrot.slane %v10570_v7, 7 }
0x1f84   :  { %v3756_v44 = vsel %vm3753_vm5, %v3755_v4, %v3751_v16  ;;  %v3766_v2 = vsel %vm3765_vm3, %v7612_v11, %v3762_v49 }
0x1f85   :  { %v3771_v14 = vsel %vm3768_vm11, %v3770_v24, %v3766_v2  ;;  %v3775_v43 = vmul.f32 0.0, %v3756_v44 }
0x1f86   :  { %v3776_v48 = vmul.f32 0.0, %v3771_v14 }
0x1fe1   :  { %v3780_v19 = vpop.permute.xlu0 %3779 }
0x1fe2   :  { %v3785_v18 = vmul.f32 %v3780_v19, %v3756_v44 }
0x1fe3   :  { %v3782_v37 = vpop.permute.xlu1 %3781 }
0x1fe4   :  { %3789 = vrot.lane.b32.xlu2 %v3785_v18, %s7831_s28  ;;  %v3786_v6 = vmul.f32 %v3782_v37, %v3771_v14 }
0x1fe6   :  { %3791 = vrot.lane.b32.xlu0 %v3786_v6, %s7831_s28 }
0x203e   :  { %v3790_v32 = vpop.permute.xlu2 %3789 }
0x203f   :  { %v10588_v63 = vadd.f32 %v3790_v32, %v3775_v43 }
0x2041   :  { %7613 = vtanh.f32 %v10588_v63 }
0x2047   :  { %v7614_v61 = vpop.eup %7613 }
0x2048   :  { %3801 = vrot.lane.b32.xlu1 %v7614_v61, %s7833_s30 }
0x2058   :  { %v3792_v52 = vpop.permute.xlu0 %3791 }
0x2059   :  { %v10592_v25 = vadd.f32 %v3792_v52, %v3776_v48 }
0x205b   :  { %7615 = vtanh.f32 %v10592_v25 }
0x2061   :  { %v7616_v50 = vpop.eup %7615 }
0x2062   :  { %3803 = vrot.lane.b32.xlu2 %v7616_v50, %s7833_s30 }
0x20ba   :  { %v3802_v46 = vpop.permute.xlu1 %3801 }
0x20bb   :  { %v3807_v60 = vmul.f32 %v3802_v46, %v3756_v44 }
0x20bc   :  { %v3804_v9 = vpop.permute.xlu2 %3803 }
0x20bd   :  { %v3808_v12 = vmul.f32 %v3804_v9, %v3771_v14  ;;  %v3811_v11 = vperm.slane %v3807_v60, 0 }
0x20bf   :  { %v3812_v45 = vperm.slane %v3808_v12, 0 }
0x20c1   :  { %v3813_v10 = vsel %vm434_vm0, %v3812_v45, %v3811_v11 }
0x20c2   :  { %3814 = vrot.lane.b32.xlu0 %v3813_v10, %s7845_s17 }
0x2134   :  { %v10598_v17 = vpop.permute.xlu0 %3814 }
0x2135   :  { %7235 = vmatmul.msk.f32.vlgmr.msrb.gmra.mxu2 %vm1309_vm14, %v10598_v17 }
0x21b8   :  { %v3835_v62 = vpop.f32.mrf.mxu2 }
0x21b9   :  { %v3839_v47 = vrot.slane %v3835_v62, 7  ;;  %v3843_v55 = vadd.f32 %v3835_v62, %v3696_v3 }
0x21bb   :  { %v3842_v1 = vadd.f32 %v3839_v47, %v10573_v36  ;;  %v3847_v8 = vadd.f32 %v10570_v7, %v3843_v55 }
0x21bd   :  { %v3846_v49 = vadd.f32 %v10605_v41, %v3842_v1  ;;  %7617 = vtanh.f32 %v3847_v8  ;;  %v7237_v4 = vmul.f32 -1.442695, %v3847_v8 }
0x21bf   :  { %7619 = vtanh.f32 %v3846_v49  ;;  %v7236_v2 = vmul.f32 -1.442695, %v3846_v49 }
0x21c0   :  { %7621 = vpow2.f32 %v7237_v4 }
0x21c3   :  { %v7618_v16 = vpop.eup %7617 }
0x21c4   :  { %3900 = vrot.lane.b32.xlu2 %v7618_v16, %s7844_s16  ;;  %v3891_v16 = vrot.slane %v10592_v25, 7 }
0x21c5   :  { %v7620_v23 = vpop.eup %7619 }
0x21c6   :  { %3898 = vrot.lane.b32.xlu1 %v7620_v23, %s7844_s16  ;;  %v7622_v3 = vpop.eup %7621 }
0x21c7   :  { %v3855_v38 = vadd.f32 1.0, %v7622_v3 }
0x21c9   :  { %7623 = vrcp.f32 %v3855_v38  ;;  %v3882_v6 = vand.u32 2147483648, %v3855_v38  ;;  %vm3876_vm5 = vweird.f32 %v3855_v38  ;;  %v3880_v32 = vand.u32 2147483647, %v3855_v38 }
0x21ca   :  { %7625 = vpow2.f32 %v7236_v2 }
0x21cb   :  { %v3883_v48 = vor.u32 1.1754944e-38, %v3882_v6  ;;  %vm3881_vm11 = vcmp.eq.f32.partialorder %v3880_v32, 8.507059e+37 }
0x21cf   :  { %v7624_v19 = vpop.eup %7623 }
0x21d0   :  { %v3872_v44 = vmul.f32 %v7624_v19, %v3855_v38  ;;  %v7626_v37 = vpop.eup %7625  ;;  %vm3877_vm3 = vweird.f32 %v7624_v19 }
0x21d1   :  { %v3854_v43 = vadd.f32 1.0, %v7626_v37  ;;  %vm3878_vm10 = vmor %vm3876_vm5, %vm3877_vm3 }
0x21d2   :  { %v3873_v18 = vsub.f32 1.0, %v3872_v44 }
0x21d3   :  { %7627 = vrcp.f32 %v3854_v43  ;;  %v3867_v10 = vand.u32 2147483648, %v3854_v43  ;;  %vm3861_vm2 = vweird.f32 %v3854_v43  ;;  %v3865_v62 = vand.u32 2147483647, %v3854_v43 }
0x21d4   :  { %v3874_v24 = vmul.f32 %v7624_v19, %v3873_v18 }
0x21d5   :  { %v3868_v55 = vor.u32 1.1754944e-38, %v3867_v10  ;;  %vm3866_vm6 = vcmp.eq.f32.partialorder %v3865_v62, 8.507059e+37 }
0x21d6   :  { %v3875_v14 = vadd.f32 %v7624_v19, %v3874_v24 }
0x21d8   :  { %v3879_v61 = vsel %vm3878_vm10, %v7624_v19, %v3875_v14  ;;  %v3890_v19 = vrot.slane %v10588_v63, 7 }
0x21d9   :  { %v3884_v50 = vsel %vm3881_vm11, %v3883_v48, %v3879_v61  ;;  %v7628_v60 = vpop.eup %7627 }
0x21da   :  { %v3857_v9 = vmul.f32 %v7628_v60, %v3854_v43  ;;  %vm3862_vm13 = vweird.f32 %v7628_v60  ;;  %v3895_v23 = vmul.f32 %v3891_v16, %v3884_v50 }
0x21db   :  { %vm3863_vm4 = vmor %vm3861_vm2, %vm3862_vm13 }
0x21dc   :  { %v3858_v12 = vsub.f32 1.0, %v3857_v9 }
0x21de   :  { %v3859_v11 = vmul.f32 %v7628_v60, %v3858_v12 }
0x21e0   :  { %v3860_v45 = vadd.f32 %v7628_v60, %v3859_v11 }
0x21e2   :  { %v3864_v47 = vsel %vm3863_vm4, %v7628_v60, %v3860_v45 }
0x21e3   :  { %v3869_v8 = vsel %vm3866_vm6, %v3868_v55, %v3864_v47 }
0x21e4   :  { %v3894_v44 = vmul.f32 %v3890_v19, %v3869_v8 }
0x221e   :  { %v3901_v52 = vpop.permute.xlu2 %3900 }
0x221f   :  { %v3905_v46 = vmul.f32 %v3901_v52, %v3884_v50  ;;  %v3689_v52 = vpop.f32.mrf.mxu0 }
0x2221   :  { %3910 = vrot.lane.b32.xlu1 %v3905_v46, %s7831_s28  ;;  %v3694_v46 = vrot.slane %v10573_v36, 2 }
0x2238   :  { %v3899_v1 = vpop.permute.xlu1 %3898 }
0x2239   :  { %v3904_v49 = vmul.f32 %v3899_v1, %v3869_v8 }
0x223b   :  { %3908 = vrot.lane.b32.xlu0 %v3904_v49, %s7831_s28 }
0x2293   :  { %v3911_v4 = vpop.permute.xlu1 %3910 }
0x2294   :  { %v10615_v3 = vadd.f32 %v3911_v4, %v3895_v23 }
0x2296   :  { %7629 = vtanh.f32 %v10615_v3 }
0x229c   :  { %v7630_v38 = vpop.eup %7629 }
0x229d   :  { %3922 = vrot.lane.b32.xlu0 %v7630_v38, %s7833_s30 }
0x22ad   :  { %v3909_v2 = vpop.permute.xlu0 %3908 }
0x22ae   :  { %v10620_v18 = vadd.f32 %v3909_v2, %v3894_v44 }
0x22b0   :  { %7631 = vtanh.f32 %v10620_v18 }
0x22b6   :  { %v7632_v24 = vpop.eup %7631 }
0x22b7   :  { %3920 = vrot.lane.b32.xlu2 %v7632_v24, %s7833_s30 }
0x230f   :  { %v3923_v25 = vpop.permute.xlu0 %3922 }
0x2310   :  { %v3927_v37 = vmul.f32 %v3923_v25, %v3884_v50  ;;  %v10632_v50 = vadd.f32 %v10567_v33, %v3689_v52 }
0x2311   :  { %v3921_v14 = vpop.permute.xlu2 %3920 }
0x2312   :  { %v3926_v6 = vmul.f32 %v3921_v14, %v3869_v8  ;;  %v3931_v43 = vperm.slane %v3927_v37, 1 }
0x2314   :  { %v3930_v32 = vperm.slane %v3926_v6, 1 }
0x2316   :  { %v3932_v61 = vsel %vm434_vm0, %v3931_v43, %v3930_v32  ;;  %v10626_v48 = vsel %vm436_vm1, %v3931_v43, %v3930_v32 }
0x2317   :  { %3933 = vrot.lane.b32.xlu1 %v3932_v61, %s7845_s17 }
0x2389   :  { %v3934_v63 = vpop.permute.xlu1 %3933 }
0x238a   :  { %7238 = vmatmul.msk.f32.vlgmr.msra.gmra.mxu1 %vm1309_vm14, %v3934_v63 }
0x2407   :  { %v3954_v60 = vpop.f32.mrf.mxu1 }
0x2408   :  { %v3958_v9 = vrot.slane %v3954_v60, 1  ;;  %v3961_v12 = vadd.f32 %v3954_v60, %v3694_v46 }
0x240a   :  { %v3962_v11 = vadd.f32 %v3958_v9, %v10632_v50  ;;  %v3963_v45 = vadd.f32 %v10570_v7, %v3961_v12 }
0x240c   :  { %v3964_v10 = vadd.f32 %v3962_v11, %v10578_v28  ;;  %7633 = vtanh.f32 %v3963_v45  ;;  %v7239_v33 = vmul.f32 -1.442695, %v3963_v45 }
0x240e   :  { %7635 = vtanh.f32 %v3964_v10  ;;  %v7240_v16 = vmul.f32 -1.442695, %v3964_v10 }
0x240f   :  { %7637 = vpow2.f32 %v7239_v33  ;;  %v7241_v33 = vrot.slane %v10620_v18, 9 }
0x2412   :  { %v7634_v62 = vpop.eup %7633 }
0x2413   :  { %4017 = vrot.lane.b32.xlu2 %v7634_v62, %s7844_s16 }
0x2414   :  { %v7636_v47 = vpop.eup %7635 }
0x2415   :  { %4019 = vrot.lane.b32.xlu0 %v7636_v47, %s7844_s16  ;;  %v7638_v55 = vpop.eup %7637 }
0x2416   :  { %v3971_v1 = vadd.f32 1.0, %v7638_v55 }
0x2418   :  { %7639 = vrcp.f32 %v3971_v1  ;;  %v3984_v44 = vand.u32 2147483648, %v3971_v1  ;;  %vm3978_vm5 = vweird.f32 %v3971_v1  ;;  %v3982_v24 = vand.u32 2147483647, %v3971_v1 }
0x2419   :  { %7641 = vpow2.f32 %v7240_v16 }
0x241a   :  { %v3985_v37 = vor.u32 1.1754944e-38, %v3984_v44  ;;  %vm3983_vm11 = vcmp.eq.f32.partialorder %v3982_v24, 8.507059e+37 }
0x241e   :  { %v7640_v8 = vpop.eup %7639 }
0x241f   :  { %v3974_v49 = vmul.f32 %v7640_v8, %v3971_v1  ;;  %v7642_v38 = vpop.eup %7641  ;;  %vm3979_vm3 = vweird.f32 %v7640_v8  ;;  %v7242_v1 = vrot.slane %v10615_v3, 9 }
0x2420   :  { %v3972_v2 = vadd.f32 1.0, %v7642_v38  ;;  %vm3980_vm10 = vmor %vm3978_vm5, %vm3979_vm3 }
0x2421   :  { %v3975_v23 = vsub.f32 1.0, %v3974_v49 }
0x2422   :  { %7643 = vrcp.f32 %v3972_v2  ;;  %v3999_v9 = vand.u32 2147483648, %v3972_v2  ;;  %vm3993_vm2 = vweird.f32 %v3972_v2  ;;  %v3997_v12 = vand.u32 2147483647, %v3972_v2 }
0x2423   :  { %v3976_v4 = vmul.f32 %v7640_v8, %v3975_v23 }
0x2424   :  { %v4000_v45 = vor.u32 1.1754944e-38, %v3999_v9  ;;  %vm3998_vm6 = vcmp.eq.f32.partialorder %v3997_v12, 8.507059e+37 }
0x2425   :  { %v3977_v19 = vadd.f32 %v7640_v8, %v3976_v4 }
0x2427   :  { %v3981_v25 = vsel %vm3980_vm10, %v7640_v8, %v3977_v19 }
0x2428   :  { %v3986_v6 = vsel %vm3983_vm11, %v3985_v37, %v3981_v25  ;;  %v7644_v32 = vpop.eup %7643 }
0x2429   :  { %v3989_v61 = vmul.f32 %v7644_v32, %v3972_v2  ;;  %vm3994_vm13 = vweird.f32 %v7644_v32  ;;  %v4013_v55 = vmul.f32 %v7241_v33, %v3986_v6 }
0x242a   :  { %vm3995_vm4 = vmor %vm3993_vm2, %vm3994_vm13 }
0x242b   :  { %v3990_v63 = vsub.f32 1.0, %v3989_v61 }
0x242d   :  { %v3991_v52 = vmul.f32 %v7644_v32, %v3990_v63 }
0x242f   :  { %v3992_v60 = vadd.f32 %v7644_v32, %v3991_v52  ;;  %v7362_v52 = vld [vmem:[%s10562_s14] ss:$0 sm:$0xff] }
0x2431   :  { %v3996_v11 = vsel %vm3995_vm4, %v7644_v32, %v3992_v60  ;;  %v4437_v32 = vpop.f32.mrf.mxu0 }
0x2432   :  { %v4001_v62 = vsel %vm3998_vm6, %v4000_v45, %v3996_v11 }
0x2433   :  { %v4014_v16 = vmul.f32 %v7242_v1, %v4001_v62 }
0x2439   :  { %v4440_v61 = vpop.f32.mrf.mxu0 }
0x243a   :  { %v10682_v12 = vadd.f32 %v7362_v52, %v4440_v61 }
0x246d   :  { %v4018_v14 = vpop.permute.xlu2 %4017 }
0x246e   :  { %v4023_v43 = vmul.f32 %v4018_v14, %v3986_v6  ;;  %v10658_v14 = vld [vmem:[%s7144_s20 + $0x8] sm:$0xff] }
0x246f   :  { %4467 = vmatpush.msra.mxu3 %v10658_v14  ;;  %4583 = vmatpush.msrb.mxu2 %v10658_v14 }
0x2470   :  { %4027 = vrot.lane.b32.xlu1 %v4023_v43, %s7831_s28  ;;  %v10660_v43 = vld [vmem:[%s7144_s20] sm:$0xff]  ;;  %4704 = vmatpush.msra.mxu1 %v10658_v14 }
0x2471   :  { %4468 = vmatpush.msra.mxu3 %v10660_v43  ;;  %4584 = vmatpush.msrb.mxu2 %v10660_v43 }
0x2472   :  { %4705 = vmatpush.msra.mxu1 %v10660_v43 }
0x2487   :  { %v4020_v10 = vpop.permute.xlu0 %4019 }
0x2488   :  { %v4024_v47 = vmul.f32 %v4020_v10, %v4001_v62  ;;  %v10687_v10 = vadd.f32 %v7362_v52, %v4437_v32 }
0x248a   :  { %4029 = vrot.lane.b32.xlu2 %v4024_v47, %s7831_s28  ;;  %v10692_v47 = vld [vmem:[%s10677_s23] ss:$0 sm:$0xff] }
0x24e2   :  { %v4028_v8 = vpop.permute.xlu1 %4027 }
0x24e3   :  { %v10645_v49 = vadd.f32 %v4028_v8, %v4013_v55  ;;  %v12350_v55 = vrot.slane %v10687_v10, 4 }
0x24e4   :  { %v4030_v23 = vpop.permute.xlu2 %4029 }
0x24e5   :  { %7645 = vtanh.f32 %v10645_v49  ;;  %v10648_v4 = vadd.f32 %v4030_v23, %v4014_v16  ;;  %v10700_v23 = vrot.slane %v10692_v47, 7 }
0x24e7   :  { %7647 = vtanh.f32 %v10648_v4 }
0x24eb   :  { %v7646_v38 = vpop.eup %7645 }
0x24ec   :  { %4039 = vrot.lane.b32.xlu0 %v7646_v38, %s7833_s30 }
0x24ed   :  { %v7648_v19 = vpop.eup %7647 }
0x24ee   :  { %4041 = vrot.lane.b32.xlu1 %v7648_v19, %s7833_s30 }
0x255e   :  { %v4040_v18 = vpop.permute.xlu0 %4039 }
0x255f   :  { %v4045_v44 = vmul.f32 %v4040_v18, %v3986_v6 }
0x2560   :  { %v4042_v3 = vpop.permute.xlu1 %4041 }
0x2561   :  { %v4046_v2 = vmul.f32 %v4042_v3, %v4001_v62  ;;  %v4049_v24 = vperm.slane %v4045_v44, 0 }
0x2563   :  { %v4050_v25 = vperm.slane %v4046_v2, 0 }
0x2565   :  { %v4051_v37 = vsel %vm434_vm0, %v4050_v25, %v4049_v24 }
0x2566   :  { %4052 = vrot.lane.b32.xlu2 %v4051_v37, %s7845_s17 }
0x25c0   :  { %v10668_v6 = vpop.permute.xlu2 %4052 }
0x25c1   :  { %7243 = vmatmul.msk.f32.vlgmr.msrb.gmra.mxu3 %vm1309_vm14, %v10668_v6 }
0x25c2   :  { %4821 = vmatpush.msrb.mxu3 %v10658_v14 }
0x25c4   :  { %4822 = vmatpush.msrb.mxu3 %v10660_v43 }
0x25c9   :  { %4469 = vmatmul.f32.vlgmr.msra.gmra.mxu3 %v12527_v5  ;;  %v12349_v5 = vrot.slane %v10682_v12, 2 }
0x2644   :  { %v4073_v63 = vpop.f32.mrf.mxu3 }
0x2645   :  { %v4077_v60 = vrot.slane %v4073_v63, 7  ;;  %v4081_v9 = vadd.f32 %v4073_v63, %v10632_v50 }
0x2647   :  { %v4080_v11 = vadd.f32 %v4077_v60, %v3694_v46  ;;  %v4083_v45 = vadd.f32 %v10570_v7, %v4081_v9 }
0x2649   :  { %v4082_v62 = vadd.f32 %v4080_v11, %v10605_v41  ;;  %7649 = vtanh.f32 %v4083_v45  ;;  %v7245_v25 = vmul.f32 -1.442695, %v4083_v45 }
0x264b   :  { %7651 = vtanh.f32 %v4082_v62  ;;  %v7244_v37 = vmul.f32 -1.442695, %v4082_v62 }
0x264c   :  { %v4470_v33 = vpop.f32.mrf.mxu3 }
0x264d   :  { %v4474_v1 = vrot.slane %v4470_v33, 7  ;;  %v4478_v8 = vadd.f32 %v4470_v33, %v12349_v5 }
0x264f   :  { %v7650_v46 = vpop.eup %7649  ;;  %v4477_v16 = vadd.f32 %v4474_v1, %v12350_v55  ;;  %v4485_v38 = vadd.f32 %v10692_v47, %v4478_v8 }
0x2650   :  { %4136 = vrot.lane.b32.xlu1 %v7650_v46, %s7844_s16 }
0x2651   :  { %v7652_v19 = vpop.eup %7651  ;;  %v4484_v18 = vadd.f32 %v10700_v23, %v4477_v16  ;;  %7653 = vtanh.f32 %v4485_v38  ;;  %v7257_v63 = vmul.f32 -1.442695, %v4485_v38 }
0x2652   :  { %4134 = vrot.lane.b32.xlu0 %v7652_v19, %s7844_s16 }
0x2653   :  { %7655 = vtanh.f32 %v4484_v18  ;;  %v7256_v2 = vmul.f32 -1.442695, %v4484_v18 }
0x2655   :  { %7657 = vpow2.f32 %v7256_v2 }
0x2656   :  { %7659 = vpow2.f32 %v7245_v25 }
0x2657   :  { %v7654_v44 = vpop.eup %7653  ;;  %7661 = vpow2.f32 %v7244_v37 }
0x2659   :  { %v7656_v3 = vpop.eup %7655 }
0x265a   :  { %4532 = vrot.lane.b32.xlu0 %v7654_v44, %s7844_s16  ;;  %4530 = vrot.lane.b32.xlu2 %v7656_v3, %s7844_s16 }
0x265b   :  { %v7658_v24 = vpop.eup %7657 }
0x265c   :  { %v4492_v32 = vadd.f32 1.0, %v7658_v24  ;;  %v7660_v61 = vpop.eup %7659 }
0x265d   :  { %v7662_v52 = vpop.eup %7661  ;;  %v4091_v9 = vadd.f32 1.0, %v7660_v61 }
0x265e   :  { %7663 = vrcp.f32 %v4492_v32  ;;  %v4090_v11 = vadd.f32 1.0, %v7662_v52  ;;  %v4505_v44 = vand.u32 2147483648, %v4492_v32  ;;  %vm4499_vm5 = vweird.f32 %v4492_v32 }
0x265f   :  { %7665 = vpow2.f32 %v7257_v63  ;;  %v4503_v3 = vand.u32 2147483647, %v4492_v32  ;;  %vm4112_vm2 = vweird.f32 %v4091_v9 }
0x2660   :  { %7667 = vrcp.f32 %v4091_v9  ;;  %v4506_v25 = vor.u32 1.1754944e-38, %v4505_v44 }
0x2661   :  { %7669 = vrcp.f32 %v4090_v11  ;;  %vm4504_vm11 = vcmp.eq.f32.partialorder %v4503_v3, 8.507059e+37 }
0x2664   :  { %v7664_v60 = vpop.eup %7663 }
0x2665   :  { %v4495_v33 = vmul.f32 %v7664_v60, %v4492_v32  ;;  %v7666_v8 = vpop.eup %7665  ;;  %vm4500_vm3 = vweird.f32 %v7664_v60  ;;  %v4118_v32 = vand.u32 2147483648, %v4091_v9 }
0x2666   :  { %v7668_v46 = vpop.eup %7667  ;;  %v4493_v16 = vadd.f32 1.0, %v7666_v8  ;;  %vm4501_vm10 = vmor %vm4499_vm5, %vm4500_vm3  ;;  %vm4097_vm3 = vweird.f32 %v4090_v11 }
0x2667   :  { %v4496_v1 = vsub.f32 1.0, %v4495_v33  ;;  %v7670_v62 = vpop.eup %7669  ;;  %v4108_v19 = vmul.f32 %v7668_v46, %v4091_v9  ;;  %vm4113_vm13 = vweird.f32 %v7668_v46  ;;  %v4119_v3 = vor.u32 1.1754944e-38, %v4118_v32 }
0x2668   :  { %7671 = vrcp.f32 %v4493_v16  ;;  %v4093_v38 = vmul.f32 %v7670_v62, %v4090_v11  ;;  %vm4114_vm4 = vmor %vm4112_vm2, %vm4113_vm13  ;;  %vm4098_vm6 = vweird.f32 %v7670_v62  ;;  %vm4514_vm2 = vweird.f32 %v4493_v16 }
0x2669   :  { %v4497_v45 = vmul.f32 %v7664_v60, %v4496_v1  ;;  %v4109_v2 = vsub.f32 1.0, %v4108_v19  ;;  %v4116_v19 = vand.u32 2147483647, %v4091_v9 }
0x266a   :  { %v4094_v37 = vsub.f32 1.0, %v4093_v38  ;;  %v4103_v38 = vand.u32 2147483648, %v4090_v11 }
0x266b   :  { %v4498_v18 = vadd.f32 %v7664_v60, %v4497_v45  ;;  %v4110_v63 = vmul.f32 %v7668_v46, %v4109_v2  ;;  %v4101_v2 = vand.u32 2147483647, %v4090_v11  ;;  %vm4117_vm5 = vcmp.eq.f32.partialorder %v4116_v19, 8.507059e+37 }
0x266c   :  { %v4095_v8 = vmul.f32 %v7670_v62, %v4094_v37  ;;  %v4518_v11 = vand.u32 2147483647, %v4493_v16 }
0x266d   :  { %v4502_v24 = vsel %vm4501_vm10, %v7664_v60, %v4498_v18  ;;  %v4111_v5 = vadd.f32 %v7668_v46, %v4110_v63  ;;  %vm4099_vm10 = vmor %vm4097_vm3, %vm4098_vm6 }
0x266e   :  { %v7672_v61 = vpop.eup %7671  ;;  %v10708_v33 = vsel %vm4504_vm11, %v4506_v25, %v4502_v24  ;;  %v4096_v60 = vadd.f32 %v7670_v62, %v4095_v8  ;;  %vm4102_vm11 = vcmp.eq.f32.partialorder %v4101_v2, 8.507059e+37  ;;  %vm4519_vm6 = vcmp.eq.f32.partialorder %v4518_v11, 8.507059e+37 }
0x266f   :  { %v4510_v45 = vmul.f32 %v7672_v61, %v4493_v16  ;;  %v4115_v44 = vsel %vm4114_vm4, %v7668_v46, %v4111_v5  ;;  %vm4515_vm13 = vweird.f32 %v7672_v61  ;;  %v4520_v5 = vand.u32 2147483648, %v4493_v16 }
0x2670   :  { %v4120_v25 = vsel %vm4117_vm5, %v4119_v3, %v4115_v44  ;;  %v4100_v37 = vsel %vm4099_vm10, %v7670_v62, %v4096_v60  ;;  %vm4516_vm4 = vmor %vm4514_vm2, %vm4515_vm13  ;;  %v4526_v16 = vmul.f32 0.0, %v10708_v33 }
0x2671   :  { %v4511_v18 = vsub.f32 1.0, %v4510_v45  ;;  %v4521_v32 = vor.u32 1.1754944e-38, %v4520_v5 }
0x26b4   :  { %v4531_v52 = vpop.permute.xlu2 %4530 }
0x26b5   :  { %v4536_v1 = vmul.f32 %v4531_v52, %v10708_v33  ;;  %v4512_v52 = vmul.f32 %v7672_v61, %v4511_v18  ;;  %v4127_v18 = vrot.slane %v10648_v4, 7 }
0x26b7   :  { %4540 = vrot.lane.b32.xlu0 %v4536_v1, %s7831_s28  ;;  %v4104_v1 = vor.u32 1.1754944e-38, %v4103_v38  ;;  %v4513_v45 = vadd.f32 %v7672_v61, %v4512_v52  ;;  %v4131_v44 = vmul.f32 %v4127_v18, %v4120_v25 }
0x26b9   :  { %v4105_v9 = vsel %vm4102_vm11, %v4104_v1, %v4100_v37  ;;  %v4517_v46 = vsel %vm4516_vm4, %v7672_v61, %v4513_v45  ;;  %v4126_v37 = vrot.slane %v10645_v49, 7 }
0x26ba   :  { %v4522_v62 = vsel %vm4519_vm6, %v4521_v32, %v4517_v46 }
0x26bb   :  { %v4130_v4 = vmul.f32 %v4126_v37, %v4105_v9  ;;  %v4527_v1 = vmul.f32 0.0, %v4522_v62 }
0x26c2   :  { %v4137_v24 = vpop.permute.xlu1 %4136 }
0x26c3   :  { %v4141_v63 = vmul.f32 %v4137_v24, %v4120_v25 }
0x26c4   :  { %v4135_v55 = vpop.permute.xlu0 %4134 }
0x26c5   :  { %4146 = vrot.lane.b32.xlu2 %v4141_v63, %s7831_s28  ;;  %v4140_v8 = vmul.f32 %v4135_v55, %v4105_v9 }
0x26c7   :  { %4144 = vrot.lane.b32.xlu1 %v4140_v8, %s7831_s28 }
0x26cc   :  { %v4533_v19 = vpop.permute.xlu0 %4532 }
0x26cd   :  { %v4537_v60 = vmul.f32 %v4533_v19, %v4522_v62 }
0x26cf   :  { %4542 = vrot.lane.b32.xlu1 %v4537_v60, %s7831_s28 }
0x271f   :  { %v4147_v55 = vpop.permute.xlu2 %4146 }
0x2720   :  { %v10716_v38 = vadd.f32 %v4147_v55, %v4131_v44 }
0x2722   :  { %7673 = vtanh.f32 %v10716_v38 }
0x2728   :  { %v7674_v3 = vpop.eup %7673 }
0x2729   :  { %4158 = vrot.lane.b32.xlu0 %v7674_v3, %s7833_s30  ;;  %v4541_v61 = vpop.permute.xlu0 %4540 }
0x272a   :  { %v10721_v2 = vadd.f32 %v4541_v61, %v4526_v16 }
0x272c   :  { %7675 = vtanh.f32 %v10721_v2 }
0x2732   :  { %v7676_v24 = vpop.eup %7675 }
0x2733   :  { %4552 = vrot.lane.b32.xlu1 %v7676_v24, %s7833_s30 }
0x2739   :  { %v4145_v52 = vpop.permute.xlu1 %4144 }
0x273a   :  { %v10726_v63 = vadd.f32 %v4145_v52, %v4130_v4 }
0x273c   :  { %7677 = vtanh.f32 %v10726_v63 }
0x2741   :  { %v4543_v8 = vpop.permute.xlu1 %4542 }
0x2742   :  { %v7678_v45 = vpop.eup %7677  ;;  %v10729_v5 = vadd.f32 %v4543_v8, %v4527_v1  ;;  %v12351_v8 = vrot.slane %v10632_v50, 2 }
0x2743   :  { %4156 = vrot.lane.b32.xlu2 %v7678_v45, %s7833_s30 }
0x2744   :  { %7679 = vtanh.f32 %v10729_v5 }
0x274a   :  { %v7680_v11 = vpop.eup %7679 }
0x274b   :  { %4554 = vrot.lane.b32.xlu2 %v7680_v11, %s7833_s30 }
0x279b   :  { %v4159_v49 = vpop.permute.xlu0 %4158 }
0x279c   :  { %v4163_v46 = vmul.f32 %v4159_v49, %v4120_v25 }
0x279d   :  { %v4157_v32 = vpop.permute.xlu2 %4156 }
0x279e   :  { %v4162_v19 = vmul.f32 %v4157_v32, %v4105_v9  ;;  %v4167_v60 = vperm.slane %v4163_v46, 1 }
0x27a0   :  { %v4166_v18 = vperm.slane %v4162_v19, 1 }
0x27a2   :  { %v4168_v44 = vsel %vm434_vm0, %v4167_v60, %v4166_v18  ;;  %v10736_v55 = vsel %vm436_vm1, %v4167_v60, %v4166_v18 }
0x27a3   :  { %4169 = vrot.lane.b32.xlu0 %v4168_v44, %s7845_s17  ;;  %v12533_v44 = vrot.slane %v10687_v10, 4 }
0x27a5   :  { %v4555_v3 = vpop.permute.xlu2 %4554  ;;  %v4553_v61 = vpop.permute.xlu1 %4552 }
0x27a6   :  { %v4559_v16 = vmul.f32 %v4555_v3, %v4522_v62  ;;  %v4558_v24 = vmul.f32 %v4553_v61, %v10708_v33  ;;  %v12352_v33 = vrot.slane %v10573_v36, 4 }
0x27a8   :  { %v4563_v37 = vperm.slane %v4559_v16, 1  ;;  %v4562_v4 = vperm.slane %v4558_v24, 1  ;;  %v10761_v16 = vrot.slane %v10692_v47, 1  ;;  %v12534_v24 = vrot.slane %v10682_v12, 2 }
0x27aa   :  { %v4564_v25 = vsel %vm434_vm0, %v4563_v37, %v4562_v4  ;;  %v10742_v9 = vsel %vm436_vm1, %v4563_v37, %v4562_v4 }
0x27ab   :  { %4565 = vrot.lane.b32.xlu1 %v4564_v25, %s7845_s17 }
0x2815   :  { %v4170_v52 = vpop.permute.xlu0 %4169 }
0x2816   :  { %7246 = vmatmul.msk.f32.vlgmr.msra.gmra.mxu2 %vm1309_vm14, %v4170_v52 }
0x2817   :  { %4940 = vmatpush.msra.mxu2 %v10658_v14 }
0x2819   :  { %4941 = vmatpush.msra.mxu2 %v10660_v43 }
0x281d   :  { %v4566_v62 = vpop.permute.xlu1 %4565 }
0x281e   :  { %7258 = vmatmul.msk.f32.vlgmr.msrb.gmra.mxu2 %vm1309_vm14, %v4566_v62 }
0x2899   :  { %v4190_v1 = vpop.f32.mrf.mxu2 }
0x289a   :  { %v4194_v45 = vrot.slane %v4190_v1, 1  ;;  %v4197_v11 = vadd.f32 %v4190_v1, %v12352_v33 }
0x289c   :  { %v4198_v49 = vadd.f32 %v4194_v45, %v12351_v8  ;;  %v4199_v46 = vadd.f32 %v10570_v7, %v4197_v11 }
0x289e   :  { %v4200_v32 = vadd.f32 %v4198_v49, %v10578_v28  ;;  %7681 = vtanh.f32 %v4199_v46  ;;  %v7247_v52 = vmul.f32 -1.442695, %v4199_v46 }
0x28a0   :  { %7683 = vtanh.f32 %v4200_v32 }
0x28a1   :  { %v4586_v60 = vpop.f32.mrf.mxu2 }
0x28a2   :  { %v4590_v18 = vrot.slane %v4586_v60, 1  ;;  %v4593_v3 = vadd.f32 %v4586_v60, %v12533_v44  ;;  %v7248_v60 = vmul.f32 -1.442695, %v4200_v32 }
0x28a4   :  { %v7682_v19 = vpop.eup %7681  ;;  %v4594_v37 = vadd.f32 %v4590_v18, %v12534_v24  ;;  %v4597_v7 = vadd.f32 %v10692_v47, %v4593_v3 }
0x28a5   :  { %4253 = vrot.lane.b32.xlu2 %v7682_v19, %s7844_s16 }
0x28a6   :  { %v7684_v61 = vpop.eup %7683  ;;  %v4598_v28 = vadd.f32 %v10761_v16, %v4594_v37  ;;  %7685 = vtanh.f32 %v4597_v7 }
0x28a7   :  { %4255 = vrot.lane.b32.xlu0 %v7684_v61, %s7844_s16  ;;  %v7259_v61 = vmul.f32 -1.442695, %v4597_v7 }
0x28a8   :  { %7687 = vtanh.f32 %v4598_v28  ;;  %v7260_v45 = vmul.f32 -1.442695, %v4598_v28 }
0x28a9   :  { %7689 = vpow2.f32 %v7247_v52 }
0x28ac   :  { %v7686_v4 = vpop.eup %7685 }
0x28ad   :  { %4651 = vrot.lane.b32.xlu1 %v7686_v4, %s7844_s16 }
0x28ae   :  { %v7688_v25 = vpop.eup %7687 }
0x28af   :  { %4653 = vrot.lane.b32.xlu2 %v7688_v25, %s7844_s16  ;;  %v7690_v62 = vpop.eup %7689 }
0x28b0   :  { %v4207_v1 = vadd.f32 1.0, %v7690_v62 }
0x28b2   :  { %7691 = vrcp.f32 %v4207_v1  ;;  %v4220_v4 = vand.u32 2147483648, %v4207_v1  ;;  %vm4214_vm5 = vweird.f32 %v4207_v1  ;;  %v4218_v28 = vand.u32 2147483647, %v4207_v1 }
0x28b3   :  { %7693 = vpow2.f32 %v7260_v45 }
0x28b4   :  { %7695 = vpow2.f32 %v7248_v60  ;;  %v4221_v45 = vor.u32 1.1754944e-38, %v4220_v4  ;;  %vm4219_vm11 = vcmp.eq.f32.partialorder %v4218_v28, 8.507059e+37 }
0x28b8   :  { %v7692_v11 = vpop.eup %7691 }
0x28b9   :  { %v7694_v49 = vpop.eup %7693  ;;  %v4210_v19 = vmul.f32 %v7692_v11, %v4207_v1  ;;  %vm4215_vm3 = vweird.f32 %v7692_v11 }
0x28ba   :  { %v4606_v18 = vadd.f32 1.0, %v7694_v49  ;;  %v7696_v24 = vpop.eup %7695  ;;  %vm4216_vm10 = vmor %vm4214_vm5, %vm4215_vm3 }
0x28bb   :  { %v4211_v44 = vsub.f32 1.0, %v4210_v19  ;;  %v4208_v25 = vadd.f32 1.0, %v7696_v24 }
0x28bc   :  { %7697 = vrcp.f32 %v4606_v18  ;;  %vm4627_vm2 = vweird.f32 %v4606_v18 }
0x28bd   :  { %v4212_v3 = vmul.f32 %v7692_v11, %v4211_v44  ;;  %7699 = vpow2.f32 %v7259_v61  ;;  %v4235_v8 = vand.u32 2147483648, %v4208_v25  ;;  %vm4229_vm5 = vweird.f32 %v4208_v25 }
0x28be   :  { %7701 = vrcp.f32 %v4208_v25 }
0x28bf   :  { %v4213_v37 = vadd.f32 %v7692_v11, %v4212_v3 }
0x28c1   :  { %v4217_v52 = vsel %vm4216_vm10, %v7692_v11, %v4213_v37  ;;  %v4633_v11 = vand.u32 2147483648, %v4606_v18  ;;  %v4631_v37 = vand.u32 2147483647, %v4606_v18 }
0x28c2   :  { %v7698_v46 = vpop.eup %7697  ;;  %v10770_v32 = vsel %vm4219_vm11, %v4221_v45, %v4217_v52 }
0x28c3   :  { %v4623_v62 = vmul.f32 %v7698_v46, %v4606_v18  ;;  %v7700_v19 = vpop.eup %7699  ;;  %vm4628_vm13 = vweird.f32 %v7698_v46  ;;  %v4634_v45 = vor.u32 1.1754944e-38, %v4633_v11  ;;  %vm4632_vm6 = vcmp.eq.f32.partialorder %v4631_v37, 8.507059e+37 }
0x28c4   :  { %v4605_v44 = vadd.f32 1.0, %v7700_v19  ;;  %v7702_v3 = vpop.eup %7701  ;;  %vm4629_vm4 = vmor %vm4627_vm2, %vm4628_vm13  ;;  %v4233_v18 = vand.u32 2147483647, %v4208_v25 }
0x28c5   :  { %v4624_v60 = vsub.f32 1.0, %v4623_v62  ;;  %v4225_v1 = vmul.f32 %v7702_v3, %v4208_v25  ;;  %vm4230_vm3 = vweird.f32 %v7702_v3 }
0x28c6   :  { %7703 = vrcp.f32 %v4605_v44  ;;  %vm4231_vm10 = vmor %vm4229_vm5, %vm4230_vm3  ;;  %vm4234_vm11 = vcmp.eq.f32.partialorder %v4233_v18, 8.507059e+37  ;;  %vm4612_vm2 = vweird.f32 %v4605_v44 }
0x28c7   :  { %v4625_v61 = vmul.f32 %v7698_v46, %v4624_v60  ;;  %v4226_v4 = vsub.f32 1.0, %v4225_v1  ;;  %v4236_v1 = vor.u32 1.1754944e-38, %v4235_v8 }
0x28c9   :  { %v4626_v24 = vadd.f32 %v7698_v46, %v4625_v61 }
0x28cb   :  { %v4630_v28 = vsel %vm4629_vm4, %v7698_v46, %v4626_v24 }
0x28cc   :  { %v7704_v52 = vpop.eup %7703 }
0x28cd   :  { %v4608_v60 = vmul.f32 %v7704_v52, %v4605_v44  ;;  %vm4613_vm13 = vweird.f32 %v7704_v52 }
0x28ce   :  { %vm4614_vm4 = vmor %vm4612_vm2, %vm4613_vm13 }
0x28cf   :  { %v4609_v33 = vsub.f32 1.0, %v4608_v60 }
0x28d1   :  { %v4610_v24 = vmul.f32 %v7704_v52, %v4609_v33  ;;  %v7249_v33 = vrot.slane %v10726_v63, 9 }
0x28d3   :  { %v4249_v8 = vmul.f32 %v7249_v33, %v10770_v32 }
0x28ff   :  { %v4254_v49 = vpop.permute.xlu2 %4253 }
0x2900   :  { %v4259_v7 = vmul.f32 %v4254_v49, %v10770_v32  ;;  %v10774_v49 = vsel %vm4632_vm6, %v4634_v45, %v4630_v28  ;;  %v4618_v45 = vand.u32 2147483648, %v4605_v44 }
0x2902   :  { %4263 = vrot.lane.b32.xlu0 %v4259_v7, %s7831_s28  ;;  %v4227_v7 = vmul.f32 %v7702_v3, %v4226_v4  ;;  %v4611_v4 = vadd.f32 %v7704_v52, %v4610_v24  ;;  %v7262_v24 = vrot.slane %v10729_v5, 9 }
0x2904   :  { %v4228_v61 = vadd.f32 %v7702_v3, %v4227_v7  ;;  %v4615_v7 = vsel %vm4614_vm4, %v7704_v52, %v4611_v4  ;;  %v4648_v63 = vmul.f32 %v7262_v24, %v10774_v49 }
0x2906   :  { %v4232_v46 = vsel %vm4231_vm10, %v7702_v3, %v4228_v61 }
0x2907   :  { %v4237_v37 = vsel %vm4234_vm11, %v4236_v1, %v4232_v46 }
0x2909   :  { %v4654_v62 = vpop.permute.xlu2 %4653 }
0x290a   :  { %v4658_v19 = vmul.f32 %v4654_v62, %v10774_v49  ;;  %v4616_v62 = vand.u32 2147483647, %v4605_v44  ;;  %v7261_v44 = vrot.slane %v10721_v2, 9  ;;  %v7250_v2 = vrot.slane %v10716_v38, 9 }
0x290c   :  { %4663 = vrot.lane.b32.xlu0 %v4658_v19, %s7831_s28  ;;  %v4619_v19 = vor.u32 1.1754944e-38, %v4618_v45  ;;  %vm4617_vm6 = vcmp.eq.f32.partialorder %v4616_v62, 8.507059e+37  ;;  %v4250_v5 = vmul.f32 %v7250_v2, %v4237_v37 }
0x290e   :  { %v4620_v60 = vsel %vm4617_vm6, %v4619_v19, %v4615_v7 }
0x290f   :  { %v4647_v52 = vmul.f32 %v7261_v44, %v4620_v60 }
0x2919   :  { %v4256_v11 = vpop.permute.xlu0 %4255 }
0x291a   :  { %v4260_v28 = vmul.f32 %v4256_v11, %v4237_v37 }
0x291c   :  { %4265 = vrot.lane.b32.xlu1 %v4260_v28, %s7831_s28 }
0x291f   :  { %v4652_v25 = vpop.permute.xlu1 %4651 }
0x2920   :  { %v4657_v3 = vmul.f32 %v4652_v25, %v4620_v60 }
0x2922   :  { %4661 = vrot.lane.b32.xlu2 %v4657_v3, %s7831_s28 }
0x2974   :  { %v4264_v61 = vpop.permute.xlu0 %4263 }
0x2975   :  { %v10782_v18 = vadd.f32 %v4264_v61, %v4249_v8 }
0x2977   :  { %7705 = vtanh.f32 %v10782_v18 }
0x297c   :  { %v4662_v1 = vpop.permute.xlu2 %4661 }
0x297d   :  { %v7706_v46 = vpop.eup %7705  ;;  %v10788_v11 = vadd.f32 %v4662_v1, %v4647_v52 }
0x297e   :  { %4275 = vrot.lane.b32.xlu1 %v7706_v46, %s7833_s30  ;;  %v4664_v28 = vpop.permute.xlu0 %4663 }
0x297f   :  { %7707 = vtanh.f32 %v10788_v11  ;;  %v10792_v4 = vadd.f32 %v4664_v28, %v4648_v63 }
0x2981   :  { %7709 = vtanh.f32 %v10792_v4 }
0x2985   :  { %v7708_v45 = vpop.eup %7707 }
0x2986   :  { %4673 = vrot.lane.b32.xlu0 %v7708_v45, %s7833_s30 }
0x2987   :  { %v7710_v62 = vpop.eup %7709 }
0x2988   :  { %4675 = vrot.lane.b32.xlu1 %v7710_v62, %s7833_s30  ;;  %v4445_v62 = vrot.slane %v10687_v10, 2 }
0x298e   :  { %v4266_v7 = vpop.permute.xlu1 %4265 }
0x298f   :  { %v10798_v19 = vadd.f32 %v4266_v7, %v4250_v5 }
0x2991   :  { %7711 = vtanh.f32 %v10798_v19 }
0x2997   :  { %v7712_v25 = vpop.eup %7711 }
0x2998   :  { %4277 = vrot.lane.b32.xlu2 %v7712_v25, %s7833_s30 }
0x29f0   :  { %v4276_v3 = vpop.permute.xlu1 %4275 }
0x29f1   :  { %v4281_v33 = vmul.f32 %v4276_v3, %v10770_v32 }
0x29f2   :  { %v4278_v8 = vpop.permute.xlu2 %4277 }
0x29f3   :  { %v4282_v61 = vmul.f32 %v4278_v8, %v4237_v37  ;;  %v4285_v46 = vperm.slane %v4281_v33, 0 }
0x29f5   :  { %v4286_v44 = vperm.slane %v4282_v61, 0 }
0x29f7   :  { %v4287_v38 = vsel %vm434_vm0, %v4286_v44, %v4285_v46 }
0x29f8   :  { %4288 = vrot.lane.b32.xlu2 %v4287_v38, %s7845_s17  ;;  %v4674_v52 = vpop.permute.xlu0 %4673 }
0x29f9   :  { %v4679_v1 = vmul.f32 %v4674_v52, %v4620_v60 }
0x29fa   :  { %v4676_v24 = vpop.permute.xlu1 %4675 }
0x29fb   :  { %v4680_v63 = vmul.f32 %v4676_v24, %v10774_v49  ;;  %v4683_v28 = vperm.slane %v4679_v1, 0 }
0x29fd   :  { %v4684_v45 = vperm.slane %v4680_v63, 0 }
0x29ff   :  { %v10807_v2 = vsel %vm434_vm0, %v4684_v45, %v4683_v28 }
0x2a00   :  { %4686 = vrot.lane.b32.xlu0 %v10807_v2, %s7845_s17 }
0x2a52   :  { %v10811_v32 = vpop.permute.xlu2 %4288 }
0x2a53   :  { %7251 = vmatmul.msk.f32.vlgmr.msrb.gmra.mxu1 %vm1309_vm14, %v10811_v32 }
0x2a54   :  { %5057 = vmatpush.msrb.mxu1 %v10658_v14 }
0x2a56   :  { %5058 = vmatpush.msrb.mxu1 %v10660_v43 }
0x2a72   :  { %v4687_v37 = vpop.permute.xlu0 %4686 }
0x2a73   :  { %7263 = vmatmul.msk.f32.vlgmr.msra.gmra.mxu1 %vm1309_vm14, %v4687_v37 }
0x2ad0   :  { %v10818_v49 = vpop.f32.mrf.mxu1 }
0x2af0   :  { %v4707_v60 = vpop.f32.mrf.mxu1 }
0x2af1   :  { %v4711_v5 = vrot.slane %v4707_v60, 7  ;;  %v4715_v7 = vadd.f32 %v4707_v60, %v10682_v12 }
0x2af3   :  { %v4714_v25 = vadd.f32 %v4711_v5, %v4445_v62  ;;  %v4717_v3 = vadd.f32 %v10692_v47, %v4715_v7 }
0x2af5   :  { %v4716_v14 = vadd.f32 %v4714_v25, %v10700_v23  ;;  %7713 = vtanh.f32 %v4717_v3  ;;  %v7265_v8 = vmul.f32 -1.442695, %v4717_v3 }
0x2af7   :  { %7715 = vtanh.f32 %v4716_v14  ;;  %v7264_v52 = vmul.f32 -1.442695, %v4716_v14 }
0x2af8   :  { %7717 = vpow2.f32 %v7265_v8 }
0x2afb   :  { %v7714_v43 = vpop.eup %7713 }
0x2afc   :  { %4770 = vrot.lane.b32.xlu2 %v7714_v43, %s7844_s16 }
0x2afd   :  { %v7716_v33 = vpop.eup %7715 }
0x2afe   :  { %4768 = vrot.lane.b32.xlu1 %v7716_v33, %s7844_s16  ;;  %v7718_v61 = vpop.eup %7717 }
0x2aff   :  { %v4725_v46 = vadd.f32 1.0, %v7718_v61 }
0x2b01   :  { %7719 = vrcp.f32 %v4725_v46  ;;  %v4752_v45 = vand.u32 2147483648, %v4725_v46  ;;  %vm4746_vm5 = vweird.f32 %v4725_v46  ;;  %v4750_v60 = vand.u32 2147483647, %v4725_v46 }
0x2b02   :  { %7721 = vpow2.f32 %v7264_v52 }
0x2b03   :  { %v4753_v7 = vor.u32 1.1754944e-38, %v4752_v45  ;;  %vm4751_vm11 = vcmp.eq.f32.partialorder %v4750_v60, 8.507059e+37  ;;  %v4761_v45 = vrot.slane %v10792_v4, 7 }
0x2b07   :  { %v7720_v44 = vpop.eup %7719 }
0x2b08   :  { %v4742_v38 = vmul.f32 %v7720_v44, %v4725_v46  ;;  %v7722_v63 = vpop.eup %7721  ;;  %vm4747_vm3 = vweird.f32 %v7720_v44 }
0x2b09   :  { %v4724_v37 = vadd.f32 1.0, %v7722_v63  ;;  %vm4748_vm10 = vmor %vm4746_vm5, %vm4747_vm3 }
0x2b0a   :  { %v4743_v1 = vsub.f32 1.0, %v4742_v38 }
0x2b0b   :  { %7723 = vrcp.f32 %v4724_v37  ;;  %v4737_v52 = vand.u32 2147483648, %v4724_v37  ;;  %vm4731_vm2 = vweird.f32 %v4724_v37 }
0x2b0c   :  { %v4744_v24 = vmul.f32 %v7720_v44, %v4743_v1  ;;  %v4735_v1 = vand.u32 2147483647, %v4724_v37 }
0x2b0e   :  { %v4745_v28 = vadd.f32 %v7720_v44, %v4744_v24  ;;  %vm4736_vm6 = vcmp.eq.f32.partialorder %v4735_v1, 8.507059e+37 }
0x2b10   :  { %v4749_v5 = vsel %vm4748_vm10, %v7720_v44, %v4745_v28  ;;  %v4738_v44 = vor.u32 1.1754944e-38, %v4737_v52 }
0x2b11   :  { %v4754_v3 = vsel %vm4751_vm11, %v4753_v7, %v4749_v5  ;;  %v7724_v14 = vpop.eup %7723 }
0x2b12   :  { %v4727_v33 = vmul.f32 %v7724_v14, %v4724_v37  ;;  %vm4732_vm13 = vweird.f32 %v7724_v14  ;;  %v4765_v60 = vmul.f32 %v4761_v45, %v4754_v3  ;;  %v4760_v37 = vrot.slane %v10788_v11, 7 }
0x2b13   :  { %vm4733_vm4 = vmor %vm4731_vm2, %vm4732_vm13 }
0x2b14   :  { %v4728_v8 = vsub.f32 1.0, %v4727_v33 }
0x2b16   :  { %v4729_v61 = vmul.f32 %v7724_v14, %v4728_v8 }
0x2b18   :  { %v4730_v38 = vadd.f32 %v7724_v14, %v4729_v61 }
0x2b1a   :  { %v4734_v46 = vsel %vm4733_vm4, %v7724_v14, %v4730_v38 }
0x2b1b   :  { %v4739_v63 = vsel %vm4736_vm6, %v4738_v44, %v4734_v46 }
0x2b56   :  { %v4771_v25 = vpop.permute.xlu2 %4770 }
0x2b57   :  { %v4775_v43 = vmul.f32 %v4771_v25, %v4754_v3 }
0x2b59   :  { %4780 = vrot.lane.b32.xlu1 %v4775_v43, %s7831_s28  ;;  %v4764_v43 = vmul.f32 %v4760_v37, %v4739_v63 }
0x2b70   :  { %v4769_v24 = vpop.permute.xlu1 %4768 }
0x2b71   :  { %v4774_v28 = vmul.f32 %v4769_v24, %v4739_v63 }
0x2b73   :  { %4778 = vrot.lane.b32.xlu0 %v4774_v28, %s7831_s28 }
0x2bcb   :  { %v4781_v5 = vpop.permute.xlu1 %4780 }
0x2bcc   :  { %v10831_v7 = vadd.f32 %v4781_v5, %v4765_v60 }
0x2bce   :  { %7725 = vtanh.f32 %v10831_v7 }
0x2bd4   :  { %v7726_v25 = vpop.eup %7725 }
0x2bd5   :  { %4792 = vrot.lane.b32.xlu0 %v7726_v25, %s7833_s30 }
0x2be5   :  { %v4779_v14 = vpop.permute.xlu0 %4778 }
0x2be6   :  { %v10836_v33 = vadd.f32 %v4779_v14, %v4764_v43 }
0x2be8   :  { %7727 = vtanh.f32 %v10836_v33 }
0x2bee   :  { %v7728_v8 = vpop.eup %7727 }
0x2bef   :  { %4790 = vrot.lane.b32.xlu2 %v7728_v8, %s7833_s30 }
0x2c47   :  { %v4793_v4 = vpop.permute.xlu0 %4792 }
0x2c48   :  { %v4797_v61 = vmul.f32 %v4793_v4, %v4754_v3 }
0x2c49   :  { %v4791_v38 = vpop.permute.xlu2 %4790 }
0x2c4a   :  { %v4796_v52 = vmul.f32 %v4791_v38, %v4739_v63  ;;  %v4801_v1 = vperm.slane %v4797_v61, 1 }
0x2c4c   :  { %v4800_v46 = vperm.slane %v4796_v52, 1 }
0x2c4e   :  { %v4802_v44 = vsel %vm434_vm0, %v4801_v1, %v4800_v46  ;;  %v10842_v24 = vsel %vm436_vm1, %v4801_v1, %v4800_v46 }
0x2c4f   :  { %4803 = vrot.lane.b32.xlu1 %v4802_v44, %s7845_s17 }
0x2cc1   :  { %v4804_v11 = vpop.permute.xlu1 %4803 }
0x2cc2   :  { %7266 = vmatmul.msk.f32.vlgmr.msrb.gmra.mxu3 %vm1309_vm14, %v4804_v11 }
0x2d45   :  { %v4824_v28 = vpop.f32.mrf.mxu3 }
0x2d46   :  { %v4828_v45 = vrot.slane %v4824_v28, 1  ;;  %v4831_v60 = vadd.f32 %v4824_v28, %v4445_v62 }
0x2d48   :  { %v4832_v3 = vadd.f32 %v4828_v45, %v10682_v12  ;;  %v4833_v63 = vadd.f32 %v10692_v47, %v4831_v60 }
0x2d4a   :  { %v4834_v5 = vadd.f32 %v4832_v3, %v10761_v16  ;;  %7729 = vtanh.f32 %v4833_v63  ;;  %v7267_v43 = vmul.f32 -1.442695, %v4833_v63 }
0x2d4c   :  { %7731 = vtanh.f32 %v4834_v5  ;;  %v7268_v12 = vmul.f32 -1.442695, %v4834_v5 }
0x2d4d   :  { %7733 = vpow2.f32 %v7267_v43 }
0x2d50   :  { %v7730_v25 = vpop.eup %7729 }
0x2d51   :  { %4887 = vrot.lane.b32.xlu2 %v7730_v25, %s7844_s16 }
0x2d52   :  { %v7732_v37 = vpop.eup %7731 }
0x2d53   :  { %4889 = vrot.lane.b32.xlu0 %v7732_v37, %s7844_s16  ;;  %v7734_v14 = vpop.eup %7733 }
0x2d54   :  { %v4841_v8 = vadd.f32 1.0, %v7734_v14 }
0x2d56   :  { %7735 = vrcp.f32 %v4841_v8  ;;  %v4854_v46 = vand.u32 2147483648, %v4841_v8  ;;  %vm4848_vm5 = vweird.f32 %v4841_v8  ;;  %v4852_v11 = vand.u32 2147483647, %v4841_v8 }
0x2d57   :  { %7737 = vpow2.f32 %v7268_v12 }
0x2d58   :  { %v4855_v45 = vor.u32 1.1754944e-38, %v4854_v46  ;;  %vm4853_vm11 = vcmp.eq.f32.partialorder %v4852_v11, 8.507059e+37  ;;  %v7270_v11 = vrot.slane %v10831_v7, 9 }
0x2d5c   :  { %v7736_v62 = vpop.eup %7735 }
0x2d5d   :  { %v4844_v4 = vmul.f32 %v7736_v62, %v4841_v8  ;;  %v7738_v52 = vpop.eup %7737  ;;  %vm4849_vm3 = vweird.f32 %v7736_v62 }
0x2d5e   :  { %v4842_v44 = vadd.f32 1.0, %v7738_v52  ;;  %vm4850_vm10 = vmor %vm4848_vm5, %vm4849_vm3 }
0x2d5f   :  { %v4845_v61 = vsub.f32 1.0, %v4844_v4 }
0x2d60   :  { %7739 = vrcp.f32 %v4842_v44  ;;  %v4869_v4 = vand.u32 2147483648, %v4842_v44  ;;  %vm4863_vm2 = vweird.f32 %v4842_v44  ;;  %v4867_v12 = vand.u32 2147483647, %v4842_v44 }
0x2d61   :  { %v4846_v38 = vmul.f32 %v7736_v62, %v4845_v61 }
0x2d62   :  { %vm4868_vm6 = vcmp.eq.f32.partialorder %v4867_v12, 8.507059e+37 }
0x2d63   :  { %v4847_v1 = vadd.f32 %v7736_v62, %v4846_v38 }
0x2d65   :  { %v4851_v28 = vsel %vm4850_vm10, %v7736_v62, %v4847_v1  ;;  %v4870_v62 = vor.u32 1.1754944e-38, %v4869_v4  ;;  %v7269_v1 = vrot.slane %v10836_v33, 9 }
0x2d66   :  { %v4856_v3 = vsel %vm4853_vm11, %v4855_v45, %v4851_v28  ;;  %v7740_v5 = vpop.eup %7739 }
0x2d67   :  { %v4859_v25 = vmul.f32 %v7740_v5, %v4842_v44  ;;  %vm4864_vm13 = vweird.f32 %v7740_v5  ;;  %v4883_v46 = vmul.f32 %v7269_v1, %v4856_v3 }
0x2d68   :  { %vm4865_vm4 = vmor %vm4863_vm2, %vm4864_vm13 }
0x2d69   :  { %v4860_v37 = vsub.f32 1.0, %v4859_v25 }
0x2d6b   :  { %v4861_v43 = vmul.f32 %v7740_v5, %v4860_v37 }
0x2d6d   :  { %v4862_v14 = vadd.f32 %v7740_v5, %v4861_v43 }
0x2d6f   :  { %v4866_v8 = vsel %vm4865_vm4, %v7740_v5, %v4862_v14 }
0x2d70   :  { %v4871_v38 = vsel %vm4868_vm6, %v4870_v62, %v4866_v8  ;;  %v4447_v62 = vrot.slane %v10687_v10, 6 }
0x2dab   :  { %v4888_v60 = vpop.permute.xlu2 %4887 }
0x2dac   :  { %v4893_v63 = vmul.f32 %v4888_v60, %v4856_v3  ;;  %v4884_v60 = vmul.f32 %v7270_v11, %v4871_v38 }
0x2dae   :  { %4897 = vrot.lane.b32.xlu1 %v4893_v63, %s7831_s28 }
0x2dc5   :  { %v4890_v61 = vpop.permute.xlu0 %4889 }
0x2dc6   :  { %v4894_v52 = vmul.f32 %v4890_v61, %v4871_v38 }
0x2dc8   :  { %4899 = vrot.lane.b32.xlu2 %v4894_v52, %s7831_s28 }
0x2e20   :  { %v4898_v28 = vpop.permute.xlu1 %4897 }
0x2e21   :  { %v10857_v45 = vadd.f32 %v4898_v28, %v4883_v46 }
0x2e22   :  { %v4900_v44 = vpop.permute.xlu2 %4899 }
0x2e23   :  { %7741 = vtanh.f32 %v10857_v45  ;;  %v10860_v63 = vadd.f32 %v4900_v44, %v4884_v60 }
0x2e25   :  { %7743 = vtanh.f32 %v10860_v63 }
0x2e29   :  { %v7742_v5 = vpop.eup %7741 }
0x2e2a   :  { %4909 = vrot.lane.b32.xlu0 %v7742_v5, %s7833_s30 }
0x2e2b   :  { %v7744_v25 = vpop.eup %7743 }
0x2e2c   :  { %4911 = vrot.lane.b32.xlu1 %v7744_v25, %s7833_s30 }
0x2e9c   :  { %v4910_v33 = vpop.permute.xlu0 %4909 }
0x2e9d   :  { %v4915_v37 = vmul.f32 %v4910_v33, %v4856_v3 }
0x2e9e   :  { %v4912_v7 = vpop.permute.xlu1 %4911 }
0x2e9f   :  { %v4916_v43 = vmul.f32 %v4912_v7, %v4871_v38  ;;  %v4919_v14 = vperm.slane %v4915_v37, 0 }
0x2ea1   :  { %v4920_v4 = vperm.slane %v4916_v43, 0 }
0x2ea3   :  { %v10866_v12 = vsel %vm434_vm0, %v4920_v4, %v4919_v14 }
0x2ea4   :  { %4922 = vrot.lane.b32.xlu2 %v10866_v12, %s7845_s17 }
0x2efe   :  { %v4923_v8 = vpop.permute.xlu2 %4922 }
0x2eff   :  { %7271 = vmatmul.msk.f32.vlgmr.msra.gmra.mxu2 %vm1309_vm14, %v4923_v8 }
0x2f82   :  { %v4943_v61 = vpop.f32.mrf.mxu2 }
0x2f83   :  { %v4947_v52 = vrot.slane %v4943_v61, 7  ;;  %v4951_v3 = vadd.f32 %v4943_v61, %v4447_v62 }
0x2f85   :  { %v4950_v38 = vadd.f32 %v4947_v52, %v10687_v10  ;;  %v4953_v1 = vadd.f32 %v10692_v47, %v4951_v3 }
0x2f87   :  { %v4952_v46 = vadd.f32 %v4950_v38, %v10700_v23  ;;  %7745 = vtanh.f32 %v4953_v1  ;;  %v7273_v60 = vmul.f32 -1.442695, %v4953_v1 }
0x2f89   :  { %7747 = vtanh.f32 %v4952_v46  ;;  %v7272_v44 = vmul.f32 -1.442695, %v4952_v46 }
0x2f8a   :  { %7749 = vpow2.f32 %v7273_v60 }
0x2f8b   :  { %7751 = vpow2.f32 %v7272_v44 }
0x2f8d   :  { %v7746_v11 = vpop.eup %7745 }
0x2f8e   :  { %5006 = vrot.lane.b32.xlu1 %v7746_v11, %s7844_s16 }
0x2f8f   :  { %v7748_v28 = vpop.eup %7747 }
0x2f90   :  { %5004 = vrot.lane.b32.xlu0 %v7748_v28, %s7844_s16  ;;  %v7750_v5 = vpop.eup %7749 }
0x2f91   :  { %v7752_v25 = vpop.eup %7751  ;;  %v4961_v33 = vadd.f32 1.0, %v7750_v5 }
0x2f92   :  { %v4960_v37 = vadd.f32 1.0, %v7752_v25 }
0x2f93   :  { %7753 = vrcp.f32 %v4961_v33  ;;  %v4988_v3 = vand.u32 2147483648, %v4961_v33  ;;  %vm4982_vm5 = vweird.f32 %v4961_v33  ;;  %v4986_v38 = vand.u32 2147483647, %v4961_v33 }
0x2f94   :  { %7755 = vrcp.f32 %v4960_v37  ;;  %v4973_v11 = vand.u32 2147483648, %v4960_v37  ;;  %vm4967_vm13 = vweird.f32 %v4960_v37  ;;  %v4971_v60 = vand.u32 2147483647, %v4960_v37 }
0x2f95   :  { %v4989_v28 = vor.u32 1.1754944e-38, %v4988_v3  ;;  %vm4987_vm2 = vcmp.eq.f32.partialorder %v4986_v38, 8.507059e+37 }
0x2f96   :  { %vm4972_vm6 = vcmp.eq.f32.partialorder %v4971_v60, 8.507059e+37 }
0x2f99   :  { %v7754_v47 = vpop.eup %7753 }
0x2f9a   :  { %v7756_v23 = vpop.eup %7755  ;;  %v4978_v7 = vmul.f32 %v7754_v47, %v4961_v33  ;;  %vm4983_vm3 = vweird.f32 %v7754_v47 }
0x2f9b   :  { %v4963_v43 = vmul.f32 %v7756_v23, %v4960_v37  ;;  %vm4984_vm10 = vmor %vm4982_vm5, %vm4983_vm3  ;;  %vm4968_vm11 = vweird.f32 %v7756_v23 }
0x2f9c   :  { %v4979_v14 = vsub.f32 1.0, %v4978_v7  ;;  %vm4969_vm4 = vmor %vm4967_vm13, %vm4968_vm11 }
0x2f9d   :  { %v4964_v4 = vsub.f32 1.0, %v4963_v43  ;;  %v4974_v43 = vor.u32 1.1754944e-38, %v4973_v11 }
0x2f9e   :  { %v4980_v8 = vmul.f32 %v7754_v47, %v4979_v14 }
0x2f9f   :  { %v4965_v61 = vmul.f32 %v7756_v23, %v4964_v4 }
0x2fa0   :  { %v4981_v52 = vadd.f32 %v7754_v47, %v4980_v8  ;;  %v4313_v8 = vrot.slane %v10818_v49, 7 }
0x2fa1   :  { %v4966_v1 = vadd.f32 %v7756_v23, %v4965_v61 }
0x2fa2   :  { %v4985_v46 = vsel %vm4984_vm10, %v7754_v47, %v4981_v52  ;;  %v4996_v47 = vrot.slane %v10857_v45, 7  ;;  %v4997_v45 = vrot.slane %v10860_v63, 7 }
0x2fa3   :  { %v4990_v5 = vsel %vm4987_vm2, %v4989_v28, %v4985_v46  ;;  %v4970_v25 = vsel %vm4969_vm4, %v7756_v23, %v4966_v1  ;;  %v12535_v23 = vrot.slane %v10573_v36, 4  ;;  %v12536_v36 = vrot.slane %v10632_v50, 2 }
0x2fa4   :  { %v4975_v4 = vsel %vm4972_vm6, %v4974_v43, %v4970_v25  ;;  %v5001_v11 = vmul.f32 %v4997_v45, %v4990_v5 }
0x2fa5   :  { %v5000_v37 = vmul.f32 %v4996_v47, %v4975_v4  ;;  %v4316_v3 = vadd.f32 %v4313_v8, %v12535_v23 }
0x2fa7   :  { %v4318_v38 = vadd.f32 %v4316_v3, %v10605_v41  ;;  %v7818_v41 = vld [vmem:[%s10555_s4] ss:$0 sm:$0xff]  ;;  %s7859_s4 = smov 1  }
0x2fa8   :  { %s11036_s13 = sld [smem:[%s12206_s0 + %s7859_s4]]  }
0x2fa9   :  { %v7252_v63 = vmul.f32 -1.442695, %v4318_v38 }
0x3000   :  { %v5007_v44 = vpop.permute.xlu1 %5006 }
0x3001   :  { %v5011_v7 = vmul.f32 %v5007_v44, %v4990_v5  ;;  %v4317_v44 = vadd.f32 %v10818_v49, %v12536_v36 }
0x3002   :  { %v5005_v14 = vpop.permute.xlu0 %5004 }
0x3003   :  { %5016 = vrot.lane.b32.xlu0 %v5011_v7, %s7831_s28  ;;  %v5010_v33 = vmul.f32 %v5005_v14, %v4975_v4  ;;  %v4319_v25 = vadd.f32 %v7818_v41, %v4317_v44 }
0x3005   :  { %5014 = vrot.lane.b32.xlu2 %v5010_v33, %s7831_s28 }
0x305f   :  { %v5015_v61 = vpop.permute.xlu2 %5014 }
0x3060   :  { %v10883_v52 = vadd.f32 %v5015_v61, %v5000_v37 }
0x3062   :  { %7757 = vtanh.f32 %v10883_v52 }
0x3063   :  { %7759 = vtanh.f32 %v4318_v38 }
0x3068   :  { %v7758_v1 = vpop.eup %7757 }
0x3069   :  { %5026 = vrot.lane.b32.xlu1 %v7758_v1, %s7833_s30  ;;  %v7760_v46 = vpop.eup %7759 }
0x3071   :  { %4370 = vrot.lane.b32.xlu1 %v7760_v46, %s7844_s16 }
0x3075   :  { %v5017_v28 = vpop.permute.xlu0 %5016 }
0x3076   :  { %v10892_v60 = vadd.f32 %v5017_v28, %v5001_v11 }
0x3078   :  { %7761 = vtanh.f32 %v10892_v60 }
0x3079   :  { %7763 = vtanh.f32 %v4319_v25 }
0x307a   :  { %7765 = vpow2.f32 %v7252_v63  ;;  %v7253_v63 = vmul.f32 -1.442695, %v4319_v25 }
0x307e   :  { %v7762_v7 = vpop.eup %7761 }
0x307f   :  { %5028 = vrot.lane.b32.xlu2 %v7762_v7, %s7833_s30  ;;  %v7764_v43 = vpop.eup %7763 }
0x3080   :  { %v7766_v14 = vpop.eup %7765 }
0x3081   :  { %v4326_v33 = vadd.f32 1.0, %v7766_v14 }
0x3083   :  { %7767 = vrcp.f32 %v4326_v33  ;;  %v4339_v46 = vand.u32 2147483648, %v4326_v33  ;;  %vm4333_vm5 = vweird.f32 %v4326_v33  ;;  %v4337_v28 = vand.u32 2147483647, %v4326_v33 }
0x3084   :  { %7769 = vpow2.f32 %v7253_v63 }
0x3085   :  { %v4340_v41 = vor.u32 1.1754944e-38, %v4339_v46  ;;  %vm4338_vm11 = vcmp.eq.f32.partialorder %v4337_v28, 8.507059e+37 }
0x3087   :  { %4372 = vrot.lane.b32.xlu2 %v7764_v43, %s7844_s16 }
0x3089   :  { %v7768_v47 = vpop.eup %7767 }
0x308a   :  { %v4329_v50 = vmul.f32 %v7768_v47, %v4326_v33  ;;  %vm4334_vm3 = vweird.f32 %v7768_v47  ;;  %v7770_v14 = vpop.eup %7769 }
0x308b   :  { %vm4335_vm10 = vmor %vm4333_vm5, %vm4334_vm3  ;;  %v4327_v33 = vadd.f32 1.0, %v7770_v14 }
0x308c   :  { %v4330_v8 = vsub.f32 1.0, %v4329_v50 }
0x308d   :  { %7771 = vrcp.f32 %v4327_v33  ;;  %vm4348_vm2 = vweird.f32 %v4327_v33 }
0x308e   :  { %v4331_v37 = vmul.f32 %v7768_v47, %v4330_v8 }
0x3090   :  { %v4332_v1 = vadd.f32 %v7768_v47, %v4331_v37 }
0x3092   :  { %v4336_v36 = vsel %vm4335_vm10, %v7768_v47, %v4332_v1 }
0x3093   :  { %v7772_v47 = vpop.eup %7771 }
0x3094   :  { %v4344_v50 = vmul.f32 %v7772_v47, %v4327_v33  ;;  %vm4349_vm13 = vweird.f32 %v7772_v47 }
0x3095   :  { %vm4350_vm4 = vmor %vm4348_vm2, %vm4349_vm13 }
0x30d9   :  { %v5029_v49 = vpop.permute.xlu2 %5028 }
0x30da   :  { %v5033_v61 = vmul.f32 %v5029_v49, %v4990_v5 }
0x30db   :  { %v5027_v23 = vpop.permute.xlu1 %5026 }
0x30dc   :  { %v5032_v3 = vmul.f32 %v5027_v23, %v4975_v4  ;;  %v5037_v45 = vperm.slane %v5033_v61, 1  ;;  %v10906_v4 = vsel %vm4338_vm11, %v4340_v41, %v4336_v36  ;;  %v4345_v61 = vsub.f32 1.0, %v4344_v50 }
0x30dd   :  { %v4352_v36 = vand.u32 2147483647, %v4327_v33  ;;  %v4362_v41 = vrot.slane %v10782_v18, 7 }
0x30de   :  { %v5036_v11 = vperm.slane %v5032_v3, 1  ;;  %v7819_v3 = vld [vmem:[%s10677_s23] ss:$0 sm:$0xff] }
0x30df   :  { %vm4353_vm6 = vcmp.eq.f32.partialorder %v4352_v36, 8.507059e+37 }
0x30e0   :  { %v5038_v38 = vsel %vm434_vm0, %v5037_v45, %v5036_v11  ;;  %v10903_v44 = vsel %vm436_vm1, %v5037_v45, %v5036_v11  ;;  %v4346_v45 = vmul.f32 %v7772_v47, %v4345_v61 }
0x30e1   :  { %5039 = vrot.lane.b32.xlu0 %v5038_v38, %s7845_s17  ;;  %v4373_v25 = vpop.permute.xlu2 %4372  ;;  %v4354_v38 = vand.u32 2147483648, %v4327_v33 }
0x30e2   :  { %v4347_v11 = vadd.f32 %v7772_v47, %v4346_v45 }
0x30e3   :  { %v4371_v5 = vpop.permute.xlu1 %4370 }
0x30e4   :  { %v4376_v7 = vmul.f32 %v4371_v5, %v10906_v4 }
0x30e6   :  { %4380 = vrot.lane.b32.xlu2 %v4376_v7, %s7831_s28  ;;  %v4355_v7 = vor.u32 1.1754944e-38, %v4354_v38 }
0x3140   :  { %v4381_v5 = vpop.permute.xlu2 %4380 }
0x3153   :  { %v5040_v43 = vpop.permute.xlu0 %5039 }
0x3154   :  { %7274 = vmatmul.msk.f32.vlgmr.msrb.gmra.mxu1 %vm1309_vm14, %v5040_v43 }
0x31d1   :  { %v5060_v8 = vpop.f32.mrf.mxu1 }
0x31d2   :  { %v5064_v49 = vrot.slane %v5060_v8, 1  ;;  %v5067_v37 = vadd.f32 %v5060_v8, %v10687_v10 }
0x31d4   :  { %v5068_v23 = vadd.f32 %v5064_v49, %v4447_v62  ;;  %v5069_v1 = vadd.f32 %v7819_v3, %v5067_v37  ;;  %v4351_v62 = vsel %vm4350_vm4, %v7772_v47, %v4347_v11 }
0x31d5   :  { %v10920_v43 = vsel %vm4353_vm6, %v4355_v7, %v4351_v62 }
0x31d6   :  { %v5070_v46 = vadd.f32 %v5068_v23, %v10761_v16  ;;  %7773 = vtanh.f32 %v5069_v1  ;;  %v4366_v16 = vmul.f32 %v4362_v41, %v10906_v4  ;;  %v4377_v14 = vmul.f32 %v4373_v25, %v10920_v43 }
0x31d7   :  { %v7275_v18 = vmul.f32 -1.442695, %v5069_v1 }
0x31d8   :  { %7775 = vtanh.f32 %v5070_v46  ;;  %v4386_v63 = vadd.f32 %v4381_v5, %v4366_v16  ;;  %v7276_v47 = vmul.f32 -1.442695, %v5070_v46 }
0x31da   :  { %7777 = vtanh.f32 %v4386_v63 }
0x31db   :  { %7779 = vpow2.f32 %v7275_v18 }
0x31dc   :  { %v7774_v28 = vpop.eup %7773  ;;  %7781 = vpow2.f32 %v7276_v47 }
0x31dd   :  { %5123 = vrot.lane.b32.xlu0 %v7774_v28, %s7844_s16 }
0x31de   :  { %v7776_v10 = vpop.eup %7775 }
0x31df   :  { %5125 = vrot.lane.b32.xlu1 %v7776_v10, %s7844_s16 }
0x31e0   :  { %v7778_v33 = vpop.eup %7777 }
0x31e1   :  { %v7780_v50 = vpop.eup %7779 }
0x31e2   :  { %v7782_v8 = vpop.eup %7781  ;;  %v5077_v49 = vadd.f32 1.0, %v7780_v50 }
0x31e3   :  { %v5078_v37 = vadd.f32 1.0, %v7782_v8 }
0x31e4   :  { %7783 = vrcp.f32 %v5077_v49  ;;  %v5090_v1 = vand.u32 2147483648, %v5077_v49  ;;  %vm5084_vm5 = vweird.f32 %v5077_v49  ;;  %v5088_v46 = vand.u32 2147483647, %v5077_v49 }
0x31e5   :  { %4382 = vrot.lane.b32.xlu0 %v4377_v14, %s7831_s28  ;;  %7785 = vrcp.f32 %v5078_v37  ;;  %v5105_v62 = vand.u32 2147483648, %v5078_v37  ;;  %vm5099_vm13 = vweird.f32 %v5078_v37  ;;  %v5103_v7 = vand.u32 2147483647, %v5078_v37 }
0x31e6   :  { %v5091_v5 = vor.u32 1.1754944e-38, %v5090_v1  ;;  %vm5089_vm2 = vcmp.eq.f32.partialorder %v5088_v46, 8.507059e+37 }
0x31e7   :  { %v5106_v18 = vor.u32 1.1754944e-38, %v5105_v62  ;;  %vm5104_vm6 = vcmp.eq.f32.partialorder %v5103_v7, 8.507059e+37 }
0x31ea   :  { %v7784_v61 = vpop.eup %7783 }
0x31eb   :  { %v7786_v23 = vpop.eup %7785  ;;  %v5080_v3 = vmul.f32 %v7784_v61, %v5077_v49  ;;  %vm5085_vm3 = vweird.f32 %v7784_v61  ;;  %v4363_v49 = vrot.slane %v10798_v19, 7  ;;  %v7278_v19 = vrot.slane %v10892_v60, 9 }
0x31ec   :  { %v5095_v25 = vmul.f32 %v7786_v23, %v5078_v37  ;;  %vm5086_vm10 = vmor %vm5084_vm5, %vm5085_vm3  ;;  %vm5100_vm11 = vweird.f32 %v7786_v23  ;;  %vm12540_vm3 = vcmask 1044484  }
0x31ed   :  { %4392 = vrot.lane.b32.xlu0 %v7778_v33, %s7833_s30  ;;  %v5081_v45 = vsub.f32 1.0, %v5080_v3  ;;  %vm5101_vm4 = vmor %vm5099_vm13, %vm5100_vm11  ;;  %vm12563_vm13 = vcmask 392192  }
0x31ee   :  { %v5096_v11 = vsub.f32 1.0, %v5095_v25 }
0x31ef   :  { %v5082_v28 = vmul.f32 %v7784_v61, %v5081_v45 }
0x31f0   :  { %v5097_v38 = vmul.f32 %v7786_v23, %v5096_v11 }
0x31f1   :  { %v5083_v36 = vadd.f32 %v7784_v61, %v5082_v28 }
0x31f2   :  { %v5098_v41 = vadd.f32 %v7786_v23, %v5097_v38  ;;  %v7277_v38 = vrot.slane %v10883_v52, 9 }
0x31f3   :  { %v5087_v10 = vsel %vm5086_vm10, %v7784_v61, %v5083_v36  ;;  %v4367_v61 = vmul.f32 %v4363_v49, %v10920_v43  ;;  %vm12541_vm10 = vcmask 1046534  }
0x31f4   :  { %v5092_v63 = vsel %vm5089_vm2, %v5091_v5, %v5087_v10  ;;  %v5102_v14 = vsel %vm5101_vm4, %v7786_v23, %v5098_v41 }
0x31f5   :  { %v5107_v47 = vsel %vm5104_vm6, %v5106_v18, %v5102_v14 }
0x31f6   :  { %v5120_v23 = vmul.f32 %v7278_v19, %v5107_v47 }
0x324f   :  { %v5124_v16 = vpop.permute.xlu0 %5123 }
0x3250   :  { %v5129_v33 = vmul.f32 %v5124_v16, %v5092_v63 }
0x3251   :  { %v5126_v50 = vpop.permute.xlu1 %5125 }
0x3252   :  { %5133 = vrot.lane.b32.xlu1 %v5129_v33, %s7831_s28  ;;  %v5130_v8 = vmul.f32 %v5126_v50, %v5107_v47 }
0x3254   :  { %5135 = vrot.lane.b32.xlu2 %v5130_v8, %s7831_s28 }
0x3257   :  { %v4383_v37 = vpop.permute.xlu0 %4382 }
0x3258   :  { %v4387_v3 = vadd.f32 %v4383_v37, %v4367_v61 }
0x325a   :  { %7787 = vtanh.f32 %v4387_v3 }
0x325f   :  { %v4393_v1 = vpop.permute.xlu0 %4392 }
0x3260   :  { %v7788_v25 = vpop.eup %7787 }
0x3261   :  { %4394 = vrot.lane.b32.xlu1 %v7788_v25, %s7833_s30 }
0x3269   :  { %5167 = vrot.lane.b32.xlu1 %v10626_v48, %s7845_s17  ;;  %v5119_v48 = vmul.f32 %v7277_v38, %v5092_v63 }
0x3271   :  { %5193 = vrot.lane.b32.xlu1 %v10842_v24, %s7844_s16 }
0x3279   :  { %5182 = vrot.lane.b32.xlu1 %v10866_v12, %s7844_s16 }
0x32ae   :  { %v5136_v45 = vpop.permute.xlu2 %5135 }
0x32af   :  { %v5140_v11 = vadd.f32 %v5136_v45, %v5120_v23 }
0x32b1   :  { %7789 = vtanh.f32 %v5140_v11 }
0x32b7   :  { %v7790_v28 = vpop.eup %7789 }
0x32b8   :  { %5147 = vrot.lane.b32.xlu0 %v7790_v28, %s7833_s30 }
0x32c0   :  { %5189 = vrot.lane.b32.xlu0 %v10736_v55, %s7845_s17  ;;  %v4398_v55 = vmul.f32 %v4393_v1, %v10906_v4 }
0x32c2   :  { %v5212_v41 = vperm.slane %v4398_v55, 1 }
0x32c4   :  { %v5134_v36 = vpop.permute.xlu1 %5133 }
0x32c5   :  { %v5139_v24 = vadd.f32 %v5134_v36, %v5119_v48 }
0x32c7   :  { %7791 = vtanh.f32 %v5139_v24 }
0x32c8   :  { %5219 = vrot.lane.b32.xlu0 %v10742_v9, %s7844_s16 }
0x32cd   :  { %v7792_v12 = vpop.eup %7791 }
0x32ce   :  { %5145 = vrot.lane.b32.xlu2 %v7792_v12, %s7833_s30 }
0x32d0   :  { %5204 = vrot.lane.b32.xlu0 %v10807_v2, %s7844_s16 }
0x32d3   :  { %v4395_v60 = vpop.permute.xlu1 %4394 }
0x32d4   :  { %v4399_v52 = vmul.f32 %v4395_v60, %v10920_v43 }
0x32d6   :  { %5171 = vrot.lane.b32.xlu2 %v10903_v44, %s7844_s16  ;;  %v5213_v46 = vperm.slane %v4399_v52, 1 }
0x32d8   :  { %v5214_v10 = vsel %vm436_vm1, %v5213_v46, %v5212_v41 }
0x32db   :  { %v5168_v2 = vpop.permute.xlu1 %5167 }
0x32de   :  { %5215 = vrot.lane.b32.xlu2 %v5214_v10, %s7845_s17  ;;  %s7858_s17 = smov 34  }
0x32df   :  { %s7151_s3 = sld [smem:[%s12206_s0 + %s7858_s17]]  }
0x32e0   :  { %s7123_s17 = sld [smem:[%s12206_s0 + %s7822_s7]]  }
0x32e3   :  { %v5194_v33 = vpop.permute.xlu1 %5193 }
0x32e5   :  { %v211_v25 = vld [vmem:[%s7151_s3 + $0x18] sm:$0xff]  ;;  %v210_v19 = vld [vmem:[%s7151_s3 + $0x10] sm:$0xff]  ;;  %v209_v23 = vld [vmem:[%s7151_s3 + $0x8] sm:$0xff] }
0x32e6   :  { %5297 = vmatpush.msra.mxu0 %v211_v25  ;;  %v208_v45 = vld [vmem:[%s7151_s3] sm:$0xff] }
0x32e8   :  { %5298 = vmatpush.msra.mxu0 %v210_v19  ;;  %v2048_v19 = vrot.slane %v10117_v27, 4 }
0x32ea   :  { %5299 = vmatpush.msra.mxu0 %v209_v23 }
0x32eb   :  { %v5183_v11 = vpop.permute.xlu1 %5182 }
0x32ec   :  { %5300 = vmatpush.msra.mxu0 %v208_v45  ;;  %v5185_v38 = vsel %vm1309_vm14, %v10668_v6, %v5183_v11  ;;  %v2050_v45 = vrot.slane %v10158_v15, 2 }
0x32ed   :  { %v5187_v36 = vrot.slane %v5185_v38, 1  ;;  %v5233_v60 = vperm.slane %v5185_v38, 0 }
0x3328   :  { %v5146_v9 = vpop.permute.xlu2 %5145 }
0x3329   :  { %v5151_v62 = vmul.f32 %v5146_v9, %v5092_v63 }
0x332a   :  { %v5148_v5 = vpop.permute.xlu0 %5147 }
0x332b   :  { %v5152_v7 = vmul.f32 %v5148_v5, %v5107_v47  ;;  %v5156_v16 = vperm.slane %v5151_v62, 0  ;;  %v5234_v62 = vperm.slane %v5187_v36, 0 }
0x332d   :  { %v5157_v14 = vperm.slane %v5152_v7, 0 }
0x332f   :  { %v5158_v4 = vsel %vm434_vm0, %v5157_v14, %v5156_v16  ;;  %vm12537_vm0 = vcmask 261120  }
0x3330   :  { %v5172_v44 = vpop.permute.xlu2 %5171  ;;  %5159 = vrot.lane.b32.xlu2 %v5158_v4, %s7844_s16 }
0x3331   :  { %v5174_v43 = vsel %vm1309_vm14, %v5168_v2, %v5172_v44 }
0x3332   :  { %5176 = vst [vmem:[#allocation1] sm:$0xff] %v5174_v43  ;;  %v5190_v63 = vpop.permute.xlu0 %5189 }
0x3333   :  { %v5196_v50 = vsel %vm1309_vm14, %v5190_v63, %v5194_v33 }
0x3338   :  { %v5216_v49 = vpop.permute.xlu2 %5215 }
0x3339   :  { %v5178_v18 = vld [vmem:[#allocation1 + $0x1] ss:$9 sm:$0xff] }
0x333a   :  { %v5180_v47 = vld [vmem:[#allocation1 + $0x2] ss:$9 sm:$0xff]  ;;  %v5220_v8 = vpop.permute.xlu0 %5219  ;;  %v5229_v24 = vperm.slane %v5178_v18, 0 }
0x333b   :  { %5198 = vst [vmem:[#allocation1] sm:$0xff] %v5196_v50  ;;  %v5222_v3 = vsel %vm1309_vm14, %v5216_v49, %v5220_v8  ;;  %v5230_v46 = vperm.slane %v5180_v47, 0 }
0x3342   :  { %v5200_v61 = vld [vmem:[#allocation1 + $0x1] ss:$9 sm:$0xff]  ;;  %v5205_v28 = vpop.permute.xlu0 %5204 }
0x3343   :  { %v5202_v37 = vld [vmem:[#allocation1 + $0x2] ss:$9 sm:$0xff]  ;;  %v5207_v48 = vsel %vm1309_vm14, %v10811_v32, %v5205_v28  ;;  %v5237_v10 = vperm.slane %v5200_v61, 0 }
0x3344   :  { %5224 = vst [vmem:[#allocation1] sm:$0xff] %v5222_v3  ;;  %v5209_v52 = vrot.slane %v5207_v48, 1  ;;  %v5241_v6 = vperm.slane %v5207_v48, 0  ;;  %v5238_v32 = vperm.slane %v5202_v37, 0 }
0x3346   :  { %v5242_v44 = vperm.slane %v5209_v52, 0 }
0x334b   :  { %v5226_v1 = vld [vmem:[#allocation1 + $0x1] ss:$9 sm:$0xff] }
0x334c   :  { %v5228_v5 = vld [vmem:[#allocation1 + $0x2] ss:$9 sm:$0xff]  ;;  %v5245_v2 = vperm.slane %v5226_v1, 0 }
0x334d   :  { %v5246_v43 = vperm.slane %v5228_v5, 0  ;;  %v12545_v5 = vld [vmem:[#allocation15_spill] sm:$0xff] }
0x338a   :  { %v5160_v12 = vpop.permute.xlu2 %5159 }
0x338b   :  { %v5162_v55 = vsel %vm1309_vm14, %v10598_v17, %v5160_v12 }
0x338c   :  { %v5164_v41 = vrot.slane %v5162_v55, 1  ;;  %v5249_v9 = vsel %vm3628_vm8, %v5162_v55, %v5229_v24 }
0x338d   :  { %v5251_v7 = vsel %vm3631_vm9, %v5249_v9, %v5233_v60 }
0x338e   :  { %v5250_v16 = vsel %vm3628_vm8, %v5164_v41, %v5230_v46  ;;  %v5253_v14 = vsel %vm3634_vm7, %v5251_v7, %v5237_v10 }
0x338f   :  { %v5252_v4 = vsel %vm3631_vm9, %v5250_v16, %v5234_v62  ;;  %v5255_v17 = vsel %vm3637_vm12, %v5253_v14, %v5241_v6  ;;  %v12544_v62 = vld [vmem:[#allocation10_spill] sm:$0xff]  ;;  %v12546_v6 = vld [vmem:[#allocation4_spill] sm:$0xff]  ;;  %v12550_v14 = vld [vmem:[#allocation5_spill] sm:$0xff] }
0x3390   :  { %v5254_v63 = vsel %vm3634_vm7, %v5252_v4, %v5238_v32  ;;  %v5257_v33 = vsel %vm3640_vm15, %v5255_v17, %v5245_v2  ;;  %v12547_v32 = vld [vmem:[#allocation7_spill] sm:$0xff]  ;;  %v12549_v16 = vld [vmem:[#allocation16_spill] sm:$0xff]  ;;  %v12551_v4 = vld [vmem:[#allocation9_spill] sm:$0xff] }
0x3391   :  { %v5256_v18 = vsel %vm3637_vm12, %v5254_v63, %v5242_v44  ;;  %v5261_v47 = vrot.slane %v5257_v33, 2  ;;  %v5262_v50 = vrot.slane %v5257_v33, 4  ;;  %5268 = vst [vmem:[#allocation1] ss:$4 sm:$0xff] %v5257_v33  ;;  %vm12538_vm12 = vmmov %vm12537_vm0  ;;  %v12548_v2 = vld [vmem:[#allocation11_spill] sm:$0xff]  ;;  %v12553_v17 = vld [vmem:[#allocation17_spill] sm:$0xff] }
0x3392   :  { %v5258_v8 = vsel %vm3640_vm15, %v5256_v18, %v5246_v43  ;;  %vm5330_vm15 = vmor %vm3628_vm8, %vm436_vm1  ;;  %v12554_v43 = vld [vmem:[#allocation2_spill] sm:$0xff]  ;;  %v12555_v33 = vld [vmem:[#allocation3_spill] sm:$0xff] }
0x3393   :  { %v5263_v49 = vrot.slane %v5258_v8, 2  ;;  %v5264_v61 = vrot.slane %v5258_v8, 4  ;;  %5270 = vst [vmem:[#allocation1 + $0x1] ss:$4 sm:$0xff] %v5261_v47  ;;  %vm5331_vm5 = vmor %vm5330_vm15, %vm12540_vm3  ;;  %v12556_v18 = vld [vmem:[#allocation13_spill] sm:$0xff]  ;;  %v12557_v47 = vld [vmem:[#allocation18_spill] sm:$0xff] }
0x3394   :  { %5272 = vst [vmem:[#allocation1 + $0x2] ss:$4 sm:$0xff] %v5262_v50  ;;  %vm11023_vm11 = vmor %vm5331_vm5, %vm12541_vm10  ;;  %v12558_v50 = vld [vmem:[#allocation6_spill] sm:$0xff]  ;;  %vm12564_vm15 = vcmask 64512   ;;  %vm12565_vm3 = vcmask 195584  }
0x3395   :  { %5274 = vst [vmem:[#allocation1 + $0x3] ss:$4 sm:$0xff] %v5258_v8  ;;  %vm12562_vm1 = vmmov %vm12537_vm0 }
0x3396   :  { %5276 = vst [vmem:[#allocation1 + $0x20] ss:$4 sm:$0xff] %v5263_v49  ;;  %v12559_v49 = vld [vmem:[#allocation14_spill] sm:$0xff]  ;;  %vm12566_vm5 = vmmov %vm12564_vm15 }
0x3397   :  { %5278 = vst [vmem:[#allocation1 + $0x21] ss:$4 sm:$0xff] %v5264_v61  ;;  %v12560_v61 = vld [vmem:[#allocation19_spill] sm:$0xff]  ;;  %vm12567_vm10 = vmmov %vm12565_vm3 }
0x339c   :  { %v5279_v37 = vld.sshfl [vmem:[#allocation1] sm:$0xff pattern:$0x73625140] }
0x339d   :  { %7279 = vmatmul.msk.f32.vlgmr.msra.gmra.mxu0 %vm12537_vm0, %v5279_v37  ;;  %v12561_v37 = vld [vmem:[#allocation8_spill] sm:$0xff] }
0x339e   :  { %v5280_v3 = vld.sshfl [vmem:[#allocation1 + $0x20] sm:$0xff pattern:$0x73625140] }
0x339f   :  { %5647 = vst [vmem:[#allocation1 + $0x20] ss:$4 sm:$0xff] %v9867_v39 }
0x33a0   :  { %5649 = vst [vmem:[#allocation1 + $0x21] ss:$4 sm:$0xff] %v9906_v13  ;;  %v2047_v13 = vrot.slane %v10117_v27, 2 }
0x33a1   :  { %5651 = vst [vmem:[#allocation1 + $0x22] ss:$4 sm:$0xff] %v9951_v0 }
0x33a2   :  { %5653 = vst [vmem:[#allocation1 + $0x23] ss:$4 sm:$0xff] %v9814_v42 }
0x33a5   :  { %7280 = vmatmul.msk.f32.gmra.mxu0 %vm12538_vm12, %v5280_v3  ;;  %v152_v3 = vld [vmem:[%s7119_s15 + $0x28] sm:$0xff]  ;;  %vm5737_vm12 = vcmask 1043458  }
0x33a6   :  { %5396 = vmatpush.msra.mxu3 %v152_v3 }
0x33a9   :  { %v10987_v25 = vld [vmem:[#allocation1 + $0x20] sm:$0xff] }
0x33aa   :  { %5660 = vst [vmem:[#allocation1 + $0x20] ss:$4 sm:$0xff] %v9874_v29  ;;  %v7364_v29 = vld [vmem:[%s10955_s1] ss:$0 sm:$0xff] }
0x33ab   :  { %5661 = vst [vmem:[#allocation1 + $0x21] ss:$4 sm:$0xff] %v9913_v57  ;;  %v2049_v57 = vrot.slane %v10117_v27, 6 }
0x33ac   :  { %5662 = vst [vmem:[#allocation1 + $0x22] ss:$4 sm:$0xff] %v9958_v22 }
0x33ad   :  { %5663 = vst [vmem:[#allocation1 + $0x23] ss:$4 sm:$0xff] %v9826_v56 }
0x33b4   :  { %v10993_v39 = vld [vmem:[#allocation1 + $0x20] sm:$0xff] }
0x33b5   :  { %5671 = vst [vmem:[#allocation1 + $0x20] ss:$4 sm:$0xff] %v9883_v26 }
0x33b6   :  { %5672 = vst [vmem:[#allocation1 + $0x21] ss:$4 sm:$0xff] %v9923_v20 }
0x33b7   :  { %5673 = vst [vmem:[#allocation1 + $0x22] ss:$4 sm:$0xff] %v9968_v35 }
0x33b8   :  { %5674 = vst [vmem:[#allocation1 + $0x23] ss:$4 sm:$0xff] %v9837_v30  ;;  %v12539_v30 = vrot.slane %v9843_v59, 7 }
0x33bf   :  { %v10999_v42 = vld [vmem:[#allocation1 + $0x20] sm:$0xff] }
0x33c0   :  { %5680 = vst [vmem:[#allocation1 + $0x20] ss:$4 sm:$0xff] %v9889_v40 }
0x33c1   :  { %5681 = vst [vmem:[#allocation1 + $0x21] ss:$4 sm:$0xff] %v9931_v58 }
0x33c2   :  { %5682 = vst [vmem:[#allocation1 + $0x22] ss:$4 sm:$0xff] %v9976_v54 }
0x33c3   :  { %5683 = vst [vmem:[#allocation1 + $0x23] ss:$4 sm:$0xff] %v9856_v31 }
0x33ca   :  { %v11005_v56 = vld [vmem:[#allocation1 + $0x20] sm:$0xff] }
0x33cb   :  { %5690 = vst [vmem:[#allocation1 + $0x20] ss:$4 sm:$0xff] %v9894_v51 }
0x33cc   :  { %5691 = vst [vmem:[#allocation1 + $0x21] ss:$4 sm:$0xff] %v9939_v21 }
0x33cd   :  { %5692 = vst [vmem:[#allocation1 + $0x22] ss:$4 sm:$0xff] %v9984_v53 }
0x33ce   :  { %5693 = vst [vmem:[#allocation1 + $0x23] ss:$4 sm:$0xff] %v12539_v30  ;;  %v151_v30 = vld [vmem:[%s7119_s15 + $0x20] sm:$0xff] }
0x33cf   :  { %5397 = vmatpush.msra.mxu3 %v151_v30 }
0x341a   :  { %v5302_v26 = vpop.f32.mrf.mxu0 }
0x341b   :  { %v5303_v40 = vadd.f32 %v7364_v29, %v5302_v26  ;;  %v149_v26 = vld [vmem:[%s7119_s15 + $0x10] sm:$0xff] }
0x341d   :  { %v5310_v20 = vrot.slane %v5303_v40, 2  ;;  %v5312_v31 = vrot.slane %v5303_v40, 6  ;;  %v5318_v58 = vadd.f32 %v5303_v40, %v10117_v27  ;;  %v5311_v35 = vrot.slane %v5303_v40, 4  ;;  %v147_v40 = vld [vmem:[%s7119_s15] sm:$0xff] }
0x341f   :  { %v5319_v0 = vadd.f32 %v5310_v20, %v2047_v13  ;;  %v5321_v51 = vadd.f32 %v5312_v31, %v2049_v57  ;;  %5347 = vst [vmem:[#allocation1] ss:$4 sm:$0xff] %v5318_v58  ;;  %v5320_v11 = vadd.f32 %v5311_v35, %v2048_v19  ;;  %v7281_v24 = vrot.slane %v5318_v58, 9  ;;  %v7365_v58 = vld [vmem:[%s11036_s13] ss:$0 sm:$0xff] }
0x3421   :  { %5349 = vst [vmem:[#allocation1 + $0x1] ss:$4 sm:$0xff] %v5319_v0  ;;  %v5335_v23 = vrot.slane %v5319_v0, 7  ;;  %v5338_v12 = vrot.slane %v5320_v11, 7 }
0x3422   :  { %5351 = vst [vmem:[#allocation1 + $0x2] ss:$4 sm:$0xff] %v5321_v51  ;;  %v5305_v21 = vpop.f32.mrf.mxu0 }
0x3423   :  { %v5306_v22 = vadd.f32 %v7364_v29, %v5305_v21  ;;  %v5337_v36 = vrot.slane %v5335_v23, 2  ;;  %v5336_v27 = vsel %vm11023_vm11, %v7281_v24, %v5335_v23  ;;  %v150_v29 = vld [vmem:[%s7119_s15 + $0x18] sm:$0xff] }
0x3424   :  { %5398 = vmatpush.msra.mxu3 %v150_v29 }
0x3425   :  { %v5313_v54 = vrot.slane %v5306_v22, 2  ;;  %v5322_v53 = vadd.f32 %v5306_v22, %v10158_v15  ;;  %v7282_v15 = vrot.slane %v5321_v51, 9  ;;  %v5339_v55 = vsel %vm11023_vm11, %v5337_v36, %v5338_v12  ;;  %v154_v51 = vld [vmem:[%s7121_s19] sm:$0xff] }
0x3426   :  { %5399 = vmatpush.msra.mxu3 %v149_v26 }
0x3427   :  { %5353 = vst [vmem:[#allocation1 + $0x3] ss:$4 sm:$0xff] %v5322_v53  ;;  %v5323_v28 = vadd.f32 %v5313_v54, %v2050_v45  ;;  %v5342_v38 = vrot.slane %v5322_v53, 7 }
0x3429   :  { %v5344_v60 = vrot.slane %v5342_v38, 2  ;;  %v5345_v1 = vrot.slane %v5323_v28, 7  ;;  %v5343_v46 = vsel %vm11023_vm11, %v7282_v15, %v5342_v38 }
0x342b   :  { %v5346_v41 = vsel %vm11023_vm11, %v5344_v60, %v5345_v1 }
0x342e   :  { %v5354_v52 = vld.sshfl [vmem:[#allocation1] sm:$0xff pattern:$0x73625140] }
0x342f   :  { %5356 = vst [vmem:[#allocation1] ss:$4 sm:$0xff] %v5336_v27 }
0x3430   :  { %5358 = vst [vmem:[#allocation1 + $0x1] ss:$4 sm:$0xff] %v5339_v55 }
0x3431   :  { %5360 = vst [vmem:[#allocation1 + $0x2] ss:$4 sm:$0xff] %v5343_v46 }
0x3432   :  { %5362 = vst [vmem:[#allocation1 + $0x3] ss:$4 sm:$0xff] %v5346_v41 }
0x3439   :  { %v5363_v10 = vld.sshfl [vmem:[#allocation1] sm:$0xff pattern:$0x73625140] }
0x343a   :  { %5371 = vst [vmem:[#allocation1 + $0x2] ss:$4 sm:$0xff] %v5322_v53  ;;  %5364 = vrot.lane.b32.xlu1 %v5363_v10, %s7831_s28 }
0x343b   :  { %5373 = vst [vmem:[#allocation1 + $0x3] ss:$4 sm:$0xff] %v5323_v28 }
0x343c   :  { %5367 = vst [vmem:[#allocation1] ss:$4 sm:$0xff] %v5319_v0  ;;  %v155_v0 = vld [vmem:[%s7121_s19 + $0x8] sm:$0xff] }
0x343d   :  { %5369 = vst [vmem:[#allocation1 + $0x1] ss:$4 sm:$0xff] %v5320_v11  ;;  %5447 = vmatpush.msrb.mxu2 %v155_v0 }
0x343f   :  { %5448 = vmatpush.msrb.mxu2 %v154_v51 }
0x3444   :  { %v5374_v9 = vld.sshfl [vmem:[#allocation1] sm:$0xff pattern:$0x73625140] }
0x3445   :  { %5375 = vrot.lane.b32.xlu2 %v5374_v9, %s7833_s30  ;;  %5639 = vst [vmem:[#allocation1] ss:$4 sm:$0xff] %v9862_v34  ;;  %v12552_v34 = vld [vmem:[#allocation12_spill] sm:$0xff] }
0x3446   :  { %5641 = vst [vmem:[#allocation1 + $0x1] ss:$4 sm:$0xff] %v12544_v62 }
0x3447   :  { %5643 = vst [vmem:[#allocation1 + $0x2] ss:$4 sm:$0xff] %v12545_v5 }
0x3448   :  { %5645 = vst [vmem:[#allocation1 + $0x3] ss:$4 sm:$0xff] %v12546_v6 }
0x344f   :  { %v11046_v7 = vld [vmem:[#allocation1] sm:$0xff] }
0x3450   :  { %5656 = vst [vmem:[#allocation1] ss:$4 sm:$0xff] %v12547_v32 }
0x3451   :  { %5657 = vst [vmem:[#allocation1 + $0x1] ss:$4 sm:$0xff] %v12548_v2 }
0x3452   :  { %5658 = vst [vmem:[#allocation1 + $0x2] ss:$4 sm:$0xff] %v12549_v16 }
0x3453   :  { %5659 = vst [vmem:[#allocation1 + $0x3] ss:$4 sm:$0xff] %v12550_v14 }
0x345a   :  { %v11052_v44 = vld [vmem:[#allocation1] sm:$0xff] }
0x345b   :  { %5666 = vst [vmem:[#allocation1] ss:$4 sm:$0xff] %v12551_v4 }
0x345c   :  { %5667 = vst [vmem:[#allocation1 + $0x1] ss:$4 sm:$0xff] %v12552_v34 }
0x345d   :  { %5668 = vst [vmem:[#allocation1 + $0x2] ss:$4 sm:$0xff] %v12553_v17 }
0x345e   :  { %5669 = vst [vmem:[#allocation1 + $0x3] ss:$4 sm:$0xff] %v12554_v43 }
0x3465   :  { %v11058_v63 = vld [vmem:[#allocation1] sm:$0xff] }
0x3466   :  { %5676 = vst [vmem:[#allocation1] ss:$4 sm:$0xff] %v12555_v33 }
0x3467   :  { %5677 = vst [vmem:[#allocation1 + $0x1] ss:$4 sm:$0xff] %v12556_v18 }
0x3468   :  { %5678 = vst [vmem:[#allocation1 + $0x2] ss:$4 sm:$0xff] %v12557_v47  ;;  %v11128_v47 = vld [vmem:[%s11087_s22] ss:$0 sm:$0xff] }
0x3469   :  { %5679 = vst [vmem:[#allocation1 + $0x3] ss:$4 sm:$0xff] %v12558_v50 }
0x3470   :  { %v11064_v8 = vld [vmem:[#allocation1] sm:$0xff] }
0x3471   :  { %5686 = vst [vmem:[#allocation1] ss:$4 sm:$0xff] %v9843_v59  ;;  %v148_v59 = vld [vmem:[%s7119_s15 + $0x8] sm:$0xff] }
0x3472   :  { %5687 = vst [vmem:[#allocation1 + $0x1] ss:$4 sm:$0xff] %v12559_v49  ;;  %5400 = vmatpush.msra.mxu3 %v148_v59 }
0x3473   :  { %5688 = vst [vmem:[#allocation1 + $0x2] ss:$4 sm:$0xff] %v12560_v61 }
0x3474   :  { %5689 = vst [vmem:[#allocation1 + $0x3] ss:$4 sm:$0xff] %v12561_v37  ;;  %5401 = vmatpush.msra.mxu3 %v147_v40 }
0x349f   :  { %v5376_v57 = vpop.permute.xlu2 %5375 }
0x34ac   :  { %v5365_v13 = vpop.permute.xlu1 %5364 }
0x34ad   :  { %v5378_v20 = vsel %vm1309_vm14, %v5354_v52, %v5365_v13  ;;  %v11140_v13 = vld [vmem:[#allocation1] sm:$0xff] }
0x34ae   :  { %v5379_v31 = vsel %vm12562_vm1, %v5378_v20, %v5376_v57  ;;  %vm12569_vm1 = vmmov %vm12565_vm3 }
0x34af   :  { %7283 = vmatmul.msk.f32.vlgmr.msra.gmra.mxu3 %vm12563_vm13, %v5379_v31  ;;  %vm12570_vm13 = vmmov %vm12566_vm5 }
0x3532   :  { %v5403_v21 = vpop.f32.mrf.mxu3 }
0x3533   :  { %v5404_v22 = vadd.f32 %v7365_v58, %v5403_v21 }
0x3535   :  { %v7284_v35 = vmul.f32 -1.442695, %v5404_v22 }
0x3537   :  { %7793 = vpow2.f32 %v7284_v35 }
0x353d   :  { %v7794_v54 = vpop.eup %7793 }
0x353e   :  { %v5409_v53 = vadd.f32 1.0, %v7794_v54 }
0x3540   :  { %7795 = vrcp.f32 %v5409_v53  ;;  %v5421_v11 = vand.u32 2147483648, %v5409_v53  ;;  %v5419_v38 = vand.u32 2147483647, %v5409_v53  ;;  %vm5415_vm4 = vweird.f32 %v5409_v53 }
0x3542   :  { %v5422_v24 = vor.u32 1.1754944e-38, %v5421_v11  ;;  %vm5420_vm0 = vcmp.eq.f32.partialorder %v5419_v38, 8.507059e+37 }
0x3546   :  { %v7796_v19 = vpop.eup %7795 }
0x3547   :  { %v5411_v23 = vmul.f32 %v7796_v19, %v5409_v53  ;;  %vm5416_vm2 = vweird.f32 %v7796_v19 }
0x3548   :  { %vm5417_vm6 = vmor %vm5415_vm4, %vm5416_vm2 }
0x3549   :  { %v5412_v45 = vsub.f32 1.0, %v5411_v23  ;;  %vm12571_vm2 = vmmov %vm12569_vm1 }
0x354a   :  { %vm12572_vm4 = vmmov %vm12566_vm5 }
0x354b   :  { %v5413_v28 = vmul.f32 %v7796_v19, %v5412_v45 }
0x354d   :  { %v5414_v36 = vadd.f32 %v7796_v19, %v5413_v28 }
0x354f   :  { %v5418_v12 = vsel %vm5417_vm6, %v7796_v19, %v5414_v36  ;;  %vm12573_vm6 = vmmov %vm12569_vm1 }
0x3550   :  { %v5423_v60 = vsel %vm5420_vm0, %v5422_v24, %v5418_v12 }
0x3551   :  { %5426 = vrot.lane.b32.xlu0 %v5423_v60, %s7841_s11 }
0x35c3   :  { %v5427_v1 = vpop.permute.xlu0 %5426 }
0x35c4   :  { %v5429_v27 = vmul.f32 %v5427_v1, %v5404_v22 }
0x35c6   :  { %7285 = vmatmul.msk.f32.vlgmr.msrb.gmra.mxu2 %vm1309_vm14, %v5429_v27 }
0x3649   :  { %v11089_v15 = vpop.f32.mrf.mxu2 }
0x364a   :  { %v5468_v52 = vperm.slane %v11089_v15, 0  ;;  %v5456_v55 = vrot.slane %v11089_v15, 3  ;;  %v5460_v41 = vrot.slane %v11089_v15, 7  ;;  %v5459_v10 = vrot.slane %v11089_v15, 6 }
0x364b   :  { %v5457_v5 = vrot.slane %v11089_v15, 4  ;;  %v5455_v32 = vrot.slane %v11089_v15, 2  ;;  %v5454_v2 = vrot.slane %v11089_v15, 1  ;;  %v5458_v4 = vrot.slane %v11089_v15, 5 }
0x364c   :  { %5524 = vrot.lane.b32.xlu0 %v5468_v52, %s7861_s10  ;;  %5500 = vrot.lane.b32.xlu2 %v5468_v52, %s7841_s11  ;;  %v5471_v46 = vperm.slane %v5456_v55, 0  ;;  %v5475_v9 = vperm.slane %v5460_v41, 0  ;;  %v5474_v62 = vperm.slane %v5459_v10, 0 }
0x364d   :  { %5476 = vrot.lane.b32.xlu1 %v5468_v52, %s7830_s27  ;;  %v5472_v6 = vperm.slane %v5457_v5, 0  ;;  %v5470_v16 = vperm.slane %v5455_v32, 0  ;;  %v5469_v14 = vperm.slane %v5454_v2, 0  ;;  %v5473_v34 = vperm.slane %v5458_v4, 0 }
0x3654   :  { %5530 = vrot.lane.b32.xlu0 %v5471_v46, %s7861_s10  ;;  %5506 = vrot.lane.b32.xlu2 %v5471_v46, %s7841_s11 }
0x3655   :  { %5482 = vrot.lane.b32.xlu1 %v5471_v46, %s7830_s27 }
0x365c   :  { %5490 = vrot.lane.b32.xlu0 %v5475_v9, %s7830_s27  ;;  %5512 = vrot.lane.b32.xlu2 %v5474_v62, %s7841_s11 }
0x365d   :  { %5488 = vrot.lane.b32.xlu1 %v5474_v62, %s7830_s27 }
0x3664   :  { %5538 = vrot.lane.b32.xlu0 %v5475_v9, %s7861_s10  ;;  %5514 = vrot.lane.b32.xlu2 %v5475_v9, %s7841_s11 }
0x3665   :  { %5536 = vrot.lane.b32.xlu1 %v5474_v62, %s7861_s10 }
0x366c   :  { %5532 = vrot.lane.b32.xlu0 %v5472_v6, %s7861_s10  ;;  %5508 = vrot.lane.b32.xlu2 %v5472_v6, %s7841_s11 }
0x366d   :  { %5484 = vrot.lane.b32.xlu1 %v5472_v6, %s7830_s27 }
0x3674   :  { %5480 = vrot.lane.b32.xlu2 %v5470_v16, %s7830_s27  ;;  %5502 = vrot.lane.b32.xlu0 %v5469_v14, %s7841_s11 }
0x3675   :  { %5478 = vrot.lane.b32.xlu1 %v5469_v14, %s7830_s27 }
0x367c   :  { %5526 = vrot.lane.b32.xlu2 %v5469_v14, %s7861_s10  ;;  %5528 = vrot.lane.b32.xlu0 %v5470_v16, %s7861_s10 }
0x367d   :  { %5504 = vrot.lane.b32.xlu1 %v5470_v16, %s7841_s11 }
0x3684   :  { %5510 = vrot.lane.b32.xlu2 %v5473_v34, %s7841_s11  ;;  %5534 = vrot.lane.b32.xlu0 %v5473_v34, %s7861_s10 }
0x3685   :  { %5486 = vrot.lane.b32.xlu1 %v5473_v34, %s7830_s27 }
0x36a6   :  { %v5501_v17 = vpop.permute.xlu2 %5500 }
0x36ae   :  { %v5507_v43 = vpop.permute.xlu2 %5506 }
0x36b6   :  { %v5513_v49 = vpop.permute.xlu2 %5512 }
0x36be   :  { %v5525_v33 = vpop.permute.xlu0 %5524  ;;  %v5515_v31 = vpop.permute.xlu2 %5514 }
0x36bf   :  { %v5477_v18 = vpop.permute.xlu1 %5476 }
0x36c0   :  { %v5548_v50 = vsel %vm3628_vm8, %v11089_v15, %v5477_v18  ;;  %v11191_v15 = vrot.slane %v11128_v47, 4 }
0x36c1   :  { %v5556_v61 = vsel %vm3631_vm9, %v5548_v50, %v5501_v17 }
0x36c2   :  { %v5564_v37 = vsel %vm3634_vm7, %v5556_v61, %v5525_v33 }
0x36c3   :  { %v5619_v3 = vadd.f32 %v11128_v47, %v5564_v37  ;;  %5580 = vrot.lane.b32.xlu1 %v5564_v37, %s7844_s16 }
0x36c5   :  { %v5629_v30 = vmax.f32 %v5619_v3, 0.0 }
0x36c6   :  { %v5531_v29 = vpop.permute.xlu0 %5530  ;;  %v5509_v21 = vpop.permute.xlu2 %5508 }
0x36c7   :  { %v11137_v26 = vadd.f32 %v11046_v7, %v5629_v30  ;;  %v5483_v59 = vpop.permute.xlu1 %5482 }
0x36c8   :  { %v5551_v40 = vsel %vm3628_vm8, %v5456_v55, %v5483_v59 }
0x36c9   :  { %v5559_v57 = vsel %vm3631_vm9, %v5551_v40, %v5507_v43  ;;  %5823 = vst.sshfl [vmem:[#allocation1] sm:$0xff pattern:$0x75643120] %v11137_v26 }
0x36ca   :  { %v11145_v20 = vsel %vm3634_vm7, %v5559_v57, %v5531_v29 }
0x36cb   :  { %5586 = vrot.lane.b32.xlu2 %v11145_v20, %s7844_s16 }
0x36ce   :  { %v5491_v58 = vpop.permute.xlu0 %5490  ;;  %v5481_v11 = vpop.permute.xlu2 %5480 }
0x36cf   :  { %v5489_v0 = vpop.permute.xlu1 %5488  ;;  %v5555_v7 = vsel %vm3628_vm8, %v5460_v41, %v5491_v58  ;;  %v5550_v41 = vsel %vm3628_vm8, %v5455_v32, %v5481_v11 }
0x36d0   :  { %v5554_v51 = vsel %vm3628_vm8, %v5459_v10, %v5489_v0  ;;  %v5563_v35 = vsel %vm3631_vm9, %v5555_v7, %v5515_v31  ;;  %v11187_v18 = vld [vmem:[#allocation1 + $0x1] ss:$2 sm:$0xff] }
0x36d1   :  { %v5562_v53 = vsel %vm3631_vm9, %v5554_v51, %v5513_v49  ;;  %v5695_v51 = vld [vmem:[#allocation1 + $0x20] sm:$0xff] }
0x36d6   :  { %v5539_v22 = vpop.permute.xlu0 %5538  ;;  %v5527_v27 = vpop.permute.xlu2 %5526 }
0x36d7   :  { %v5571_v54 = vsel %vm3634_vm7, %v5563_v35, %v5539_v22  ;;  %v5537_v19 = vpop.permute.xlu1 %5536 }
0x36d8   :  { %v11155_v23 = vsel %vm3634_vm7, %v5562_v53, %v5537_v19  ;;  %5594 = vrot.lane.b32.xlu1 %v5571_v54, %s7844_s16  ;;  %v5726_v53 = vrot.slane %v11137_v26, 2 }
0x36d9   :  { %5592 = vrot.lane.b32.xlu0 %v11155_v23, %s7844_s16 }
0x36de   :  { %v5533_v45 = vpop.permute.xlu0 %5532  ;;  %v5511_v6 = vpop.permute.xlu2 %5510 }
0x36df   :  { %v5485_v28 = vpop.permute.xlu1 %5484 }
0x36e0   :  { %v5552_v38 = vsel %vm3628_vm8, %v5457_v5, %v5485_v28  ;;  %v5738_v28 = vsel %vm5737_vm12, %v11137_v26, %v5726_v53 }
0x36e1   :  { %v5560_v36 = vsel %vm3631_vm9, %v5552_v38, %v5509_v21 }
0x36e2   :  { %v5568_v24 = vsel %vm3634_vm7, %v5560_v36, %v5533_v45  ;;  %v5739_v36 = vrot.slane %v5738_v28, 2 }
0x36e3   :  { %5588 = vrot.lane.b32.xlu2 %v5568_v24, %s7844_s16  ;;  %v5624_v37 = vadd.f32 %v11128_v47, %v5568_v24  ;;  %v11223_v24 = vsel %vm3631_vm9, %v11137_v26, %v5726_v53 }
0x36e5   :  { %v5634_v30 = vmax.f32 %v5624_v37, 0.0 }
0x36e6   :  { %v5503_v12 = vpop.permute.xlu0 %5502 }
0x36e7   :  { %v5479_v60 = vpop.permute.xlu1 %5478 }
0x36e8   :  { %v5549_v1 = vsel %vm3628_vm8, %v5454_v2, %v5479_v60 }
0x36e9   :  { %v5557_v52 = vsel %vm3631_vm9, %v5549_v1, %v5503_v12 }
0x36ea   :  { %v5565_v55 = vsel %vm3634_vm7, %v5557_v52, %v5527_v27 }
0x36eb   :  { %5582 = vrot.lane.b32.xlu0 %v5565_v55, %s7844_s16 }
0x36ee   :  { %v5529_v46 = vpop.permute.xlu0 %5528 }
0x36ef   :  { %v5505_v10 = vpop.permute.xlu1 %5504 }
0x36f0   :  { %v5558_v9 = vsel %vm3631_vm9, %v5550_v41, %v5505_v10 }
0x36f1   :  { %v11173_v62 = vsel %vm3634_vm7, %v5558_v9, %v5529_v46 }
0x36f2   :  { %5584 = vrot.lane.b32.xlu1 %v11173_v62, %s7844_s16 }
0x36f6   :  { %v5535_v16 = vpop.permute.xlu0 %5534 }
0x36f7   :  { %v5487_v5 = vpop.permute.xlu1 %5486 }
0x36f8   :  { %v5553_v2 = vsel %vm3628_vm8, %v5458_v4, %v5487_v5 }
0x36f9   :  { %v5561_v14 = vsel %vm3631_vm9, %v5553_v2, %v5511_v6 }
0x36fa   :  { %v5569_v32 = vsel %vm3634_vm7, %v5561_v14, %v5535_v16 }
0x36fb   :  { %5590 = vrot.lane.b32.xlu2 %v5569_v32, %s7844_s16  ;;  %s7862_s16 = smov 5  }
0x36fc   :  { %s11431_s25 = sld [smem:[%s12206_s0 + %s7862_s16]]  }
0x3725   :  { %v5587_v34 = vpop.permute.xlu2 %5586 }
0x3726   :  { %v5623_v17 = vadd.f32 %v11128_v47, %v5587_v34 }
0x3728   :  { %v5633_v43 = vmax.f32 %v5623_v17, 0.0 }
0x372a   :  { %v11185_v33 = vadd.f32 %v11058_v63, %v5633_v43  ;;  %v5711_v63 = vadd.f32 %v10999_v42, %v5634_v30 }
0x372c   :  { %5841 = vst.sshfl [vmem:[#allocation1] sm:$0xff pattern:$0x75643120] %v11185_v33  ;;  %v5731_v10 = vrot.slane %v5711_v63, 2  ;;  %v5730_v6 = vrot.slane %v11185_v33, 2 }
0x372e   :  { %v11243_v16 = vsel %vm5737_vm12, %v5711_v63, %v5731_v10 }
0x3733   :  { %v11212_v19 = vld [vmem:[#allocation1] ss:$2 sm:$0xff] }
0x3735   :  { %v5581_v4 = vpop.permute.xlu1 %5580 }
0x3736   :  { %v5605_v50 = vadd.f32 %v5581_v4, %v5565_v55  ;;  %v5752_v4 = vrot.slane %v11243_v16, 2 }
0x3738   :  { %v5620_v49 = vadd.f32 %v11191_v15, %v5605_v50 }
0x373a   :  { %v5630_v61 = vmax.f32 %v5620_v49, 0.0 }
0x373c   :  { %v5707_v3 = vadd.f32 %v10987_v25, %v5630_v61 }
0x373d   :  { %v5589_v42 = vpop.permute.xlu2 %5588 }
0x373e   :  { %5824 = vst.sshfl [vmem:[#allocation1 + $0x10] sm:$0xff pattern:$0x75643120] %v5707_v3  ;;  %v5610_v45 = vadd.f32 %v5589_v42, %v5569_v32  ;;  %v5727_v11 = vrot.slane %v5707_v3, 2  ;;  %v5769_v42 = vrot.slane %v5739_v36, 7 }
0x3740   :  { %v5625_v38 = vadd.f32 %v11191_v15, %v5610_v45  ;;  %v11235_v52 = vsel %vm3631_vm9, %v5707_v3, %v5727_v11 }
0x3742   :  { %v5635_v46 = vmax.f32 %v5625_v38, 0.0  ;;  %v5771_v38 = vrot.slane %v5769_v42, 2 }
0x3744   :  { %v5712_v5 = vadd.f32 %v11064_v8, %v5635_v46  ;;  %v11255_v8 = vsel %vm3631_vm9, %v5711_v63, %v5731_v10 }
0x3745   :  { %v11197_v29 = vld [vmem:[#allocation1 + $0x10] ss:$2 sm:$0xff]  ;;  %v11199_v59 = vld [vmem:[#allocation1 + $0x11] ss:$2 sm:$0xff] }
0x3746   :  { %5844 = vst.sshfl [vmem:[#allocation1 + $0x10] sm:$0xff pattern:$0x75643120] %v5711_v63  ;;  %v5732_v32 = vrot.slane %v5712_v5, 2 }
0x3748   :  { %v11264_v61 = vsel %vm3631_vm9, %v5712_v5, %v5732_v32  ;;  %v5754_v10 = vsel %vm5737_vm12, %v5712_v5, %v5732_v32 }
0x374a   :  { %v5595_v40 = vpop.permute.xlu1 %5594 }
0x374b   :  { %v5593_v57 = vpop.permute.xlu0 %5592  ;;  %v5628_v31 = vadd.f32 %v11128_v47, %v5595_v40 }
0x374c   :  { %v5612_v58 = vadd.f32 %v5593_v57, %v5571_v54  ;;  %v11214_v54 = vld [vmem:[#allocation1 + $0x1] ss:$2 sm:$0xff] }
0x374d   :  { %v5638_v0 = vmax.f32 %v5628_v31, 0.0  ;;  %v11205_v22 = vld [vmem:[#allocation1 + $0x11] ss:$2 sm:$0xff] }
0x374e   :  { %v5627_v7 = vadd.f32 %v11191_v15, %v5612_v58 }
0x374f   :  { %v11203_v21 = vadd.f32 %v5695_v51, %v5638_v0  ;;  %v5772_v0 = vrot.slane %v11235_v52, 7 }
0x3750   :  { %v5637_v25 = vmax.f32 %v5627_v7, 0.0 }
0x3751   :  { %5853 = vst.sshfl [vmem:[#allocation1 + $0x10] sm:$0xff pattern:$0x75643120] %v11203_v21  ;;  %v5735_v30 = vrot.slane %v11203_v21, 2  ;;  %v5774_v28 = vrot.slane %v5772_v0, 2 }
0x3752   :  { %v11209_v35 = vadd.f32 %v11140_v13, %v5637_v25  ;;  %v5741_v13 = vsel %vm5737_vm12, %v5707_v3, %v5727_v11  ;;  %v7286_v11 = vrot.slane %v11223_v24, 9 }
0x3753   :  { %v5742_v55 = vrot.slane %v5741_v13, 2 }
0x3754   :  { %5852 = vst.sshfl [vmem:[#allocation1] sm:$0xff pattern:$0x75643120] %v11209_v35  ;;  %v5734_v37 = vrot.slane %v11209_v35, 2 }
0x3755   :  { %v5591_v34 = vpop.permute.xlu2 %5590  ;;  %v5775_v45 = vrot.slane %v5742_v55, 7 }
0x3758   :  { %v11229_v1 = vld [vmem:[#allocation1 + $0x10] ss:$2 sm:$0xff]  ;;  %v11231_v27 = vld [vmem:[#allocation1 + $0x11] ss:$2 sm:$0xff] }
0x375b   :  { %v11225_v12 = vld [vmem:[#allocation1] ss:$2 sm:$0xff]  ;;  %v11227_v60 = vld [vmem:[#allocation1 + $0x1] ss:$2 sm:$0xff] }
0x375c   :  { %5858 = vst [vmem:[#allocation1] ss:$4 sm:$0xff] %v11223_v24  ;;  %v5776_v24 = vsel %vm11023_vm11, %v5774_v28, %v5775_v45 }
0x375d   :  { %5860 = vst [vmem:[#allocation1 + $0x1] ss:$4 sm:$0xff] %v5739_v36  ;;  %v5583_v41 = vpop.permute.xlu0 %5582  ;;  %v5773_v36 = vsel %vm11023_vm11, %v5771_v38, %v5772_v0  ;;  %v7288_v0 = vrot.slane %v11255_v8, 9 }
0x375e   :  { %5862 = vst [vmem:[#allocation1 + $0x2] ss:$4 sm:$0xff] %v11235_v52  ;;  %v5606_v26 = vadd.f32 %v5583_v41, %v11173_v62  ;;  %v11250_v62 = vsel %vm3631_vm9, %v11185_v33, %v5730_v6  ;;  %v5770_v52 = vsel %vm11023_vm11, %v7286_v11, %v5769_v42  ;;  %v5777_v41 = vrot.slane %v5775_v45, 2 }
0x375f   :  { %5864 = vst [vmem:[#allocation1 + $0x3] ss:$4 sm:$0xff] %v5742_v55  ;;  %v5790_v55 = vrot.slane %v11250_v62, 7 }
0x3760   :  { %v5621_v9 = vadd.f32 %v11128_v47, %v5606_v26 }
0x3762   :  { %v5631_v2 = vmax.f32 %v5621_v9, 0.0 }
0x3764   :  { %v5585_v14 = vpop.permute.xlu1 %5584  ;;  %v5708_v50 = vadd.f32 %v11052_v44, %v5631_v2 }
0x3765   :  { %v5607_v17 = vadd.f32 %v5585_v14, %v11145_v20  ;;  %v5611_v20 = vadd.f32 %v5591_v34, %v11155_v23  ;;  %v11276_v23 = vsel %vm5737_vm12, %v11209_v35, %v5734_v37 }
0x3766   :  { %v11252_v43 = vld.sshfl [vmem:[#allocation1] sm:$0xff pattern:$0x73625140]  ;;  %5825 = vst.sshfl [vmem:[#allocation1 + $0x20] sm:$0xff pattern:$0x75643120] %v5708_v50 }
0x3767   :  { %5875 = vst [vmem:[#allocation1] ss:$4 sm:$0xff] %v11250_v62  ;;  %v5622_v49 = vadd.f32 %v11191_v15, %v5607_v17  ;;  %v5626_v15 = vadd.f32 %v11128_v47, %v5611_v20  ;;  %v5761_v63 = vrot.slane %v11276_v23, 2  ;;  %v5728_v47 = vrot.slane %v5708_v50, 2 }
0x3768   :  { %5876 = vst [vmem:[#allocation1 + $0x1] ss:$4 sm:$0xff] %v11255_v8  ;;  %v5800_v20 = vrot.slane %v11264_v61, 7  ;;  %v5765_v23 = vsel %vm5737_vm12, %v11203_v21, %v5735_v30 }
0x3769   :  { %5877 = vst [vmem:[#allocation1 + $0x2] ss:$4 sm:$0xff] %v5752_v4  ;;  %v5632_v3 = vmax.f32 %v5622_v49, 0.0  ;;  %v5636_v40 = vmax.f32 %v5626_v15, 0.0  ;;  %v11304_v53 = vsel %vm3631_vm9, %v5708_v50, %v5728_v47  ;;  %v5744_v26 = vsel %vm5737_vm12, %v5708_v50, %v5728_v47 }
0x376a   :  { %5878 = vst [vmem:[#allocation1 + $0x3] ss:$4 sm:$0xff] %v11264_v61  ;;  %v5778_v13 = vrot.slane %v11304_v53, 7  ;;  %v5745_v17 = vrot.slane %v5744_v26, 2  ;;  %v5755_v49 = vrot.slane %v5754_v10, 2  ;;  %v5792_v47 = vrot.slane %v5790_v55, 2 }
0x376b   :  { %v5709_v44 = vadd.f32 %v10993_v39, %v5632_v3  ;;  %v11286_v39 = vsel %vm3631_vm9, %v11203_v21, %v5735_v30  ;;  %v11297_v7 = vadd.f32 %v11005_v56, %v5636_v40  ;;  %v5797_v40 = vrot.slane %v5752_v4, 7 }
0x376c   :  { %v5779_v9 = vsel %vm11023_vm11, %v5777_v41, %v5778_v13  ;;  %v5802_v42 = vrot.slane %v5800_v20, 2  ;;  %v11346_v45 = vrot.slane %v5755_v49, 7  ;;  %v5815_v38 = vrot.slane %v5761_v63, 7 }
0x376d   :  { %5826 = vst.sshfl [vmem:[#allocation1 + $0x30] sm:$0xff pattern:$0x75643120] %v5709_v44  ;;  %v11290_v31 = vld [vmem:[#allocation1 + $0x20] ss:$2 sm:$0xff]  ;;  %v5729_v56 = vrot.slane %v5709_v44, 2  ;;  %v5798_v16 = vsel %vm11023_vm11, %v7288_v0, %v5797_v40  ;;  %v5759_v26 = vsel %vm3631_vm9, %v11209_v35, %v5734_v37 }
0x376e   :  { %v11293_v58 = vld [vmem:[#allocation1 + $0x21] ss:$2 sm:$0xff]  ;;  %v5799_v61 = vrot.slane %v5797_v40, 2  ;;  %v5804_v28 = vsel %vm11023_vm11, %v5802_v42, %v11346_v45  ;;  %v7289_v10 = vrot.slane %v5765_v23, 9  ;;  %v5805_v62 = vrot.slane %v11346_v45, 2 }
0x376f   :  { %5845 = vst.sshfl [vmem:[#allocation1 + $0x20] sm:$0xff pattern:$0x75643120] %v5712_v5  ;;  %v5747_v2 = vsel %vm5737_vm12, %v5709_v44, %v5729_v56  ;;  %v5763_v5 = vsel %vm5737_vm12, %v11185_v33, %v5730_v6  ;;  %v5746_v3 = vsel %vm3631_vm9, %v5709_v44, %v5729_v56  ;;  %v5733_v6 = vrot.slane %v11297_v7, 2 }
0x3770   :  { %v5748_v15 = vrot.slane %v5747_v2, 2  ;;  %v7287_v33 = vrot.slane %v5763_v5, 9  ;;  %v5801_v4 = vsel %vm11023_vm11, %v5799_v61, %v5800_v20  ;;  %v5818_v56 = vrot.slane %v11286_v39, 7 }
0x3771   :  { %v11280_v57 = vld.sshfl [vmem:[#allocation1] sm:$0xff pattern:$0x73625140]  ;;  %v5757_v8 = vsel %vm5737_vm12, %v11297_v7, %v5733_v6  ;;  %v5780_v5 = vrot.slane %v5778_v13, 2 }
0x3772   :  { %5885 = vst [vmem:[#allocation1] ss:$4 sm:$0xff] %v5761_v63  ;;  %v5794_v44 = vsel %vm11023_vm11, %v5792_v47, %v7287_v33  ;;  %v5758_v41 = vrot.slane %v5757_v8, 2  ;;  %v5820_v63 = vrot.slane %v5818_v56, 2  ;;  %v5812_v33 = vrot.slane %v5759_v26, 7 }
0x3773   :  { %5886 = vst [vmem:[#allocation1 + $0x1] ss:$4 sm:$0xff] %v11286_v39  ;;  %v5784_v39 = vrot.slane %v5746_v3, 7 }
0x3774   :  { %v11299_v51 = vld [vmem:[#allocation1 + $0x30] ss:$2 sm:$0xff]  ;;  %v11301_v25 = vld [vmem:[#allocation1 + $0x31] ss:$2 sm:$0xff]  ;;  %v5822_v37 = vsel %vm11023_vm11, %v5820_v63, %v7289_v10  ;;  %v5809_v40 = vrot.slane %v5758_v41, 7  ;;  %v5814_v42 = vrot.slane %v5812_v33, 2 }
0x3775   :  { %5846 = vst.sshfl [vmem:[#allocation1 + $0x30] sm:$0xff pattern:$0x75643120] %v11297_v7 }
0x3776   :  { %v11329_v50 = vld [vmem:[#allocation1 + $0x20] ss:$2 sm:$0xff]  ;;  %v11335_v32 = vld [vmem:[#allocation1 + $0x21] ss:$2 sm:$0xff]  ;;  %v5811_v0 = vrot.slane %v5809_v40, 2 }
0x377a   :  { %v11311_v46 = vld.sshfl [vmem:[#allocation1] sm:$0xff pattern:$0x73625140] }
0x377b   :  { %5893 = vst [vmem:[#allocation1] ss:$4 sm:$0xff] %v5770_v52 }
0x377c   :  { %5895 = vst [vmem:[#allocation1 + $0x1] ss:$4 sm:$0xff] %v5773_v36  ;;  %v11325_v14 = vld [vmem:[#allocation1 + $0x30] ss:$2 sm:$0xff]  ;;  %v11327_v34 = vld [vmem:[#allocation1 + $0x31] ss:$2 sm:$0xff]  ;;  %v5756_v36 = vsel %vm3631_vm9, %v11297_v7, %v5733_v6 }
0x377d   :  { %5897 = vst [vmem:[#allocation1 + $0x2] ss:$4 sm:$0xff] %v5776_v24  ;;  %v5817_v24 = vrot.slane %v5815_v38, 2  ;;  %v5781_v7 = vrot.slane %v5745_v17, 7  ;;  %v5806_v13 = vrot.slane %v5756_v36, 7 }
0x377e   :  { %5899 = vst [vmem:[#allocation1 + $0x3] ss:$4 sm:$0xff] %v5779_v9  ;;  %v5787_v9 = vrot.slane %v5748_v15, 7 }
0x377f   :  { %5866 = vst [vmem:[#allocation1 + $0x20] ss:$4 sm:$0xff] %v11304_v53  ;;  %v5819_v2 = vsel %vm11023_vm11, %v5817_v24, %v5818_v56  ;;  %v5783_v21 = vrot.slane %v5781_v7, 2  ;;  %v5782_v20 = vsel %vm11023_vm11, %v5780_v5, %v5781_v7  ;;  %v5808_v6 = vrot.slane %v5806_v13, 2 }
0x3780   :  { %5868 = vst [vmem:[#allocation1 + $0x21] ss:$4 sm:$0xff] %v5745_v17  ;;  %v5789_v30 = vrot.slane %v5787_v9, 2 }
0x3781   :  { %5870 = vst [vmem:[#allocation1 + $0x22] ss:$4 sm:$0xff] %v5746_v3  ;;  %v5785_v3 = vsel %vm11023_vm11, %v5783_v21, %v5784_v39 }
0x3782   :  { %5872 = vst [vmem:[#allocation1 + $0x23] ss:$4 sm:$0xff] %v5748_v15  ;;  %v5791_v15 = vsel %vm11023_vm11, %v5789_v30, %v5790_v55  ;;  %v5810_v55 = vsel %vm11023_vm11, %v5808_v6, %v5809_v40 }
0x3785   :  { %v5908_v11 = vld.sshfl [vmem:[#allocation1] sm:$0xff pattern:$0x73625140] }
0x3786   :  { %5923 = vrot.lane.b32.xlu0 %v5908_v11, %s7824_s9  ;;  %5910 = vst [vmem:[#allocation1] ss:$4 sm:$0xff] %v5794_v44  ;;  %v5807_v44 = vsel %vm11023_vm11, %v5805_v62, %v5806_v13 }
0x3787   :  { %5911 = vst [vmem:[#allocation1 + $0x1] ss:$4 sm:$0xff] %v5798_v16 }
0x3788   :  { %5912 = vst [vmem:[#allocation1 + $0x2] ss:$4 sm:$0xff] %v5801_v4 }
0x3789   :  { %v11363_v52 = vld.sshfl [vmem:[#allocation1 + $0x20] sm:$0xff pattern:$0x73625140]  ;;  %5913 = vst [vmem:[#allocation1 + $0x3] ss:$4 sm:$0xff] %v5804_v28 }
0x378a   :  { %5879 = vst [vmem:[#allocation1 + $0x20] ss:$4 sm:$0xff] %v5755_v49  ;;  %v5786_v49 = vrot.slane %v5784_v39, 2 }
0x378b   :  { %5880 = vst [vmem:[#allocation1 + $0x21] ss:$4 sm:$0xff] %v5756_v36 }
0x378c   :  { %5881 = vst [vmem:[#allocation1 + $0x22] ss:$4 sm:$0xff] %v5758_v41  ;;  %v5788_v53 = vsel %vm11023_vm11, %v5786_v49, %v5787_v9  ;;  %v7367_v41 = vld [vmem:[%s11431_s25] ss:$0 sm:$0xff] }
0x378d   :  { %5882 = vst [vmem:[#allocation1 + $0x23] ss:$4 sm:$0xff] %v5759_v26 }
0x3790   :  { %v5918_v35 = vld.sshfl [vmem:[#allocation1] sm:$0xff pattern:$0x73625140] }
0x3791   :  { %5920 = vst [vmem:[#allocation1] ss:$4 sm:$0xff] %v5819_v2 }
0x3792   :  { %5921 = vst [vmem:[#allocation1 + $0x1] ss:$4 sm:$0xff] %v5822_v37 }
0x3794   :  { %v11383_v17 = vld.sshfl [vmem:[#allocation1 + $0x20] sm:$0xff pattern:$0x73625140] }
0x3795   :  { %5901 = vst [vmem:[#allocation1 + $0x20] ss:$4 sm:$0xff] %v5782_v20 }
0x3796   :  { %5903 = vst [vmem:[#allocation1 + $0x21] ss:$4 sm:$0xff] %v5785_v3 }
0x3797   :  { %5905 = vst [vmem:[#allocation1 + $0x22] ss:$4 sm:$0xff] %v5788_v53 }
0x3798   :  { %5907 = vst [vmem:[#allocation1 + $0x23] ss:$4 sm:$0xff] %v5791_v15 }
0x3799   :  { %v5922_v47 = vld.sshfl [vmem:[#allocation1] sm:$0xff pattern:$0x73625140] }
0x379a   :  { %5938 = vst [vmem:[#allocation1] ss:$4 sm:$0xff] %v11187_v18  ;;  %v5813_v18 = vsel %vm11023_vm11, %v5811_v0, %v5812_v33 }
0x379b   :  { %5940 = vst [vmem:[#allocation1 + $0x1] ss:$4 sm:$0xff] %v11197_v29  ;;  %v5816_v29 = vsel %vm11023_vm11, %v5814_v42, %v5815_v38  ;;  %vm12568_vm11 = vmmov %vm12566_vm5 }
0x379c   :  { %5942 = vst [vmem:[#allocation1 + $0x2] ss:$4 sm:$0xff] %v11199_v59 }
0x379d   :  { %5944 = vst [vmem:[#allocation1 + $0x3] ss:$4 sm:$0xff] %v11290_v31 }
0x379f   :  { %v5909_v61 = vld.sshfl [vmem:[#allocation1 + $0x20] sm:$0xff pattern:$0x73625140] }
0x37a0   :  { %5915 = vst [vmem:[#allocation1 + $0x21] ss:$4 sm:$0xff] %v5810_v55  ;;  %5925 = vrot.lane.b32.xlu2 %v5909_v61, %s7824_s9 }
0x37a1   :  { %5914 = vst [vmem:[#allocation1 + $0x20] ss:$4 sm:$0xff] %v5807_v44 }
0x37a2   :  { %5916 = vst [vmem:[#allocation1 + $0x22] ss:$4 sm:$0xff] %v5813_v18 }
0x37a3   :  { %5917 = vst [vmem:[#allocation1 + $0x23] ss:$4 sm:$0xff] %v5816_v29 }
0x37a4   :  { %v5953_v59 = vld.sshfl [vmem:[#allocation1] sm:$0xff pattern:$0x73625140] }
0x37a5   :  { %5968 = vrot.lane.b32.xlu1 %v5953_v59, %s7831_s28  ;;  %5955 = vst [vmem:[#allocation1] ss:$4 sm:$0xff] %v11214_v54 }
0x37a6   :  { %5956 = vst [vmem:[#allocation1 + $0x1] ss:$4 sm:$0xff] %v11205_v22 }
0x37a7   :  { %5957 = vst [vmem:[#allocation1 + $0x2] ss:$4 sm:$0xff] %v11329_v50 }
0x37a8   :  { %5958 = vst [vmem:[#allocation1 + $0x3] ss:$4 sm:$0xff] %v11335_v32 }
0x37aa   :  { %v5919_v31 = vld.sshfl [vmem:[#allocation1 + $0x20] sm:$0xff pattern:$0x73625140] }
0x37ab   :  { %5946 = vst [vmem:[#allocation1 + $0x20] ss:$4 sm:$0xff] %v11293_v58 }
0x37ac   :  { %5948 = vst [vmem:[#allocation1 + $0x21] ss:$4 sm:$0xff] %v11299_v51 }
0x37ad   :  { %5927 = vrot.lane.b32.xlu1 %v5918_v35, %s7824_s9  ;;  %5950 = vst [vmem:[#allocation1 + $0x22] ss:$4 sm:$0xff] %v11301_v25 }
0x37ae   :  { %5952 = vst [vmem:[#allocation1 + $0x23] ss:$4 sm:$0xff] %v11212_v19 }
0x37af   :  { %v5963_v48 = vld.sshfl [vmem:[#allocation1] sm:$0xff pattern:$0x73625140] }
0x37b0   :  { %5972 = vrot.lane.b32.xlu2 %v5963_v48, %s7831_s28  ;;  %5965 = vst [vmem:[#allocation1] ss:$4 sm:$0xff] %v11229_v1  ;;  %v157_v1 = vld [vmem:[%s7123_s17] sm:$0xff] }
0x37b1   :  { %5966 = vst [vmem:[#allocation1 + $0x1] ss:$4 sm:$0xff] %v11231_v27 }
0x37b5   :  { %v5954_v22 = vld.sshfl [vmem:[#allocation1 + $0x20] sm:$0xff pattern:$0x73625140] }
0x37b6   :  { %5970 = vrot.lane.b32.xlu0 %v5954_v22, %s7831_s28  ;;  %5959 = vst [vmem:[#allocation1 + $0x20] ss:$4 sm:$0xff] %v11325_v14 }
0x37b7   :  { %5960 = vst [vmem:[#allocation1 + $0x21] ss:$4 sm:$0xff] %v11327_v34 }
0x37b8   :  { %5931 = vrot.lane.b32.xlu2 %v5922_v47, %s7824_s9  ;;  %5961 = vst [vmem:[#allocation1 + $0x22] ss:$4 sm:$0xff] %v11225_v12  ;;  %v5967_v54 = vld.sshfl [vmem:[#allocation1] sm:$0xff pattern:$0x73625140]  ;;  %v159_v12 = vld [vmem:[%s7123_s17 + $0x10] sm:$0xff] }
0x37b9   :  { %5962 = vst [vmem:[#allocation1 + $0x23] ss:$4 sm:$0xff] %v11227_v60  ;;  %v158_v60 = vld [vmem:[%s7123_s17 + $0x8] sm:$0xff]  ;;  %6024 = vmatpush.msra.mxu1 %v159_v12 }
0x37bb   :  { %6025 = vmatpush.msra.mxu1 %v158_v60 }
0x37bd   :  { %6026 = vmatpush.msra.mxu1 %v157_v1 }
0x37be   :  { %5929 = vrot.lane.b32.xlu0 %v5919_v31, %s7824_s9  ;;  %s7863_s9 = smov 124  }
0x37c0   :  { %v5964_v19 = vld.sshfl [vmem:[#allocation1 + $0x20] sm:$0xff pattern:$0x73625140] }
0x37c1   :  { %5974 = vrot.lane.b32.xlu1 %v5964_v19, %s7831_s28 }
0x37c6   :  { %5976 = vrot.lane.b32.xlu0 %v5967_v54, %s7831_s28 }
0x37f8   :  { %v5924_v27 = vpop.permute.xlu0 %5923 }
0x37f9   :  { %v5983_v58 = vsel %vm12564_vm15, %v11252_v43, %v5924_v27 }
0x37fa   :  { %v5926_v14 = vpop.permute.xlu2 %5925 }
0x37fb   :  { %v5984_v34 = vsel %vm12566_vm5, %v11363_v52, %v5926_v14 }
0x380a   :  { %v5973_v43 = vpop.permute.xlu2 %5972 }
0x3812   :  { %v5932_v56 = vpop.permute.xlu2 %5931 }
0x3813   :  { %v5987_v36 = vsel %vm12572_vm4, %v11311_v46, %v5932_v56 }
0x3817   :  { %v5969_v51 = vpop.permute.xlu1 %5968 }
0x3818   :  { %v5988_v25 = vsel %vm1309_vm14, %v5983_v58, %v5969_v51 }
0x3819   :  { %7290 = vmatmul.msk.f32.vlgmr.msra.gmra.mxu1 %vm12565_vm3, %v5988_v25 }
0x381f   :  { %v5928_v45 = vpop.permute.xlu1 %5927 }
0x3820   :  { %v5985_v11 = vsel %vm12568_vm11, %v11280_v57, %v5928_v45 }
0x3821   :  { %v5990_v16 = vsel %vm1309_vm14, %v5985_v11, %v5973_v43 }
0x3828   :  { %v5971_v50 = vpop.permute.xlu0 %5970 }
0x3829   :  { %v5989_v32 = vsel %vm1309_vm14, %v5984_v34, %v5971_v50 }
0x382a   :  { %7291 = vmatmul.msk.f32.gmra.mxu1 %vm12567_vm10, %v5989_v32 }
0x3830   :  { %v5930_v4 = vpop.permute.xlu0 %5929 }
0x3831   :  { %v5986_v8 = vsel %vm12570_vm13, %v11383_v17, %v5930_v4 }
0x3832   :  { %7292 = vmatmul.msk.f32.gmra.mxu1 %vm12569_vm1, %v5990_v16 }
0x3833   :  { %v5975_v28 = vpop.permute.xlu1 %5974 }
0x3834   :  { %v5991_v38 = vsel %vm1309_vm14, %v5986_v8, %v5975_v28 }
0x3838   :  { %v5977_v52 = vpop.permute.xlu0 %5976 }
0x3839   :  { %v5992_v57 = vsel %vm1309_vm14, %v5987_v36, %v5977_v52 }
0x383a   :  { %7293 = vmatmul.msk.f32.gmra.mxu1 %vm12571_vm2, %v5991_v38 }
0x3842   :  { %7294 = vmatmul.msk.f32.gmra.mxu1 %vm12573_vm6, %v5992_v57 }
0x3896   :  { %v6028_v26 = vpop.f32.mrf.mxu1 }
0x3897   :  { %v11459_v24 = vadd.f32 %v7367_v41, %v6028_v26 }
0x3899   :  { %v7295_v23 = vmul.f32 -1.442695, %v11459_v24 }
0x389b   :  { %7797 = vpow2.f32 %v7295_v23 }
0x38a1   :  { %v7798_v63 = vpop.eup %7797 }
0x38a2   :  { %v6058_v39 = vadd.f32 1.0, %v7798_v63 }
0x38a4   :  { %7799 = vrcp.f32 %v6058_v39  ;;  %v6074_v35 = vand.u32 2147483648, %v6058_v39  ;;  %v6072_v21 = vand.u32 2147483647, %v6058_v39  ;;  %vm6068_vm0 = vweird.f32 %v6058_v39 }
0x38a6   :  { %v6075_v53 = vor.u32 1.1754944e-38, %v6074_v35  ;;  %vm6073_vm15 = vcmp.eq.f32.partialorder %v6072_v21, 8.507059e+37 }
0x38a7   :  { %v6031_v10 = vpop.f32.mrf.mxu1 }
0x38a8   :  { %v11462_v7 = vadd.f32 %v7367_v41, %v6031_v10 }
0x38aa   :  { %v7800_v9 = vpop.eup %7799  ;;  %v7296_v46 = vmul.f32 -1.442695, %v11462_v7 }
0x38ab   :  { %v6064_v2 = vmul.f32 %v7800_v9, %v6058_v39  ;;  %vm6069_vm14 = vweird.f32 %v7800_v9 }
0x38ac   :  { %7801 = vpow2.f32 %v7296_v46  ;;  %vm6070_vm12 = vmor %vm6068_vm0, %vm6069_vm14 }
0x38ad   :  { %v6065_v5 = vsub.f32 1.0, %v6064_v2 }
0x38af   :  { %v6034_v37 = vpop.f32.mrf.mxu1  ;;  %v6066_v49 = vmul.f32 %v7800_v9, %v6065_v5 }
0x38b0   :  { %v11465_v30 = vadd.f32 %v7367_v41, %v6034_v37 }
0x38b1   :  { %v6067_v20 = vadd.f32 %v7800_v9, %v6066_v49  ;;  %v161_v49 = vld [vmem:[%s7125_s2] sm:$0xff] }
0x38b2   :  { %v7802_v17 = vpop.eup %7801  ;;  %v7297_v3 = vmul.f32 -1.442695, %v11465_v30  ;;  %6193 = vmatpush.msra.mxu2 %v161_v49 }
0x38b3   :  { %v6059_v13 = vadd.f32 1.0, %v7802_v17  ;;  %v6071_v15 = vsel %vm6070_vm12, %v7800_v9, %v6067_v20 }
0x38b4   :  { %7803 = vpow2.f32 %v7297_v3  ;;  %v6076_v40 = vsel %vm6073_vm15, %v6075_v53, %v6071_v15 }
0x38b5   :  { %7805 = vrcp.f32 %v6059_v13  ;;  %6143 = vrot.lane.b32.xlu1 %v6076_v40, %s7830_s27  ;;  %v6089_v18 = vand.u32 2147483648, %v6059_v13  ;;  %v6087_v31 = vand.u32 2147483647, %v6059_v13  ;;  %vm6083_vm5 = vweird.f32 %v6059_v13 }
0x38b7   :  { %v6037_v47 = vpop.f32.mrf.mxu1  ;;  %v6090_v60 = vor.u32 1.1754944e-38, %v6089_v18  ;;  %vm6088_vm11 = vcmp.eq.f32.partialorder %v6087_v31, 8.507059e+37 }
0x38b8   :  { %v11469_v33 = vadd.f32 %v7367_v41, %v6037_v47 }
0x38ba   :  { %v7804_v6 = vpop.eup %7803  ;;  %v7298_v0 = vmul.f32 -1.442695, %v11469_v33 }
0x38bb   :  { %v7806_v62 = vpop.eup %7805  ;;  %v6060_v42 = vadd.f32 1.0, %v7804_v6 }
0x38bc   :  { %7807 = vpow2.f32 %v7298_v0  ;;  %v6079_v55 = vmul.f32 %v7806_v62, %v6059_v13  ;;  %vm6084_vm3 = vweird.f32 %v7806_v62 }
0x38bd   :  { %7809 = vrcp.f32 %v6060_v42  ;;  %vm6085_vm10 = vmor %vm6083_vm5, %vm6084_vm3  ;;  %v6104_v25 = vand.u32 2147483648, %v6060_v42  ;;  %v6102_v34 = vand.u32 2147483647, %v6060_v42  ;;  %vm6098_vm13 = vweird.f32 %v6060_v42 }
0x38be   :  { %v6080_v61 = vsub.f32 1.0, %v6079_v55 }
0x38bf   :  { %v6040_v44 = vpop.f32.mrf.mxu1  ;;  %v6105_v43 = vor.u32 1.1754944e-38, %v6104_v25  ;;  %vm6103_vm4 = vcmp.eq.f32.partialorder %v6102_v34, 8.507059e+37 }
0x38c0   :  { %v11472_v29 = vadd.f32 %v7367_v41, %v6040_v44  ;;  %v6081_v59 = vmul.f32 %v7806_v62, %v6080_v61 }
0x38c2   :  { %v7808_v48 = vpop.eup %7807  ;;  %v7299_v22 = vmul.f32 -1.442695, %v11472_v29  ;;  %v6082_v19 = vadd.f32 %v7806_v62, %v6081_v59 }
0x38c3   :  { %v7810_v54 = vpop.eup %7809  ;;  %v6061_v12 = vadd.f32 1.0, %v7808_v48 }
0x38c4   :  { %7811 = vpow2.f32 %v7299_v22  ;;  %v6086_v1 = vsel %vm6085_vm10, %v7806_v62, %v6082_v19  ;;  %v6094_v27 = vmul.f32 %v7810_v54, %v6060_v42  ;;  %vm6099_vm1 = vweird.f32 %v7810_v54 }
0x38c5   :  { %7813 = vrcp.f32 %v6061_v12  ;;  %v6091_v58 = vsel %vm6088_vm11, %v6090_v60, %v6086_v1  ;;  %vm6100_vm2 = vmor %vm6098_vm13, %vm6099_vm1  ;;  %v6119_v38 = vand.u32 2147483648, %v6061_v12  ;;  %v6117_v52 = vand.u32 2147483647, %v6061_v12 }
0x38c6   :  { %6145 = vrot.lane.b32.xlu2 %v6091_v58, %s7830_s27  ;;  %v6095_v51 = vsub.f32 1.0, %v6094_v27  ;;  %vm6113_vm14 = vweird.f32 %v6061_v12  ;;  %vm12574_vm11 = vcmask 64512  }
0x38c7   :  { %v6120_v41 = vor.u32 1.1754944e-38, %v6119_v38  ;;  %vm6118_vm12 = vcmp.eq.f32.partialorder %v6117_v52, 8.507059e+37  ;;  %vm12575_vm1 = vmmov %vm12574_vm11 }
0x38c8   :  { %v6096_v14 = vmul.f32 %v7810_v54, %v6095_v51  ;;  %vm12576_vm13 = vmmov %vm12575_vm1 }
0x38ca   :  { %v7812_v50 = vpop.eup %7811  ;;  %v6097_v32 = vadd.f32 %v7810_v54, %v6096_v14 }
0x38cb   :  { %v7814_v45 = vpop.eup %7813  ;;  %v6062_v11 = vadd.f32 1.0, %v7812_v50 }
0x38cc   :  { %v6101_v16 = vsel %vm6100_vm2, %v7810_v54, %v6097_v32  ;;  %v6109_v4 = vmul.f32 %v7814_v45, %v6061_v12  ;;  %vm6114_vm6 = vweird.f32 %v7814_v45  ;;  %vm12577_vm2 = vmmov %vm12575_vm1 }
0x38cd   :  { %7815 = vrcp.f32 %v6062_v11  ;;  %v6106_v8 = vsel %vm6103_vm4, %v6105_v43, %v6101_v16  ;;  %vm6115_vm0 = vmor %vm6113_vm14, %vm6114_vm6  ;;  %v6134_v10 = vand.u32 2147483648, %v6062_v11  ;;  %v6132_v46 = vand.u32 2147483647, %v6062_v11 }
0x38ce   :  { %6147 = vrot.lane.b32.xlu0 %v6106_v8, %s7830_s27  ;;  %v6110_v28 = vsub.f32 1.0, %v6109_v4  ;;  %vm6128_vm3 = vweird.f32 %v6062_v11  ;;  %vm12578_vm4 = vmmov %vm12575_vm1 }
0x38cf   :  { %v6135_v5 = vor.u32 1.1754944e-38, %v6134_v10  ;;  %vm6133_vm10 = vcmp.eq.f32.partialorder %v6132_v46, 8.507059e+37 }
0x38d0   :  { %v6111_v56 = vmul.f32 %v7814_v45, %v6110_v28 }
0x38d2   :  { %v6112_v36 = vadd.f32 %v7814_v45, %v6111_v56 }
0x38d3   :  { %v7816_v57 = vpop.eup %7815 }
0x38d4   :  { %v6116_v26 = vsel %vm6115_vm0, %v7814_v45, %v6112_v36  ;;  %v6124_v23 = vmul.f32 %v7816_v57, %v6062_v11  ;;  %vm6129_vm15 = vweird.f32 %v7816_v57 }
0x38d5   :  { %v6121_v63 = vsel %vm6118_vm12, %v6120_v41, %v6116_v26  ;;  %vm6130_vm5 = vmor %vm6128_vm3, %vm6129_vm15  ;;  %vm7102_vm3 = vcmask 27648  }
0x38d6   :  { %6149 = vrot.lane.b32.xlu1 %v6121_v63, %s7830_s27  ;;  %v6125_v39 = vsub.f32 1.0, %v6124_v23 }
0x38d8   :  { %v6126_v9 = vmul.f32 %v7816_v57, %v6125_v39 }
0x38da   :  { %v6127_v2 = vadd.f32 %v7816_v57, %v6126_v9 }
0x38dc   :  { %v6131_v35 = vsel %vm6130_vm5, %v7816_v57, %v6127_v2 }
0x38dd   :  { %v6136_v37 = vsel %vm6133_vm10, %v6135_v5, %v6131_v35  ;;  %v11617_v35 = vld [vmem:[%s11506_s5] ss:$0 sm:$0xff] }
0x38de   :  { %6151 = vrot.lane.b32.xlu2 %v6136_v37, %s7830_s27 }
0x3920   :  { %v6146_v17 = vpop.permute.xlu2 %6145 }
0x3921   :  { %v6159_v3 = vmul.f32 %v6146_v17, %v11462_v7 }
0x3927   :  { %v6144_v21 = vpop.permute.xlu1 %6143 }
0x3928   :  { %v6158_v20 = vmul.f32 %v6144_v21, %v11459_v24 }
0x392a   :  { %7300 = vmatmul.msk.f32.vlgmr.msra.gmra.mxu2 %vm12574_vm11, %v6158_v20 }
0x3932   :  { %7301 = vmatmul.msk.f32.gmra.mxu2 %vm12575_vm1, %v6159_v3 }
0x3938   :  { %v6152_v47 = vpop.permute.xlu2 %6151 }
0x3939   :  { %v6162_v24 = vmul.f32 %v6152_v47, %v11472_v29 }
0x3940   :  { %v6148_v53 = vpop.permute.xlu0 %6147 }
0x3941   :  { %v6160_v13 = vmul.f32 %v6148_v53, %v11465_v30 }
0x3943   :  { %7302 = vmatmul.msk.f32.gmra.mxu2 %vm12576_vm13, %v6160_v13 }
0x3948   :  { %v6150_v15 = vpop.permute.xlu1 %6149 }
0x3949   :  { %v6161_v40 = vmul.f32 %v6150_v15, %v11469_v33 }
0x394b   :  { %7303 = vmatmul.msk.f32.gmra.mxu2 %vm12577_vm2, %v6161_v40 }
0x3953   :  { %7304 = vmatmul.msk.f32.gmra.mxu2 %vm12578_vm4, %v6162_v24 }
0x39ad   :  { %v11493_v6 = vpop.f32.mrf.mxu2 }
0x39ae   :  { %v6277_v7 = vperm.slane %v11493_v6, 0  ;;  %v6216_v0 = vrot.slane %v11493_v6, 2  ;;  %v6215_v30 = vrot.slane %v11493_v6, 1  ;;  %v6219_v42 = vrot.slane %v11493_v6, 5 }
0x39af   :  { %v6218_v55 = vrot.slane %v11493_v6, 4  ;;  %v6221_v18 = vrot.slane %v11493_v6, 7  ;;  %v6217_v59 = vrot.slane %v11493_v6, 3  ;;  %v6220_v48 = vrot.slane %v11493_v6, 6 }
0x39b0   :  { %6313 = vrot.lane.b32.xlu0 %v6277_v7, %s7863_s9  ;;  %v6279_v33 = vperm.slane %v6216_v0, 0  ;;  %v6278_v62 = vperm.slane %v6215_v30, 0  ;;  %v6282_v61 = vperm.slane %v6219_v42, 0 }
0x39b1   :  { %v6281_v44 = vperm.slane %v6218_v55, 0  ;;  %v6284_v29 = vperm.slane %v6221_v18, 0  ;;  %v6280_v31 = vperm.slane %v6217_v59, 0  ;;  %v6283_v22 = vperm.slane %v6220_v48, 0 }
0x39b2   :  { %6317 = vrot.lane.b32.xlu2 %v6279_v33, %s7863_s9  ;;  %6315 = vrot.lane.b32.xlu1 %v6278_v62, %s7863_s9 }
0x39b5   :  { %v11540_v19 = vpop.f32.mrf.mxu2 }
0x39b6   :  { %v6285_v54 = vperm.slane %v11540_v19, 0  ;;  %v6222_v12 = vrot.slane %v11540_v19, 1  ;;  %v6224_v60 = vrot.slane %v11540_v19, 3  ;;  %v6223_v1 = vrot.slane %v11540_v19, 2 }
0x39b7   :  { %v6225_v25 = vrot.slane %v11540_v19, 4  ;;  %v6227_v14 = vrot.slane %v11540_v19, 6  ;;  %v6226_v34 = vrot.slane %v11540_v19, 5  ;;  %v6228_v11 = vrot.slane %v11540_v19, 7 }
0x39b8   :  { %6421 = vrot.lane.b32.xlu0 %v6277_v7, %s7830_s27  ;;  %v6286_v27 = vperm.slane %v6222_v12, 0  ;;  %v6288_v58 = vperm.slane %v6224_v60, 0  ;;  %v6287_v51 = vperm.slane %v6223_v1, 0 }
0x39b9   :  { %v6289_v50 = vperm.slane %v6225_v25, 0  ;;  %v6291_v32 = vperm.slane %v6227_v14, 0  ;;  %v6290_v45 = vperm.slane %v6226_v34, 0  ;;  %v6292_v43 = vperm.slane %v6228_v11, 0 }
0x39ba   :  { %6323 = vrot.lane.b32.xlu2 %v6282_v61, %s7863_s9  ;;  %6321 = vrot.lane.b32.xlu1 %v6281_v44, %s7863_s9 }
0x39c0   :  { %6529 = vrot.lane.b32.xlu0 %v6277_v7, %s7865_s12 }
0x39c2   :  { %6425 = vrot.lane.b32.xlu2 %v6279_v33, %s7830_s27  ;;  %6327 = vrot.lane.b32.xlu1 %v6284_v29, %s7863_s9 }
0x39c6   :  { %v11593_v56 = vpop.f32.mrf.mxu2 }
0x39c7   :  { %v6229_v26 = vrot.slane %v11593_v56, 1  ;;  %v6293_v63 = vperm.slane %v11593_v56, 0  ;;  %v6232_v2 = vrot.slane %v11593_v56, 4  ;;  %v6235_v15 = vrot.slane %v11593_v56, 7 }
0x39c8   :  { %6319 = vrot.lane.b32.xlu0 %v6280_v31, %s7863_s9  ;;  %v6230_v7 = vrot.slane %v11593_v56, 2 }
0x39c9   :  { %v11606_v39 = vperm.slane %v6229_v26, 0  ;;  %v11621_v37 = vperm.slane %v6232_v2, 0  ;;  %v11641_v47 = vperm.slane %v6235_v15, 0 }
0x39ca   :  { %6431 = vrot.lane.b32.xlu2 %v6282_v61, %s7830_s27  ;;  %6423 = vrot.lane.b32.xlu1 %v6278_v62, %s7830_s27 }
0x39d0   :  { %6325 = vrot.lane.b32.xlu0 %v6283_v22, %s7863_s9 }
0x39d2   :  { %6533 = vrot.lane.b32.xlu2 %v6279_v33, %s7865_s12  ;;  %6429 = vrot.lane.b32.xlu1 %v6281_v44, %s7830_s27 }
0x39d8   :  { %6427 = vrot.lane.b32.xlu0 %v6280_v31, %s7830_s27 }
0x39da   :  { %6539 = vrot.lane.b32.xlu2 %v6282_v61, %s7865_s12  ;;  %6435 = vrot.lane.b32.xlu1 %v6284_v29, %s7830_s27 }
0x39e0   :  { %6433 = vrot.lane.b32.xlu0 %v6283_v22, %s7830_s27 }
0x39e2   :  { %6531 = vrot.lane.b32.xlu1 %v6278_v62, %s7865_s12  ;;  %6329 = vrot.lane.b32.xlu2 %v6285_v54, %s7863_s9 }
0x39e8   :  { %6535 = vrot.lane.b32.xlu0 %v6280_v31, %s7865_s12 }
0x39ea   :  { %6537 = vrot.lane.b32.xlu1 %v6281_v44, %s7865_s12  ;;  %6437 = vrot.lane.b32.xlu2 %v6285_v54, %s7830_s27  ;;  %v6295_v44 = vperm.slane %v6230_v7, 0 }
0x39f0   :  { %6541 = vrot.lane.b32.xlu0 %v6283_v22, %s7865_s12 }
0x39f2   :  { %6543 = vrot.lane.b32.xlu1 %v6284_v29, %s7865_s12  ;;  %6545 = vrot.lane.b32.xlu2 %v6285_v54, %s7865_s12 }
0x39f8   :  { %6331 = vrot.lane.b32.xlu0 %v6286_v27, %s7863_s9 }
0x39fa   :  { %6335 = vrot.lane.b32.xlu2 %v6288_v58, %s7863_s9  ;;  %6333 = vrot.lane.b32.xlu1 %v6287_v51, %s7863_s9 }
0x3a00   :  { %6337 = vrot.lane.b32.xlu0 %v6289_v50, %s7863_s9 }
0x3a02   :  { %6341 = vrot.lane.b32.xlu2 %v6291_v32, %s7863_s9  ;;  %6339 = vrot.lane.b32.xlu1 %v6290_v45, %s7863_s9 }
0x3a08   :  { %6343 = vrot.lane.b32.xlu0 %v6292_v43, %s7863_s9 }
0x3a0a   :  { %6443 = vrot.lane.b32.xlu2 %v6288_v58, %s7830_s27  ;;  %6441 = vrot.lane.b32.xlu1 %v6287_v51, %s7830_s27 }
0x3a0c   :  { %v6318_v16 = vpop.permute.xlu2 %6317 }
0x3a0d   :  { %v6639_v8 = vsel %vm3628_vm8, %v6216_v0, %v6318_v16 }
0x3a10   :  { %6439 = vrot.lane.b32.xlu0 %v6286_v27, %s7830_s27 }
0x3a12   :  { %6449 = vrot.lane.b32.xlu2 %v6291_v32, %s7830_s27  ;;  %6447 = vrot.lane.b32.xlu1 %v6290_v45, %s7830_s27 }
0x3a14   :  { %v6324_v4 = vpop.permute.xlu2 %6323 }
0x3a15   :  { %v6642_v36 = vsel %vm3628_vm8, %v6219_v42, %v6324_v4  ;;  %v6231_v42 = vrot.slane %v11593_v56, 3 }
0x3a17   :  { %v6296_v29 = vperm.slane %v6231_v42, 0 }
0x3a18   :  { %6445 = vrot.lane.b32.xlu0 %v6289_v50, %s7830_s27 }
0x3a1a   :  { %6551 = vrot.lane.b32.xlu2 %v6288_v58, %s7865_s12  ;;  %6549 = vrot.lane.b32.xlu1 %v6287_v51, %s7865_s12  ;;  %v6234_v51 = vrot.slane %v11593_v56, 6 }
0x3a1c   :  { %v6426_v28 = vpop.permute.xlu2 %6425 }
0x3a1d   :  { %v6675_v38 = vsel %vm3631_vm9, %v6639_v8, %v6426_v28 }
0x3a20   :  { %6451 = vrot.lane.b32.xlu0 %v6292_v43, %s7830_s27 }
0x3a22   :  { %v6314_v52 = vpop.permute.xlu0 %6313  ;;  %6557 = vrot.lane.b32.xlu2 %v6291_v32, %s7865_s12  ;;  %6555 = vrot.lane.b32.xlu1 %v6290_v45, %s7865_s12 }
0x3a23   :  { %v6637_v49 = vsel %vm3628_vm8, %v11493_v6, %v6314_v52 }
0x3a24   :  { %v6432_v57 = vpop.permute.xlu2 %6431  ;;  %v6316_v41 = vpop.permute.xlu1 %6315 }
0x3a25   :  { %v6678_v23 = vsel %vm3631_vm9, %v6642_v36, %v6432_v57  ;;  %v6638_v0 = vsel %vm3628_vm8, %v6215_v30, %v6316_v41  ;;  %v6233_v30 = vrot.slane %v11593_v56, 5 }
0x3a27   :  { %v6298_v45 = vperm.slane %v6233_v30, 0 }
0x3a28   :  { %6547 = vrot.lane.b32.xlu0 %v6286_v27, %s7865_s12 }
0x3a2a   :  { %v6422_v10 = vpop.permute.xlu0 %6421  ;;  %6345 = vrot.lane.b32.xlu1 %v6293_v63, %s7863_s9  ;;  %6347 = vrot.lane.b32.xlu2 %v11606_v39, %s7863_s9 }
0x3a2b   :  { %v6673_v21 = vsel %vm3631_vm9, %v6637_v49, %v6422_v10 }
0x3a2c   :  { %v6534_v9 = vpop.permute.xlu2 %6533  ;;  %v6322_v46 = vpop.permute.xlu1 %6321 }
0x3a2d   :  { %v11613_v5 = vsel %vm3634_vm7, %v6675_v38, %v6534_v9  ;;  %v6641_v22 = vsel %vm3628_vm8, %v6218_v55, %v6322_v46 }
0x3a30   :  { %6553 = vrot.lane.b32.xlu0 %v6289_v50, %s7865_s12 }
0x3a32   :  { %v6530_v20 = vpop.permute.xlu0 %6529  ;;  %6453 = vrot.lane.b32.xlu1 %v6293_v63, %s7830_s27  ;;  %6353 = vrot.lane.b32.xlu2 %v11621_v37, %s7863_s9 }
0x3a33   :  { %v11630_v17 = vsel %vm3634_vm7, %v6673_v21, %v6530_v20 }
0x3a34   :  { %v6932_v3 = vadd.f32 %v11617_v35, %v11630_v17  ;;  %v6540_v53 = vpop.permute.xlu2 %6539  ;;  %v6328_v13 = vpop.permute.xlu1 %6327 }
0x3a35   :  { %v11636_v40 = vsel %vm3634_vm7, %v6678_v23, %v6540_v53  ;;  %v6644_v8 = vsel %vm3628_vm8, %v6221_v18, %v6328_v13 }
0x3a36   :  { %7008 = vst [vmem:[#allocation1] ss:$2 sm:$0xff] %v6932_v3 }
0x3a38   :  { %6559 = vrot.lane.b32.xlu0 %v6292_v43, %s7865_s12  ;;  %v6299_v43 = vperm.slane %v6234_v51, 0 }
0x3a3a   :  { %v6320_v24 = vpop.permute.xlu0 %6319  ;;  %6561 = vrot.lane.b32.xlu1 %v6293_v63, %s7865_s12  ;;  %6359 = vrot.lane.b32.xlu2 %v11641_v47, %s7863_s9 }
0x3a3b   :  { %v6640_v55 = vsel %vm3628_vm8, %v6217_v59, %v6320_v24  ;;  %v11724_v24 = vpop.f32.mrf.mxu2 }
0x3a3c   :  { %v6330_v33 = vpop.permute.xlu2 %6329  ;;  %v6424_v62 = vpop.permute.xlu1 %6423 }
0x3a3d   :  { %v6674_v61 = vsel %vm3631_vm9, %v6638_v0, %v6424_v62  ;;  %v6645_v54 = vsel %vm3628_vm8, %v11540_v19, %v6330_v33  ;;  %v6237_v62 = vrot.slane %v11724_v24, 2 }
0x3a40   :  { %6349 = vrot.lane.b32.xlu0 %v6295_v44, %s7863_s9 }
0x3a42   :  { %v6326_v31 = vpop.permute.xlu0 %6325  ;;  %6351 = vrot.lane.b32.xlu1 %v6296_v29, %s7863_s9  ;;  %6455 = vrot.lane.b32.xlu2 %v11606_v39, %s7830_s27 }
0x3a43   :  { %v6643_v59 = vsel %vm3628_vm8, %v6220_v48, %v6326_v31  ;;  %v6303_v31 = vperm.slane %v6237_v62, 0 }
0x3a44   :  { %v6438_v27 = vpop.permute.xlu2 %6437  ;;  %v6430_v58 = vpop.permute.xlu1 %6429 }
0x3a45   :  { %v6681_v50 = vsel %vm3631_vm9, %v6645_v54, %v6438_v27  ;;  %v6677_v32 = vsel %vm3631_vm9, %v6641_v22, %v6430_v58  ;;  %v6240_v27 = vrot.slane %v11724_v24, 5  ;;  %v6239_v58 = vrot.slane %v11724_v24, 4 }
0x3a48   :  { %6355 = vrot.lane.b32.xlu0 %v6298_v45, %s7863_s9 }
0x3a4a   :  { %v6428_v16 = vpop.permute.xlu0 %6427  ;;  %6357 = vrot.lane.b32.xlu1 %v6299_v43, %s7863_s9  ;;  %6461 = vrot.lane.b32.xlu2 %v11621_v37, %s7830_s27 }
0x3a4b   :  { %v6676_v4 = vsel %vm3631_vm9, %v6640_v55, %v6428_v16 }
0x3a4c   :  { %v6546_v28 = vpop.permute.xlu2 %6545  ;;  %v6436_v38 = vpop.permute.xlu1 %6435 }
0x3a4d   :  { %v11685_v52 = vsel %vm3634_vm7, %v6681_v50, %v6546_v28  ;;  %v6680_v36 = vsel %vm3631_vm9, %v6644_v8, %v6436_v38  ;;  %v12356_v8 = vrot.slane %v11724_v24, 7 }
0x3a50   :  { %6457 = vrot.lane.b32.xlu0 %v6295_v44, %s7830_s27 }
0x3a52   :  { %v6434_v57 = vpop.permute.xlu0 %6433  ;;  %6459 = vrot.lane.b32.xlu1 %v6296_v29, %s7830_s27  ;;  %6467 = vrot.lane.b32.xlu2 %v11641_v47, %s7830_s27 }
0x3a53   :  { %v6679_v18 = vsel %vm3631_vm9, %v6643_v59, %v6434_v57  ;;  %v6238_v57 = vrot.slane %v11724_v24, 3 }
0x3a54   :  { %v6336_v41 = vpop.permute.xlu2 %6335  ;;  %v6532_v23 = vpop.permute.xlu1 %6531 }
0x3a55   :  { %v11697_v63 = vsel %vm3634_vm7, %v6674_v61, %v6532_v23  ;;  %v6236_v61 = vrot.slane %v11724_v24, 1 }
0x3a58   :  { %6463 = vrot.lane.b32.xlu0 %v6298_v45, %s7830_s27 }
0x3a5a   :  { %v6536_v10 = vpop.permute.xlu0 %6535  ;;  %6465 = vrot.lane.b32.xlu1 %v6299_v43, %s7830_s27  ;;  %6563 = vrot.lane.b32.xlu2 %v11606_v39, %s7865_s12  ;;  %v6648_v39 = vsel %vm3628_vm8, %v6224_v60, %v6336_v41 }
0x3a5b   :  { %v11704_v6 = vsel %vm3634_vm7, %v6676_v4, %v6536_v10 }
0x3a5c   :  { %v6342_v48 = vpop.permute.xlu2 %6341  ;;  %v6538_v9 = vpop.permute.xlu1 %6537 }
0x3a5d   :  { %v11707_v46 = vsel %vm3634_vm7, %v6677_v32, %v6538_v9  ;;  %v6651_v60 = vsel %vm3628_vm8, %v6227_v14, %v6342_v48  ;;  %v6306_v32 = vperm.slane %v6240_v27, 0 }
0x3a60   :  { %6565 = vrot.lane.b32.xlu0 %v6295_v44, %s7865_s12 }
0x3a62   :  { %v6542_v49 = vpop.permute.xlu0 %6541  ;;  %6567 = vrot.lane.b32.xlu1 %v6296_v29, %s7865_s12  ;;  %6569 = vrot.lane.b32.xlu2 %v11621_v37, %s7865_s12  ;;  %v6301_v29 = vperm.slane %v11724_v24, 0 }
0x3a63   :  { %v11714_v21 = vsel %vm3634_vm7, %v6679_v18, %v6542_v49 }
0x3a64   :  { %v6444_v20 = vpop.permute.xlu2 %6443  ;;  %v6544_v3 = vpop.permute.xlu1 %6543 }
0x3a65   :  { %v6684_v53 = vsel %vm3631_vm9, %v6648_v39, %v6444_v20  ;;  %v11721_v13 = vsel %vm3634_vm7, %v6680_v36, %v6544_v3  ;;  %v11772_v36 = vperm.slane %v12356_v8, 0 }
0x3a68   :  { %6571 = vrot.lane.b32.xlu0 %v6298_v45, %s7865_s12  ;;  %v11756_v45 = vperm.slane %v6239_v58, 0 }
0x3a6a   :  { %v6332_v0 = vpop.permute.xlu0 %6331  ;;  %6573 = vrot.lane.b32.xlu1 %v6299_v43, %s7865_s12  ;;  %6575 = vrot.lane.b32.xlu2 %v11641_v47, %s7865_s12  ;;  %v11741_v47 = vperm.slane %v6236_v61, 0 }
0x3a6b   :  { %v6646_v59 = vsel %vm3628_vm8, %v6222_v12, %v6332_v0  ;;  %v6304_v12 = vperm.slane %v6238_v57, 0 }
0x3a6c   :  { %v6450_v37 = vpop.permute.xlu2 %6449  ;;  %v6334_v33 = vpop.permute.xlu1 %6333 }
0x3a6d   :  { %v6687_v44 = vsel %vm3631_vm9, %v6651_v60, %v6450_v37  ;;  %v6647_v55 = vsel %vm3628_vm8, %v6223_v1, %v6334_v33 }
0x3a70   :  { %6361 = vrot.lane.b32.xlu0 %v6301_v29, %s7863_s9 }
0x3a72   :  { %v6338_v14 = vpop.permute.xlu0 %6337  ;;  %6365 = vrot.lane.b32.xlu2 %v6303_v31, %s7863_s9  ;;  %6363 = vrot.lane.b32.xlu1 %v11741_v47, %s7863_s9 }
0x3a73   :  { %v6649_v9 = vsel %vm3628_vm8, %v6225_v25, %v6338_v14 }
0x3a74   :  { %v6552_v22 = vpop.permute.xlu2 %6551  ;;  %v6340_v54 = vpop.permute.xlu1 %6339 }
0x3a75   :  { %v11749_v50 = vsel %vm3634_vm7, %v6684_v53, %v6552_v22  ;;  %v6650_v41 = vsel %vm3628_vm8, %v6226_v34, %v6340_v54  ;;  %v6241_v34 = vrot.slane %v11724_v24, 6  ;;  %v11823_v54 = vpop.f32.mrf.mxu2 }
0x3a77   :  { %v6307_v0 = vperm.slane %v6241_v34, 0 }
0x3a78   :  { %6469 = vrot.lane.b32.xlu0 %v6301_v29, %s7830_s27 }
0x3a7a   :  { %v6344_v43 = vpop.permute.xlu0 %6343  ;;  %6371 = vrot.lane.b32.xlu2 %v6306_v32, %s7863_s9  ;;  %6369 = vrot.lane.b32.xlu1 %v11756_v45, %s7863_s9 }
0x3a7b   :  { %v6652_v25 = vsel %vm3628_vm8, %v6228_v11, %v6344_v43 }
0x3a7c   :  { %v6558_v16 = vpop.permute.xlu2 %6557  ;;  %v6442_v4 = vpop.permute.xlu1 %6441 }
0x3a7d   :  { %v11766_v28 = vsel %vm3634_vm7, %v6687_v44, %v6558_v16  ;;  %v6683_v38 = vsel %vm3631_vm9, %v6647_v55, %v6442_v4  ;;  %v6309_v55 = vperm.slane %v11823_v54, 0 }
0x3a80   :  { %6577 = vrot.lane.b32.xlu0 %v6301_v29, %s7865_s12 }
0x3a82   :  { %v6440_v1 = vpop.permute.xlu0 %6439  ;;  %6473 = vrot.lane.b32.xlu2 %v6303_v31, %s7830_s27  ;;  %6375 = vrot.lane.b32.xlu1 %v11772_v36, %s7863_s9 }
0x3a83   :  { %v6682_v18 = vsel %vm3631_vm9, %v6646_v59, %v6440_v1 }
0x3a84   :  { %v6348_v23 = vpop.permute.xlu2 %6347  ;;  %v6448_v10 = vpop.permute.xlu1 %6447 }
0x3a85   :  { %v6686_v48 = vsel %vm3631_vm9, %v6650_v41, %v6448_v10  ;;  %v6654_v11 = vsel %vm3628_vm8, %v6229_v26, %v6348_v23 }
0x3a88   :  { %6367 = vrot.lane.b32.xlu0 %v6304_v12, %s7863_s9 }
0x3a8a   :  { %v6446_v49 = vpop.permute.xlu0 %6445  ;;  %6479 = vrot.lane.b32.xlu2 %v6306_v32, %s7830_s27  ;;  %6471 = vrot.lane.b32.xlu1 %v11741_v47, %s7830_s27 }
0x3a8b   :  { %v6685_v39 = vsel %vm3631_vm9, %v6649_v9, %v6446_v49  ;;  %v12353_v49 = vrot.slane %v11823_v54, 2 }
0x3a8c   :  { %v6354_v20 = vpop.permute.xlu2 %6353  ;;  %v6550_v3 = vpop.permute.xlu1 %6549 }
0x3a8d   :  { %v11798_v53 = vsel %vm3634_vm7, %v6683_v38, %v6550_v3  ;;  %v6657_v26 = vsel %vm3628_vm8, %v6232_v2, %v6354_v20 }
0x3a90   :  { %6373 = vrot.lane.b32.xlu0 %v6307_v0, %s7863_s9 }
0x3a92   :  { %v6452_v60 = vpop.permute.xlu0 %6451  ;;  %6581 = vrot.lane.b32.xlu2 %v6303_v31, %s7865_s12  ;;  %6477 = vrot.lane.b32.xlu1 %v11756_v45, %s7830_s27 }
0x3a93   :  { %v6688_v37 = vsel %vm3631_vm9, %v6652_v25, %v6452_v60  ;;  %v6311_v25 = vperm.slane %v12353_v49, 0 }
0x3a94   :  { %v6360_v33 = vpop.permute.xlu2 %6359  ;;  %v6556_v44 = vpop.permute.xlu1 %6555 }
0x3a95   :  { %v11811_v29 = vsel %vm3634_vm7, %v6686_v48, %v6556_v44  ;;  %v6660_v2 = vsel %vm3628_vm8, %v6235_v15, %v6360_v33  ;;  %v12355_v15 = vrot.slane %v11823_v54, 3 }
0x3a98   :  { %6475 = vrot.lane.b32.xlu0 %v6304_v12, %s7830_s27 }
0x3a9a   :  { %v6548_v14 = vpop.permute.xlu0 %6547  ;;  %6587 = vrot.lane.b32.xlu2 %v6306_v32, %s7865_s12  ;;  %6483 = vrot.lane.b32.xlu1 %v11772_v36, %s7830_s27 }
0x3a9b   :  { %v11818_v19 = vsel %vm3634_vm7, %v6682_v18, %v6548_v14 }
0x3a9c   :  { %v6456_v31 = vpop.permute.xlu2 %6455  ;;  %v6346_v22 = vpop.permute.xlu1 %6345 }
0x3a9d   :  { %v6690_v43 = vsel %vm3631_vm9, %v6654_v11, %v6456_v31  ;;  %v6653_v4 = vsel %vm3628_vm8, %v11593_v56, %v6346_v22 }
0x3aa0   :  { %6481 = vrot.lane.b32.xlu0 %v6307_v0, %s7830_s27 }
0x3aa2   :  { %v6554_v32 = vpop.permute.xlu0 %6553  ;;  %6579 = vrot.lane.b32.xlu1 %v11741_v47, %s7865_s12  ;;  %6377 = vrot.lane.b32.xlu2 %v6309_v55, %s7863_s9 }
0x3aa3   :  { %v11832_v16 = vsel %vm3634_vm7, %v6685_v39, %v6554_v32 }
0x3aa4   :  { %v6462_v38 = vpop.permute.xlu2 %6461  ;;  %v6454_v59 = vpop.permute.xlu1 %6453 }
0x3aa5   :  { %v6693_v1 = vsel %vm3631_vm9, %v6657_v26, %v6462_v38  ;;  %v6689_v18 = vsel %vm3631_vm9, %v6653_v4, %v6454_v59 }
0x3aa8   :  { %6583 = vrot.lane.b32.xlu0 %v6304_v12, %s7865_s12 }
0x3aaa   :  { %v6560_v47 = vpop.permute.xlu0 %6559  ;;  %6585 = vrot.lane.b32.xlu1 %v11756_v45, %s7865_s12  ;;  %6485 = vrot.lane.b32.xlu2 %v6309_v55, %s7830_s27  ;;  %v12354_v45 = vrot.slane %v11823_v54, 1 }
0x3aab   :  { %v11846_v41 = vsel %vm3634_vm7, %v6688_v37, %v6560_v47 }
0x3aac   :  { %v6468_v23 = vpop.permute.xlu2 %6467  ;;  %v6562_v10 = vpop.permute.xlu1 %6561 }
0x3aad   :  { %v6696_v48 = vsel %vm3631_vm9, %v6660_v2, %v6468_v23  ;;  %v11853_v9 = vsel %vm3634_vm7, %v6689_v18, %v6562_v10 }
0x3ab0   :  { %6589 = vrot.lane.b32.xlu0 %v6307_v0, %s7865_s12  ;;  %v6310_v0 = vperm.slane %v12354_v45, 0 }
0x3ab2   :  { %v6350_v12 = vpop.permute.xlu0 %6349  ;;  %6591 = vrot.lane.b32.xlu1 %v11772_v36, %s7865_s12  ;;  %6593 = vrot.lane.b32.xlu2 %v6309_v55, %s7865_s12  ;;  %v6312_v36 = vperm.slane %v12355_v15, 0 }
0x3ab4   :  { %v6564_v39 = vpop.permute.xlu2 %6563  ;;  %v11862_v20 = vpop.permute.xlu1 %6351 }
0x3ab5   :  { %v11865_v3 = vsel %vm3634_vm7, %v6690_v43, %v6564_v39 }
0x3ab8   :  { %6379 = vrot.lane.b32.xlu0 %v6310_v0, %s7863_s9 }
0x3aba   :  { %v11874_v60 = vpop.permute.xlu0 %6355  ;;  %6383 = vrot.lane.b32.xlu2 %v6312_v36, %s7863_s9  ;;  %6381 = vrot.lane.b32.xlu1 %v6311_v25, %s7863_s9 }
0x3abc   :  { %v6570_v37 = vpop.permute.xlu2 %6569  ;;  %v11878_v33 = vpop.permute.xlu1 %6357 }
0x3abd   :  { %v11881_v44 = vsel %vm3634_vm7, %v6693_v1, %v6570_v37 }
0x3ac0   :  { %6487 = vrot.lane.b32.xlu0 %v6310_v0, %s7830_s27 }
0x3ac2   :  { %v6458_v14 = vpop.permute.xlu0 %6457  ;;  %6491 = vrot.lane.b32.xlu2 %v6312_v36, %s7830_s27  ;;  %6489 = vrot.lane.b32.xlu1 %v6311_v25, %s7830_s27  ;;  %s7866_s27 = smov 35  }
0x3ac3   :  { %s12099_s14 = sld [smem:[%s12206_s0 + %s7866_s27]]  }
0x3ac4   :  { %v6576_v11 = vpop.permute.xlu2 %6575  ;;  %v6460_v31 = vpop.permute.xlu1 %6459 }
0x3ac5   :  { %v11887_v22 = vsel %vm3634_vm7, %v6696_v48, %v6576_v11 }
0x3ac8   :  { %6595 = vrot.lane.b32.xlu0 %v6310_v0, %s7865_s12 }
0x3aca   :  { %v6464_v43 = vpop.permute.xlu0 %6463  ;;  %6599 = vrot.lane.b32.xlu2 %v6312_v36, %s7865_s12  ;;  %6597 = vrot.lane.b32.xlu1 %v6311_v25, %s7865_s12  ;;  %v6655_v25 = vsel %vm3628_vm8, %v6230_v7, %v6350_v12  ;;  %v6656_v7 = vsel %vm3628_vm8, %v6231_v42, %v11862_v20  ;;  %v6658_v42 = vsel %vm3628_vm8, %v6233_v30, %v11874_v60 }
0x3acb   :  { %v6691_v37 = vsel %vm3631_vm9, %v6655_v25, %v6458_v14  ;;  %v6692_v12 = vsel %vm3631_vm9, %v6656_v7, %v6460_v31  ;;  %v6694_v20 = vsel %vm3631_vm9, %v6658_v42, %v6464_v43  ;;  %v6659_v31 = vsel %vm3628_vm8, %v6234_v51, %v11878_v33 }
0x3acc   :  { %v11892_v55 = vpop.permute.xlu2 %6365  ;;  %v6466_v32 = vpop.permute.xlu1 %6465 }
0x3acd   :  { %v6695_v7 = vsel %vm3631_vm9, %v6659_v31, %v6466_v32  ;;  %v6663_v33 = vsel %vm3628_vm8, %v6237_v62, %v11892_v55 }
0x3ad0   :  { %6781 = vrot.lane.b32.xlu0 %v11630_v17, %s7841_s11 }
0x3ad2   :  { %v6566_v26 = vpop.permute.xlu0 %6565  ;;  %6785 = vrot.lane.b32.xlu2 %v11613_v5, %s7841_s11  ;;  %6783 = vrot.lane.b32.xlu1 %v11697_v63, %s7841_s11 }
0x3ad3   :  { %v11935_v11 = vsel %vm3634_vm7, %v6691_v37, %v6566_v26 }
0x3ad4   :  { %v11900_v4 = vpop.permute.xlu2 %6371  ;;  %v6568_v38 = vpop.permute.xlu1 %6567 }
0x3ad5   :  { %v11947_v14 = vsel %vm3634_vm7, %v6692_v12, %v6568_v38 }
0x3ad8   :  { %6787 = vrot.lane.b32.xlu0 %v11704_v6, %s7841_s11 }
0x3ada   :  { %v6572_v59 = vpop.permute.xlu0 %6571  ;;  %6791 = vrot.lane.b32.xlu2 %v11636_v40, %s7841_s11  ;;  %6789 = vrot.lane.b32.xlu1 %v11707_v46, %s7841_s11 }
0x3adb   :  { %v11965_v38 = vsel %vm3634_vm7, %v6694_v20, %v6572_v59 }
0x3adc   :  { %v6474_v17 = vpop.permute.xlu2 %6473  ;;  %v6574_v1 = vpop.permute.xlu1 %6573 }
0x3add   :  { %v11971_v12 = vsel %vm3634_vm7, %v6695_v7, %v6574_v1  ;;  %v6699_v32 = vsel %vm3631_vm9, %v6663_v33, %v6474_v17  ;;  %v12579_v7 = vrot.slane %v11724_v24, 7 }
0x3ae0   :  { %6793 = vrot.lane.b32.xlu0 %v11714_v21, %s7841_s11 }
0x3ae2   :  { %v6362_v18 = vpop.permute.xlu0 %6361  ;;  %6797 = vrot.lane.b32.xlu2 %v11685_v52, %s7841_s11  ;;  %6795 = vrot.lane.b32.xlu1 %v11721_v13, %s7841_s11 }
0x3ae3   :  { %v6661_v51 = vsel %vm3628_vm8, %v11724_v24, %v6362_v18  ;;  %v12580_v24 = vrot.slane %v11823_v54, 3 }
0x3ae4   :  { %v6480_v47 = vpop.permute.xlu2 %6479  ;;  %v6364_v2 = vpop.permute.xlu1 %6363 }
0x3ae5   :  { %v6662_v18 = vsel %vm3628_vm8, %v6236_v61, %v6364_v2 }
0x3ae8   :  { %6799 = vrot.lane.b32.xlu0 %v11818_v19, %s7841_s11 }
0x3aea   :  { %v6470_v23 = vpop.permute.xlu0 %6469  ;;  %6803 = vrot.lane.b32.xlu2 %v11749_v50, %s7841_s11  ;;  %6801 = vrot.lane.b32.xlu1 %v11798_v53, %s7841_s11 }
0x3aeb   :  { %v6697_v60 = vsel %vm3631_vm9, %v6661_v51, %v6470_v23 }
0x3aec   :  { %v6582_v10 = vpop.permute.xlu2 %6581  ;;  %v6370_v48 = vpop.permute.xlu1 %6369 }
0x3aed   :  { %v11991_v59 = vsel %vm3634_vm7, %v6699_v32, %v6582_v10  ;;  %v6666_v10 = vsel %vm3628_vm8, %v6240_v27, %v11900_v4  ;;  %v6665_v20 = vsel %vm3628_vm8, %v6239_v58, %v6370_v48  ;;  %v12069_v32 = vrot.slane %v11617_v35, 4 }
0x3af0   :  { %6805 = vrot.lane.b32.xlu0 %v11832_v16, %s7841_s11 }
0x3af2   :  { %v6578_v39 = vpop.permute.xlu0 %6577  ;;  %6809 = vrot.lane.b32.xlu2 %v11766_v28, %s7841_s11  ;;  %6807 = vrot.lane.b32.xlu1 %v11811_v29, %s7841_s11 }
0x3af3   :  { %v11985_v43 = vsel %vm3634_vm7, %v6697_v60, %v6578_v39  ;;  %v6702_v39 = vsel %vm3631_vm9, %v6666_v10, %v6480_v47 }
0x3af4   :  { %v6588_v0 = vpop.permute.xlu2 %6587  ;;  %v11926_v36 = vpop.permute.xlu1 %6375 }
0x3af5   :  { %v12010_v42 = vsel %vm3634_vm7, %v6702_v39, %v6588_v0 }
0x3af8   :  { %6811 = vrot.lane.b32.xlu0 %v11846_v41, %s7841_s11 }
0x3afa   :  { %v6368_v49 = vpop.permute.xlu0 %6367  ;;  %6817 = vrot.lane.b32.xlu2 %v11935_v11, %s7841_s11  ;;  %6813 = vrot.lane.b32.xlu1 %v11853_v9, %s7841_s11 }
0x3afb   :  { %v6664_v61 = vsel %vm3628_vm8, %v6238_v57, %v6368_v49 }
0x3afc   :  { %v6378_v45 = vpop.permute.xlu2 %6377  ;;  %v6472_v15 = vpop.permute.xlu1 %6471 }
0x3afd   :  { %v6698_v62 = vsel %vm3631_vm9, %v6662_v18, %v6472_v15  ;;  %v6669_v49 = vsel %vm3628_vm8, %v11823_v54, %v6378_v45  ;;  %v6668_v45 = vsel %vm3628_vm8, %v12579_v7, %v11926_v36 }
0x3b00   :  { %6819 = vrot.lane.b32.xlu0 %v11947_v14, %s7841_s11 }
0x3b02   :  { %v6374_v26 = vpop.permute.xlu0 %6373  ;;  %6815 = vrot.lane.b32.xlu2 %v11865_v3, %s7841_s11  ;;  %6821 = vrot.lane.b32.xlu1 %v11881_v44, %s7841_s11 }
0x3b03   :  { %v6667_v48 = vsel %vm3628_vm8, %v6241_v34, %v6374_v26 }
0x3b04   :  { %v6486_v25 = vpop.permute.xlu2 %6485  ;;  %v6478_v37 = vpop.permute.xlu1 %6477 }
0x3b05   :  { %v6701_v4 = vsel %vm3631_vm9, %v6665_v20, %v6478_v37  ;;  %v6705_v58 = vsel %vm3631_vm9, %v6669_v49, %v6486_v25 }
0x3b08   :  { %6823 = vrot.lane.b32.xlu0 %v11965_v38, %s7841_s11 }
0x3b0a   :  { %v6476_v8 = vpop.permute.xlu0 %6475  ;;  %6827 = vrot.lane.b32.xlu2 %v11887_v22, %s7841_s11  ;;  %6825 = vrot.lane.b32.xlu1 %v11971_v12, %s7841_s11 }
0x3b0b   :  { %v6700_v15 = vsel %vm3631_vm9, %v6664_v61, %v6476_v8 }
0x3b0c   :  { %v6594_v56 = vpop.permute.xlu2 %6593  ;;  %v6484_v30 = vpop.permute.xlu1 %6483 }
0x3b0d   :  { %v12039_v0 = vsel %vm3634_vm7, %v6705_v58, %v6594_v56  ;;  %v6704_v51 = vsel %vm3631_vm9, %v6668_v45, %v6484_v30 }
0x3b10   :  { %6829 = vrot.lane.b32.xlu0 %v11985_v43, %s7841_s11 }
0x3b12   :  { %v6482_v1 = vpop.permute.xlu0 %6481  ;;  %6833 = vrot.lane.b32.xlu2 %v11991_v59, %s7841_s11 }
0x3b13   :  { %v6703_v37 = vsel %vm3631_vm9, %v6667_v48, %v6482_v1 }
0x3b14   :  { %v6384_v55 = vpop.permute.xlu2 %6383  ;;  %v6580_v23 = vpop.permute.xlu1 %6579 }
0x3b15   :  { %v12000_v17 = vsel %vm3634_vm7, %v6698_v62, %v6580_v23  ;;  %v6672_v36 = vsel %vm3628_vm8, %v12580_v24, %v6384_v55 }
0x3b16   :  { %6831 = vrot.lane.b32.xlu1 %v12000_v17, %s7841_s11 }
0x3b1a   :  { %v6584_v2 = vpop.permute.xlu0 %6583  ;;  %6839 = vrot.lane.b32.xlu2 %v12010_v42, %s7841_s11 }
0x3b1b   :  { %v12022_v27 = vsel %vm3634_vm7, %v6700_v15, %v6584_v2  ;;  %v12581_v2 = vrot.slane %v11823_v54, 1 }
0x3b1c   :  { %v6492_v47 = vpop.permute.xlu2 %6491  ;;  %6835 = vrot.lane.b32.xlu0 %v12022_v27, %s7841_s11  ;;  %v6586_v57 = vpop.permute.xlu1 %6585 }
0x3b1d   :  { %v12028_v8 = vsel %vm3634_vm7, %v6701_v4, %v6586_v57  ;;  %v6708_v60 = vsel %vm3631_vm9, %v6672_v36, %v6492_v47 }
0x3b1e   :  { %6837 = vrot.lane.b32.xlu1 %v12028_v8, %s7841_s11 }
0x3b22   :  { %v6590_v31 = vpop.permute.xlu0 %6589  ;;  %6845 = vrot.lane.b32.xlu2 %v12039_v0, %s7841_s11 }
0x3b23   :  { %v12049_v25 = vsel %vm3634_vm7, %v6703_v37, %v6590_v31 }
0x3b24   :  { %v6600_v34 = vpop.permute.xlu2 %6599  ;;  %6841 = vrot.lane.b32.xlu0 %v12049_v25, %s7841_s11  ;;  %v6592_v26 = vpop.permute.xlu1 %6591 }
0x3b25   :  { %v12055_v56 = vsel %vm3634_vm7, %v6704_v51, %v6592_v26  ;;  %v12064_v33 = vsel %vm3634_vm7, %v6708_v60, %v6600_v34 }
0x3b26   :  { %6843 = vrot.lane.b32.xlu1 %v12055_v56, %s7841_s11 }
0x3b2a   :  { %6851 = vrot.lane.b32.xlu2 %v12064_v33, %s7841_s11  ;;  %v6380_v30 = vpop.permute.xlu0 %6379 }
0x3b2b   :  { %v6670_v20 = vsel %vm3628_vm8, %v12581_v2, %v6380_v30 }
0x3b2c   :  { %v6786_v1 = vpop.permute.xlu2 %6785  ;;  %v6382_v18 = vpop.permute.xlu1 %6381 }
0x3b2d   :  { %v6892_v62 = vadd.f32 %v6786_v1, %v11704_v6  ;;  %v12582_v6 = vrot.slane %v11823_v54, 2 }
0x3b2f   :  { %v6935_v23 = vadd.f32 %v12069_v32, %v6892_v62  ;;  %v6671_v57 = vsel %vm3628_vm8, %v12582_v6, %v6382_v18  ;;  %vm12583_vm8 = vcmask 31744  }
0x3b31   :  { %7014 = vst [vmem:[#allocation1 + $0x11] ss:$2 sm:$0xff] %v6935_v23 }
0x3b32   :  { %v6488_v55 = vpop.permute.xlu0 %6487 }
0x3b33   :  { %v6706_v4 = vsel %vm3631_vm9, %v6670_v20, %v6488_v55 }
0x3b34   :  { %v6792_v10 = vpop.permute.xlu2 %6791  ;;  %v6490_v39 = vpop.permute.xlu1 %6489 }
0x3b35   :  { %v6895_v61 = vadd.f32 %v6792_v10, %v11714_v21  ;;  %v6707_v58 = vsel %vm3631_vm9, %v6671_v57, %v6490_v39  ;;  %vm12584_vm9 = vmmov %vm12583_vm8 }
0x3b37   :  { %v6938_v15 = vadd.f32 %v11617_v35, %v6895_v61 }
0x3b39   :  { %7020 = vst [vmem:[#allocation1 + $0x30] ss:$2 sm:$0xff] %v6938_v15 }
0x3b3a   :  { %v6596_v47 = vpop.permute.xlu0 %6595 }
0x3b3b   :  { %v12083_v49 = vsel %vm3634_vm7, %v6706_v4, %v6596_v47 }
0x3b3c   :  { %v6798_v21 = vpop.permute.xlu2 %6797  ;;  %6847 = vrot.lane.b32.xlu0 %v12083_v49, %s7841_s11  ;;  %v6598_v48 = vpop.permute.xlu1 %6597 }
0x3b3d   :  { %v12089_v37 = vsel %vm3634_vm7, %v6707_v58, %v6598_v48  ;;  %vm12585_vm7 = vmmov %vm12583_vm8 }
0x3b3e   :  { %6849 = vrot.lane.b32.xlu1 %v12089_v37, %s7841_s11  ;;  %vm12586_vm6 = vmmov %vm12585_vm7 }
0x3b3f   :  { %vm12587_vm14 = vmmov %vm12586_vm6 }
0x3b40   :  { %vm12588_vm0 = vmmov %vm12586_vm6 }
0x3b41   :  { %vm12589_vm12 = vmmov %vm12588_vm0 }
0x3b42   :  { %v6782_v31 = vpop.permute.xlu0 %6781  ;;  %vm12590_vm15 = vmmov %vm12588_vm0 }
0x3b43   :  { %v6890_v54 = vadd.f32 %v6782_v31, %v11697_v63  ;;  %v6898_v63 = vadd.f32 %v6798_v21, %v11818_v19  ;;  %vm12591_vm5 = vmmov %vm12588_vm0 }
0x3b44   :  { %v6804_v7 = vpop.permute.xlu2 %6803  ;;  %v6784_v45 = vpop.permute.xlu1 %6783  ;;  %vm12592_vm10 = vmmov %vm12588_vm0 }
0x3b45   :  { %v6933_v51 = vadd.f32 %v12069_v32, %v6890_v54  ;;  %v6891_v34 = vadd.f32 %v6784_v45, %v11613_v5  ;;  %v6941_v1 = vadd.f32 %v12069_v32, %v6898_v63  ;;  %v6901_v15 = vadd.f32 %v6804_v7, %v11832_v16  ;;  %vm12593_vm11 = vmmov %vm12588_vm0 }
0x3b46   :  { %vm12594_vm1 = vmmov %vm12588_vm0 }
0x3b47   :  { %7010 = vst [vmem:[#allocation1 + $0x1] ss:$2 sm:$0xff] %v6933_v51  ;;  %v6934_v26 = vadd.f32 %v11617_v35, %v6891_v34  ;;  %v6944_v4 = vadd.f32 %v11617_v35, %v6901_v15  ;;  %vm12595_vm13 = vmmov %vm12588_vm0 }
0x3b48   :  { %vm12596_vm2 = vmmov %vm12588_vm0 }
0x3b49   :  { %7012 = vst [vmem:[#allocation1 + $0x10] ss:$2 sm:$0xff] %v6934_v26  ;;  %vm12597_vm4 = vmmov %vm12588_vm0 }
0x3b4a   :  { %v6788_v24 = vpop.permute.xlu0 %6787 }
0x3b4b   :  { %v6893_v36 = vadd.f32 %v6788_v24, %v11707_v46 }
0x3b4c   :  { %v6810_v60 = vpop.permute.xlu2 %6809  ;;  %v6790_v30 = vpop.permute.xlu1 %6789 }
0x3b4d   :  { %v6894_v5 = vadd.f32 %v6790_v30, %v11636_v40  ;;  %v6936_v62 = vadd.f32 %v11617_v35, %v6893_v36  ;;  %v6904_v20 = vadd.f32 %v6810_v60, %v11846_v41 }
0x3b4e   :  { %v7023_v18 = vld.sshfl [vmem:[#allocation1] sm:$0xff pattern:$0x75316420] }
0x3b4f   :  { %7093 = vst.msk [vmem:[%s12099_s14] sm:$0xff] %vm12583_vm8, %v7023_v18  ;;  %v6937_v23 = vadd.f32 %v12069_v32, %v6894_v5  ;;  %v6947_v16 = vadd.f32 %v12069_v32, %v6904_v20  ;;  %vm12598_vm8 = vmmov %vm12588_vm0 }
0x3b50   :  { %7028 = vst [vmem:[#allocation1 + $0x1] ss:$2 sm:$0xff] %v6941_v1  ;;  %v7024_v55 = vld.sshfl [vmem:[#allocation1 + $0x10] sm:$0xff pattern:$0x75316420] }
0x3b51   :  { %7094 = vst.msk [vmem:[%s12099_s14 + $0x8] sm:$0xff] %vm12584_vm9, %v7024_v55  ;;  %vm12599_vm9 = vmmov %vm12588_vm0 }
0x3b52   :  { %7016 = vst [vmem:[#allocation1 + $0x20] ss:$2 sm:$0xff] %v6936_v62  ;;  %v6794_v46 = vpop.permute.xlu0 %6793 }
0x3b53   :  { %7018 = vst [vmem:[#allocation1 + $0x21] ss:$2 sm:$0xff] %v6937_v23  ;;  %v6896_v19 = vadd.f32 %v6794_v46, %v11721_v13 }
0x3b54   :  { %v6818_v40 = vpop.permute.xlu2 %6817  ;;  %v6796_v10 = vpop.permute.xlu1 %6795 }
0x3b55   :  { %v6939_v39 = vadd.f32 %v12069_v32, %v6896_v19  ;;  %v6897_v61 = vadd.f32 %v6796_v10, %v11685_v52  ;;  %v6909_v63 = vadd.f32 %v6818_v40, %v11947_v14 }
0x3b57   :  { %7022 = vst [vmem:[#allocation1 + $0x31] ss:$2 sm:$0xff] %v6939_v39  ;;  %v6940_v2 = vadd.f32 %v11617_v35, %v6897_v61  ;;  %v6952_v5 = vadd.f32 %v12069_v32, %v6909_v63 }
0x3b59   :  { %7027 = vst [vmem:[#allocation1] ss:$2 sm:$0xff] %v6940_v2 }
0x3b5a   :  { %v7025_v47 = vld.sshfl [vmem:[#allocation1 + $0x20] sm:$0xff pattern:$0x75316420]  ;;  %v6800_v13 = vpop.permute.xlu0 %6799 }
0x3b5b   :  { %7095 = vst.msk [vmem:[%s12099_s14 + $0x10] sm:$0xff] %vm12585_vm7, %v7025_v47  ;;  %v6899_v6 = vadd.f32 %v6800_v13, %v11798_v53  ;;  %vm12600_vm7 = vmmov %vm12588_vm0 }
0x3b5c   :  { %7031 = vst [vmem:[#allocation1 + $0x20] ss:$2 sm:$0xff] %v6944_v4  ;;  %v6816_v52 = vpop.permute.xlu2 %6815  ;;  %v6802_v57 = vpop.permute.xlu1 %6801 }
0x3b5d   :  { %v6900_v58 = vadd.f32 %v6802_v57, %v11749_v50  ;;  %v6942_v41 = vadd.f32 %v11617_v35, %v6899_v6  ;;  %v6950_v26 = vadd.f32 %v11617_v35, %v6816_v52 }
0x3b5e   :  { %v7026_v21 = vld.sshfl [vmem:[#allocation1 + $0x30] sm:$0xff pattern:$0x75316420] }
0x3b5f   :  { %7034 = vst [vmem:[#allocation1 + $0x31] ss:$2 sm:$0xff] %v6947_v16  ;;  %v6943_v48 = vadd.f32 %v12069_v32, %v6900_v58 }
0x3b60   :  { %7096 = vst.msk [vmem:[%s12099_s14 + $0x18] sm:$0xff] %vm12586_vm6, %v7026_v21  ;;  %v7035_v31 = vld.sshfl [vmem:[#allocation1] sm:$0xff pattern:$0x75316420] }
0x3b61   :  { %7097 = vst.msk [vmem:[%s12099_s14 + $0x20] sm:$0xff] %vm12587_vm14, %v7035_v31 }
0x3b62   :  { %7029 = vst [vmem:[#allocation1 + $0x10] ss:$2 sm:$0xff] %v6942_v41  ;;  %v6806_v53 = vpop.permute.xlu0 %6805 }
0x3b63   :  { %7030 = vst [vmem:[#allocation1 + $0x11] ss:$2 sm:$0xff] %v6943_v48  ;;  %v6902_v54 = vadd.f32 %v6806_v53, %v11811_v29 }
0x3b64   :  { %v6808_v7 = vpop.permute.xlu1 %6807  ;;  %v6828_v51 = vpop.permute.xlu2 %6827 }
0x3b65   :  { %v6945_v50 = vadd.f32 %v12069_v32, %v6902_v54  ;;  %v6903_v45 = vadd.f32 %v6808_v7, %v11766_v28  ;;  %v6951_v28 = vadd.f32 %v11617_v35, %v11935_v11  ;;  %v6914_v14 = vadd.f32 %v6828_v51, %v11985_v43 }
0x3b67   :  { %7032 = vst [vmem:[#allocation1 + $0x21] ss:$2 sm:$0xff] %v6945_v50  ;;  %v6946_v34 = vadd.f32 %v11617_v35, %v6903_v45  ;;  %v6957_v55 = vadd.f32 %v11617_v35, %v6914_v14 }
0x3b69   :  { %7033 = vst [vmem:[#allocation1 + $0x30] ss:$2 sm:$0xff] %v6946_v34 }
0x3b6a   :  { %v6812_v24 = vpop.permute.xlu0 %6811  ;;  %v7036_v36 = vld.sshfl [vmem:[#allocation1 + $0x10] sm:$0xff pattern:$0x75316420] }
0x3b6b   :  { %v6905_v60 = vadd.f32 %v6812_v24, %v11853_v9  ;;  %7041 = vst [vmem:[#allocation1 + $0x10] ss:$2 sm:$0xff] %v6950_v26 }
0x3b6c   :  { %v6814_v29 = vpop.permute.xlu1 %6813  ;;  %7098 = vst.msk [vmem:[%s12099_s14 + $0x28] sm:$0xff] %vm12588_vm0, %v7036_v36  ;;  %v6834_v62 = vpop.permute.xlu2 %6833 }
0x3b6d   :  { %v6906_v30 = vadd.f32 %v6814_v29, %v11865_v3  ;;  %v6948_v18 = vadd.f32 %v11617_v35, %v6905_v60  ;;  %v6917_v43 = vadd.f32 %v6834_v62, %v12022_v27 }
0x3b6e   :  { %v7037_v1 = vld.sshfl [vmem:[#allocation1 + $0x20] sm:$0xff pattern:$0x75316420] }
0x3b6f   :  { %7044 = vst [vmem:[#allocation1 + $0x20] ss:$2 sm:$0xff] %v6951_v28  ;;  %v6949_v23 = vadd.f32 %v12069_v32, %v6906_v30  ;;  %v6960_v61 = vadd.f32 %v12069_v32, %v6917_v43 }
0x3b70   :  { %7045 = vst [vmem:[#allocation1 + $0x21] ss:$2 sm:$0xff] %v6952_v5  ;;  %v7038_v9 = vld.sshfl [vmem:[#allocation1 + $0x30] sm:$0xff pattern:$0x75316420] }
0x3b71   :  { %7099 = vst.msk [vmem:[%s12099_s14 + $0x30] sm:$0xff] %vm12589_vm12, %v7037_v1 }
0x3b72   :  { %7100 = vst.msk [vmem:[%s12099_s14 + $0x38] sm:$0xff] %vm12590_vm15, %v7038_v9  ;;  %v6820_v11 = vpop.permute.xlu0 %6819  ;;  %v7043_v3 = vld.sshfl [vmem:[#allocation1 + $0x10] sm:$0xff pattern:$0x75316420] }
0x3b73   :  { %7039 = vst [vmem:[#allocation1] ss:$2 sm:$0xff] %v6948_v18  ;;  %v6910_v46 = vadd.f32 %v6820_v11, %v11881_v44 }
0x3b74   :  { %7040 = vst [vmem:[#allocation1 + $0x1] ss:$2 sm:$0xff] %v6949_v23  ;;  %v6822_v19 = vpop.permute.xlu1 %6821 }
0x3b75   :  { %v6953_v40 = vadd.f32 %v11617_v35, %v6910_v46  ;;  %v6911_v10 = vadd.f32 %v6822_v19, %v11965_v38  ;;  %7052 = vst [vmem:[#allocation1 + $0x10] ss:$2 sm:$0xff] %v6957_v55  ;;  %v6840_v38 = vpop.permute.xlu2 %6839 }
0x3b76   :  { %7103 = vst.msk [vmem:[%s12099_s14 + $0x48] sm:$0xf] %vm7102_vm3, %v7043_v3 }
0x3b77   :  { %v7048_v39 = vld.sshfl [vmem:[#allocation1 + $0x20] sm:$0xff pattern:$0x75316420]  ;;  %7046 = vst [vmem:[#allocation1 + $0x30] ss:$2 sm:$0xff] %v6953_v40  ;;  %v6954_v15 = vadd.f32 %v12069_v32, %v6911_v10 }
0x3b78   :  { %7104 = vst.msk [vmem:[%s12099_s14 + $0x50] sm:$0xff] %vm12591_vm5, %v7048_v39 }
0x3b79   :  { %7055 = vst [vmem:[#allocation1 + $0x21] ss:$2 sm:$0xff] %v6960_v61 }
0x3b7a   :  { %7047 = vst [vmem:[#allocation1 + $0x31] ss:$2 sm:$0xff] %v6954_v15  ;;  %v6824_v44 = vpop.permute.xlu0 %6823 }
0x3b7b   :  { %v7042_v27 = vld.sshfl [vmem:[#allocation1] sm:$0xff pattern:$0x75316420]  ;;  %v6912_v2 = vadd.f32 %v6824_v44, %v11971_v12  ;;  %v6920_v12 = vadd.f32 %v6840_v38, %v12049_v25 }
0x3b7c   :  { %7101 = vst.msk [vmem:[%s12099_s14 + $0x40] sm:$0xff] %vm12592_vm10, %v7042_v27  ;;  %v6826_v20 = vpop.permute.xlu1 %6825 }
0x3b7d   :  { %v6955_v4 = vadd.f32 %v11617_v35, %v6912_v2  ;;  %v6913_v47 = vadd.f32 %v6826_v20, %v11887_v22  ;;  %v6846_v58 = vpop.permute.xlu2 %6845  ;;  %v6963_v22 = vadd.f32 %v11617_v35, %v6920_v12 }
0x3b7e   :  { %v6923_v48 = vadd.f32 %v6846_v58, %v12083_v49 }
0x3b7f   :  { %7050 = vst [vmem:[#allocation1] ss:$2 sm:$0xff] %v6955_v4  ;;  %v6956_v13 = vadd.f32 %v12069_v32, %v6913_v47 }
0x3b80   :  { %v6966_v25 = vadd.f32 %v12069_v32, %v6923_v48 }
0x3b81   :  { %v7049_v6 = vld.sshfl [vmem:[#allocation1 + $0x30] sm:$0xff pattern:$0x75316420]  ;;  %7051 = vst [vmem:[#allocation1 + $0x1] ss:$2 sm:$0xff] %v6956_v13 }
0x3b82   :  { %7105 = vst.msk [vmem:[%s12099_s14 + $0x58] sm:$0xff] %vm12593_vm11, %v7049_v6  ;;  %v6830_v52 = vpop.permute.xlu0 %6829 }
0x3b83   :  { %v6915_v57 = vadd.f32 %v6830_v52, %v12000_v17 }
0x3b85   :  { %v6958_v16 = vadd.f32 %v12069_v32, %v6915_v57  ;;  %v6852_v63 = vpop.permute.xlu2 %6851 }
0x3b86   :  { %v6969_v60 = vadd.f32 %v11617_v35, %v6852_v63 }
0x3b87   :  { %7053 = vst [vmem:[#allocation1 + $0x11] ss:$2 sm:$0xff] %v6958_v16 }
0x3b88   :  { %v7058_v21 = vld.sshfl [vmem:[#allocation1] sm:$0xff pattern:$0x75316420]  ;;  %v6832_v41 = vpop.permute.xlu1 %6831 }
0x3b89   :  { %7106 = vst.msk [vmem:[%s12099_s14 + $0x60] sm:$0xff] %vm12594_vm1, %v7058_v21  ;;  %v6916_v31 = vadd.f32 %v6832_v41, %v11991_v59 }
0x3b8a   :  { %7062 = vst [vmem:[#allocation1] ss:$2 sm:$0xff] %v6963_v22 }
0x3b8b   :  { %v6959_v17 = vadd.f32 %v11617_v35, %v6916_v31 }
0x3b8d   :  { %7054 = vst [vmem:[#allocation1 + $0x20] ss:$2 sm:$0xff] %v6959_v17 }
0x3b8e   :  { %v6836_v53 = vpop.permute.xlu0 %6835  ;;  %v7059_v54 = vld.sshfl [vmem:[#allocation1 + $0x10] sm:$0xff pattern:$0x75316420] }
0x3b8f   :  { %v6918_v7 = vadd.f32 %v6836_v53, %v12028_v8  ;;  %7065 = vst [vmem:[#allocation1 + $0x11] ss:$2 sm:$0xff] %v6966_v25 }
0x3b90   :  { %7107 = vst.msk [vmem:[%s12099_s14 + $0x68] sm:$0xff] %vm12595_vm13, %v7059_v54  ;;  %v6838_v50 = vpop.permute.xlu1 %6837 }
0x3b91   :  { %v6961_v49 = vadd.f32 %v11617_v35, %v6918_v7  ;;  %v6919_v45 = vadd.f32 %v6838_v50, %v12010_v42 }
0x3b93   :  { %7056 = vst [vmem:[#allocation1 + $0x30] ss:$2 sm:$0xff] %v6961_v49  ;;  %v6962_v59 = vadd.f32 %v12069_v32, %v6919_v45 }
0x3b94   :  { %v7060_v51 = vld.sshfl [vmem:[#allocation1 + $0x20] sm:$0xff pattern:$0x75316420] }
0x3b95   :  { %7108 = vst.msk [vmem:[%s12099_s14 + $0x70] sm:$0xff] %vm12596_vm2, %v7060_v51 }
0x3b96   :  { %7057 = vst [vmem:[#allocation1 + $0x31] ss:$2 sm:$0xff] %v6962_v59  ;;  %v6842_v34 = vpop.permute.xlu0 %6841 }
0x3b97   :  { %v6921_v8 = vadd.f32 %v6842_v34, %v12055_v56 }
0x3b98   :  { %v6844_v26 = vpop.permute.xlu1 %6843 }
0x3b99   :  { %v6964_v24 = vadd.f32 %v12069_v32, %v6921_v8  ;;  %v6922_v42 = vadd.f32 %v6844_v26, %v12039_v0 }
0x3b9b   :  { %7063 = vst [vmem:[#allocation1 + $0x1] ss:$2 sm:$0xff] %v6964_v24  ;;  %v6965_v36 = vadd.f32 %v11617_v35, %v6922_v42  ;;  %v7820_v35 = vld [vmem:[%s11506_s5] ss:$0 sm:$0xff] }
0x3b9d   :  { %v7061_v29 = vld.sshfl [vmem:[#allocation1 + $0x30] sm:$0xff pattern:$0x75316420]  ;;  %7064 = vst [vmem:[#allocation1 + $0x10] ss:$2 sm:$0xff] %v6965_v36 }
0x3b9e   :  { %7068 = vst [vmem:[#allocation1 + $0x30] ss:$2 sm:$0xff] %v6969_v60 }
0x3b9f   :  { %7109 = vst.msk [vmem:[%s12099_s14 + $0x78] sm:$0xff] %vm12597_vm4, %v7061_v29 }
0x3ba2   :  { %v7069_v56 = vld.sshfl [vmem:[#allocation1] sm:$0xff pattern:$0x75316420] }
0x3ba3   :  { %7110 = vst.msk [vmem:[%s12099_s14 + $0x80] sm:$0xff] %vm12598_vm8, %v7069_v56 }
0x3ba4   :  { %v7070_v28 = vld.sshfl [vmem:[#allocation1 + $0x10] sm:$0xff pattern:$0x75316420] }
0x3ba5   :  { %v7072_v30 = vld.sshfl [vmem:[#allocation1 + $0x30] sm:$0xff pattern:$0x75316420]  ;;  %7111 = vst.msk [vmem:[%s12099_s14 + $0x88] sm:$0xff] %vm12599_vm9, %v7070_v28 }
0x3ba6   :  { %7113 = vst.msk [vmem:[%s12099_s14 + $0x98] sm:$0xf] %vm7102_vm3, %v7072_v30 }
0x3bae   :  { %v6848_v0 = vpop.permute.xlu0 %6847 }
0x3baf   :  { %v6924_v5 = vadd.f32 %v6848_v0, %v12089_v37 }
0x3bb0   :  { %v6850_v1 = vpop.permute.xlu1 %6849 }
0x3bb1   :  { %v6967_v14 = vadd.f32 %v7820_v35, %v6924_v5  ;;  %v6925_v18 = vadd.f32 %v6850_v1, %v12064_v33 }
0x3bb3   :  { %7066 = vst [vmem:[#allocation1 + $0x20] ss:$2 sm:$0xff] %v6967_v14  ;;  %v6968_v9 = vadd.f32 %v12069_v32, %v6925_v18 }
0x3bb5   :  { %7067 = vst [vmem:[#allocation1 + $0x21] ss:$2 sm:$0xff] %v6968_v9 }
0x3bbc   :  { %v7071_v62 = vld.sshfl [vmem:[#allocation1 + $0x20] sm:$0xff pattern:$0x75316420] }
0x3bbd   :  { %7112 = vst.msk [vmem:[%s12099_s14 + $0x90] sm:$0xff] %vm12600_vm7, %v7071_v62 }

</bundles_post_ra>
